<compile_context>
chip_gen: v5e
topology: v5e:2x2
jax: 0.10.0
libtpu: 0.0.40
codegen_flags: <defaults>
</compile_context>

<pallas_src>
import functools

import jax
import jax.numpy as jnp
from jax import lax
from jax.experimental import pallas as pl
from jax.experimental.pallas import tpu as pltpu

BN_EPS = 1e-5
LRELU_SLOPE = 0.01


# ----------------------------------------------------------------------------
# Fused kernel: conv1 -> BN1 -> LeakyReLU -> conv2 -> BN2 -> residual add
# ----------------------------------------------------------------------------
def _resblock_kernel(x_ref, w1_ref, w2_ref, mask_ref,
                     g1_ref, b1_ref, g2_ref, b2_ref, o_ref, *,
                     n, dhw, offsets, neg_slope):
    nq = n * dhw
    cout = w1_ref.shape[1]

    # Fold the batch into the lane axis: (C, N*DHW).  DHW is a multiple of 128 at the
    # supported sizes, so this is an aligned lane concatenation (pure vreg placement).
    xs = x_ref[0] if n == 1 else jnp.concatenate([x_ref[i] for i in range(n)], axis=-1)

    def shift_lanes(a, off):
        # shifted[:, q] = a[:, (q + off) % nq].  Wrapped / cross-boundary lanes are zeroed
        # by the per-tap mask below, so the circular wrap is harmless.  Lowers to XLU
        # lane rotates which co-issue with the MXU matmuls.
        k = off % nq
        if k == 0:
            return a
        return jnp.concatenate([a[:, k:], a[:, :k]], axis=1)

    def conv3x3x3(a, w_ref):
        # 27 accumulated (Cout, Cin) x (Cin, N*DHW) MXU matmuls, f32 accumulation.
        # Zero im2col packing stores, zero col scratch.
        acc = jnp.zeros((cout, nq), jnp.float32)
        for t, off in enumerate(offsets):
            tap = shift_lanes(a, off) * mask_ref[t:t + 1, :]
            acc = acc + jnp.dot(w_ref[t], tap, preferred_element_type=jnp.float32)
        return acc

    def batchnorm(y, g_ref, b_ref):
        # Training-mode BatchNorm: biased batch statistics over all N*D*H*W columns
        # (every column of the folded slab is a real voxel).  Centred two-pass variance
        # avoids the E[x^2] - mean^2 cancellation flagged in the review.
        mean = jnp.mean(y, axis=1, keepdims=True)
        centred = y - mean
        var = jnp.mean(centred * centred, axis=1, keepdims=True)
        return centred * (g_ref[...] * lax.rsqrt(var + BN_EPS)) + b_ref[...]

    y = batchnorm(conv3x3x3(xs, w1_ref), g1_ref, b1_ref)
    y = jnp.where(y >= 0, y, neg_slope * y)
    y = batchnorm(conv3x3x3(y, w2_ref), g2_ref, b2_ref)
    out = xs + y

    # Un-fold the batch: 512-lane aligned slices -> unmasked lane-dense stores.
    for i in range(n):
        o_ref[i] = out[:, i * dhw:(i + 1) * dhw]


# ----------------------------------------------------------------------------
# Host-side packing helpers (tiny, traced under jit)
# ----------------------------------------------------------------------------
def _pack_weight_taps(w_oidhw):
    """(Cout, Cin, 3, 3, 3) torch layout -> (27, Cout, Cin) with tap t = kd*9 + kh*3 + kw."""
    co, ci = w_oidhw.shape[:2]
    return jnp.transpose(w_oidhw, (2, 3, 4, 0, 1)).reshape(27, co, ci)


def _tap_offsets(d, h, w):
    return tuple(dz * h * w + dy * w + dx
                 for dz in (-1, 0, 1) for dy in (-1, 0, 1) for dx in (-1, 0, 1))


def _tap_masks(n, d, h, w):
    """(27, N*D*H*W) f32: mask[t, q] = 1 iff tap t of voxel q stays inside its volume."""
    hw = h * w
    q = jnp.arange(n * d * hw, dtype=jnp.int32) % (d * hw)
    z, y, x = q // hw, (q // w) % h, q % w
    rows = []
    for dz in (-1, 0, 1):
        for dy in (-1, 0, 1):
            for dx in (-1, 0, 1):
                rows.append((z + dz >= 0) & (z + dz < d) &
                            (y + dy >= 0) & (y + dy < h) &
                            (x + dx >= 0) & (x + dx < w))
    return jnp.stack(rows, axis=0).astype(jnp.float32)


# ----------------------------------------------------------------------------
# Forward pass (training-mode BatchNorm: batch statistics, biased variance)
# ----------------------------------------------------------------------------
@jax.jit
def conv3d_resblock_forward(x_ncdhw, params):
    """x' = x + BN2(Conv2(LeakyReLU(BN1(Conv1(x))))); PyTorch NCDHW layout in/out."""
    n, c, d, h, w = x_ncdhw.shape
    if params["w1"].shape[0] != c or params["w2"].shape[0] != c:
        raise ValueError("residual block requires c_in == c_out")
    dhw = d * h * w
    nq = n * dhw

    x_flat = x_ncdhw.reshape(n, c, dhw)          # free: contiguous reshape, no pad/transpose
    w1 = _pack_weight_taps(params["w1"])
    w2 = _pack_weight_taps(params["w2"])
    masks = _tap_masks(n, d, h, w)
    g1 = params["g1"].reshape(c, 1)
    b1 = params["b1"].reshape(c, 1)
    g2 = params["g2"].reshape(c, 1)
    b2 = params["b2"].reshape(c, 1)

    kernel = functools.partial(
        _resblock_kernel, n=n, dhw=dhw,
        offsets=_tap_offsets(d, h, w), neg_slope=LRELU_SLOPE)

    full3 = lambda i: (0, 0, 0)
    full2 = lambda i: (0, 0)
    out_flat = pl.pallas_call(
        kernel,
        out_shape=jax.ShapeDtypeStruct((n, c, dhw), jnp.float32),
        grid=(1,),
        in_specs=[
            pl.BlockSpec((n, c, dhw), full3),     # x (folded in-kernel)
            pl.BlockSpec((27, c, c), full3),      # conv1 weights, per tap
            pl.BlockSpec((27, c, c), full3),      # conv2 weights, per tap
            pl.BlockSpec((27, nq), full2),        # per-tap boundary masks
            pl.BlockSpec((c, 1), full2),          # gamma1
            pl.BlockSpec((c, 1), full2),          # beta1
            pl.BlockSpec((c, 1), full2),          # gamma2
            pl.BlockSpec((c, 1), full2),          # beta2
        ],
        out_specs=pl.BlockSpec((n, c, dhw), full3),
        compiler_params=pltpu.CompilerParams(dimension_semantics=("arbitrary",)),
    )(x_flat, w1, w2, masks, g1, b1, g2, b2)

    return out_flat.reshape(n, c, d, h, w)


# ----------------------------------------------------------------------------
# Pure-JAX reference (mirrors the PyTorch module exactly)
# ----------------------------------------------------------------------------
def ref_forward(x, params):
    dn = ("NCDHW", "OIDHW", "NCDHW")

    def conv(v, wt):
        return lax.conv_general_dilated(
            v, wt, window_strides=(1, 1, 1), padding=[(1, 1)] * 3,
            dimension_numbers=dn, precision=lax.Precision.HIGHEST)

    def bn(y, g, b):
        mean = jnp.mean(y, axis=(0, 2, 3, 4), keepdims=True)
        var = jnp.var(y, axis=(0, 2, 3, 4), keepdims=True)
        return (y - mean) / jnp.sqrt(var + BN_EPS) * g.reshape(1, -1, 1, 1, 1) \
            + b.reshape(1, -1, 1, 1, 1)

    y = conv(x, params["w1"])
    y = bn(y, params["g1"], params["b1"])
    y = jnp.where(y >= 0, y, LRELU_SLOPE * y)
    y = conv(y, params["w2"])
    y = bn(y, params["g2"], params["b2"])
    return x + y


# ----------------------------------------------------------------------------
if __name__ == "__main__":
    N, C, D, H, W = 2, 8, 8, 8, 8  # residual requires c_in == c_out
    key = jax.random.PRNGKey(0)
    k_x, k_w1, k_w2, k_g1, k_b1, k_g2, k_b2 = jax.random.split(key, 7)

    x = jax.random.normal(k_x, (N, C, D, H, W), jnp.float32)
    params = {
        # conv weights in the torch OIDHW layout: (Cout, Cin, kD, kH, kW)
        "w1": 0.1 * jax.random.normal(k_w1, (C, C, 3, 3, 3), jnp.float32),
        "w2": 0.1 * jax.random.normal(k_w2, (C, C, 3, 3, 3), jnp.float32),
        "g1": 1.0 + 0.1 * jax.random.normal(k_g1, (C,), jnp.float32),
        "b1": 0.1 * jax.random.normal(k_b1, (C,), jnp.float32),
        "g2": 1.0 + 0.1 * jax.random.normal(k_g2, (C,), jnp.float32),
        "b2": 0.1 * jax.random.normal(k_b2, (C,), jnp.float32),
    }

    out = jax.block_until_ready(conv3d_resblock_forward(x, params))
    ref = jax.block_until_ready(ref_forward(x, params))

    assert out.shape == (N, C, D, H, W) and out.dtype == jnp.float32
    max_err = float(jnp.max(jnp.abs(out - ref)))
    assert jnp.allclose(out, ref, rtol=2e-4, atol=2e-4), f"max err {max_err}"

    print("KERNEL_OK")
</pallas_src>

<mosaic_0001>
module attributes {stable_mosaic.version = 11 : i64} {
  func.func @_resblock_kernel(%arg0: i32, %arg1: memref<2x8x512xf32, #tpu.memory_space<vmem>>, %arg2: memref<27x8x8xf32, #tpu.memory_space<vmem>>, %arg3: memref<27x8x8xf32, #tpu.memory_space<vmem>>, %arg4: memref<27x1024xf32, #tpu.memory_space<vmem>>, %arg5: memref<8x1xf32, #tpu.memory_space<vmem>>, %arg6: memref<8x1xf32, #tpu.memory_space<vmem>>, %arg7: memref<8x1xf32, #tpu.memory_space<vmem>>, %arg8: memref<8x1xf32, #tpu.memory_space<vmem>>, %arg9: memref<2x8x512xf32, #tpu.memory_space<vmem>>) attributes {dimension_semantics = [#tpu.dimension_semantics<arbitrary>], iteration_bounds = array<i64: 1>, scalar_prefetch = 0 : i64, scratch_operands = 0 : i64, tpu.core_type = #tpu.core_type<tc>, window_params = [{pipeline_mode = #tpu.pipeline_mode<synchronous>, transform_indices = @transform_0, window_bounds = array<i64: 2, 8, 512>}, {pipeline_mode = #tpu.pipeline_mode<synchronous>, transform_indices = @transform_1, window_bounds = array<i64: 27, 8, 8>}, {pipeline_mode = #tpu.pipeline_mode<synchronous>, transform_indices = @transform_2, window_bounds = array<i64: 27, 8, 8>}, {pipeline_mode = #tpu.pipeline_mode<synchronous>, transform_indices = @transform_3, window_bounds = array<i64: 27, 1024>}, {pipeline_mode = #tpu.pipeline_mode<synchronous>, transform_indices = @transform_4, window_bounds = array<i64: 8, 1>}, {pipeline_mode = #tpu.pipeline_mode<synchronous>, transform_indices = @transform_5, window_bounds = array<i64: 8, 1>}, {pipeline_mode = #tpu.pipeline_mode<synchronous>, transform_indices = @transform_6, window_bounds = array<i64: 8, 1>}, {pipeline_mode = #tpu.pipeline_mode<synchronous>, transform_indices = @transform_7, window_bounds = array<i64: 8, 1>}, {pipeline_mode = #tpu.pipeline_mode<synchronous>, transform_indices = @transform_8, window_bounds = array<i64: 2, 8, 512>}]} {
    %c0 = arith.constant 0 : index
    %c0_0 = arith.constant 0 : index
    %c0_1 = arith.constant 0 : index
    %0 = vector.load %arg1[%c0, %c0_0, %c0_1] : memref<2x8x512xf32, #tpu.memory_space<vmem>>, vector<1x8x512xf32>
    %1 = vector.shape_cast %0 : vector<1x8x512xf32> to vector<8x512xf32>
    %c1 = arith.constant 1 : index
    %c0_2 = arith.constant 0 : index
    %c0_3 = arith.constant 0 : index
    %2 = vector.load %arg1[%c1, %c0_2, %c0_3] : memref<2x8x512xf32, #tpu.memory_space<vmem>>, vector<1x8x512xf32>
    %3 = vector.shape_cast %2 : vector<1x8x512xf32> to vector<8x512xf32>
    %4 = tpu.concatenate %1, %3 in 1 : vector<8x512xf32>, vector<8x512xf32> -> vector<8x1024xf32>
    %cst = arith.constant 0.000000e+00 : f32
    %5 = vector.broadcast %cst : f32 to vector<8x1024xf32>
    %6 = vector.extract_strided_slice %4 {offsets = [0, 951], sizes = [8, 73], strides = [1, 1]} : vector<8x1024xf32> to vector<8x73xf32>
    %7 = vector.extract_strided_slice %4 {offsets = [0, 0], sizes = [8, 951], strides = [1, 1]} : vector<8x1024xf32> to vector<8x951xf32>
    %8 = tpu.concatenate %6, %7 in 1 : vector<8x73xf32>, vector<8x951xf32> -> vector<8x1024xf32>
    %c0_4 = arith.constant 0 : index
    %c0_5 = arith.constant 0 : index
    %9 = vector.load %arg4[%c0_4, %c0_5] : memref<27x1024xf32, #tpu.memory_space<vmem>>, vector<1x1024xf32>
    %10 = vector.broadcast %9 : vector<1x1024xf32> to vector<8x1024xf32>
    %11 = arith.mulf %8, %10 : vector<8x1024xf32>
    %c0_6 = arith.constant 0 : index
    %c0_7 = arith.constant 0 : index
    %c0_8 = arith.constant 0 : index
    %12 = vector.load %arg2[%c0_6, %c0_7, %c0_8] : memref<27x8x8xf32, #tpu.memory_space<vmem>>, vector<1x8x8xf32>
    %13 = vector.shape_cast %12 : vector<1x8x8xf32> to vector<8x8xf32>
    %cst_9 = arith.constant dense<0.000000e+00> : vector<8x1024xf32>
    %14 = tpu.matmul %13, %11, %cst_9 {dimension_numbers = #tpu.dot_dimension_numbers<[1], [0], [0], [1], [0, 0, 1, 1], [], []>} : vector<8x8xf32>, vector<8x1024xf32>, vector<8x1024xf32> -> vector<8x1024xf32>
    %15 = arith.addf %5, %14 : vector<8x1024xf32>
    %16 = vector.extract_strided_slice %4 {offsets = [0, 952], sizes = [8, 72], strides = [1, 1]} : vector<8x1024xf32> to vector<8x72xf32>
    %17 = vector.extract_strided_slice %4 {offsets = [0, 0], sizes = [8, 952], strides = [1, 1]} : vector<8x1024xf32> to vector<8x952xf32>
    %18 = tpu.concatenate %16, %17 in 1 : vector<8x72xf32>, vector<8x952xf32> -> vector<8x1024xf32>
    %c1_10 = arith.constant 1 : index
    %c0_11 = arith.constant 0 : index
    %19 = vector.load %arg4[%c1_10, %c0_11] : memref<27x1024xf32, #tpu.memory_space<vmem>>, vector<1x1024xf32>
    %20 = vector.broadcast %19 : vector<1x1024xf32> to vector<8x1024xf32>
    %21 = arith.mulf %18, %20 : vector<8x1024xf32>
    %c1_12 = arith.constant 1 : index
    %c0_13 = arith.constant 0 : index
    %c0_14 = arith.constant 0 : index
    %22 = vector.load %arg2[%c1_12, %c0_13, %c0_14] : memref<27x8x8xf32, #tpu.memory_space<vmem>>, vector<1x8x8xf32>
    %23 = vector.shape_cast %22 : vector<1x8x8xf32> to vector<8x8xf32>
    %cst_15 = arith.constant dense<0.000000e+00> : vector<8x1024xf32>
    %24 = tpu.matmul %23, %21, %cst_15 {dimension_numbers = #tpu.dot_dimension_numbers<[1], [0], [0], [1], [0, 0, 1, 1], [], []>} : vector<8x8xf32>, vector<8x1024xf32>, vector<8x1024xf32> -> vector<8x1024xf32>
    %25 = arith.addf %15, %24 : vector<8x1024xf32>
    %26 = vector.extract_strided_slice %4 {offsets = [0, 953], sizes = [8, 71], strides = [1, 1]} : vector<8x1024xf32> to vector<8x71xf32>
    %27 = vector.extract_strided_slice %4 {offsets = [0, 0], sizes = [8, 953], strides = [1, 1]} : vector<8x1024xf32> to vector<8x953xf32>
    %28 = tpu.concatenate %26, %27 in 1 : vector<8x71xf32>, vector<8x953xf32> -> vector<8x1024xf32>
    %c2 = arith.constant 2 : index
    %c0_16 = arith.constant 0 : index
    %29 = vector.load %arg4[%c2, %c0_16] : memref<27x1024xf32, #tpu.memory_space<vmem>>, vector<1x1024xf32>
    %30 = vector.broadcast %29 : vector<1x1024xf32> to vector<8x1024xf32>
    %31 = arith.mulf %28, %30 : vector<8x1024xf32>
    %c2_17 = arith.constant 2 : index
    %c0_18 = arith.constant 0 : index
    %c0_19 = arith.constant 0 : index
    %32 = vector.load %arg2[%c2_17, %c0_18, %c0_19] : memref<27x8x8xf32, #tpu.memory_space<vmem>>, vector<1x8x8xf32>
    %33 = vector.shape_cast %32 : vector<1x8x8xf32> to vector<8x8xf32>
    %cst_20 = arith.constant dense<0.000000e+00> : vector<8x1024xf32>
    %34 = tpu.matmul %33, %31, %cst_20 {dimension_numbers = #tpu.dot_dimension_numbers<[1], [0], [0], [1], [0, 0, 1, 1], [], []>} : vector<8x8xf32>, vector<8x1024xf32>, vector<8x1024xf32> -> vector<8x1024xf32>
    %35 = arith.addf %25, %34 : vector<8x1024xf32>
    %36 = vector.extract_strided_slice %4 {offsets = [0, 959], sizes = [8, 65], strides = [1, 1]} : vector<8x1024xf32> to vector<8x65xf32>
    %37 = vector.extract_strided_slice %4 {offsets = [0, 0], sizes = [8, 959], strides = [1, 1]} : vector<8x1024xf32> to vector<8x959xf32>
    %38 = tpu.concatenate %36, %37 in 1 : vector<8x65xf32>, vector<8x959xf32> -> vector<8x1024xf32>
    %c3 = arith.constant 3 : index
    %c0_21 = arith.constant 0 : index
    %39 = vector.load %arg4[%c3, %c0_21] : memref<27x1024xf32, #tpu.memory_space<vmem>>, vector<1x1024xf32>
    %40 = vector.broadcast %39 : vector<1x1024xf32> to vector<8x1024xf32>
    %41 = arith.mulf %38, %40 : vector<8x1024xf32>
    %c3_22 = arith.constant 3 : index
    %c0_23 = arith.constant 0 : index
    %c0_24 = arith.constant 0 : index
    %42 = vector.load %arg2[%c3_22, %c0_23, %c0_24] : memref<27x8x8xf32, #tpu.memory_space<vmem>>, vector<1x8x8xf32>
    %43 = vector.shape_cast %42 : vector<1x8x8xf32> to vector<8x8xf32>
    %cst_25 = arith.constant dense<0.000000e+00> : vector<8x1024xf32>
    %44 = tpu.matmul %43, %41, %cst_25 {dimension_numbers = #tpu.dot_dimension_numbers<[1], [0], [0], [1], [0, 0, 1, 1], [], []>} : vector<8x8xf32>, vector<8x1024xf32>, vector<8x1024xf32> -> vector<8x1024xf32>
    %45 = arith.addf %35, %44 : vector<8x1024xf32>
    %46 = vector.extract_strided_slice %4 {offsets = [0, 960], sizes = [8, 64], strides = [1, 1]} : vector<8x1024xf32> to vector<8x64xf32>
    %47 = vector.extract_strided_slice %4 {offsets = [0, 0], sizes = [8, 960], strides = [1, 1]} : vector<8x1024xf32> to vector<8x960xf32>
    %48 = tpu.concatenate %46, %47 in 1 : vector<8x64xf32>, vector<8x960xf32> -> vector<8x1024xf32>
    %c4 = arith.constant 4 : index
    %c0_26 = arith.constant 0 : index
    %49 = vector.load %arg4[%c4, %c0_26] : memref<27x1024xf32, #tpu.memory_space<vmem>>, vector<1x1024xf32>
    %50 = vector.broadcast %49 : vector<1x1024xf32> to vector<8x1024xf32>
    %51 = arith.mulf %48, %50 : vector<8x1024xf32>
    %c4_27 = arith.constant 4 : index
    %c0_28 = arith.constant 0 : index
    %c0_29 = arith.constant 0 : index
    %52 = vector.load %arg2[%c4_27, %c0_28, %c0_29] : memref<27x8x8xf32, #tpu.memory_space<vmem>>, vector<1x8x8xf32>
    %53 = vector.shape_cast %52 : vector<1x8x8xf32> to vector<8x8xf32>
    %cst_30 = arith.constant dense<0.000000e+00> : vector<8x1024xf32>
    %54 = tpu.matmul %53, %51, %cst_30 {dimension_numbers = #tpu.dot_dimension_numbers<[1], [0], [0], [1], [0, 0, 1, 1], [], []>} : vector<8x8xf32>, vector<8x1024xf32>, vector<8x1024xf32> -> vector<8x1024xf32>
    %55 = arith.addf %45, %54 : vector<8x1024xf32>
    %56 = vector.extract_strided_slice %4 {offsets = [0, 961], sizes = [8, 63], strides = [1, 1]} : vector<8x1024xf32> to vector<8x63xf32>
    %57 = vector.extract_strided_slice %4 {offsets = [0, 0], sizes = [8, 961], strides = [1, 1]} : vector<8x1024xf32> to vector<8x961xf32>
    %58 = tpu.concatenate %56, %57 in 1 : vector<8x63xf32>, vector<8x961xf32> -> vector<8x1024xf32>
    %c5 = arith.constant 5 : index
    %c0_31 = arith.constant 0 : index
    %59 = vector.load %arg4[%c5, %c0_31] : memref<27x1024xf32, #tpu.memory_space<vmem>>, vector<1x1024xf32>
    %60 = vector.broadcast %59 : vector<1x1024xf32> to vector<8x1024xf32>
    %61 = arith.mulf %58, %60 : vector<8x1024xf32>
    %c5_32 = arith.constant 5 : index
    %c0_33 = arith.constant 0 : index
    %c0_34 = arith.constant 0 : index
    %62 = vector.load %arg2[%c5_32, %c0_33, %c0_34] : memref<27x8x8xf32, #tpu.memory_space<vmem>>, vector<1x8x8xf32>
    %63 = vector.shape_cast %62 : vector<1x8x8xf32> to vector<8x8xf32>
    %cst_35 = arith.constant dense<0.000000e+00> : vector<8x1024xf32>
    %64 = tpu.matmul %63, %61, %cst_35 {dimension_numbers = #tpu.dot_dimension_numbers<[1], [0], [0], [1], [0, 0, 1, 1], [], []>} : vector<8x8xf32>, vector<8x1024xf32>, vector<8x1024xf32> -> vector<8x1024xf32>
    %65 = arith.addf %55, %64 : vector<8x1024xf32>
    %66 = vector.extract_strided_slice %4 {offsets = [0, 967], sizes = [8, 57], strides = [1, 1]} : vector<8x1024xf32> to vector<8x57xf32>
    %67 = vector.extract_strided_slice %4 {offsets = [0, 0], sizes = [8, 967], strides = [1, 1]} : vector<8x1024xf32> to vector<8x967xf32>
    %68 = tpu.concatenate %66, %67 in 1 : vector<8x57xf32>, vector<8x967xf32> -> vector<8x1024xf32>
    %c6 = arith.constant 6 : index
    %c0_36 = arith.constant 0 : index
    %69 = vector.load %arg4[%c6, %c0_36] : memref<27x1024xf32, #tpu.memory_space<vmem>>, vector<1x1024xf32>
    %70 = vector.broadcast %69 : vector<1x1024xf32> to vector<8x1024xf32>
    %71 = arith.mulf %68, %70 : vector<8x1024xf32>
    %c6_37 = arith.constant 6 : index
    %c0_38 = arith.constant 0 : index
    %c0_39 = arith.constant 0 : index
    %72 = vector.load %arg2[%c6_37, %c0_38, %c0_39] : memref<27x8x8xf32, #tpu.memory_space<vmem>>, vector<1x8x8xf32>
    %73 = vector.shape_cast %72 : vector<1x8x8xf32> to vector<8x8xf32>
    %cst_40 = arith.constant dense<0.000000e+00> : vector<8x1024xf32>
    %74 = tpu.matmul %73, %71, %cst_40 {dimension_numbers = #tpu.dot_dimension_numbers<[1], [0], [0], [1], [0, 0, 1, 1], [], []>} : vector<8x8xf32>, vector<8x1024xf32>, vector<8x1024xf32> -> vector<8x1024xf32>
    %75 = arith.addf %65, %74 : vector<8x1024xf32>
    %76 = vector.extract_strided_slice %4 {offsets = [0, 968], sizes = [8, 56], strides = [1, 1]} : vector<8x1024xf32> to vector<8x56xf32>
    %77 = vector.extract_strided_slice %4 {offsets = [0, 0], sizes = [8, 968], strides = [1, 1]} : vector<8x1024xf32> to vector<8x968xf32>
    %78 = tpu.concatenate %76, %77 in 1 : vector<8x56xf32>, vector<8x968xf32> -> vector<8x1024xf32>
    %c7 = arith.constant 7 : index
    %c0_41 = arith.constant 0 : index
    %79 = vector.load %arg4[%c7, %c0_41] : memref<27x1024xf32, #tpu.memory_space<vmem>>, vector<1x1024xf32>
    %80 = vector.broadcast %79 : vector<1x1024xf32> to vector<8x1024xf32>
    %81 = arith.mulf %78, %80 : vector<8x1024xf32>
    %c7_42 = arith.constant 7 : index
    %c0_43 = arith.constant 0 : index
    %c0_44 = arith.constant 0 : index
    %82 = vector.load %arg2[%c7_42, %c0_43, %c0_44] : memref<27x8x8xf32, #tpu.memory_space<vmem>>, vector<1x8x8xf32>
    %83 = vector.shape_cast %82 : vector<1x8x8xf32> to vector<8x8xf32>
    %cst_45 = arith.constant dense<0.000000e+00> : vector<8x1024xf32>
    %84 = tpu.matmul %83, %81, %cst_45 {dimension_numbers = #tpu.dot_dimension_numbers<[1], [0], [0], [1], [0, 0, 1, 1], [], []>} : vector<8x8xf32>, vector<8x1024xf32>, vector<8x1024xf32> -> vector<8x1024xf32>
    %85 = arith.addf %75, %84 : vector<8x1024xf32>
    %86 = vector.extract_strided_slice %4 {offsets = [0, 969], sizes = [8, 55], strides = [1, 1]} : vector<8x1024xf32> to vector<8x55xf32>
    %87 = vector.extract_strided_slice %4 {offsets = [0, 0], sizes = [8, 969], strides = [1, 1]} : vector<8x1024xf32> to vector<8x969xf32>
    %88 = tpu.concatenate %86, %87 in 1 : vector<8x55xf32>, vector<8x969xf32> -> vector<8x1024xf32>
    %c8 = arith.constant 8 : index
    %c0_46 = arith.constant 0 : index
    %89 = vector.load %arg4[%c8, %c0_46] : memref<27x1024xf32, #tpu.memory_space<vmem>>, vector<1x1024xf32>
    %90 = vector.broadcast %89 : vector<1x1024xf32> to vector<8x1024xf32>
    %91 = arith.mulf %88, %90 : vector<8x1024xf32>
    %c8_47 = arith.constant 8 : index
    %c0_48 = arith.constant 0 : index
    %c0_49 = arith.constant 0 : index
    %92 = vector.load %arg2[%c8_47, %c0_48, %c0_49] : memref<27x8x8xf32, #tpu.memory_space<vmem>>, vector<1x8x8xf32>
    %93 = vector.shape_cast %92 : vector<1x8x8xf32> to vector<8x8xf32>
    %cst_50 = arith.constant dense<0.000000e+00> : vector<8x1024xf32>
    %94 = tpu.matmul %93, %91, %cst_50 {dimension_numbers = #tpu.dot_dimension_numbers<[1], [0], [0], [1], [0, 0, 1, 1], [], []>} : vector<8x8xf32>, vector<8x1024xf32>, vector<8x1024xf32> -> vector<8x1024xf32>
    %95 = arith.addf %85, %94 : vector<8x1024xf32>
    %96 = vector.extract_strided_slice %4 {offsets = [0, 1015], sizes = [8, 9], strides = [1, 1]} : vector<8x1024xf32> to vector<8x9xf32>
    %97 = vector.extract_strided_slice %4 {offsets = [0, 0], sizes = [8, 1015], strides = [1, 1]} : vector<8x1024xf32> to vector<8x1015xf32>
    %98 = tpu.concatenate %96, %97 in 1 : vector<8x9xf32>, vector<8x1015xf32> -> vector<8x1024xf32>
    %c9 = arith.constant 9 : index
    %c0_51 = arith.constant 0 : index
    %99 = vector.load %arg4[%c9, %c0_51] : memref<27x1024xf32, #tpu.memory_space<vmem>>, vector<1x1024xf32>
    %100 = vector.broadcast %99 : vector<1x1024xf32> to vector<8x1024xf32>
    %101 = arith.mulf %98, %100 : vector<8x1024xf32>
    %c9_52 = arith.constant 9 : index
    %c0_53 = arith.constant 0 : index
    %c0_54 = arith.constant 0 : index
    %102 = vector.load %arg2[%c9_52, %c0_53, %c0_54] : memref<27x8x8xf32, #tpu.memory_space<vmem>>, vector<1x8x8xf32>
    %103 = vector.shape_cast %102 : vector<1x8x8xf32> to vector<8x8xf32>
    %cst_55 = arith.constant dense<0.000000e+00> : vector<8x1024xf32>
    %104 = tpu.matmul %103, %101, %cst_55 {dimension_numbers = #tpu.dot_dimension_numbers<[1], [0], [0], [1], [0, 0, 1, 1], [], []>} : vector<8x8xf32>, vector<8x1024xf32>, vector<8x1024xf32> -> vector<8x1024xf32>
    %105 = arith.addf %95, %104 : vector<8x1024xf32>
    %106 = vector.extract_strided_slice %4 {offsets = [0, 1016], sizes = [8, 8], strides = [1, 1]} : vector<8x1024xf32> to vector<8x8xf32>
    %107 = vector.extract_strided_slice %4 {offsets = [0, 0], sizes = [8, 1016], strides = [1, 1]} : vector<8x1024xf32> to vector<8x1016xf32>
    %108 = tpu.concatenate %106, %107 in 1 : vector<8x8xf32>, vector<8x1016xf32> -> vector<8x1024xf32>
    %c10 = arith.constant 10 : index
    %c0_56 = arith.constant 0 : index
    %109 = vector.load %arg4[%c10, %c0_56] : memref<27x1024xf32, #tpu.memory_space<vmem>>, vector<1x1024xf32>
    %110 = vector.broadcast %109 : vector<1x1024xf32> to vector<8x1024xf32>
    %111 = arith.mulf %108, %110 : vector<8x1024xf32>
    %c10_57 = arith.constant 10 : index
    %c0_58 = arith.constant 0 : index
    %c0_59 = arith.constant 0 : index
    %112 = vector.load %arg2[%c10_57, %c0_58, %c0_59] : memref<27x8x8xf32, #tpu.memory_space<vmem>>, vector<1x8x8xf32>
    %113 = vector.shape_cast %112 : vector<1x8x8xf32> to vector<8x8xf32>
    %cst_60 = arith.constant dense<0.000000e+00> : vector<8x1024xf32>
    %114 = tpu.matmul %113, %111, %cst_60 {dimension_numbers = #tpu.dot_dimension_numbers<[1], [0], [0], [1], [0, 0, 1, 1], [], []>} : vector<8x8xf32>, vector<8x1024xf32>, vector<8x1024xf32> -> vector<8x1024xf32>
    %115 = arith.addf %105, %114 : vector<8x1024xf32>
    %116 = vector.extract_strided_slice %4 {offsets = [0, 1017], sizes = [8, 7], strides = [1, 1]} : vector<8x1024xf32> to vector<8x7xf32>
    %117 = vector.extract_strided_slice %4 {offsets = [0, 0], sizes = [8, 1017], strides = [1, 1]} : vector<8x1024xf32> to vector<8x1017xf32>
    %118 = tpu.concatenate %116, %117 in 1 : vector<8x7xf32>, vector<8x1017xf32> -> vector<8x1024xf32>
    %c11 = arith.constant 11 : index
    %c0_61 = arith.constant 0 : index
    %119 = vector.load %arg4[%c11, %c0_61] : memref<27x1024xf32, #tpu.memory_space<vmem>>, vector<1x1024xf32>
    %120 = vector.broadcast %119 : vector<1x1024xf32> to vector<8x1024xf32>
    %121 = arith.mulf %118, %120 : vector<8x1024xf32>
    %c11_62 = arith.constant 11 : index
    %c0_63 = arith.constant 0 : index
    %c0_64 = arith.constant 0 : index
    %122 = vector.load %arg2[%c11_62, %c0_63, %c0_64] : memref<27x8x8xf32, #tpu.memory_space<vmem>>, vector<1x8x8xf32>
    %123 = vector.shape_cast %122 : vector<1x8x8xf32> to vector<8x8xf32>
    %cst_65 = arith.constant dense<0.000000e+00> : vector<8x1024xf32>
    %124 = tpu.matmul %123, %121, %cst_65 {dimension_numbers = #tpu.dot_dimension_numbers<[1], [0], [0], [1], [0, 0, 1, 1], [], []>} : vector<8x8xf32>, vector<8x1024xf32>, vector<8x1024xf32> -> vector<8x1024xf32>
    %125 = arith.addf %115, %124 : vector<8x1024xf32>
    %126 = vector.extract_strided_slice %4 {offsets = [0, 1023], sizes = [8, 1], strides = [1, 1]} : vector<8x1024xf32> to vector<8x1xf32>
    %127 = vector.extract_strided_slice %4 {offsets = [0, 0], sizes = [8, 1023], strides = [1, 1]} : vector<8x1024xf32> to vector<8x1023xf32>
    %128 = tpu.concatenate %126, %127 in 1 : vector<8x1xf32>, vector<8x1023xf32> -> vector<8x1024xf32>
    %c12 = arith.constant 12 : index
    %c0_66 = arith.constant 0 : index
    %129 = vector.load %arg4[%c12, %c0_66] : memref<27x1024xf32, #tpu.memory_space<vmem>>, vector<1x1024xf32>
    %130 = vector.broadcast %129 : vector<1x1024xf32> to vector<8x1024xf32>
    %131 = arith.mulf %128, %130 : vector<8x1024xf32>
    %c12_67 = arith.constant 12 : index
    %c0_68 = arith.constant 0 : index
    %c0_69 = arith.constant 0 : index
    %132 = vector.load %arg2[%c12_67, %c0_68, %c0_69] : memref<27x8x8xf32, #tpu.memory_space<vmem>>, vector<1x8x8xf32>
    %133 = vector.shape_cast %132 : vector<1x8x8xf32> to vector<8x8xf32>
    %cst_70 = arith.constant dense<0.000000e+00> : vector<8x1024xf32>
    %134 = tpu.matmul %133, %131, %cst_70 {dimension_numbers = #tpu.dot_dimension_numbers<[1], [0], [0], [1], [0, 0, 1, 1], [], []>} : vector<8x8xf32>, vector<8x1024xf32>, vector<8x1024xf32> -> vector<8x1024xf32>
    %135 = arith.addf %125, %134 : vector<8x1024xf32>
    %c13 = arith.constant 13 : index
    %c0_71 = arith.constant 0 : index
    %136 = vector.load %arg4[%c13, %c0_71] : memref<27x1024xf32, #tpu.memory_space<vmem>>, vector<1x1024xf32>
    %137 = vector.broadcast %136 : vector<1x1024xf32> to vector<8x1024xf32>
    %138 = arith.mulf %4, %137 : vector<8x1024xf32>
    %c13_72 = arith.constant 13 : index
    %c0_73 = arith.constant 0 : index
    %c0_74 = arith.constant 0 : index
    %139 = vector.load %arg2[%c13_72, %c0_73, %c0_74] : memref<27x8x8xf32, #tpu.memory_space<vmem>>, vector<1x8x8xf32>
    %140 = vector.shape_cast %139 : vector<1x8x8xf32> to vector<8x8xf32>
    %cst_75 = arith.constant dense<0.000000e+00> : vector<8x1024xf32>
    %141 = tpu.matmul %140, %138, %cst_75 {dimension_numbers = #tpu.dot_dimension_numbers<[1], [0], [0], [1], [0, 0, 1, 1], [], []>} : vector<8x8xf32>, vector<8x1024xf32>, vector<8x1024xf32> -> vector<8x1024xf32>
    %142 = arith.addf %135, %141 : vector<8x1024xf32>
    %143 = vector.extract_strided_slice %4 {offsets = [0, 1], sizes = [8, 1023], strides = [1, 1]} : vector<8x1024xf32> to vector<8x1023xf32>
    %144 = vector.extract_strided_slice %4 {offsets = [0, 0], sizes = [8, 1], strides = [1, 1]} : vector<8x1024xf32> to vector<8x1xf32>
    %145 = tpu.concatenate %143, %144 in 1 : vector<8x1023xf32>, vector<8x1xf32> -> vector<8x1024xf32>
    %c14 = arith.constant 14 : index
    %c0_76 = arith.constant 0 : index
    %146 = vector.load %arg4[%c14, %c0_76] : memref<27x1024xf32, #tpu.memory_space<vmem>>, vector<1x1024xf32>
    %147 = vector.broadcast %146 : vector<1x1024xf32> to vector<8x1024xf32>
    %148 = arith.mulf %145, %147 : vector<8x1024xf32>
    %c14_77 = arith.constant 14 : index
    %c0_78 = arith.constant 0 : index
    %c0_79 = arith.constant 0 : index
    %149 = vector.load %arg2[%c14_77, %c0_78, %c0_79] : memref<27x8x8xf32, #tpu.memory_space<vmem>>, vector<1x8x8xf32>
    %150 = vector.shape_cast %149 : vector<1x8x8xf32> to vector<8x8xf32>
    %cst_80 = arith.constant dense<0.000000e+00> : vector<8x1024xf32>
    %151 = tpu.matmul %150, %148, %cst_80 {dimension_numbers = #tpu.dot_dimension_numbers<[1], [0], [0], [1], [0, 0, 1, 1], [], []>} : vector<8x8xf32>, vector<8x1024xf32>, vector<8x1024xf32> -> vector<8x1024xf32>
    %152 = arith.addf %142, %151 : vector<8x1024xf32>
    %153 = vector.extract_strided_slice %4 {offsets = [0, 7], sizes = [8, 1017], strides = [1, 1]} : vector<8x1024xf32> to vector<8x1017xf32>
    %154 = vector.extract_strided_slice %4 {offsets = [0, 0], sizes = [8, 7], strides = [1, 1]} : vector<8x1024xf32> to vector<8x7xf32>
    %155 = tpu.concatenate %153, %154 in 1 : vector<8x1017xf32>, vector<8x7xf32> -> vector<8x1024xf32>
    %c15 = arith.constant 15 : index
    %c0_81 = arith.constant 0 : index
    %156 = vector.load %arg4[%c15, %c0_81] : memref<27x1024xf32, #tpu.memory_space<vmem>>, vector<1x1024xf32>
    %157 = vector.broadcast %156 : vector<1x1024xf32> to vector<8x1024xf32>
    %158 = arith.mulf %155, %157 : vector<8x1024xf32>
    %c15_82 = arith.constant 15 : index
    %c0_83 = arith.constant 0 : index
    %c0_84 = arith.constant 0 : index
    %159 = vector.load %arg2[%c15_82, %c0_83, %c0_84] : memref<27x8x8xf32, #tpu.memory_space<vmem>>, vector<1x8x8xf32>
    %160 = vector.shape_cast %159 : vector<1x8x8xf32> to vector<8x8xf32>
    %cst_85 = arith.constant dense<0.000000e+00> : vector<8x1024xf32>
    %161 = tpu.matmul %160, %158, %cst_85 {dimension_numbers = #tpu.dot_dimension_numbers<[1], [0], [0], [1], [0, 0, 1, 1], [], []>} : vector<8x8xf32>, vector<8x1024xf32>, vector<8x1024xf32> -> vector<8x1024xf32>
    %162 = arith.addf %152, %161 : vector<8x1024xf32>
    %163 = vector.extract_strided_slice %4 {offsets = [0, 8], sizes = [8, 1016], strides = [1, 1]} : vector<8x1024xf32> to vector<8x1016xf32>
    %164 = vector.extract_strided_slice %4 {offsets = [0, 0], sizes = [8, 8], strides = [1, 1]} : vector<8x1024xf32> to vector<8x8xf32>
    %165 = tpu.concatenate %163, %164 in 1 : vector<8x1016xf32>, vector<8x8xf32> -> vector<8x1024xf32>
    %c16 = arith.constant 16 : index
    %c0_86 = arith.constant 0 : index
    %166 = vector.load %arg4[%c16, %c0_86] : memref<27x1024xf32, #tpu.memory_space<vmem>>, vector<1x1024xf32>
    %167 = vector.broadcast %166 : vector<1x1024xf32> to vector<8x1024xf32>
    %168 = arith.mulf %165, %167 : vector<8x1024xf32>
    %c16_87 = arith.constant 16 : index
    %c0_88 = arith.constant 0 : index
    %c0_89 = arith.constant 0 : index
    %169 = vector.load %arg2[%c16_87, %c0_88, %c0_89] : memref<27x8x8xf32, #tpu.memory_space<vmem>>, vector<1x8x8xf32>
    %170 = vector.shape_cast %169 : vector<1x8x8xf32> to vector<8x8xf32>
    %cst_90 = arith.constant dense<0.000000e+00> : vector<8x1024xf32>
    %171 = tpu.matmul %170, %168, %cst_90 {dimension_numbers = #tpu.dot_dimension_numbers<[1], [0], [0], [1], [0, 0, 1, 1], [], []>} : vector<8x8xf32>, vector<8x1024xf32>, vector<8x1024xf32> -> vector<8x1024xf32>
    %172 = arith.addf %162, %171 : vector<8x1024xf32>
    %173 = vector.extract_strided_slice %4 {offsets = [0, 9], sizes = [8, 1015], strides = [1, 1]} : vector<8x1024xf32> to vector<8x1015xf32>
    %174 = vector.extract_strided_slice %4 {offsets = [0, 0], sizes = [8, 9], strides = [1, 1]} : vector<8x1024xf32> to vector<8x9xf32>
    %175 = tpu.concatenate %173, %174 in 1 : vector<8x1015xf32>, vector<8x9xf32> -> vector<8x1024xf32>
    %c17 = arith.constant 17 : index
    %c0_91 = arith.constant 0 : index
    %176 = vector.load %arg4[%c17, %c0_91] : memref<27x1024xf32, #tpu.memory_space<vmem>>, vector<1x1024xf32>
    %177 = vector.broadcast %176 : vector<1x1024xf32> to vector<8x1024xf32>
    %178 = arith.mulf %175, %177 : vector<8x1024xf32>
    %c17_92 = arith.constant 17 : index
    %c0_93 = arith.constant 0 : index
    %c0_94 = arith.constant 0 : index
    %179 = vector.load %arg2[%c17_92, %c0_93, %c0_94] : memref<27x8x8xf32, #tpu.memory_space<vmem>>, vector<1x8x8xf32>
    %180 = vector.shape_cast %179 : vector<1x8x8xf32> to vector<8x8xf32>
    %cst_95 = arith.constant dense<0.000000e+00> : vector<8x1024xf32>
    %181 = tpu.matmul %180, %178, %cst_95 {dimension_numbers = #tpu.dot_dimension_numbers<[1], [0], [0], [1], [0, 0, 1, 1], [], []>} : vector<8x8xf32>, vector<8x1024xf32>, vector<8x1024xf32> -> vector<8x1024xf32>
    %182 = arith.addf %172, %181 : vector<8x1024xf32>
    %183 = vector.extract_strided_slice %4 {offsets = [0, 55], sizes = [8, 969], strides = [1, 1]} : vector<8x1024xf32> to vector<8x969xf32>
    %184 = vector.extract_strided_slice %4 {offsets = [0, 0], sizes = [8, 55], strides = [1, 1]} : vector<8x1024xf32> to vector<8x55xf32>
    %185 = tpu.concatenate %183, %184 in 1 : vector<8x969xf32>, vector<8x55xf32> -> vector<8x1024xf32>
    %c18 = arith.constant 18 : index
    %c0_96 = arith.constant 0 : index
    %186 = vector.load %arg4[%c18, %c0_96] : memref<27x1024xf32, #tpu.memory_space<vmem>>, vector<1x1024xf32>
    %187 = vector.broadcast %186 : vector<1x1024xf32> to vector<8x1024xf32>
    %188 = arith.mulf %185, %187 : vector<8x1024xf32>
    %c18_97 = arith.constant 18 : index
    %c0_98 = arith.constant 0 : index
    %c0_99 = arith.constant 0 : index
    %189 = vector.load %arg2[%c18_97, %c0_98, %c0_99] : memref<27x8x8xf32, #tpu.memory_space<vmem>>, vector<1x8x8xf32>
    %190 = vector.shape_cast %189 : vector<1x8x8xf32> to vector<8x8xf32>
    %cst_100 = arith.constant dense<0.000000e+00> : vector<8x1024xf32>
    %191 = tpu.matmul %190, %188, %cst_100 {dimension_numbers = #tpu.dot_dimension_numbers<[1], [0], [0], [1], [0, 0, 1, 1], [], []>} : vector<8x8xf32>, vector<8x1024xf32>, vector<8x1024xf32> -> vector<8x1024xf32>
    %192 = arith.addf %182, %191 : vector<8x1024xf32>
    %193 = vector.extract_strided_slice %4 {offsets = [0, 56], sizes = [8, 968], strides = [1, 1]} : vector<8x1024xf32> to vector<8x968xf32>
    %194 = vector.extract_strided_slice %4 {offsets = [0, 0], sizes = [8, 56], strides = [1, 1]} : vector<8x1024xf32> to vector<8x56xf32>
    %195 = tpu.concatenate %193, %194 in 1 : vector<8x968xf32>, vector<8x56xf32> -> vector<8x1024xf32>
    %c19 = arith.constant 19 : index
    %c0_101 = arith.constant 0 : index
    %196 = vector.load %arg4[%c19, %c0_101] : memref<27x1024xf32, #tpu.memory_space<vmem>>, vector<1x1024xf32>
    %197 = vector.broadcast %196 : vector<1x1024xf32> to vector<8x1024xf32>
    %198 = arith.mulf %195, %197 : vector<8x1024xf32>
    %c19_102 = arith.constant 19 : index
    %c0_103 = arith.constant 0 : index
    %c0_104 = arith.constant 0 : index
    %199 = vector.load %arg2[%c19_102, %c0_103, %c0_104] : memref<27x8x8xf32, #tpu.memory_space<vmem>>, vector<1x8x8xf32>
    %200 = vector.shape_cast %199 : vector<1x8x8xf32> to vector<8x8xf32>
    %cst_105 = arith.constant dense<0.000000e+00> : vector<8x1024xf32>
    %201 = tpu.matmul %200, %198, %cst_105 {dimension_numbers = #tpu.dot_dimension_numbers<[1], [0], [0], [1], [0, 0, 1, 1], [], []>} : vector<8x8xf32>, vector<8x1024xf32>, vector<8x1024xf32> -> vector<8x1024xf32>
    %202 = arith.addf %192, %201 : vector<8x1024xf32>
    %203 = vector.extract_strided_slice %4 {offsets = [0, 57], sizes = [8, 967], strides = [1, 1]} : vector<8x1024xf32> to vector<8x967xf32>
    %204 = vector.extract_strided_slice %4 {offsets = [0, 0], sizes = [8, 57], strides = [1, 1]} : vector<8x1024xf32> to vector<8x57xf32>
    %205 = tpu.concatenate %203, %204 in 1 : vector<8x967xf32>, vector<8x57xf32> -> vector<8x1024xf32>
    %c20 = arith.constant 20 : index
    %c0_106 = arith.constant 0 : index
    %206 = vector.load %arg4[%c20, %c0_106] : memref<27x1024xf32, #tpu.memory_space<vmem>>, vector<1x1024xf32>
    %207 = vector.broadcast %206 : vector<1x1024xf32> to vector<8x1024xf32>
    %208 = arith.mulf %205, %207 : vector<8x1024xf32>
    %c20_107 = arith.constant 20 : index
    %c0_108 = arith.constant 0 : index
    %c0_109 = arith.constant 0 : index
    %209 = vector.load %arg2[%c20_107, %c0_108, %c0_109] : memref<27x8x8xf32, #tpu.memory_space<vmem>>, vector<1x8x8xf32>
    %210 = vector.shape_cast %209 : vector<1x8x8xf32> to vector<8x8xf32>
    %cst_110 = arith.constant dense<0.000000e+00> : vector<8x1024xf32>
    %211 = tpu.matmul %210, %208, %cst_110 {dimension_numbers = #tpu.dot_dimension_numbers<[1], [0], [0], [1], [0, 0, 1, 1], [], []>} : vector<8x8xf32>, vector<8x1024xf32>, vector<8x1024xf32> -> vector<8x1024xf32>
    %212 = arith.addf %202, %211 : vector<8x1024xf32>
    %213 = vector.extract_strided_slice %4 {offsets = [0, 63], sizes = [8, 961], strides = [1, 1]} : vector<8x1024xf32> to vector<8x961xf32>
    %214 = vector.extract_strided_slice %4 {offsets = [0, 0], sizes = [8, 63], strides = [1, 1]} : vector<8x1024xf32> to vector<8x63xf32>
    %215 = tpu.concatenate %213, %214 in 1 : vector<8x961xf32>, vector<8x63xf32> -> vector<8x1024xf32>
    %c21 = arith.constant 21 : index
    %c0_111 = arith.constant 0 : index
    %216 = vector.load %arg4[%c21, %c0_111] : memref<27x1024xf32, #tpu.memory_space<vmem>>, vector<1x1024xf32>
    %217 = vector.broadcast %216 : vector<1x1024xf32> to vector<8x1024xf32>
    %218 = arith.mulf %215, %217 : vector<8x1024xf32>
    %c21_112 = arith.constant 21 : index
    %c0_113 = arith.constant 0 : index
    %c0_114 = arith.constant 0 : index
    %219 = vector.load %arg2[%c21_112, %c0_113, %c0_114] : memref<27x8x8xf32, #tpu.memory_space<vmem>>, vector<1x8x8xf32>
    %220 = vector.shape_cast %219 : vector<1x8x8xf32> to vector<8x8xf32>
    %cst_115 = arith.constant dense<0.000000e+00> : vector<8x1024xf32>
    %221 = tpu.matmul %220, %218, %cst_115 {dimension_numbers = #tpu.dot_dimension_numbers<[1], [0], [0], [1], [0, 0, 1, 1], [], []>} : vector<8x8xf32>, vector<8x1024xf32>, vector<8x1024xf32> -> vector<8x1024xf32>
    %222 = arith.addf %212, %221 : vector<8x1024xf32>
    %223 = vector.extract_strided_slice %4 {offsets = [0, 64], sizes = [8, 960], strides = [1, 1]} : vector<8x1024xf32> to vector<8x960xf32>
    %224 = vector.extract_strided_slice %4 {offsets = [0, 0], sizes = [8, 64], strides = [1, 1]} : vector<8x1024xf32> to vector<8x64xf32>
    %225 = tpu.concatenate %223, %224 in 1 : vector<8x960xf32>, vector<8x64xf32> -> vector<8x1024xf32>
    %c22 = arith.constant 22 : index
    %c0_116 = arith.constant 0 : index
    %226 = vector.load %arg4[%c22, %c0_116] : memref<27x1024xf32, #tpu.memory_space<vmem>>, vector<1x1024xf32>
    %227 = vector.broadcast %226 : vector<1x1024xf32> to vector<8x1024xf32>
    %228 = arith.mulf %225, %227 : vector<8x1024xf32>
    %c22_117 = arith.constant 22 : index
    %c0_118 = arith.constant 0 : index
    %c0_119 = arith.constant 0 : index
    %229 = vector.load %arg2[%c22_117, %c0_118, %c0_119] : memref<27x8x8xf32, #tpu.memory_space<vmem>>, vector<1x8x8xf32>
    %230 = vector.shape_cast %229 : vector<1x8x8xf32> to vector<8x8xf32>
    %cst_120 = arith.constant dense<0.000000e+00> : vector<8x1024xf32>
    %231 = tpu.matmul %230, %228, %cst_120 {dimension_numbers = #tpu.dot_dimension_numbers<[1], [0], [0], [1], [0, 0, 1, 1], [], []>} : vector<8x8xf32>, vector<8x1024xf32>, vector<8x1024xf32> -> vector<8x1024xf32>
    %232 = arith.addf %222, %231 : vector<8x1024xf32>
    %233 = vector.extract_strided_slice %4 {offsets = [0, 65], sizes = [8, 959], strides = [1, 1]} : vector<8x1024xf32> to vector<8x959xf32>
    %234 = vector.extract_strided_slice %4 {offsets = [0, 0], sizes = [8, 65], strides = [1, 1]} : vector<8x1024xf32> to vector<8x65xf32>
    %235 = tpu.concatenate %233, %234 in 1 : vector<8x959xf32>, vector<8x65xf32> -> vector<8x1024xf32>
    %c23 = arith.constant 23 : index
    %c0_121 = arith.constant 0 : index
    %236 = vector.load %arg4[%c23, %c0_121] : memref<27x1024xf32, #tpu.memory_space<vmem>>, vector<1x1024xf32>
    %237 = vector.broadcast %236 : vector<1x1024xf32> to vector<8x1024xf32>
    %238 = arith.mulf %235, %237 : vector<8x1024xf32>
    %c23_122 = arith.constant 23 : index
    %c0_123 = arith.constant 0 : index
    %c0_124 = arith.constant 0 : index
    %239 = vector.load %arg2[%c23_122, %c0_123, %c0_124] : memref<27x8x8xf32, #tpu.memory_space<vmem>>, vector<1x8x8xf32>
    %240 = vector.shape_cast %239 : vector<1x8x8xf32> to vector<8x8xf32>
    %cst_125 = arith.constant dense<0.000000e+00> : vector<8x1024xf32>
    %241 = tpu.matmul %240, %238, %cst_125 {dimension_numbers = #tpu.dot_dimension_numbers<[1], [0], [0], [1], [0, 0, 1, 1], [], []>} : vector<8x8xf32>, vector<8x1024xf32>, vector<8x1024xf32> -> vector<8x1024xf32>
    %242 = arith.addf %232, %241 : vector<8x1024xf32>
    %243 = vector.extract_strided_slice %4 {offsets = [0, 71], sizes = [8, 953], strides = [1, 1]} : vector<8x1024xf32> to vector<8x953xf32>
    %244 = vector.extract_strided_slice %4 {offsets = [0, 0], sizes = [8, 71], strides = [1, 1]} : vector<8x1024xf32> to vector<8x71xf32>
    %245 = tpu.concatenate %243, %244 in 1 : vector<8x953xf32>, vector<8x71xf32> -> vector<8x1024xf32>
    %c24 = arith.constant 24 : index
    %c0_126 = arith.constant 0 : index
    %246 = vector.load %arg4[%c24, %c0_126] : memref<27x1024xf32, #tpu.memory_space<vmem>>, vector<1x1024xf32>
    %247 = vector.broadcast %246 : vector<1x1024xf32> to vector<8x1024xf32>
    %248 = arith.mulf %245, %247 : vector<8x1024xf32>
    %c24_127 = arith.constant 24 : index
    %c0_128 = arith.constant 0 : index
    %c0_129 = arith.constant 0 : index
    %249 = vector.load %arg2[%c24_127, %c0_128, %c0_129] : memref<27x8x8xf32, #tpu.memory_space<vmem>>, vector<1x8x8xf32>
    %250 = vector.shape_cast %249 : vector<1x8x8xf32> to vector<8x8xf32>
    %cst_130 = arith.constant dense<0.000000e+00> : vector<8x1024xf32>
    %251 = tpu.matmul %250, %248, %cst_130 {dimension_numbers = #tpu.dot_dimension_numbers<[1], [0], [0], [1], [0, 0, 1, 1], [], []>} : vector<8x8xf32>, vector<8x1024xf32>, vector<8x1024xf32> -> vector<8x1024xf32>
    %252 = arith.addf %242, %251 : vector<8x1024xf32>
    %253 = vector.extract_strided_slice %4 {offsets = [0, 72], sizes = [8, 952], strides = [1, 1]} : vector<8x1024xf32> to vector<8x952xf32>
    %254 = vector.extract_strided_slice %4 {offsets = [0, 0], sizes = [8, 72], strides = [1, 1]} : vector<8x1024xf32> to vector<8x72xf32>
    %255 = tpu.concatenate %253, %254 in 1 : vector<8x952xf32>, vector<8x72xf32> -> vector<8x1024xf32>
    %c25 = arith.constant 25 : index
    %c0_131 = arith.constant 0 : index
    %256 = vector.load %arg4[%c25, %c0_131] : memref<27x1024xf32, #tpu.memory_space<vmem>>, vector<1x1024xf32>
    %257 = vector.broadcast %256 : vector<1x1024xf32> to vector<8x1024xf32>
    %258 = arith.mulf %255, %257 : vector<8x1024xf32>
    %c25_132 = arith.constant 25 : index
    %c0_133 = arith.constant 0 : index
    %c0_134 = arith.constant 0 : index
    %259 = vector.load %arg2[%c25_132, %c0_133, %c0_134] : memref<27x8x8xf32, #tpu.memory_space<vmem>>, vector<1x8x8xf32>
    %260 = vector.shape_cast %259 : vector<1x8x8xf32> to vector<8x8xf32>
    %cst_135 = arith.constant dense<0.000000e+00> : vector<8x1024xf32>
    %261 = tpu.matmul %260, %258, %cst_135 {dimension_numbers = #tpu.dot_dimension_numbers<[1], [0], [0], [1], [0, 0, 1, 1], [], []>} : vector<8x8xf32>, vector<8x1024xf32>, vector<8x1024xf32> -> vector<8x1024xf32>
    %262 = arith.addf %252, %261 : vector<8x1024xf32>
    %263 = vector.extract_strided_slice %4 {offsets = [0, 73], sizes = [8, 951], strides = [1, 1]} : vector<8x1024xf32> to vector<8x951xf32>
    %264 = vector.extract_strided_slice %4 {offsets = [0, 0], sizes = [8, 73], strides = [1, 1]} : vector<8x1024xf32> to vector<8x73xf32>
    %265 = tpu.concatenate %263, %264 in 1 : vector<8x951xf32>, vector<8x73xf32> -> vector<8x1024xf32>
    %c26 = arith.constant 26 : index
    %c0_136 = arith.constant 0 : index
    %266 = vector.load %arg4[%c26, %c0_136] : memref<27x1024xf32, #tpu.memory_space<vmem>>, vector<1x1024xf32>
    %267 = vector.broadcast %266 : vector<1x1024xf32> to vector<8x1024xf32>
    %268 = arith.mulf %265, %267 : vector<8x1024xf32>
    %c26_137 = arith.constant 26 : index
    %c0_138 = arith.constant 0 : index
    %c0_139 = arith.constant 0 : index
    %269 = vector.load %arg2[%c26_137, %c0_138, %c0_139] : memref<27x8x8xf32, #tpu.memory_space<vmem>>, vector<1x8x8xf32>
    %270 = vector.shape_cast %269 : vector<1x8x8xf32> to vector<8x8xf32>
    %cst_140 = arith.constant dense<0.000000e+00> : vector<8x1024xf32>
    %271 = tpu.matmul %270, %268, %cst_140 {dimension_numbers = #tpu.dot_dimension_numbers<[1], [0], [0], [1], [0, 0, 1, 1], [], []>} : vector<8x8xf32>, vector<8x1024xf32>, vector<8x1024xf32> -> vector<8x1024xf32>
    %272 = arith.addf %262, %271 : vector<8x1024xf32>
    %cst_141 = arith.constant dense<0.000000e+00> : vector<8xf32>
    %273 = vector.multi_reduction <add>, %272, %cst_141 [1] : vector<8x1024xf32> to vector<8xf32>
    %274 = vector.shape_cast %273 : vector<8xf32> to vector<8x1xf32>
    %cst_142 = arith.constant 1.024000e+03 : f32
    %275 = vector.broadcast %cst_142 : f32 to vector<8x1xf32>
    %276 = arith.divf %274, %275 : vector<8x1xf32>
    %277 = vector.broadcast %276 : vector<8x1xf32> to vector<8x1024xf32>
    %278 = arith.subf %272, %277 : vector<8x1024xf32>
    %279 = arith.mulf %278, %278 : vector<8x1024xf32>
    %cst_143 = arith.constant dense<0.000000e+00> : vector<8xf32>
    %280 = vector.multi_reduction <add>, %279, %cst_143 [1] : vector<8x1024xf32> to vector<8xf32>
    %281 = vector.shape_cast %280 : vector<8xf32> to vector<8x1xf32>
    %cst_144 = arith.constant 1.024000e+03 : f32
    %282 = vector.broadcast %cst_144 : f32 to vector<8x1xf32>
    %283 = arith.divf %281, %282 : vector<8x1xf32>
    %c0_145 = arith.constant 0 : index
    %c0_146 = arith.constant 0 : index
    %284 = vector.load %arg5[%c0_145, %c0_146] : memref<8x1xf32, #tpu.memory_space<vmem>>, vector<8x1xf32>
    %cst_147 = arith.constant 9.99999974E-6 : f32
    %285 = vector.broadcast %cst_147 : f32 to vector<8x1xf32>
    %286 = arith.addf %283, %285 : vector<8x1xf32>
    %287 = math.rsqrt %286 : vector<8x1xf32>
    %288 = arith.mulf %284, %287 : vector<8x1xf32>
    %289 = vector.broadcast %288 : vector<8x1xf32> to vector<8x1024xf32>
    %290 = arith.mulf %278, %289 : vector<8x1024xf32>
    %c0_148 = arith.constant 0 : index
    %c0_149 = arith.constant 0 : index
    %291 = vector.load %arg6[%c0_148, %c0_149] : memref<8x1xf32, #tpu.memory_space<vmem>>, vector<8x1xf32>
    %292 = vector.broadcast %291 : vector<8x1xf32> to vector<8x1024xf32>
    %293 = arith.addf %290, %292 : vector<8x1024xf32>
    %cst_150 = arith.constant 0.000000e+00 : f32
    %294 = vector.broadcast %cst_150 : f32 to vector<8x1024xf32>
    %295 = arith.cmpf oge, %293, %294 : vector<8x1024xf32>
    %cst_151 = arith.constant 0.00999999977 : f32
    %296 = vector.broadcast %cst_151 : f32 to vector<8x1024xf32>
    %297 = arith.mulf %296, %293 : vector<8x1024xf32>
    %298 = arith.select %295, %293, %297 : vector<8x1024xi1>, vector<8x1024xf32>
    %cst_152 = arith.constant 0.000000e+00 : f32
    %299 = vector.broadcast %cst_152 : f32 to vector<8x1024xf32>
    %300 = vector.extract_strided_slice %298 {offsets = [0, 951], sizes = [8, 73], strides = [1, 1]} : vector<8x1024xf32> to vector<8x73xf32>
    %301 = vector.extract_strided_slice %298 {offsets = [0, 0], sizes = [8, 951], strides = [1, 1]} : vector<8x1024xf32> to vector<8x951xf32>
    %302 = tpu.concatenate %300, %301 in 1 : vector<8x73xf32>, vector<8x951xf32> -> vector<8x1024xf32>
    %c0_153 = arith.constant 0 : index
    %c0_154 = arith.constant 0 : index
    %303 = vector.load %arg4[%c0_153, %c0_154] : memref<27x1024xf32, #tpu.memory_space<vmem>>, vector<1x1024xf32>
    %304 = vector.broadcast %303 : vector<1x1024xf32> to vector<8x1024xf32>
    %305 = arith.mulf %302, %304 : vector<8x1024xf32>
    %c0_155 = arith.constant 0 : index
    %c0_156 = arith.constant 0 : index
    %c0_157 = arith.constant 0 : index
    %306 = vector.load %arg3[%c0_155, %c0_156, %c0_157] : memref<27x8x8xf32, #tpu.memory_space<vmem>>, vector<1x8x8xf32>
    %307 = vector.shape_cast %306 : vector<1x8x8xf32> to vector<8x8xf32>
    %cst_158 = arith.constant dense<0.000000e+00> : vector<8x1024xf32>
    %308 = tpu.matmul %307, %305, %cst_158 {dimension_numbers = #tpu.dot_dimension_numbers<[1], [0], [0], [1], [0, 0, 1, 1], [], []>} : vector<8x8xf32>, vector<8x1024xf32>, vector<8x1024xf32> -> vector<8x1024xf32>
    %309 = arith.addf %299, %308 : vector<8x1024xf32>
    %310 = vector.extract_strided_slice %298 {offsets = [0, 952], sizes = [8, 72], strides = [1, 1]} : vector<8x1024xf32> to vector<8x72xf32>
    %311 = vector.extract_strided_slice %298 {offsets = [0, 0], sizes = [8, 952], strides = [1, 1]} : vector<8x1024xf32> to vector<8x952xf32>
    %312 = tpu.concatenate %310, %311 in 1 : vector<8x72xf32>, vector<8x952xf32> -> vector<8x1024xf32>
    %c1_159 = arith.constant 1 : index
    %c0_160 = arith.constant 0 : index
    %313 = vector.load %arg4[%c1_159, %c0_160] : memref<27x1024xf32, #tpu.memory_space<vmem>>, vector<1x1024xf32>
    %314 = vector.broadcast %313 : vector<1x1024xf32> to vector<8x1024xf32>
    %315 = arith.mulf %312, %314 : vector<8x1024xf32>
    %c1_161 = arith.constant 1 : index
    %c0_162 = arith.constant 0 : index
    %c0_163 = arith.constant 0 : index
    %316 = vector.load %arg3[%c1_161, %c0_162, %c0_163] : memref<27x8x8xf32, #tpu.memory_space<vmem>>, vector<1x8x8xf32>
    %317 = vector.shape_cast %316 : vector<1x8x8xf32> to vector<8x8xf32>
    %cst_164 = arith.constant dense<0.000000e+00> : vector<8x1024xf32>
    %318 = tpu.matmul %317, %315, %cst_164 {dimension_numbers = #tpu.dot_dimension_numbers<[1], [0], [0], [1], [0, 0, 1, 1], [], []>} : vector<8x8xf32>, vector<8x1024xf32>, vector<8x1024xf32> -> vector<8x1024xf32>
    %319 = arith.addf %309, %318 : vector<8x1024xf32>
    %320 = vector.extract_strided_slice %298 {offsets = [0, 953], sizes = [8, 71], strides = [1, 1]} : vector<8x1024xf32> to vector<8x71xf32>
    %321 = vector.extract_strided_slice %298 {offsets = [0, 0], sizes = [8, 953], strides = [1, 1]} : vector<8x1024xf32> to vector<8x953xf32>
    %322 = tpu.concatenate %320, %321 in 1 : vector<8x71xf32>, vector<8x953xf32> -> vector<8x1024xf32>
    %c2_165 = arith.constant 2 : index
    %c0_166 = arith.constant 0 : index
    %323 = vector.load %arg4[%c2_165, %c0_166] : memref<27x1024xf32, #tpu.memory_space<vmem>>, vector<1x1024xf32>
    %324 = vector.broadcast %323 : vector<1x1024xf32> to vector<8x1024xf32>
    %325 = arith.mulf %322, %324 : vector<8x1024xf32>
    %c2_167 = arith.constant 2 : index
    %c0_168 = arith.constant 0 : index
    %c0_169 = arith.constant 0 : index
    %326 = vector.load %arg3[%c2_167, %c0_168, %c0_169] : memref<27x8x8xf32, #tpu.memory_space<vmem>>, vector<1x8x8xf32>
    %327 = vector.shape_cast %326 : vector<1x8x8xf32> to vector<8x8xf32>
    %cst_170 = arith.constant dense<0.000000e+00> : vector<8x1024xf32>
    %328 = tpu.matmul %327, %325, %cst_170 {dimension_numbers = #tpu.dot_dimension_numbers<[1], [0], [0], [1], [0, 0, 1, 1], [], []>} : vector<8x8xf32>, vector<8x1024xf32>, vector<8x1024xf32> -> vector<8x1024xf32>
    %329 = arith.addf %319, %328 : vector<8x1024xf32>
    %330 = vector.extract_strided_slice %298 {offsets = [0, 959], sizes = [8, 65], strides = [1, 1]} : vector<8x1024xf32> to vector<8x65xf32>
    %331 = vector.extract_strided_slice %298 {offsets = [0, 0], sizes = [8, 959], strides = [1, 1]} : vector<8x1024xf32> to vector<8x959xf32>
    %332 = tpu.concatenate %330, %331 in 1 : vector<8x65xf32>, vector<8x959xf32> -> vector<8x1024xf32>
    %c3_171 = arith.constant 3 : index
    %c0_172 = arith.constant 0 : index
    %333 = vector.load %arg4[%c3_171, %c0_172] : memref<27x1024xf32, #tpu.memory_space<vmem>>, vector<1x1024xf32>
    %334 = vector.broadcast %333 : vector<1x1024xf32> to vector<8x1024xf32>
    %335 = arith.mulf %332, %334 : vector<8x1024xf32>
    %c3_173 = arith.constant 3 : index
    %c0_174 = arith.constant 0 : index
    %c0_175 = arith.constant 0 : index
    %336 = vector.load %arg3[%c3_173, %c0_174, %c0_175] : memref<27x8x8xf32, #tpu.memory_space<vmem>>, vector<1x8x8xf32>
    %337 = vector.shape_cast %336 : vector<1x8x8xf32> to vector<8x8xf32>
    %cst_176 = arith.constant dense<0.000000e+00> : vector<8x1024xf32>
    %338 = tpu.matmul %337, %335, %cst_176 {dimension_numbers = #tpu.dot_dimension_numbers<[1], [0], [0], [1], [0, 0, 1, 1], [], []>} : vector<8x8xf32>, vector<8x1024xf32>, vector<8x1024xf32> -> vector<8x1024xf32>
    %339 = arith.addf %329, %338 : vector<8x1024xf32>
    %340 = vector.extract_strided_slice %298 {offsets = [0, 960], sizes = [8, 64], strides = [1, 1]} : vector<8x1024xf32> to vector<8x64xf32>
    %341 = vector.extract_strided_slice %298 {offsets = [0, 0], sizes = [8, 960], strides = [1, 1]} : vector<8x1024xf32> to vector<8x960xf32>
    %342 = tpu.concatenate %340, %341 in 1 : vector<8x64xf32>, vector<8x960xf32> -> vector<8x1024xf32>
    %c4_177 = arith.constant 4 : index
    %c0_178 = arith.constant 0 : index
    %343 = vector.load %arg4[%c4_177, %c0_178] : memref<27x1024xf32, #tpu.memory_space<vmem>>, vector<1x1024xf32>
    %344 = vector.broadcast %343 : vector<1x1024xf32> to vector<8x1024xf32>
    %345 = arith.mulf %342, %344 : vector<8x1024xf32>
    %c4_179 = arith.constant 4 : index
    %c0_180 = arith.constant 0 : index
    %c0_181 = arith.constant 0 : index
    %346 = vector.load %arg3[%c4_179, %c0_180, %c0_181] : memref<27x8x8xf32, #tpu.memory_space<vmem>>, vector<1x8x8xf32>
    %347 = vector.shape_cast %346 : vector<1x8x8xf32> to vector<8x8xf32>
    %cst_182 = arith.constant dense<0.000000e+00> : vector<8x1024xf32>
    %348 = tpu.matmul %347, %345, %cst_182 {dimension_numbers = #tpu.dot_dimension_numbers<[1], [0], [0], [1], [0, 0, 1, 1], [], []>} : vector<8x8xf32>, vector<8x1024xf32>, vector<8x1024xf32> -> vector<8x1024xf32>
    %349 = arith.addf %339, %348 : vector<8x1024xf32>
    %350 = vector.extract_strided_slice %298 {offsets = [0, 961], sizes = [8, 63], strides = [1, 1]} : vector<8x1024xf32> to vector<8x63xf32>
    %351 = vector.extract_strided_slice %298 {offsets = [0, 0], sizes = [8, 961], strides = [1, 1]} : vector<8x1024xf32> to vector<8x961xf32>
    %352 = tpu.concatenate %350, %351 in 1 : vector<8x63xf32>, vector<8x961xf32> -> vector<8x1024xf32>
    %c5_183 = arith.constant 5 : index
    %c0_184 = arith.constant 0 : index
    %353 = vector.load %arg4[%c5_183, %c0_184] : memref<27x1024xf32, #tpu.memory_space<vmem>>, vector<1x1024xf32>
    %354 = vector.broadcast %353 : vector<1x1024xf32> to vector<8x1024xf32>
    %355 = arith.mulf %352, %354 : vector<8x1024xf32>
    %c5_185 = arith.constant 5 : index
    %c0_186 = arith.constant 0 : index
    %c0_187 = arith.constant 0 : index
    %356 = vector.load %arg3[%c5_185, %c0_186, %c0_187] : memref<27x8x8xf32, #tpu.memory_space<vmem>>, vector<1x8x8xf32>
    %357 = vector.shape_cast %356 : vector<1x8x8xf32> to vector<8x8xf32>
    %cst_188 = arith.constant dense<0.000000e+00> : vector<8x1024xf32>
    %358 = tpu.matmul %357, %355, %cst_188 {dimension_numbers = #tpu.dot_dimension_numbers<[1], [0], [0], [1], [0, 0, 1, 1], [], []>} : vector<8x8xf32>, vector<8x1024xf32>, vector<8x1024xf32> -> vector<8x1024xf32>
    %359 = arith.addf %349, %358 : vector<8x1024xf32>
    %360 = vector.extract_strided_slice %298 {offsets = [0, 967], sizes = [8, 57], strides = [1, 1]} : vector<8x1024xf32> to vector<8x57xf32>
    %361 = vector.extract_strided_slice %298 {offsets = [0, 0], sizes = [8, 967], strides = [1, 1]} : vector<8x1024xf32> to vector<8x967xf32>
    %362 = tpu.concatenate %360, %361 in 1 : vector<8x57xf32>, vector<8x967xf32> -> vector<8x1024xf32>
    %c6_189 = arith.constant 6 : index
    %c0_190 = arith.constant 0 : index
    %363 = vector.load %arg4[%c6_189, %c0_190] : memref<27x1024xf32, #tpu.memory_space<vmem>>, vector<1x1024xf32>
    %364 = vector.broadcast %363 : vector<1x1024xf32> to vector<8x1024xf32>
    %365 = arith.mulf %362, %364 : vector<8x1024xf32>
    %c6_191 = arith.constant 6 : index
    %c0_192 = arith.constant 0 : index
    %c0_193 = arith.constant 0 : index
    %366 = vector.load %arg3[%c6_191, %c0_192, %c0_193] : memref<27x8x8xf32, #tpu.memory_space<vmem>>, vector<1x8x8xf32>
    %367 = vector.shape_cast %366 : vector<1x8x8xf32> to vector<8x8xf32>
    %cst_194 = arith.constant dense<0.000000e+00> : vector<8x1024xf32>
    %368 = tpu.matmul %367, %365, %cst_194 {dimension_numbers = #tpu.dot_dimension_numbers<[1], [0], [0], [1], [0, 0, 1, 1], [], []>} : vector<8x8xf32>, vector<8x1024xf32>, vector<8x1024xf32> -> vector<8x1024xf32>
    %369 = arith.addf %359, %368 : vector<8x1024xf32>
    %370 = vector.extract_strided_slice %298 {offsets = [0, 968], sizes = [8, 56], strides = [1, 1]} : vector<8x1024xf32> to vector<8x56xf32>
    %371 = vector.extract_strided_slice %298 {offsets = [0, 0], sizes = [8, 968], strides = [1, 1]} : vector<8x1024xf32> to vector<8x968xf32>
    %372 = tpu.concatenate %370, %371 in 1 : vector<8x56xf32>, vector<8x968xf32> -> vector<8x1024xf32>
    %c7_195 = arith.constant 7 : index
    %c0_196 = arith.constant 0 : index
    %373 = vector.load %arg4[%c7_195, %c0_196] : memref<27x1024xf32, #tpu.memory_space<vmem>>, vector<1x1024xf32>
    %374 = vector.broadcast %373 : vector<1x1024xf32> to vector<8x1024xf32>
    %375 = arith.mulf %372, %374 : vector<8x1024xf32>
    %c7_197 = arith.constant 7 : index
    %c0_198 = arith.constant 0 : index
    %c0_199 = arith.constant 0 : index
    %376 = vector.load %arg3[%c7_197, %c0_198, %c0_199] : memref<27x8x8xf32, #tpu.memory_space<vmem>>, vector<1x8x8xf32>
    %377 = vector.shape_cast %376 : vector<1x8x8xf32> to vector<8x8xf32>
    %cst_200 = arith.constant dense<0.000000e+00> : vector<8x1024xf32>
    %378 = tpu.matmul %377, %375, %cst_200 {dimension_numbers = #tpu.dot_dimension_numbers<[1], [0], [0], [1], [0, 0, 1, 1], [], []>} : vector<8x8xf32>, vector<8x1024xf32>, vector<8x1024xf32> -> vector<8x1024xf32>
    %379 = arith.addf %369, %378 : vector<8x1024xf32>
    %380 = vector.extract_strided_slice %298 {offsets = [0, 969], sizes = [8, 55], strides = [1, 1]} : vector<8x1024xf32> to vector<8x55xf32>
    %381 = vector.extract_strided_slice %298 {offsets = [0, 0], sizes = [8, 969], strides = [1, 1]} : vector<8x1024xf32> to vector<8x969xf32>
    %382 = tpu.concatenate %380, %381 in 1 : vector<8x55xf32>, vector<8x969xf32> -> vector<8x1024xf32>
    %c8_201 = arith.constant 8 : index
    %c0_202 = arith.constant 0 : index
    %383 = vector.load %arg4[%c8_201, %c0_202] : memref<27x1024xf32, #tpu.memory_space<vmem>>, vector<1x1024xf32>
    %384 = vector.broadcast %383 : vector<1x1024xf32> to vector<8x1024xf32>
    %385 = arith.mulf %382, %384 : vector<8x1024xf32>
    %c8_203 = arith.constant 8 : index
    %c0_204 = arith.constant 0 : index
    %c0_205 = arith.constant 0 : index
    %386 = vector.load %arg3[%c8_203, %c0_204, %c0_205] : memref<27x8x8xf32, #tpu.memory_space<vmem>>, vector<1x8x8xf32>
    %387 = vector.shape_cast %386 : vector<1x8x8xf32> to vector<8x8xf32>
    %cst_206 = arith.constant dense<0.000000e+00> : vector<8x1024xf32>
    %388 = tpu.matmul %387, %385, %cst_206 {dimension_numbers = #tpu.dot_dimension_numbers<[1], [0], [0], [1], [0, 0, 1, 1], [], []>} : vector<8x8xf32>, vector<8x1024xf32>, vector<8x1024xf32> -> vector<8x1024xf32>
    %389 = arith.addf %379, %388 : vector<8x1024xf32>
    %390 = vector.extract_strided_slice %298 {offsets = [0, 1015], sizes = [8, 9], strides = [1, 1]} : vector<8x1024xf32> to vector<8x9xf32>
    %391 = vector.extract_strided_slice %298 {offsets = [0, 0], sizes = [8, 1015], strides = [1, 1]} : vector<8x1024xf32> to vector<8x1015xf32>
    %392 = tpu.concatenate %390, %391 in 1 : vector<8x9xf32>, vector<8x1015xf32> -> vector<8x1024xf32>
    %c9_207 = arith.constant 9 : index
    %c0_208 = arith.constant 0 : index
    %393 = vector.load %arg4[%c9_207, %c0_208] : memref<27x1024xf32, #tpu.memory_space<vmem>>, vector<1x1024xf32>
    %394 = vector.broadcast %393 : vector<1x1024xf32> to vector<8x1024xf32>
    %395 = arith.mulf %392, %394 : vector<8x1024xf32>
    %c9_209 = arith.constant 9 : index
    %c0_210 = arith.constant 0 : index
    %c0_211 = arith.constant 0 : index
    %396 = vector.load %arg3[%c9_209, %c0_210, %c0_211] : memref<27x8x8xf32, #tpu.memory_space<vmem>>, vector<1x8x8xf32>
    %397 = vector.shape_cast %396 : vector<1x8x8xf32> to vector<8x8xf32>
    %cst_212 = arith.constant dense<0.000000e+00> : vector<8x1024xf32>
    %398 = tpu.matmul %397, %395, %cst_212 {dimension_numbers = #tpu.dot_dimension_numbers<[1], [0], [0], [1], [0, 0, 1, 1], [], []>} : vector<8x8xf32>, vector<8x1024xf32>, vector<8x1024xf32> -> vector<8x1024xf32>
    %399 = arith.addf %389, %398 : vector<8x1024xf32>
    %400 = vector.extract_strided_slice %298 {offsets = [0, 1016], sizes = [8, 8], strides = [1, 1]} : vector<8x1024xf32> to vector<8x8xf32>
    %401 = vector.extract_strided_slice %298 {offsets = [0, 0], sizes = [8, 1016], strides = [1, 1]} : vector<8x1024xf32> to vector<8x1016xf32>
    %402 = tpu.concatenate %400, %401 in 1 : vector<8x8xf32>, vector<8x1016xf32> -> vector<8x1024xf32>
    %c10_213 = arith.constant 10 : index
    %c0_214 = arith.constant 0 : index
    %403 = vector.load %arg4[%c10_213, %c0_214] : memref<27x1024xf32, #tpu.memory_space<vmem>>, vector<1x1024xf32>
    %404 = vector.broadcast %403 : vector<1x1024xf32> to vector<8x1024xf32>
    %405 = arith.mulf %402, %404 : vector<8x1024xf32>
    %c10_215 = arith.constant 10 : index
    %c0_216 = arith.constant 0 : index
    %c0_217 = arith.constant 0 : index
    %406 = vector.load %arg3[%c10_215, %c0_216, %c0_217] : memref<27x8x8xf32, #tpu.memory_space<vmem>>, vector<1x8x8xf32>
    %407 = vector.shape_cast %406 : vector<1x8x8xf32> to vector<8x8xf32>
    %cst_218 = arith.constant dense<0.000000e+00> : vector<8x1024xf32>
    %408 = tpu.matmul %407, %405, %cst_218 {dimension_numbers = #tpu.dot_dimension_numbers<[1], [0], [0], [1], [0, 0, 1, 1], [], []>} : vector<8x8xf32>, vector<8x1024xf32>, vector<8x1024xf32> -> vector<8x1024xf32>
    %409 = arith.addf %399, %408 : vector<8x1024xf32>
    %410 = vector.extract_strided_slice %298 {offsets = [0, 1017], sizes = [8, 7], strides = [1, 1]} : vector<8x1024xf32> to vector<8x7xf32>
    %411 = vector.extract_strided_slice %298 {offsets = [0, 0], sizes = [8, 1017], strides = [1, 1]} : vector<8x1024xf32> to vector<8x1017xf32>
    %412 = tpu.concatenate %410, %411 in 1 : vector<8x7xf32>, vector<8x1017xf32> -> vector<8x1024xf32>
    %c11_219 = arith.constant 11 : index
    %c0_220 = arith.constant 0 : index
    %413 = vector.load %arg4[%c11_219, %c0_220] : memref<27x1024xf32, #tpu.memory_space<vmem>>, vector<1x1024xf32>
    %414 = vector.broadcast %413 : vector<1x1024xf32> to vector<8x1024xf32>
    %415 = arith.mulf %412, %414 : vector<8x1024xf32>
    %c11_221 = arith.constant 11 : index
    %c0_222 = arith.constant 0 : index
    %c0_223 = arith.constant 0 : index
    %416 = vector.load %arg3[%c11_221, %c0_222, %c0_223] : memref<27x8x8xf32, #tpu.memory_space<vmem>>, vector<1x8x8xf32>
    %417 = vector.shape_cast %416 : vector<1x8x8xf32> to vector<8x8xf32>
    %cst_224 = arith.constant dense<0.000000e+00> : vector<8x1024xf32>
    %418 = tpu.matmul %417, %415, %cst_224 {dimension_numbers = #tpu.dot_dimension_numbers<[1], [0], [0], [1], [0, 0, 1, 1], [], []>} : vector<8x8xf32>, vector<8x1024xf32>, vector<8x1024xf32> -> vector<8x1024xf32>
    %419 = arith.addf %409, %418 : vector<8x1024xf32>
    %420 = vector.extract_strided_slice %298 {offsets = [0, 1023], sizes = [8, 1], strides = [1, 1]} : vector<8x1024xf32> to vector<8x1xf32>
    %421 = vector.extract_strided_slice %298 {offsets = [0, 0], sizes = [8, 1023], strides = [1, 1]} : vector<8x1024xf32> to vector<8x1023xf32>
    %422 = tpu.concatenate %420, %421 in 1 : vector<8x1xf32>, vector<8x1023xf32> -> vector<8x1024xf32>
    %c12_225 = arith.constant 12 : index
    %c0_226 = arith.constant 0 : index
    %423 = vector.load %arg4[%c12_225, %c0_226] : memref<27x1024xf32, #tpu.memory_space<vmem>>, vector<1x1024xf32>
    %424 = vector.broadcast %423 : vector<1x1024xf32> to vector<8x1024xf32>
    %425 = arith.mulf %422, %424 : vector<8x1024xf32>
    %c12_227 = arith.constant 12 : index
    %c0_228 = arith.constant 0 : index
    %c0_229 = arith.constant 0 : index
    %426 = vector.load %arg3[%c12_227, %c0_228, %c0_229] : memref<27x8x8xf32, #tpu.memory_space<vmem>>, vector<1x8x8xf32>
    %427 = vector.shape_cast %426 : vector<1x8x8xf32> to vector<8x8xf32>
    %cst_230 = arith.constant dense<0.000000e+00> : vector<8x1024xf32>
    %428 = tpu.matmul %427, %425, %cst_230 {dimension_numbers = #tpu.dot_dimension_numbers<[1], [0], [0], [1], [0, 0, 1, 1], [], []>} : vector<8x8xf32>, vector<8x1024xf32>, vector<8x1024xf32> -> vector<8x1024xf32>
    %429 = arith.addf %419, %428 : vector<8x1024xf32>
    %c13_231 = arith.constant 13 : index
    %c0_232 = arith.constant 0 : index
    %430 = vector.load %arg4[%c13_231, %c0_232] : memref<27x1024xf32, #tpu.memory_space<vmem>>, vector<1x1024xf32>
    %431 = vector.broadcast %430 : vector<1x1024xf32> to vector<8x1024xf32>
    %432 = arith.mulf %298, %431 : vector<8x1024xf32>
    %c13_233 = arith.constant 13 : index
    %c0_234 = arith.constant 0 : index
    %c0_235 = arith.constant 0 : index
    %433 = vector.load %arg3[%c13_233, %c0_234, %c0_235] : memref<27x8x8xf32, #tpu.memory_space<vmem>>, vector<1x8x8xf32>
    %434 = vector.shape_cast %433 : vector<1x8x8xf32> to vector<8x8xf32>
    %cst_236 = arith.constant dense<0.000000e+00> : vector<8x1024xf32>
    %435 = tpu.matmul %434, %432, %cst_236 {dimension_numbers = #tpu.dot_dimension_numbers<[1], [0], [0], [1], [0, 0, 1, 1], [], []>} : vector<8x8xf32>, vector<8x1024xf32>, vector<8x1024xf32> -> vector<8x1024xf32>
    %436 = arith.addf %429, %435 : vector<8x1024xf32>
    %437 = vector.extract_strided_slice %298 {offsets = [0, 1], sizes = [8, 1023], strides = [1, 1]} : vector<8x1024xf32> to vector<8x1023xf32>
    %438 = vector.extract_strided_slice %298 {offsets = [0, 0], sizes = [8, 1], strides = [1, 1]} : vector<8x1024xf32> to vector<8x1xf32>
    %439 = tpu.concatenate %437, %438 in 1 : vector<8x1023xf32>, vector<8x1xf32> -> vector<8x1024xf32>
    %c14_237 = arith.constant 14 : index
    %c0_238 = arith.constant 0 : index
    %440 = vector.load %arg4[%c14_237, %c0_238] : memref<27x1024xf32, #tpu.memory_space<vmem>>, vector<1x1024xf32>
    %441 = vector.broadcast %440 : vector<1x1024xf32> to vector<8x1024xf32>
    %442 = arith.mulf %439, %441 : vector<8x1024xf32>
    %c14_239 = arith.constant 14 : index
    %c0_240 = arith.constant 0 : index
    %c0_241 = arith.constant 0 : index
    %443 = vector.load %arg3[%c14_239, %c0_240, %c0_241] : memref<27x8x8xf32, #tpu.memory_space<vmem>>, vector<1x8x8xf32>
    %444 = vector.shape_cast %443 : vector<1x8x8xf32> to vector<8x8xf32>
    %cst_242 = arith.constant dense<0.000000e+00> : vector<8x1024xf32>
    %445 = tpu.matmul %444, %442, %cst_242 {dimension_numbers = #tpu.dot_dimension_numbers<[1], [0], [0], [1], [0, 0, 1, 1], [], []>} : vector<8x8xf32>, vector<8x1024xf32>, vector<8x1024xf32> -> vector<8x1024xf32>
    %446 = arith.addf %436, %445 : vector<8x1024xf32>
    %447 = vector.extract_strided_slice %298 {offsets = [0, 7], sizes = [8, 1017], strides = [1, 1]} : vector<8x1024xf32> to vector<8x1017xf32>
    %448 = vector.extract_strided_slice %298 {offsets = [0, 0], sizes = [8, 7], strides = [1, 1]} : vector<8x1024xf32> to vector<8x7xf32>
    %449 = tpu.concatenate %447, %448 in 1 : vector<8x1017xf32>, vector<8x7xf32> -> vector<8x1024xf32>
    %c15_243 = arith.constant 15 : index
    %c0_244 = arith.constant 0 : index
    %450 = vector.load %arg4[%c15_243, %c0_244] : memref<27x1024xf32, #tpu.memory_space<vmem>>, vector<1x1024xf32>
    %451 = vector.broadcast %450 : vector<1x1024xf32> to vector<8x1024xf32>
    %452 = arith.mulf %449, %451 : vector<8x1024xf32>
    %c15_245 = arith.constant 15 : index
    %c0_246 = arith.constant 0 : index
    %c0_247 = arith.constant 0 : index
    %453 = vector.load %arg3[%c15_245, %c0_246, %c0_247] : memref<27x8x8xf32, #tpu.memory_space<vmem>>, vector<1x8x8xf32>
    %454 = vector.shape_cast %453 : vector<1x8x8xf32> to vector<8x8xf32>
    %cst_248 = arith.constant dense<0.000000e+00> : vector<8x1024xf32>
    %455 = tpu.matmul %454, %452, %cst_248 {dimension_numbers = #tpu.dot_dimension_numbers<[1], [0], [0], [1], [0, 0, 1, 1], [], []>} : vector<8x8xf32>, vector<8x1024xf32>, vector<8x1024xf32> -> vector<8x1024xf32>
    %456 = arith.addf %446, %455 : vector<8x1024xf32>
    %457 = vector.extract_strided_slice %298 {offsets = [0, 8], sizes = [8, 1016], strides = [1, 1]} : vector<8x1024xf32> to vector<8x1016xf32>
    %458 = vector.extract_strided_slice %298 {offsets = [0, 0], sizes = [8, 8], strides = [1, 1]} : vector<8x1024xf32> to vector<8x8xf32>
    %459 = tpu.concatenate %457, %458 in 1 : vector<8x1016xf32>, vector<8x8xf32> -> vector<8x1024xf32>
    %c16_249 = arith.constant 16 : index
    %c0_250 = arith.constant 0 : index
    %460 = vector.load %arg4[%c16_249, %c0_250] : memref<27x1024xf32, #tpu.memory_space<vmem>>, vector<1x1024xf32>
    %461 = vector.broadcast %460 : vector<1x1024xf32> to vector<8x1024xf32>
    %462 = arith.mulf %459, %461 : vector<8x1024xf32>
    %c16_251 = arith.constant 16 : index
    %c0_252 = arith.constant 0 : index
    %c0_253 = arith.constant 0 : index
    %463 = vector.load %arg3[%c16_251, %c0_252, %c0_253] : memref<27x8x8xf32, #tpu.memory_space<vmem>>, vector<1x8x8xf32>
    %464 = vector.shape_cast %463 : vector<1x8x8xf32> to vector<8x8xf32>
    %cst_254 = arith.constant dense<0.000000e+00> : vector<8x1024xf32>
    %465 = tpu.matmul %464, %462, %cst_254 {dimension_numbers = #tpu.dot_dimension_numbers<[1], [0], [0], [1], [0, 0, 1, 1], [], []>} : vector<8x8xf32>, vector<8x1024xf32>, vector<8x1024xf32> -> vector<8x1024xf32>
    %466 = arith.addf %456, %465 : vector<8x1024xf32>
    %467 = vector.extract_strided_slice %298 {offsets = [0, 9], sizes = [8, 1015], strides = [1, 1]} : vector<8x1024xf32> to vector<8x1015xf32>
    %468 = vector.extract_strided_slice %298 {offsets = [0, 0], sizes = [8, 9], strides = [1, 1]} : vector<8x1024xf32> to vector<8x9xf32>
    %469 = tpu.concatenate %467, %468 in 1 : vector<8x1015xf32>, vector<8x9xf32> -> vector<8x1024xf32>
    %c17_255 = arith.constant 17 : index
    %c0_256 = arith.constant 0 : index
    %470 = vector.load %arg4[%c17_255, %c0_256] : memref<27x1024xf32, #tpu.memory_space<vmem>>, vector<1x1024xf32>
    %471 = vector.broadcast %470 : vector<1x1024xf32> to vector<8x1024xf32>
    %472 = arith.mulf %469, %471 : vector<8x1024xf32>
    %c17_257 = arith.constant 17 : index
    %c0_258 = arith.constant 0 : index
    %c0_259 = arith.constant 0 : index
    %473 = vector.load %arg3[%c17_257, %c0_258, %c0_259] : memref<27x8x8xf32, #tpu.memory_space<vmem>>, vector<1x8x8xf32>
    %474 = vector.shape_cast %473 : vector<1x8x8xf32> to vector<8x8xf32>
    %cst_260 = arith.constant dense<0.000000e+00> : vector<8x1024xf32>
    %475 = tpu.matmul %474, %472, %cst_260 {dimension_numbers = #tpu.dot_dimension_numbers<[1], [0], [0], [1], [0, 0, 1, 1], [], []>} : vector<8x8xf32>, vector<8x1024xf32>, vector<8x1024xf32> -> vector<8x1024xf32>
    %476 = arith.addf %466, %475 : vector<8x1024xf32>
    %477 = vector.extract_strided_slice %298 {offsets = [0, 55], sizes = [8, 969], strides = [1, 1]} : vector<8x1024xf32> to vector<8x969xf32>
    %478 = vector.extract_strided_slice %298 {offsets = [0, 0], sizes = [8, 55], strides = [1, 1]} : vector<8x1024xf32> to vector<8x55xf32>
    %479 = tpu.concatenate %477, %478 in 1 : vector<8x969xf32>, vector<8x55xf32> -> vector<8x1024xf32>
    %c18_261 = arith.constant 18 : index
    %c0_262 = arith.constant 0 : index
    %480 = vector.load %arg4[%c18_261, %c0_262] : memref<27x1024xf32, #tpu.memory_space<vmem>>, vector<1x1024xf32>
    %481 = vector.broadcast %480 : vector<1x1024xf32> to vector<8x1024xf32>
    %482 = arith.mulf %479, %481 : vector<8x1024xf32>
    %c18_263 = arith.constant 18 : index
    %c0_264 = arith.constant 0 : index
    %c0_265 = arith.constant 0 : index
    %483 = vector.load %arg3[%c18_263, %c0_264, %c0_265] : memref<27x8x8xf32, #tpu.memory_space<vmem>>, vector<1x8x8xf32>
    %484 = vector.shape_cast %483 : vector<1x8x8xf32> to vector<8x8xf32>
    %cst_266 = arith.constant dense<0.000000e+00> : vector<8x1024xf32>
    %485 = tpu.matmul %484, %482, %cst_266 {dimension_numbers = #tpu.dot_dimension_numbers<[1], [0], [0], [1], [0, 0, 1, 1], [], []>} : vector<8x8xf32>, vector<8x1024xf32>, vector<8x1024xf32> -> vector<8x1024xf32>
    %486 = arith.addf %476, %485 : vector<8x1024xf32>
    %487 = vector.extract_strided_slice %298 {offsets = [0, 56], sizes = [8, 968], strides = [1, 1]} : vector<8x1024xf32> to vector<8x968xf32>
    %488 = vector.extract_strided_slice %298 {offsets = [0, 0], sizes = [8, 56], strides = [1, 1]} : vector<8x1024xf32> to vector<8x56xf32>
    %489 = tpu.concatenate %487, %488 in 1 : vector<8x968xf32>, vector<8x56xf32> -> vector<8x1024xf32>
    %c19_267 = arith.constant 19 : index
    %c0_268 = arith.constant 0 : index
    %490 = vector.load %arg4[%c19_267, %c0_268] : memref<27x1024xf32, #tpu.memory_space<vmem>>, vector<1x1024xf32>
    %491 = vector.broadcast %490 : vector<1x1024xf32> to vector<8x1024xf32>
    %492 = arith.mulf %489, %491 : vector<8x1024xf32>
    %c19_269 = arith.constant 19 : index
    %c0_270 = arith.constant 0 : index
    %c0_271 = arith.constant 0 : index
    %493 = vector.load %arg3[%c19_269, %c0_270, %c0_271] : memref<27x8x8xf32, #tpu.memory_space<vmem>>, vector<1x8x8xf32>
    %494 = vector.shape_cast %493 : vector<1x8x8xf32> to vector<8x8xf32>
    %cst_272 = arith.constant dense<0.000000e+00> : vector<8x1024xf32>
    %495 = tpu.matmul %494, %492, %cst_272 {dimension_numbers = #tpu.dot_dimension_numbers<[1], [0], [0], [1], [0, 0, 1, 1], [], []>} : vector<8x8xf32>, vector<8x1024xf32>, vector<8x1024xf32> -> vector<8x1024xf32>
    %496 = arith.addf %486, %495 : vector<8x1024xf32>
    %497 = vector.extract_strided_slice %298 {offsets = [0, 57], sizes = [8, 967], strides = [1, 1]} : vector<8x1024xf32> to vector<8x967xf32>
    %498 = vector.extract_strided_slice %298 {offsets = [0, 0], sizes = [8, 57], strides = [1, 1]} : vector<8x1024xf32> to vector<8x57xf32>
    %499 = tpu.concatenate %497, %498 in 1 : vector<8x967xf32>, vector<8x57xf32> -> vector<8x1024xf32>
    %c20_273 = arith.constant 20 : index
    %c0_274 = arith.constant 0 : index
    %500 = vector.load %arg4[%c20_273, %c0_274] : memref<27x1024xf32, #tpu.memory_space<vmem>>, vector<1x1024xf32>
    %501 = vector.broadcast %500 : vector<1x1024xf32> to vector<8x1024xf32>
    %502 = arith.mulf %499, %501 : vector<8x1024xf32>
    %c20_275 = arith.constant 20 : index
    %c0_276 = arith.constant 0 : index
    %c0_277 = arith.constant 0 : index
    %503 = vector.load %arg3[%c20_275, %c0_276, %c0_277] : memref<27x8x8xf32, #tpu.memory_space<vmem>>, vector<1x8x8xf32>
    %504 = vector.shape_cast %503 : vector<1x8x8xf32> to vector<8x8xf32>
    %cst_278 = arith.constant dense<0.000000e+00> : vector<8x1024xf32>
    %505 = tpu.matmul %504, %502, %cst_278 {dimension_numbers = #tpu.dot_dimension_numbers<[1], [0], [0], [1], [0, 0, 1, 1], [], []>} : vector<8x8xf32>, vector<8x1024xf32>, vector<8x1024xf32> -> vector<8x1024xf32>
    %506 = arith.addf %496, %505 : vector<8x1024xf32>
    %507 = vector.extract_strided_slice %298 {offsets = [0, 63], sizes = [8, 961], strides = [1, 1]} : vector<8x1024xf32> to vector<8x961xf32>
    %508 = vector.extract_strided_slice %298 {offsets = [0, 0], sizes = [8, 63], strides = [1, 1]} : vector<8x1024xf32> to vector<8x63xf32>
    %509 = tpu.concatenate %507, %508 in 1 : vector<8x961xf32>, vector<8x63xf32> -> vector<8x1024xf32>
    %c21_279 = arith.constant 21 : index
    %c0_280 = arith.constant 0 : index
    %510 = vector.load %arg4[%c21_279, %c0_280] : memref<27x1024xf32, #tpu.memory_space<vmem>>, vector<1x1024xf32>
    %511 = vector.broadcast %510 : vector<1x1024xf32> to vector<8x1024xf32>
    %512 = arith.mulf %509, %511 : vector<8x1024xf32>
    %c21_281 = arith.constant 21 : index
    %c0_282 = arith.constant 0 : index
    %c0_283 = arith.constant 0 : index
    %513 = vector.load %arg3[%c21_281, %c0_282, %c0_283] : memref<27x8x8xf32, #tpu.memory_space<vmem>>, vector<1x8x8xf32>
    %514 = vector.shape_cast %513 : vector<1x8x8xf32> to vector<8x8xf32>
    %cst_284 = arith.constant dense<0.000000e+00> : vector<8x1024xf32>
    %515 = tpu.matmul %514, %512, %cst_284 {dimension_numbers = #tpu.dot_dimension_numbers<[1], [0], [0], [1], [0, 0, 1, 1], [], []>} : vector<8x8xf32>, vector<8x1024xf32>, vector<8x1024xf32> -> vector<8x1024xf32>
    %516 = arith.addf %506, %515 : vector<8x1024xf32>
    %517 = vector.extract_strided_slice %298 {offsets = [0, 64], sizes = [8, 960], strides = [1, 1]} : vector<8x1024xf32> to vector<8x960xf32>
    %518 = vector.extract_strided_slice %298 {offsets = [0, 0], sizes = [8, 64], strides = [1, 1]} : vector<8x1024xf32> to vector<8x64xf32>
    %519 = tpu.concatenate %517, %518 in 1 : vector<8x960xf32>, vector<8x64xf32> -> vector<8x1024xf32>
    %c22_285 = arith.constant 22 : index
    %c0_286 = arith.constant 0 : index
    %520 = vector.load %arg4[%c22_285, %c0_286] : memref<27x1024xf32, #tpu.memory_space<vmem>>, vector<1x1024xf32>
    %521 = vector.broadcast %520 : vector<1x1024xf32> to vector<8x1024xf32>
    %522 = arith.mulf %519, %521 : vector<8x1024xf32>
    %c22_287 = arith.constant 22 : index
    %c0_288 = arith.constant 0 : index
    %c0_289 = arith.constant 0 : index
    %523 = vector.load %arg3[%c22_287, %c0_288, %c0_289] : memref<27x8x8xf32, #tpu.memory_space<vmem>>, vector<1x8x8xf32>
    %524 = vector.shape_cast %523 : vector<1x8x8xf32> to vector<8x8xf32>
    %cst_290 = arith.constant dense<0.000000e+00> : vector<8x1024xf32>
    %525 = tpu.matmul %524, %522, %cst_290 {dimension_numbers = #tpu.dot_dimension_numbers<[1], [0], [0], [1], [0, 0, 1, 1], [], []>} : vector<8x8xf32>, vector<8x1024xf32>, vector<8x1024xf32> -> vector<8x1024xf32>
    %526 = arith.addf %516, %525 : vector<8x1024xf32>
    %527 = vector.extract_strided_slice %298 {offsets = [0, 65], sizes = [8, 959], strides = [1, 1]} : vector<8x1024xf32> to vector<8x959xf32>
    %528 = vector.extract_strided_slice %298 {offsets = [0, 0], sizes = [8, 65], strides = [1, 1]} : vector<8x1024xf32> to vector<8x65xf32>
    %529 = tpu.concatenate %527, %528 in 1 : vector<8x959xf32>, vector<8x65xf32> -> vector<8x1024xf32>
    %c23_291 = arith.constant 23 : index
    %c0_292 = arith.constant 0 : index
    %530 = vector.load %arg4[%c23_291, %c0_292] : memref<27x1024xf32, #tpu.memory_space<vmem>>, vector<1x1024xf32>
    %531 = vector.broadcast %530 : vector<1x1024xf32> to vector<8x1024xf32>
    %532 = arith.mulf %529, %531 : vector<8x1024xf32>
    %c23_293 = arith.constant 23 : index
    %c0_294 = arith.constant 0 : index
    %c0_295 = arith.constant 0 : index
    %533 = vector.load %arg3[%c23_293, %c0_294, %c0_295] : memref<27x8x8xf32, #tpu.memory_space<vmem>>, vector<1x8x8xf32>
    %534 = vector.shape_cast %533 : vector<1x8x8xf32> to vector<8x8xf32>
    %cst_296 = arith.constant dense<0.000000e+00> : vector<8x1024xf32>
    %535 = tpu.matmul %534, %532, %cst_296 {dimension_numbers = #tpu.dot_dimension_numbers<[1], [0], [0], [1], [0, 0, 1, 1], [], []>} : vector<8x8xf32>, vector<8x1024xf32>, vector<8x1024xf32> -> vector<8x1024xf32>
    %536 = arith.addf %526, %535 : vector<8x1024xf32>
    %537 = vector.extract_strided_slice %298 {offsets = [0, 71], sizes = [8, 953], strides = [1, 1]} : vector<8x1024xf32> to vector<8x953xf32>
    %538 = vector.extract_strided_slice %298 {offsets = [0, 0], sizes = [8, 71], strides = [1, 1]} : vector<8x1024xf32> to vector<8x71xf32>
    %539 = tpu.concatenate %537, %538 in 1 : vector<8x953xf32>, vector<8x71xf32> -> vector<8x1024xf32>
    %c24_297 = arith.constant 24 : index
    %c0_298 = arith.constant 0 : index
    %540 = vector.load %arg4[%c24_297, %c0_298] : memref<27x1024xf32, #tpu.memory_space<vmem>>, vector<1x1024xf32>
    %541 = vector.broadcast %540 : vector<1x1024xf32> to vector<8x1024xf32>
    %542 = arith.mulf %539, %541 : vector<8x1024xf32>
    %c24_299 = arith.constant 24 : index
    %c0_300 = arith.constant 0 : index
    %c0_301 = arith.constant 0 : index
    %543 = vector.load %arg3[%c24_299, %c0_300, %c0_301] : memref<27x8x8xf32, #tpu.memory_space<vmem>>, vector<1x8x8xf32>
    %544 = vector.shape_cast %543 : vector<1x8x8xf32> to vector<8x8xf32>
    %cst_302 = arith.constant dense<0.000000e+00> : vector<8x1024xf32>
    %545 = tpu.matmul %544, %542, %cst_302 {dimension_numbers = #tpu.dot_dimension_numbers<[1], [0], [0], [1], [0, 0, 1, 1], [], []>} : vector<8x8xf32>, vector<8x1024xf32>, vector<8x1024xf32> -> vector<8x1024xf32>
    %546 = arith.addf %536, %545 : vector<8x1024xf32>
    %547 = vector.extract_strided_slice %298 {offsets = [0, 72], sizes = [8, 952], strides = [1, 1]} : vector<8x1024xf32> to vector<8x952xf32>
    %548 = vector.extract_strided_slice %298 {offsets = [0, 0], sizes = [8, 72], strides = [1, 1]} : vector<8x1024xf32> to vector<8x72xf32>
    %549 = tpu.concatenate %547, %548 in 1 : vector<8x952xf32>, vector<8x72xf32> -> vector<8x1024xf32>
    %c25_303 = arith.constant 25 : index
    %c0_304 = arith.constant 0 : index
    %550 = vector.load %arg4[%c25_303, %c0_304] : memref<27x1024xf32, #tpu.memory_space<vmem>>, vector<1x1024xf32>
    %551 = vector.broadcast %550 : vector<1x1024xf32> to vector<8x1024xf32>
    %552 = arith.mulf %549, %551 : vector<8x1024xf32>
    %c25_305 = arith.constant 25 : index
    %c0_306 = arith.constant 0 : index
    %c0_307 = arith.constant 0 : index
    %553 = vector.load %arg3[%c25_305, %c0_306, %c0_307] : memref<27x8x8xf32, #tpu.memory_space<vmem>>, vector<1x8x8xf32>
    %554 = vector.shape_cast %553 : vector<1x8x8xf32> to vector<8x8xf32>
    %cst_308 = arith.constant dense<0.000000e+00> : vector<8x1024xf32>
    %555 = tpu.matmul %554, %552, %cst_308 {dimension_numbers = #tpu.dot_dimension_numbers<[1], [0], [0], [1], [0, 0, 1, 1], [], []>} : vector<8x8xf32>, vector<8x1024xf32>, vector<8x1024xf32> -> vector<8x1024xf32>
    %556 = arith.addf %546, %555 : vector<8x1024xf32>
    %557 = vector.extract_strided_slice %298 {offsets = [0, 73], sizes = [8, 951], strides = [1, 1]} : vector<8x1024xf32> to vector<8x951xf32>
    %558 = vector.extract_strided_slice %298 {offsets = [0, 0], sizes = [8, 73], strides = [1, 1]} : vector<8x1024xf32> to vector<8x73xf32>
    %559 = tpu.concatenate %557, %558 in 1 : vector<8x951xf32>, vector<8x73xf32> -> vector<8x1024xf32>
    %c26_309 = arith.constant 26 : index
    %c0_310 = arith.constant 0 : index
    %560 = vector.load %arg4[%c26_309, %c0_310] : memref<27x1024xf32, #tpu.memory_space<vmem>>, vector<1x1024xf32>
    %561 = vector.broadcast %560 : vector<1x1024xf32> to vector<8x1024xf32>
    %562 = arith.mulf %559, %561 : vector<8x1024xf32>
    %c26_311 = arith.constant 26 : index
    %c0_312 = arith.constant 0 : index
    %c0_313 = arith.constant 0 : index
    %563 = vector.load %arg3[%c26_311, %c0_312, %c0_313] : memref<27x8x8xf32, #tpu.memory_space<vmem>>, vector<1x8x8xf32>
    %564 = vector.shape_cast %563 : vector<1x8x8xf32> to vector<8x8xf32>
    %cst_314 = arith.constant dense<0.000000e+00> : vector<8x1024xf32>
    %565 = tpu.matmul %564, %562, %cst_314 {dimension_numbers = #tpu.dot_dimension_numbers<[1], [0], [0], [1], [0, 0, 1, 1], [], []>} : vector<8x8xf32>, vector<8x1024xf32>, vector<8x1024xf32> -> vector<8x1024xf32>
    %566 = arith.addf %556, %565 : vector<8x1024xf32>
    %cst_315 = arith.constant dense<0.000000e+00> : vector<8xf32>
    %567 = vector.multi_reduction <add>, %566, %cst_315 [1] : vector<8x1024xf32> to vector<8xf32>
    %568 = vector.shape_cast %567 : vector<8xf32> to vector<8x1xf32>
    %cst_316 = arith.constant 1.024000e+03 : f32
    %569 = vector.broadcast %cst_316 : f32 to vector<8x1xf32>
    %570 = arith.divf %568, %569 : vector<8x1xf32>
    %571 = vector.broadcast %570 : vector<8x1xf32> to vector<8x1024xf32>
    %572 = arith.subf %566, %571 : vector<8x1024xf32>
    %573 = arith.mulf %572, %572 : vector<8x1024xf32>
    %cst_317 = arith.constant dense<0.000000e+00> : vector<8xf32>
    %574 = vector.multi_reduction <add>, %573, %cst_317 [1] : vector<8x1024xf32> to vector<8xf32>
    %575 = vector.shape_cast %574 : vector<8xf32> to vector<8x1xf32>
    %cst_318 = arith.constant 1.024000e+03 : f32
    %576 = vector.broadcast %cst_318 : f32 to vector<8x1xf32>
    %577 = arith.divf %575, %576 : vector<8x1xf32>
    %c0_319 = arith.constant 0 : index
    %c0_320 = arith.constant 0 : index
    %578 = vector.load %arg7[%c0_319, %c0_320] : memref<8x1xf32, #tpu.memory_space<vmem>>, vector<8x1xf32>
    %cst_321 = arith.constant 9.99999974E-6 : f32
    %579 = vector.broadcast %cst_321 : f32 to vector<8x1xf32>
    %580 = arith.addf %577, %579 : vector<8x1xf32>
    %581 = math.rsqrt %580 : vector<8x1xf32>
    %582 = arith.mulf %578, %581 : vector<8x1xf32>
    %583 = vector.broadcast %582 : vector<8x1xf32> to vector<8x1024xf32>
    %584 = arith.mulf %572, %583 : vector<8x1024xf32>
    %c0_322 = arith.constant 0 : index
    %c0_323 = arith.constant 0 : index
    %585 = vector.load %arg8[%c0_322, %c0_323] : memref<8x1xf32, #tpu.memory_space<vmem>>, vector<8x1xf32>
    %586 = vector.broadcast %585 : vector<8x1xf32> to vector<8x1024xf32>
    %587 = arith.addf %584, %586 : vector<8x1024xf32>
    %588 = arith.addf %4, %587 : vector<8x1024xf32>
    %589 = vector.extract_strided_slice %588 {offsets = [0, 0], sizes = [8, 512], strides = [1, 1]} : vector<8x1024xf32> to vector<8x512xf32>
    %c0_324 = arith.constant 0 : index
    %c0_325 = arith.constant 0 : index
    %c0_326 = arith.constant 0 : index
    %590 = vector.load %arg9[%c0_324, %c0_325, %c0_326] : memref<2x8x512xf32, #tpu.memory_space<vmem>>, vector<1x8x512xf32>
    %591 = vector.shape_cast %590 : vector<1x8x512xf32> to vector<8x512xf32>
    %592 = vector.shape_cast %589 : vector<8x512xf32> to vector<1x8x512xf32>
    tpu.vector_store %arg9[%c0_324, %c0_325, %c0_326], %592 {strides = array<i32>} : memref<2x8x512xf32, #tpu.memory_space<vmem>>, vector<1x8x512xf32>,
    %593 = vector.extract_strided_slice %588 {offsets = [0, 512], sizes = [8, 512], strides = [1, 1]} : vector<8x1024xf32> to vector<8x512xf32>
    %c1_327 = arith.constant 1 : index
    %c0_328 = arith.constant 0 : index
    %c0_329 = arith.constant 0 : index
    %594 = vector.load %arg9[%c1_327, %c0_328, %c0_329] : memref<2x8x512xf32, #tpu.memory_space<vmem>>, vector<1x8x512xf32>
    %595 = vector.shape_cast %594 : vector<1x8x512xf32> to vector<8x512xf32>
    %596 = vector.shape_cast %593 : vector<8x512xf32> to vector<1x8x512xf32>
    tpu.vector_store %arg9[%c1_327, %c0_328, %c0_329], %596 {strides = array<i32>} : memref<2x8x512xf32, #tpu.memory_space<vmem>>, vector<1x8x512xf32>,
    return
  }
  func.func @transform_0(%arg0: i32) -> (i32, i32, i32) {
    %c0_i32 = arith.constant 0 : i32
    %c0_i32_0 = arith.constant 0 : i32
    %c0_i32_1 = arith.constant 0 : i32
    %c0_i32_2 = arith.constant 0 : i32
    return %c0_i32, %c0_i32_0, %c0_i32_1 : i32, i32, i32
  }
  func.func @transform_1(%arg0: i32) -> (i32, i32, i32) {
    %c0_i32 = arith.constant 0 : i32
    %c0_i32_0 = arith.constant 0 : i32
    %c0_i32_1 = arith.constant 0 : i32
    %c0_i32_2 = arith.constant 0 : i32
    return %c0_i32, %c0_i32_0, %c0_i32_1 : i32, i32, i32
  }
  func.func @transform_2(%arg0: i32) -> (i32, i32, i32) {
    %c0_i32 = arith.constant 0 : i32
    %c0_i32_0 = arith.constant 0 : i32
    %c0_i32_1 = arith.constant 0 : i32
    %c0_i32_2 = arith.constant 0 : i32
    return %c0_i32, %c0_i32_0, %c0_i32_1 : i32, i32, i32
  }
  func.func @transform_3(%arg0: i32) -> (i32, i32) {
    %c0_i32 = arith.constant 0 : i32
    %c0_i32_0 = arith.constant 0 : i32
    %c0_i32_1 = arith.constant 0 : i32
    return %c0_i32, %c0_i32_0 : i32, i32
  }
  func.func @transform_4(%arg0: i32) -> (i32, i32) {
    %c0_i32 = arith.constant 0 : i32
    %c0_i32_0 = arith.constant 0 : i32
    %c0_i32_1 = arith.constant 0 : i32
    return %c0_i32, %c0_i32_0 : i32, i32
  }
  func.func @transform_5(%arg0: i32) -> (i32, i32) {
    %c0_i32 = arith.constant 0 : i32
    %c0_i32_0 = arith.constant 0 : i32
    %c0_i32_1 = arith.constant 0 : i32
    return %c0_i32, %c0_i32_0 : i32, i32
  }
  func.func @transform_6(%arg0: i32) -> (i32, i32) {
    %c0_i32 = arith.constant 0 : i32
    %c0_i32_0 = arith.constant 0 : i32
    %c0_i32_1 = arith.constant 0 : i32
    return %c0_i32, %c0_i32_0 : i32, i32
  }
  func.func @transform_7(%arg0: i32) -> (i32, i32) {
    %c0_i32 = arith.constant 0 : i32
    %c0_i32_0 = arith.constant 0 : i32
    %c0_i32_1 = arith.constant 0 : i32
    return %c0_i32, %c0_i32_0 : i32, i32
  }
  func.func @transform_8(%arg0: i32) -> (i32, i32, i32) {
    %c0_i32 = arith.constant 0 : i32
    %c0_i32_0 = arith.constant 0 : i32
    %c0_i32_1 = arith.constant 0 : i32
    %c0_i32_2 = arith.constant 0 : i32
    return %c0_i32, %c0_i32_0, %c0_i32_1 : i32, i32, i32
  }
}

</mosaic_0001>

<bundles_post_ra>
// kernel: conv3d_resblock_forward.1
= control target key start
LH: loop header
LB: loop body
LE: loop exit
PB: predicated region body
PF: predicated region fallthrough
CT: control target
= control target key end

     0   :  { %s12289_s9 = smov 72   ;;  %s12290_s22 = smov 73   ;;  %vm126_vm0 = vcmask 588800   ;;  %vm174_vm1 = vcmask 64512   ;;  %vm63_vm2 = vcmask 596992   ;;  %vm518_vm3 = vcmask 580608   ;;  %s17312_s0 = inlined_call_operand.vmem [shape: f32[2,8,512], index: 0, kind: input, shape index: {}]   ;;  %s17313_s3 = inlined_call_operand.vmem [shape: f32[27,1024], index: 3, kind: input, shape index: {}]   ;;  %s17314_s1 = inlined_call_operand.vmem [shape: f32[27,8,8], index: 1, kind: input, shape index: {}]   ;;  %s17315_s5 = inlined_call_operand.vmem [shape: f32[8,1], index: 5, kind: input, shape index: {}]   ;;  %s17316_s4 = inlined_call_operand.vmem [shape: f32[8,1], index: 4, kind: input, shape index: {}]   ;;  %s17317_s2 = inlined_call_operand.vmem [shape: f32[27,8,8], index: 2, kind: input, shape index: {}]   ;;  %s17318_s6 = inlined_call_operand.vmem [shape: f32[8,1], index: 6, kind: input, shape index: {}]   ;;  %s17319_s7 = inlined_call_operand.vmem [shape: f32[8,1], index: 7, kind: input, shape index: {}]   ;;  %s17320_s8 = inlined_call_operand.vmem [shape: f32[2,8,512], index: 8, kind: output, shape index: {}]  }
   0x1   :  { %v12356_v0 = vld [vmem:[%s17312_s0 + $0x38] sm:$0xff]  ;;  %v12361_v1 = vld [vmem:[%s17312_s0 + $0x8] sm:$0xff]  ;;  %v12377_v3 = vld [vmem:[%s17312_s0 + $0x10] sm:$0xff]  ;;  %s12291_s23 = smov 71   ;;  %s12292_s24 = smov 65   ;;  %vm754_vm4 = vcmask 531456  }
   0x2   :  { %109 = vrot.lane.b32.xlu1 %v12356_v0, %s12289_s9  ;;  %114 = vrot.lane.b32.xlu0 %v12361_v1, %s12289_s9  ;;  %v12370_v2 = vld [vmem:[%s17312_s0 + $0x18] sm:$0xff]  ;;  %v12382_v4 = vld [vmem:[%s17312_s0] sm:$0xff]  ;;  %s12293_s25 = smov 64   ;;  %s12294_s26 = smov 63   ;;  %vm990_vm5 = vcmask 523264   ;;  %vm1226_vm6 = vcmask 515072  }
   0x3   :  { %118 = vrot.lane.b32.xlu2 %v12370_v2, %s12289_s9  ;;  %v12387_v5 = vld [vmem:[%s17312_s0 + $0x28] sm:$0xff]  ;;  %v12398_v6 = vld [vmem:[%s17312_s0 + $0x30] sm:$0xff]  ;;  %v12403_v7 = vld [vmem:[%s17312_s0 + $0x20] sm:$0xff]  ;;  %s12295_s16 = smov 57   ;;  %s12296_s28 = smov 56   ;;  %vm1462_vm7 = vcmask 465920  }
   0x4   :  { %v11707_v11 = vld [vmem:[%s17313_s3 + $0x1] ss:$8 sm:$0xf]  ;;  %v80_v23 = vld [vmem:[%s17313_s3] ss:$8 sm:$0xf] }
   0x5   :  { %v11708_v12 = vld [vmem:[%s17313_s3 + $0x1] ss:$8 sm:$0xf0]  ;;  %v81_v24 = vld [vmem:[%s17313_s3] ss:$8 sm:$0xf0] }
   0x6   :  { %v12495_v15 = vor.u32 %v11708_v12, %v11707_v11  ;;  %v12542_v34 = vor.u32 %v81_v24, %v80_v23  ;;  %v11709_v35 = vld [vmem:[%s17314_s1 + $0x8] sm:$0xff]  ;;  %s12297_s10 = smov 55   ;;  %s12298_s27 = smov 9   ;;  %vm1698_vm8 = vcmask 457728   ;;  %vm1934_vm9 = vcmask 449536  }
   0x7   :  { %v11726_v60 = vld [vmem:[%s17313_s3 + $0x2] ss:$8 sm:$0xf]  ;;  %s12299_s15 = smov 8   ;;  %s12300_s30 = smov 7   ;;  %vm17574_vm10 = vcmask 72704  }
   0x8   :  { %17624 = vst [vmem:[#allocation2_spill] sm:$0xff] %v12495_v15  ;;  %v17346_v17 = vperm.slane %v12495_v15, 2  ;;  %v17345_v18 = vperm.slane %v12495_v15, 3  ;;  %v17355_v19 = vperm.slane %v12495_v15, 0  ;;  %v17354_v20 = vperm.slane %v12495_v15, 1  ;;  %s12301_s19 = smov 1  }
   0x9   :  { %17625 = vst [vmem:[#allocation3_spill] sm:$0xff] %v12542_v34  ;;  %v17337_v36 = vperm.slane %v12495_v15, 6  ;;  %v17336_v37 = vperm.slane %v12495_v15, 7  ;;  %v17344_v38 = vperm.slane %v12495_v15, 4  ;;  %v17342_v39 = vperm.slane %v12495_v15, 5  ;;  %s12302_s11 = smov 127  }
   0xa   :  { %116 = vrot.lane.b32.xlu0 %v12377_v3, %s12289_s9  ;;  %112 = vrot.lane.b32.xlu1 %v12382_v4, %s12289_s9  ;;  %v17341_v40 = vperm.slane %v12542_v34, 1  ;;  %v17335_v54 = vperm.slane %v12542_v34, 2  ;;  %v17343_v55 = vperm.slane %v12542_v34, 0  ;;  %v11727_v61 = vld [vmem:[%s17313_s3 + $0x2] ss:$8 sm:$0xf0] }
   0xb   :  { %122 = vrot.lane.b32.xlu2 %v12387_v5, %s12289_s9  ;;  %v17332_v11 = vperm.slane %v12542_v34, 3  ;;  %v17334_v12 = vperm.slane %v12542_v34, 6  ;;  %s12303_s18 = smov 121   ;;  %s12304_s12 = smov 120   ;;  %vm17573_vm11 = vcmask 56320   ;;  %vm17572_vm12 = vcmask 7168  }
   0xc   :  { %s17474_s13 = smov 119   ;;  %vm17571_vm13 = vcmask 1039360   ;;  %vm17476_vm14 = vcmask 990208   ;;  %vm17570_vm15 = vcmask 982016  }
  0x12   :  { %124 = vrot.lane.b32.xlu0 %v12398_v6, %s12289_s9  ;;  %120 = vrot.lane.b32.xlu1 %v12403_v7, %s12289_s9 }
  0x13   :  { %51 = vrot.lane.b32.xlu2 %v12361_v1, %s12290_s22 }
  0x1a   :  { %53 = vrot.lane.b32.xlu0 %v12377_v3, %s12290_s22  ;;  %39 = vrot.lane.b32.xlu1 %v12356_v0, %s12290_s22 }
  0x1b   :  { %49 = vrot.lane.b32.xlu2 %v12382_v4, %s12290_s22 }
  0x22   :  { %55 = vrot.lane.b32.xlu0 %v12370_v2, %s12290_s22  ;;  %59 = vrot.lane.b32.xlu1 %v12387_v5, %s12290_s22 }
  0x23   :  { %61 = vrot.lane.b32.xlu2 %v12398_v6, %s12290_s22 }
  0x2a   :  { %57 = vrot.lane.b32.xlu0 %v12403_v7, %s12290_s22  ;;  %506 = vrot.lane.b32.xlu1 %v12361_v1, %s12291_s23 }
  0x2b   :  { %508 = vrot.lane.b32.xlu2 %v12377_v3, %s12291_s23 }
  0x32   :  { %501 = vrot.lane.b32.xlu0 %v12356_v0, %s12291_s23  ;;  %504 = vrot.lane.b32.xlu1 %v12382_v4, %s12291_s23 }
  0x33   :  { %510 = vrot.lane.b32.xlu2 %v12370_v2, %s12291_s23 }
  0x3a   :  { %514 = vrot.lane.b32.xlu0 %v12387_v5, %s12291_s23  ;;  %516 = vrot.lane.b32.xlu1 %v12398_v6, %s12291_s23 }
  0x3b   :  { %512 = vrot.lane.b32.xlu2 %v12403_v7, %s12291_s23 }
  0x42   :  { %742 = vrot.lane.b32.xlu0 %v12361_v1, %s12292_s24  ;;  %744 = vrot.lane.b32.xlu1 %v12377_v3, %s12292_s24 }
  0x43   :  { %737 = vrot.lane.b32.xlu2 %v12356_v0, %s12292_s24 }
  0x4a   :  { %740 = vrot.lane.b32.xlu0 %v12382_v4, %s12292_s24  ;;  %746 = vrot.lane.b32.xlu1 %v12370_v2, %s12292_s24 }
  0x4b   :  { %750 = vrot.lane.b32.xlu2 %v12387_v5, %s12292_s24 }
  0x52   :  { %752 = vrot.lane.b32.xlu0 %v12398_v6, %s12292_s24  ;;  %748 = vrot.lane.b32.xlu1 %v12403_v7, %s12292_s24 }
  0x53   :  { %978 = vrot.lane.b32.xlu2 %v12361_v1, %s12293_s25 }
  0x5a   :  { %980 = vrot.lane.b32.xlu0 %v12377_v3, %s12293_s25  ;;  %973 = vrot.lane.b32.xlu1 %v12356_v0, %s12293_s25 }
  0x5b   :  { %976 = vrot.lane.b32.xlu2 %v12382_v4, %s12293_s25 }
  0x5d   :  { %v12465_v8 = vpop.permute.xlu2 %118 }
  0x62   :  { %982 = vrot.lane.b32.xlu0 %v12370_v2, %s12293_s25  ;;  %986 = vrot.lane.b32.xlu1 %v12387_v5, %s12293_s25 }
  0x63   :  { %988 = vrot.lane.b32.xlu2 %v12398_v6, %s12293_s25 }
  0x65   :  { %v12473_v9 = vpop.permute.xlu2 %122 }
  0x6a   :  { %984 = vrot.lane.b32.xlu0 %v12403_v7, %s12293_s25  ;;  %1214 = vrot.lane.b32.xlu1 %v12361_v1, %s12294_s26 }
  0x6b   :  { %1216 = vrot.lane.b32.xlu2 %v12377_v3, %s12294_s26 }
  0x6d   :  { %v12481_v10 = vpop.permute.xlu2 %51 }
  0x72   :  { %1209 = vrot.lane.b32.xlu0 %v12356_v0, %s12294_s26  ;;  %1212 = vrot.lane.b32.xlu1 %v12382_v4, %s12294_s26 }
  0x73   :  { %1218 = vrot.lane.b32.xlu2 %v12370_v2, %s12294_s26 }
  0x74   :  { %v110_v13 = vpop.permute.xlu1 %109  ;;  %v115_v14 = vpop.permute.xlu0 %114 }
  0x75   :  { %v12497_v16 = vpop.permute.xlu2 %49 }
  0x76   :  { %v12561_v43 = vsel %vm63_vm2, %v12497_v16, %v12481_v10 }
  0x77   :  { %v101_v53 = vmul.f32 %v17341_v40, %v12561_v43 }
  0x7a   :  { %1222 = vrot.lane.b32.xlu0 %v12387_v5, %s12294_s26  ;;  %1224 = vrot.lane.b32.xlu1 %v12398_v6, %s12294_s26 }
  0x7b   :  { %1220 = vrot.lane.b32.xlu2 %v12403_v7, %s12294_s26 }
  0x7c   :  { %v117_v21 = vpop.permute.xlu0 %116  ;;  %v113_v22 = vpop.permute.xlu1 %112 }
  0x7d   :  { %v12516_v25 = vsel %vm126_vm0, %v115_v14, %v117_v21  ;;  %v12520_v26 = vsel %vm126_vm0, %v117_v21, %v12465_v8  ;;  %v12523_v27 = vsel %vm126_vm0, %v110_v13, %v113_v22  ;;  %v12526_v28 = vsel %vm126_vm0, %v113_v22, %v115_v14  ;;  %v12534_v31 = vpop.permute.xlu2 %61 }
  0x7e   :  { %v166_v29 = vmul.f32 %v17346_v17, %v12516_v25  ;;  %v167_v30 = vmul.f32 %v17345_v18, %v12520_v26  ;;  %v164_v32 = vmul.f32 %v17355_v19, %v12523_v27  ;;  %v165_v33 = vmul.f32 %v17354_v20, %v12526_v28 }
  0x80   :  { %233 = vmatpush.msra.mxu2 %v166_v29  ;;  %253 = vmatpush.msra.mxu3 %v167_v30 }
  0x81   :  { %193 = vmatpush.msra.mxu0 %v164_v32  ;;  %213 = vmatpush.msra.mxu1 %v165_v33 }
  0x82   :  { %1450 = vrot.lane.b32.xlu0 %v12361_v1, %s12295_s16  ;;  %1452 = vrot.lane.b32.xlu1 %v12377_v3, %s12295_s16 }
  0x83   :  { %11711 = vmatmul.msk.f32.vlgmr.msra.gmra.mxu1 %vm174_vm1, %v11709_v35  ;;  %11712 = vmatmul.msk.f32.vlgmr.msra.gmra.mxu2 %vm174_vm1, %v11709_v35 }
  0x84   :  { %v125_v41 = vpop.permute.xlu0 %124  ;;  %v121_v42 = vpop.permute.xlu1 %120  ;;  %11710 = vmatmul.msk.f32.vlgmr.msra.gmra.mxu0 %vm174_vm1, %v11709_v35  ;;  %11713 = vmatmul.msk.f32.vlgmr.msra.gmra.mxu3 %vm174_vm1, %v11709_v35 }
  0x85   :  { %v12567_v44 = vsel %vm126_vm0, %v12473_v9, %v125_v41  ;;  %v12570_v45 = vsel %vm126_vm0, %v125_v41, %v110_v13  ;;  %v12574_v46 = vsel %vm126_vm0, %v12465_v8, %v121_v42  ;;  %v12578_v47 = vsel %vm126_vm0, %v121_v42, %v12473_v9  ;;  %1445 = vrot.lane.b32.xlu2 %v12356_v0, %s12295_s16  ;;  %v12588_v50 = vpop.permute.xlu2 %508 }
  0x86   :  { %v170_v48 = vmul.f32 %v17337_v36, %v12567_v44  ;;  %v171_v49 = vmul.f32 %v17336_v37, %v12570_v45  ;;  %v168_v51 = vmul.f32 %v17344_v38, %v12574_v46  ;;  %v169_v52 = vmul.f32 %v17342_v39, %v12578_v47 }
  0x87   :  { %v12631_v9 = vor.u32 %v11727_v61, %v11726_v60  ;;  %v17327_v13 = vperm.slane %v12542_v34, 7  ;;  %v17325_v41 = vperm.slane %v12542_v34, 4  ;;  %v17324_v42 = vperm.slane %v12542_v34, 5 }
  0x88   :  { %313 = vmatpush.msrb.mxu2 %v170_v48  ;;  %333 = vmatpush.msrb.mxu3 %v171_v49 }
  0x89   :  { %273 = vmatpush.msrb.mxu0 %v168_v51  ;;  %293 = vmatpush.msrb.mxu1 %v169_v52  ;;  %17626 = vst [vmem:[#allocation4_spill] sm:$0xff] %v12631_v9  ;;  %v17326_v22 = vperm.slane %v12631_v9, 3  ;;  %v17333_v48 = vperm.slane %v12631_v9, 2 }
  0x8a   :  { %1448 = vrot.lane.b32.xlu0 %v12382_v4, %s12295_s16  ;;  %1454 = vrot.lane.b32.xlu1 %v12370_v2, %s12295_s16 }
  0x8b   :  { %376 = vmatpush.msra.mxu1 %v101_v53  ;;  %11716 = vmatmul.msk.f32.vlgmr.msrb.gmra.mxu2 %vm174_vm1, %v11709_v35 }
  0x8c   :  { %v54_v56 = vpop.permute.xlu0 %53  ;;  %v40_v57 = vpop.permute.xlu1 %39  ;;  %11714 = vmatmul.msk.f32.vlgmr.msrb.gmra.mxu0 %vm174_vm1, %v11709_v35  ;;  %11715 = vmatmul.msk.f32.vlgmr.msrb.gmra.mxu1 %vm174_vm1, %v11709_v35 }
  0x8d   :  { %v12610_v58 = vsel %vm63_vm2, %v12481_v10, %v54_v56  ;;  %v12614_v59 = vsel %vm63_vm2, %v40_v57, %v12497_v16  ;;  %11717 = vmatmul.msk.f32.vlgmr.msrb.gmra.mxu3 %vm174_vm1, %v11709_v35  ;;  %1458 = vrot.lane.b32.xlu2 %v12387_v5, %s12295_s16  ;;  %v511_v8 = vpop.permute.xlu2 %510  ;;  %v108_v10 = vld [vmem:[%s17314_s1] sm:$0xff]  ;;  %v12646_v14 = vsel %vm63_vm2, %v12534_v31, %v40_v57 }
  0x8e   :  { %v102_v62 = vmul.f32 %v17335_v54, %v12610_v58  ;;  %v100_v63 = vmul.f32 %v17343_v55, %v12614_v59  ;;  %v12660_v29 = vsel %vm518_vm3, %v12588_v50, %v511_v8  ;;  %v11749_v54 = vld [vmem:[%s17313_s3 + $0x4] ss:$8 sm:$0xf0] }
  0x8f   :  { %v559_v35 = vmul.f32 %v17326_v22, %v12660_v29 }
  0x90   :  { %396 = vmatpush.msra.mxu2 %v102_v62  ;;  %356 = vmatpush.msra.mxu0 %v100_v63  ;;  %v11728_v63 = vld [vmem:[%s17314_s1 + $0x10] sm:$0xff] }
  0x92   :  { %1460 = vrot.lane.b32.xlu0 %v12398_v6, %s12295_s16  ;;  %1456 = vrot.lane.b32.xlu1 %v12403_v7, %s12295_s16 }
  0x93   :  { %11720 = vmatmul.msk.f32.vlgmr.msra.gmra.mxu2 %vm174_vm1, %v108_v10 }
  0x94   :  { %v56_v16 = vpop.permute.xlu0 %55  ;;  %v60_v21 = vpop.permute.xlu1 %59  ;;  %11718 = vmatmul.msk.f32.vlgmr.msra.gmra.mxu0 %vm174_vm1, %v108_v10  ;;  %11719 = vmatmul.msk.f32.vlgmr.msra.gmra.mxu1 %vm174_vm1, %v108_v10 }
  0x95   :  { %v12652_v23 = vsel %vm63_vm2, %v54_v56, %v56_v16  ;;  %v12656_v24 = vsel %vm63_vm2, %v60_v21, %v12534_v31  ;;  %1686 = vrot.lane.b32.xlu2 %v12361_v1, %s12296_s28  ;;  %v12670_v33 = vpop.permute.xlu2 %512  ;;  %v107_v31 = vmul.f32 %v17327_v13, %v12646_v14 }
  0x96   :  { %v103_v30 = vmul.f32 %v17332_v11, %v12652_v23  ;;  %v106_v32 = vmul.f32 %v17334_v12, %v12656_v24  ;;  %v11748_v12 = vld [vmem:[%s17313_s3 + $0x4] ss:$8 sm:$0xf] }
  0x97   :  { %v12850_v36 = vor.u32 %v11749_v54, %v11748_v12 }
  0x98   :  { %416 = vmatpush.msra.mxu3 %v103_v30  ;;  %476 = vmatpush.msrb.mxu2 %v106_v32  ;;  %v12723_v30 = vsel %vm518_vm3, %v511_v8, %v12670_v33 }
  0x99   :  { %11721 = vmatmul.msk.f32.vlgmr.msra.gmra.mxu3 %vm174_vm1, %v108_v10  ;;  %17629 = vst [vmem:[#allocation7_spill] sm:$0xff] %v12850_v36  ;;  %v17366_v15 = vperm.slane %v12850_v36, 5 }
  0x9a   :  { %496 = vmatpush.msrb.mxu3 %v107_v31  ;;  %1688 = vrot.lane.b32.xlu0 %v12377_v3, %s12296_s28 }
  0x9b   :  { %1681 = vrot.lane.b32.xlu1 %v12356_v0, %s12296_s28  ;;  %11724 = vmatmul.msk.f32.vlgmr.msrb.gmra.mxu2 %vm174_vm1, %v108_v10 }
  0x9c   :  { %v58_v49 = vpop.permute.xlu0 %57  ;;  %v507_v51 = vpop.permute.xlu1 %506  ;;  %644 = vmatpush.msra.mxu3 %v559_v35 }
  0x9d   :  { %v12688_v52 = vsel %vm63_vm2, %v56_v16, %v58_v49  ;;  %v12691_v53 = vsel %vm63_vm2, %v58_v49, %v60_v21  ;;  %v12695_v56 = vsel %vm518_vm3, %v507_v51, %v12588_v50  ;;  %1684 = vrot.lane.b32.xlu2 %v12382_v4, %s12296_s28  ;;  %v12705_v61 = vpop.permute.xlu2 %737  ;;  %v17321_v50 = vperm.slane %v12631_v9, 4 }
  0x9e   :  { %v104_v57 = vmul.f32 %v17325_v41, %v12688_v52  ;;  %v105_v60 = vmul.f32 %v17324_v42, %v12691_v53  ;;  %v558_v62 = vmul.f32 %v17333_v48, %v12695_v56  ;;  %v17322_v16 = vperm.slane %v12631_v9, 0 }
  0x9f   :  { %v17323_v21 = vperm.slane %v12631_v9, 1 }
  0xa0   :  { %436 = vmatpush.msrb.mxu0 %v104_v57  ;;  %456 = vmatpush.msrb.mxu1 %v105_v60  ;;  %v560_v57 = vmul.f32 %v17321_v50, %v12723_v30  ;;  %v17330_v60 = vperm.slane %v12631_v9, 5 }
  0xa1   :  { %624 = vmatpush.msra.mxu2 %v558_v62  ;;  %11722 = vmatmul.msk.f32.vlgmr.msrb.gmra.mxu0 %vm174_vm1, %v108_v10  ;;  %v17329_v62 = vperm.slane %v12631_v9, 6 }
  0xa2   :  { %1690 = vrot.lane.b32.xlu0 %v12370_v2, %s12296_s28  ;;  %11723 = vmatmul.msk.f32.vlgmr.msrb.gmra.mxu1 %vm174_vm1, %v108_v10 }
  0xa3   :  { %1694 = vrot.lane.b32.xlu1 %v12387_v5, %s12296_s28  ;;  %11725 = vmatmul.msk.f32.vlgmr.msrb.gmra.mxu3 %vm174_vm1, %v108_v10 }
  0xa4   :  { %v502_v32 = vpop.permute.xlu0 %501  ;;  %v505_v31 = vpop.permute.xlu1 %504  ;;  %11731 = vmatmul.msk.f32.vlgmr.msra.gmra.mxu2 %vm174_vm1, %v11728_v63 }
  0xa5   :  { %v12729_v35 = vsel %vm518_vm3, %v505_v31, %v507_v51  ;;  %v12732_v49 = vsel %vm518_vm3, %v502_v32, %v505_v31  ;;  %1696 = vrot.lane.b32.xlu2 %v12398_v6, %s12296_s28  ;;  %v12745_v51 = vpop.permute.xlu2 %750  ;;  %v17331_v31 = vperm.slane %v12631_v9, 7 }
  0xa6   :  { %v556_v8 = vmul.f32 %v17322_v16, %v12732_v49  ;;  %v557_v10 = vmul.f32 %v17323_v21, %v12729_v35 }
  0xa8   :  { %584 = vmatpush.msra.mxu0 %v556_v8  ;;  %604 = vmatpush.msra.mxu1 %v557_v10  ;;  %v11738_v8 = vld [vmem:[%s17313_s3 + $0x3] ss:$8 sm:$0xf0] }
  0xa9   :  { %11729 = vmatmul.msk.f32.vlgmr.msra.gmra.mxu0 %vm174_vm1, %v11728_v63 }
  0xaa   :  { %664 = vmatpush.msrb.mxu0 %v560_v57  ;;  %1692 = vrot.lane.b32.xlu0 %v12403_v7, %s12296_s28  ;;  %v11737_v57 = vld [vmem:[%s17313_s3 + $0x3] ss:$8 sm:$0xf] }
  0xab   :  { %1922 = vrot.lane.b32.xlu1 %v12361_v1, %s12297_s10  ;;  %11730 = vmatmul.msk.f32.vlgmr.msra.gmra.mxu1 %vm174_vm1, %v11728_v63 }
  0xac   :  { %v515_v10 = vpop.permute.xlu0 %514  ;;  %v517_v50 = vpop.permute.xlu1 %516  ;;  %11732 = vmatmul.msk.f32.vlgmr.msra.gmra.mxu3 %vm174_vm1, %v11728_v63 }
  0xad   :  { %v12765_v16 = vsel %vm518_vm3, %v12670_v33, %v515_v10  ;;  %v12768_v21 = vsel %vm518_vm3, %v515_v10, %v517_v50  ;;  %v12771_v42 = vsel %vm518_vm3, %v517_v50, %v502_v32  ;;  %1924 = vrot.lane.b32.xlu2 %v12377_v3, %s12297_s10  ;;  %v12784_v10 = vor.u32 %v11738_v8, %v11737_v57  ;;  %v12786_v13 = vpop.permute.xlu2 %978  ;;  %v12808_v8 = vld [vmem:[%s17314_s1 + $0x18] sm:$0xff] }
  0xae   :  { %v561_v41 = vmul.f32 %v17330_v60, %v12765_v16  ;;  %v562_v22 = vmul.f32 %v17329_v62, %v12768_v21  ;;  %v563_v33 = vmul.f32 %v17331_v31, %v12771_v42 }
  0xaf   :  { %17627 = vst [vmem:[#allocation5_spill] sm:$0xff] %v12784_v10  ;;  %v17328_v50 = vperm.slane %v12784_v10, 2  ;;  %v17340_v62 = vperm.slane %v12784_v10, 3  ;;  %v17352_v54 = vperm.slane %v12784_v10, 5 }
  0xb0   :  { %684 = vmatpush.msrb.mxu1 %v561_v41  ;;  %704 = vmatpush.msrb.mxu2 %v562_v22 }
  0xb1   :  { %724 = vmatpush.msrb.mxu3 %v563_v33  ;;  %11735 = vmatmul.msk.f32.vlgmr.msrb.gmra.mxu2 %vm174_vm1, %v11728_v63 }
  0xb2   :  { %1917 = vrot.lane.b32.xlu0 %v12356_v0, %s12297_s10  ;;  %11733 = vmatmul.msk.f32.vlgmr.msrb.gmra.mxu0 %vm174_vm1, %v11728_v63 }
  0xb3   :  { %1920 = vrot.lane.b32.xlu1 %v12382_v4, %s12297_s10  ;;  %11734 = vmatmul.msk.f32.vlgmr.msrb.gmra.mxu1 %vm174_vm1, %v11728_v63 }
  0xb4   :  { %v743_v32 = vpop.permute.xlu0 %742  ;;  %v745_v57 = vpop.permute.xlu1 %744  ;;  %11736 = vmatmul.msk.f32.vlgmr.msrb.gmra.mxu3 %vm174_vm1, %v11728_v63  ;;  %v17339_v63 = vperm.slane %v12784_v10, 0 }
  0xb5   :  { %v12798_v22 = vsel %vm754_vm4, %v743_v32, %v745_v57  ;;  %1926 = vrot.lane.b32.xlu2 %v12370_v2, %s12297_s10  ;;  %v12810_v33 = vpop.permute.xlu2 %976 }
  0xb6   :  { %v794_v41 = vmul.f32 %v17328_v50, %v12798_v22  ;;  %v17338_v50 = vperm.slane %v12784_v10, 1 }
  0xb8   :  { %860 = vmatpush.msra.mxu2 %v794_v41 }
  0xb9   :  { %11742 = vmatmul.msk.f32.vlgmr.msra.gmra.mxu2 %vm174_vm1, %v12808_v8 }
  0xba   :  { %1930 = vrot.lane.b32.xlu0 %v12387_v5, %s12297_s10 }
  0xbb   :  { %1932 = vrot.lane.b32.xlu1 %v12398_v6, %s12297_s10 }
  0xbc   :  { %v741_v60 = vpop.permute.xlu0 %740  ;;  %v747_v31 = vpop.permute.xlu1 %746 }
  0xbd   :  { %v12822_v11 = vsel %vm754_vm4, %v741_v60, %v743_v32  ;;  %v12826_v41 = vsel %vm754_vm4, %v12705_v61, %v741_v60  ;;  %v12829_v48 = vsel %vm754_vm4, %v745_v57, %v747_v31  ;;  %1928 = vrot.lane.b32.xlu2 %v12403_v7, %s12297_s10  ;;  %v12845_v57 = vpop.permute.xlu2 %988 }
  0xbe   :  { %17628 = vst [vmem:[#allocation6_spill] sm:$0xff] %v12826_v41  ;;  %v792_v32 = vmul.f32 %v17339_v63, %v12826_v41  ;;  %v793_v60 = vmul.f32 %v17338_v50, %v12822_v11  ;;  %v795_v37 = vmul.f32 %v17340_v62, %v12829_v48  ;;  %v17348_v50 = vperm.slane %v12784_v10, 6 }
  0xbf   :  { %v17347_v63 = vperm.slane %v12784_v10, 7  ;;  %v12870_v62 = vsel %vm990_vm5, %v12810_v33, %v12786_v13 }
  0xc0   :  { %820 = vmatpush.msra.mxu0 %v792_v32  ;;  %840 = vmatpush.msra.mxu1 %v793_v60  ;;  %v17349_v60 = vperm.slane %v12850_v36, 1  ;;  %17630 = vst [vmem:[#allocation8_spill] sm:$0xff] %v12870_v62 }
  0xc1   :  { %880 = vmatpush.msra.mxu3 %v795_v37  ;;  %11740 = vmatmul.msk.f32.vlgmr.msra.gmra.mxu0 %vm174_vm1, %v12808_v8  ;;  %v17353_v37 = vperm.slane %v12784_v10, 4 }
  0xc2   :  { %11741 = vmatmul.msk.f32.vlgmr.msra.gmra.mxu1 %vm174_vm1, %v12808_v8  ;;  %2158 = vrot.lane.b32.xlu0 %v12361_v1, %s12298_s27 }
  0xc3   :  { %2160 = vrot.lane.b32.xlu1 %v12377_v3, %s12298_s27  ;;  %11743 = vmatmul.msk.f32.vlgmr.msra.gmra.mxu3 %vm174_vm1, %v12808_v8 }
  0xc4   :  { %v753_v12 = vpop.permute.xlu0 %752  ;;  %v749_v32 = vpop.permute.xlu1 %748 }
  0xc5   :  { %v12874_v40 = vsel %vm754_vm4, %v12745_v51, %v753_v12  ;;  %v12878_v39 = vsel %vm754_vm4, %v753_v12, %v12705_v61  ;;  %v12881_v55 = vsel %vm754_vm4, %v747_v31, %v749_v32  ;;  %v12885_v38 = vsel %vm754_vm4, %v749_v32, %v12745_v51  ;;  %2153 = vrot.lane.b32.xlu2 %v12356_v0, %s12298_s27  ;;  %v12895_v61 = vpop.permute.xlu2 %1216 }
  0xc6   :  { %17631 = vst [vmem:[#allocation9_spill] sm:$0xff] %v12874_v40  ;;  %v798_v18 = vmul.f32 %v17348_v50, %v12874_v40  ;;  %v799_v17 = vmul.f32 %v17347_v63, %v12878_v39  ;;  %v796_v31 = vmul.f32 %v17353_v37, %v12881_v55  ;;  %v797_v51 = vmul.f32 %v17352_v54, %v12885_v38 }
  0xc7   :  { %17632 = vst [vmem:[#allocation10_spill] sm:$0xff] %v12878_v39  ;;  %v1029_v12 = vmul.f32 %v17349_v60, %v12870_v62  ;;  %v17350_v32 = vperm.slane %v12850_v36, 2  ;;  %v17351_v63 = vperm.slane %v12850_v36, 0  ;;  %v11760_v60 = vld [vmem:[%s17313_s3 + $0x5] ss:$8 sm:$0xf0] }
  0xc8   :  { %17633 = vst [vmem:[#allocation11_spill] sm:$0xff] %v12881_v55  ;;  %940 = vmatpush.msrb.mxu2 %v798_v18  ;;  %960 = vmatpush.msrb.mxu3 %v799_v17 }
  0xc9   :  { %17634 = vst [vmem:[#allocation12_spill] sm:$0xff] %v12885_v38  ;;  %900 = vmatpush.msrb.mxu0 %v796_v31  ;;  %920 = vmatpush.msrb.mxu1 %v797_v51 }
  0xca   :  { %11744 = vmatmul.msk.f32.vlgmr.msrb.gmra.mxu0 %vm174_vm1, %v12808_v8  ;;  %11745 = vmatmul.msk.f32.vlgmr.msrb.gmra.mxu1 %vm174_vm1, %v12808_v8 }
  0xcb   :  { %11746 = vmatmul.msk.f32.vlgmr.msrb.gmra.mxu2 %vm174_vm1, %v12808_v8  ;;  %2156 = vrot.lane.b32.xlu0 %v12382_v4, %s12298_s27 }
  0xcc   :  { %2162 = vrot.lane.b32.xlu1 %v12370_v2, %s12298_s27  ;;  %v981_v17 = vpop.permute.xlu0 %980  ;;  %v974_v18 = vpop.permute.xlu1 %973  ;;  %1076 = vmatpush.msra.mxu1 %v1029_v12 }
  0xcd   :  { %v12920_v31 = vsel %vm990_vm5, %v12786_v13, %v981_v17  ;;  %v12924_v51 = vsel %vm990_vm5, %v974_v18, %v12810_v33  ;;  %11747 = vmatmul.msk.f32.vlgmr.msrb.gmra.mxu3 %vm174_vm1, %v12808_v8  ;;  %2166 = vrot.lane.b32.xlu2 %v12387_v5, %s12298_s27  ;;  %v11750_v13 = vld [vmem:[%s17314_s1 + $0x20] sm:$0xff]  ;;  %v12939_v33 = vpop.permute.xlu2 %1218  ;;  %v12962_v19 = vsel %vm990_vm5, %v12845_v57, %v974_v18 }
  0xce   :  { %17635 = vst [vmem:[#allocation13_spill] sm:$0xff] %v12920_v31  ;;  %v1030_v50 = vmul.f32 %v17350_v32, %v12920_v31  ;;  %v1028_v12 = vmul.f32 %v17351_v63, %v12924_v51  ;;  %v11759_v8 = vld [vmem:[%s17313_s3 + $0x5] ss:$8 sm:$0xf]  ;;  %v17362_v32 = vperm.slane %v12850_v36, 3  ;;  %v17365_v63 = vperm.slane %v12850_v36, 6 }
  0xcf   :  { %17636 = vst [vmem:[#allocation14_spill] sm:$0xff] %v12924_v51  ;;  %v12951_v54 = vor.u32 %v11760_v60, %v11759_v8  ;;  %v12974_v37 = vsel %vm1226_vm6, %v12895_v61, %v12939_v33 }
  0xd0   :  { %1056 = vmatpush.msra.mxu0 %v1028_v12  ;;  %1096 = vmatpush.msra.mxu2 %v1030_v50  ;;  %17638 = vst [vmem:[#allocation16_spill] sm:$0xff] %v12962_v19 }
  0xd1   :  { %17637 = vst [vmem:[#allocation15_spill] sm:$0xff] %v12951_v54  ;;  %v17643_v9 = vperm.slane %v12951_v54, 3 }
  0xd2   :  { %11751 = vmatmul.msk.f32.vlgmr.msra.gmra.mxu0 %vm174_vm1, %v11750_v13  ;;  %11752 = vmatmul.msk.f32.vlgmr.msra.gmra.mxu1 %vm174_vm1, %v11750_v13  ;;  %17641 = vst [vmem:[#allocation19_spill] sm:$0xff] %v12974_v37 }
  0xd3   :  { %11753 = vmatmul.msk.f32.vlgmr.msra.gmra.mxu2 %vm174_vm1, %v11750_v13  ;;  %2168 = vrot.lane.b32.xlu0 %v12398_v6, %s12298_s27  ;;  %v1267_v34 = vmul.f32 %v17643_v9, %v12974_v37 }
  0xd4   :  { %2164 = vrot.lane.b32.xlu1 %v12403_v7, %s12298_s27  ;;  %v983_v50 = vpop.permute.xlu0 %982  ;;  %v987_v12 = vpop.permute.xlu1 %986 }
  0xd5   :  { %v12965_v60 = vsel %vm990_vm5, %v981_v17, %v983_v50  ;;  %v12969_v8 = vsel %vm990_vm5, %v987_v12, %v12845_v57  ;;  %2394 = vrot.lane.b32.xlu2 %v12361_v1, %s12299_s15  ;;  %v12984_v20 = vpop.permute.xlu2 %1220  ;;  %v17642_v57 = vperm.slane %v12850_v36, 7 }
  0xd6   :  { %17639 = vst [vmem:[#allocation17_spill] sm:$0xff] %v12965_v60  ;;  %v1031_v18 = vmul.f32 %v17362_v32, %v12965_v60  ;;  %v1034_v17 = vmul.f32 %v17365_v63, %v12969_v8  ;;  %v17367_v32 = vperm.slane %v12850_v36, 4  ;;  %v17651_v36 = vperm.slane %v12951_v54, 1 }
  0xd7   :  { %17640 = vst [vmem:[#allocation18_spill] sm:$0xff] %v12969_v8  ;;  %v1035_v10 = vmul.f32 %v17642_v57, %v12962_v19 }
  0xd8   :  { %1116 = vmatpush.msra.mxu3 %v1031_v18  ;;  %1176 = vmatpush.msrb.mxu2 %v1034_v17 }
  0xd9   :  { %11754 = vmatmul.msk.f32.vlgmr.msra.gmra.mxu3 %vm174_vm1, %v11750_v13 }
  0xda   :  { %1196 = vmatpush.msrb.mxu3 %v1035_v10 }
  0xdb   :  { %11757 = vmatmul.msk.f32.vlgmr.msrb.gmra.mxu2 %vm174_vm1, %v11750_v13  ;;  %2396 = vrot.lane.b32.xlu0 %v12377_v3, %s12299_s15 }
  0xdc   :  { %2389 = vrot.lane.b32.xlu1 %v12356_v0, %s12299_s15  ;;  %v985_v18 = vpop.permute.xlu0 %984  ;;  %v1215_v17 = vpop.permute.xlu1 %1214  ;;  %1352 = vmatpush.msra.mxu3 %v1267_v34 }
  0xdd   :  { %v13002_v9 = vsel %vm990_vm5, %v983_v50, %v985_v18  ;;  %v13005_v10 = vsel %vm990_vm5, %v985_v18, %v987_v12  ;;  %v13009_v63 = vsel %vm1226_vm6, %v1215_v17, %v12895_v61  ;;  %2392 = vrot.lane.b32.xlu2 %v12382_v4, %s12299_s15  ;;  %v17647_v50 = vperm.slane %v12951_v54, 2  ;;  %v11761_v61 = vld [vmem:[%s17314_s1 + $0x28] sm:$0xff] }
  0xde   :  { %17644 = vst [vmem:[#allocation20_spill] sm:$0xff] %v13002_v9  ;;  %v1032_v57 = vmul.f32 %v17367_v32, %v13002_v9  ;;  %v1033_v34 = vmul.f32 %v17366_v15, %v13005_v10  ;;  %v17372_v15 = vperm.slane %v12951_v54, 0 }
  0xdf   :  { %17645 = vst [vmem:[#allocation21_spill] sm:$0xff] %v13005_v10  ;;  %v1266_v12 = vmul.f32 %v17647_v50, %v13009_v63  ;;  %v13022_v18 = vpop.permute.xlu2 %1445 }
  0xe0   :  { %17646 = vst [vmem:[#allocation22_spill] sm:$0xff] %v13009_v63  ;;  %1136 = vmatpush.msrb.mxu0 %v1032_v57  ;;  %1156 = vmatpush.msrb.mxu1 %v1033_v34 }
  0xe1   :  { %1332 = vmatpush.msra.mxu2 %v1266_v12  ;;  %11755 = vmatmul.msk.f32.vlgmr.msrb.gmra.mxu0 %vm174_vm1, %v11750_v13 }
  0xe2   :  { %11756 = vmatmul.msk.f32.vlgmr.msrb.gmra.mxu1 %vm174_vm1, %v11750_v13  ;;  %11758 = vmatmul.msk.f32.vlgmr.msrb.gmra.mxu3 %vm174_vm1, %v11750_v13  ;;  %v13041_v13 = vsel %vm1226_vm6, %v12939_v33, %v12984_v20  ;;  %v17652_v33 = vperm.slane %v12951_v54, 4 }
  0xe3   :  { %11764 = vmatmul.msk.f32.vlgmr.msra.gmra.mxu2 %vm174_vm1, %v11761_v61  ;;  %2398 = vrot.lane.b32.xlu0 %v12370_v2, %s12299_s15  ;;  %17648 = vst [vmem:[#allocation23_spill] sm:$0xff] %v13041_v13 }
  0xe4   :  { %2402 = vrot.lane.b32.xlu1 %v12387_v5, %s12299_s15  ;;  %v1210_v34 = vpop.permute.xlu0 %1209  ;;  %v1213_v50 = vpop.permute.xlu1 %1212  ;;  %v1268_v37 = vmul.f32 %v17652_v33, %v13041_v13 }
  0xe5   :  { %v13044_v12 = vsel %vm1226_vm6, %v1213_v50, %v1215_v17  ;;  %v13047_v32 = vsel %vm1226_vm6, %v1210_v34, %v1213_v50  ;;  %2404 = vrot.lane.b32.xlu2 %v12398_v6, %s12299_s15 }
  0xe6   :  { %17649 = vst [vmem:[#allocation24_spill] sm:$0xff] %v13044_v12  ;;  %v1264_v57 = vmul.f32 %v17372_v15, %v13047_v32  ;;  %v1265_v63 = vmul.f32 %v17651_v36, %v13044_v12  ;;  %v17657_v12 = vperm.slane %v12951_v54, 6 }
  0xe7   :  { %17650 = vst [vmem:[#allocation25_spill] sm:$0xff] %v13047_v32  ;;  %v13060_v17 = vpop.permute.xlu2 %1458  ;;  %v17656_v32 = vperm.slane %v12951_v54, 5 }
  0xe8   :  { %1292 = vmatpush.msra.mxu0 %v1264_v57  ;;  %1312 = vmatpush.msra.mxu1 %v1265_v63  ;;  %v11770_v63 = vld [vmem:[%s17313_s3 + $0x6] ss:$8 sm:$0xf] }
  0xe9   :  { %11762 = vmatmul.msk.f32.vlgmr.msra.gmra.mxu0 %vm174_vm1, %v11761_v61  ;;  %v11771_v57 = vld [vmem:[%s17313_s3 + $0x6] ss:$8 sm:$0xf0] }
  0xea   :  { %11763 = vmatmul.msk.f32.vlgmr.msra.gmra.mxu1 %vm174_vm1, %v11761_v61  ;;  %11765 = vmatmul.msk.f32.vlgmr.msra.gmra.mxu3 %vm174_vm1, %v11761_v61 }
  0xeb   :  { %2400 = vrot.lane.b32.xlu0 %v12403_v7, %s12299_s15  ;;  %1372 = vmatpush.msrb.mxu0 %v1268_v37 }
  0xec   :  { %2629 = vrot.lane.b32.xlu1 %v12361_v1, %s12300_s30  ;;  %v1223_v33 = vpop.permute.xlu0 %1222  ;;  %v1225_v15 = vpop.permute.xlu1 %1224 }
  0xed   :  { %v13080_v36 = vsel %vm1226_vm6, %v12984_v20, %v1223_v33  ;;  %v13083_v37 = vsel %vm1226_vm6, %v1223_v33, %v1225_v15  ;;  %v13086_v50 = vsel %vm1226_vm6, %v1225_v15, %v1210_v34  ;;  %2631 = vrot.lane.b32.xlu2 %v12377_v3, %s12300_s30  ;;  %v17658_v20 = vperm.slane %v12951_v54, 7 }
  0xee   :  { %17653 = vst [vmem:[#allocation26_spill] sm:$0xff] %v13080_v36  ;;  %v1269_v13 = vmul.f32 %v17656_v32, %v13080_v36  ;;  %v1270_v51 = vmul.f32 %v17657_v12, %v13083_v37  ;;  %v13099_v33 = vor.u32 %v11771_v57, %v11770_v63  ;;  %v11781_v63 = vld [vmem:[%s17313_s3 + $0x7] ss:$8 sm:$0xf] }
  0xef   :  { %17654 = vst [vmem:[#allocation27_spill] sm:$0xff] %v13083_v37  ;;  %v1271_v8 = vmul.f32 %v17658_v20, %v13086_v50  ;;  %v13101_v10 = vpop.permute.xlu2 %1686 }
  0xf0   :  { %17655 = vst [vmem:[#allocation28_spill] sm:$0xff] %v13086_v50  ;;  %1392 = vmatpush.msrb.mxu1 %v1269_v13  ;;  %1412 = vmatpush.msrb.mxu2 %v1270_v51  ;;  %v17379_v15 = vperm.slane %v13099_v33, 2 }
  0xf1   :  { %17659 = vst [vmem:[#allocation29_spill] sm:$0xff] %v13099_v33  ;;  %1432 = vmatpush.msrb.mxu3 %v1271_v8  ;;  %11766 = vmatmul.msk.f32.vlgmr.msrb.gmra.mxu0 %vm174_vm1, %v11761_v61 }
  0xf2   :  { %11767 = vmatmul.msk.f32.vlgmr.msrb.gmra.mxu1 %vm174_vm1, %v11761_v61  ;;  %11768 = vmatmul.msk.f32.vlgmr.msrb.gmra.mxu2 %vm174_vm1, %v11761_v61 }
  0xf3   :  { %11769 = vmatmul.msk.f32.vlgmr.msrb.gmra.mxu3 %vm174_vm1, %v11761_v61  ;;  %2624 = vrot.lane.b32.xlu0 %v12356_v0, %s12300_s30  ;;  %v11772_v61 = vld [vmem:[%s17314_s1 + $0x30] sm:$0xff] }
  0xf4   :  { %2627 = vrot.lane.b32.xlu1 %v12382_v4, %s12300_s30  ;;  %v1451_v32 = vpop.permute.xlu0 %1450  ;;  %v1453_v51 = vpop.permute.xlu1 %1452 }
  0xf5   :  { %v13113_v8 = vsel %vm1462_vm7, %v1451_v32, %v1453_v51  ;;  %2633 = vrot.lane.b32.xlu2 %v12370_v2, %s12300_s30 }
  0xf6   :  { %17660 = vst [vmem:[#allocation30_spill] sm:$0xff] %v13113_v8  ;;  %v1502_v34 = vmul.f32 %v17379_v15, %v13113_v8  ;;  %v17666_v8 = vperm.slane %v13099_v33, 3 }
  0xf7   :  { %v13123_v13 = vpop.permute.xlu2 %1684 }
  0xf8   :  { %1568 = vmatpush.msra.mxu2 %v1502_v34 }
  0xfa   :  { %11775 = vmatmul.msk.f32.vlgmr.msra.gmra.mxu2 %vm174_vm1, %v11772_v61 }
  0xfb   :  { %2637 = vrot.lane.b32.xlu0 %v12387_v5, %s12300_s30 }
  0xfc   :  { %2639 = vrot.lane.b32.xlu1 %v12398_v6, %s12300_s30  ;;  %v1449_v20 = vpop.permute.xlu0 %1448  ;;  %v1455_v15 = vpop.permute.xlu1 %1454  ;;  %v11782_v6 = vld [vmem:[%s17313_s3 + $0x7] ss:$8 sm:$0xf0] }
  0xfd   :  { %v13134_v54 = vsel %vm1462_vm7, %v1449_v20, %v1451_v32  ;;  %v13138_v34 = vsel %vm1462_vm7, %v13022_v18, %v1449_v20  ;;  %v13141_v12 = vsel %vm1462_vm7, %v1453_v51, %v1455_v15  ;;  %2635 = vrot.lane.b32.xlu2 %v12403_v7, %s12300_s30  ;;  %v17664_v32 = vperm.slane %v13099_v33, 0 }
  0xfe   :  { %17661 = vst [vmem:[#allocation31_spill] sm:$0xff] %v13134_v54  ;;  %v17665_v20 = vperm.slane %v13099_v33, 1  ;;  %v1503_v37 = vmul.f32 %v17666_v8, %v13141_v12  ;;  %v13162_v50 = vor.u32 %v11782_v6, %v11781_v63  ;;  %v17387_v7 = vperm.slane %v13099_v33, 6 }
  0xff   :  { %17662 = vst [vmem:[#allocation32_spill] sm:$0xff] %v13138_v34  ;;  %v1500_v57 = vmul.f32 %v17664_v32, %v13138_v34  ;;  %v13160_v36 = vpop.permute.xlu2 %1696  ;;  %v17386_v32 = vperm.slane %v13099_v33, 7  ;;  %v17388_v8 = vperm.slane %v13099_v33, 4 }
 0x100   :  { %17663 = vst [vmem:[#allocation33_spill] sm:$0xff] %v13141_v12  ;;  %v1501_v51 = vmul.f32 %v17665_v20, %v13134_v54  ;;  %1588 = vmatpush.msra.mxu3 %v1503_v37 }
 0x101   :  { %1528 = vmatpush.msra.mxu0 %v1500_v57  ;;  %17667 = vst [vmem:[#allocation34_spill] sm:$0xff] %v13162_v50  ;;  %11776 = vmatmul.msk.f32.vlgmr.msra.gmra.mxu3 %vm174_vm1, %v11772_v61 }
 0x102   :  { %1548 = vmatpush.msra.mxu1 %v1501_v51  ;;  %11773 = vmatmul.msk.f32.vlgmr.msra.gmra.mxu0 %vm174_vm1, %v11772_v61 }
 0x103   :  { %11774 = vmatmul.msk.f32.vlgmr.msra.gmra.mxu1 %vm174_vm1, %v11772_v61  ;;  %2865 = vrot.lane.b32.xlu0 %v12361_v1, %s12301_s19 }
 0x104   :  { %2867 = vrot.lane.b32.xlu1 %v12377_v3, %s12301_s19  ;;  %v1461_v37 = vpop.permute.xlu0 %1460  ;;  %v1457_v57 = vpop.permute.xlu1 %1456 }
 0x105   :  { %v13178_v20 = vsel %vm1462_vm7, %v13060_v17, %v1461_v37  ;;  %v13182_v51 = vsel %vm1462_vm7, %v1461_v37, %v13022_v18  ;;  %v13185_v1 = vsel %vm1462_vm7, %v1455_v15, %v1457_v57  ;;  %v13189_v63 = vsel %vm1462_vm7, %v1457_v57, %v13060_v17  ;;  %2860 = vrot.lane.b32.xlu2 %v12356_v0, %s12301_s19 }
 0x106   :  { %17668 = vst [vmem:[#allocation35_spill] sm:$0xff] %v13178_v20  ;;  %v1506_v3 = vmul.f32 %v17387_v7, %v13178_v20  ;;  %v1507_v6 = vmul.f32 %v17386_v32, %v13182_v51  ;;  %v13202_v18 = vsel %vm1698_vm8, %v13123_v13, %v13101_v10  ;;  %v1504_v17 = vmul.f32 %v17388_v8, %v13185_v1 }
 0x107   :  { %17669 = vst [vmem:[#allocation36_spill] sm:$0xff] %v13182_v51  ;;  %v17673_v0 = vperm.slane %v13099_v33, 5  ;;  %v13210_v37 = vpop.permute.xlu2 %1924  ;;  %v17674_v57 = vperm.slane %v13162_v50, 1  ;;  %v17389_v7 = vperm.slane %v13162_v50, 2  ;;  %v17390_v8 = vperm.slane %v13162_v50, 0  ;;  %v13299_v33 = vld [vmem:[%s17312_s0 + $0x10] sm:$0xff]  ;;  %v13375_v51 = vpop.f32.mrf.mxu2 }
 0x108   :  { %17670 = vst [vmem:[#allocation37_spill] sm:$0xff] %v13185_v1  ;;  %1648 = vmatpush.msrb.mxu2 %v1506_v3  ;;  %1668 = vmatpush.msrb.mxu3 %v1507_v6  ;;  %v17685_v20 = vperm.slane %v13162_v50, 7  ;;  %v11794_v1 = vld [vmem:[%s17314_s1 + $0x40] sm:$0xff] }
 0x109   :  { %17671 = vst [vmem:[#allocation38_spill] sm:$0xff] %v13189_v63  ;;  %v1505_v15 = vmul.f32 %v17673_v0, %v13189_v63  ;;  %1608 = vmatpush.msrb.mxu0 %v1504_v17  ;;  %v1737_v32 = vmul.f32 %v17674_v57, %v13202_v18  ;;  %11779 = vmatmul.msk.f32.vlgmr.msrb.gmra.mxu2 %vm174_vm1, %v11772_v61 }
 0x10a   :  { %17672 = vst [vmem:[#allocation39_spill] sm:$0xff] %v13202_v18  ;;  %11777 = vmatmul.msk.f32.vlgmr.msrb.gmra.mxu0 %vm174_vm1, %v11772_v61  ;;  %11780 = vmatmul.msk.f32.vlgmr.msrb.gmra.mxu3 %vm174_vm1, %v11772_v61 }
 0x10b   :  { %1628 = vmatpush.msrb.mxu1 %v1505_v15  ;;  %2863 = vrot.lane.b32.xlu0 %v12382_v4, %s12301_s19 }
 0x10c   :  { %11778 = vmatmul.msk.f32.vlgmr.msrb.gmra.mxu1 %vm174_vm1, %v11772_v61  ;;  %2869 = vrot.lane.b32.xlu1 %v12370_v2, %s12301_s19  ;;  %v1689_v6 = vpop.permute.xlu0 %1688  ;;  %v11793_v61 = vld [vmem:[%s17313_s3 + $0x40] ss:$8 sm:$0xf0] }
 0x10d   :  { %v1682_v3 = vpop.permute.xlu1 %1681  ;;  %v13227_v17 = vsel %vm1698_vm8, %v13101_v10, %v1689_v6  ;;  %1784 = vmatpush.msra.mxu1 %v1737_v32  ;;  %2873 = vrot.lane.b32.xlu2 %v12387_v5, %s12301_s19  ;;  %v11792_v10 = vld [vmem:[%s17313_s3 + $0x40] ss:$8 sm:$0xf] }
 0x10e   :  { %17675 = vst [vmem:[#allocation40_spill] sm:$0xff] %v13227_v17  ;;  %v13231_v0 = vsel %vm1698_vm8, %v1682_v3, %v13123_v13  ;;  %v1738_v4 = vmul.f32 %v17389_v7, %v13227_v17  ;;  %v13250_v5 = vld [vmem:[%s17314_s1 + $0x38] sm:$0xff]  ;;  %v13254_v32 = vor.u32 %v11793_v61, %v11792_v10  ;;  %v13276_v10 = vld [vmem:[%s17312_s0 + $0x20] sm:$0xff]  ;;  %v13287_v57 = vsel %vm1698_vm8, %v13160_v36, %v1682_v3 }
 0x10f   :  { %17676 = vst [vmem:[#allocation41_spill] sm:$0xff] %v13231_v0  ;;  %v1736_v2 = vmul.f32 %v17390_v8, %v13231_v0  ;;  %v13252_v13 = vpop.permute.xlu2 %1926  ;;  %v17682_v3 = vperm.slane %v13162_v50, 3  ;;  %v1743_v63 = vmul.f32 %v17685_v20, %v13287_v57  ;;  %v13329_v20 = vld [vmem:[%s17312_s0 + $0x18] sm:$0xff] }
 0x110   :  { %1804 = vmatpush.msra.mxu2 %v1738_v4  ;;  %17677 = vst [vmem:[#allocation42_spill] sm:$0xff] %v13254_v32  ;;  %v13268_v4 = vld [vmem:[%s17312_s0 + $0x30] sm:$0xff]  ;;  %v13283_v7 = vsel %vm1934_vm9, %v13210_v37, %v13252_v13  ;;  %v17708_v54 = vperm.slane %v13254_v32, 6 }
 0x111   :  { %1764 = vmatpush.msra.mxu0 %v1736_v2  ;;  %11786 = vmatmul.msk.f32.vlgmr.msra.gmra.mxu2 %vm174_vm1, %v13250_v5  ;;  %17678 = vst [vmem:[#allocation43_spill] sm:$0xff] %v13283_v7 }
 0x112   :  { %11784 = vmatmul.msk.f32.vlgmr.msra.gmra.mxu0 %vm174_vm1, %v13250_v5  ;;  %17679 = vst [vmem:[#allocation44_spill] sm:$0xff] %v13287_v57 }
 0x113   :  { %2875 = vrot.lane.b32.xlu0 %v13268_v4, %s12301_s19 }
 0x114   :  { %11785 = vmatmul.msk.f32.vlgmr.msra.gmra.mxu1 %vm174_vm1, %v13250_v5  ;;  %2871 = vrot.lane.b32.xlu1 %v13276_v10, %s12301_s19  ;;  %v1691_v61 = vpop.permute.xlu0 %1690 }
 0x115   :  { %v1695_v8 = vpop.permute.xlu1 %1694  ;;  %v13290_v2 = vsel %vm1698_vm8, %v1689_v6, %v1691_v61  ;;  %3302 = vrot.lane.b32.xlu2 %v13299_v33, %s12302_s11  ;;  %v17683_v6 = vperm.slane %v13162_v50, 6 }
 0x116   :  { %17680 = vst [vmem:[#allocation45_spill] sm:$0xff] %v13290_v2  ;;  %v13294_v15 = vsel %vm1698_vm8, %v1695_v8, %v13160_v36  ;;  %v1739_v0 = vmul.f32 %v17682_v3, %v13290_v2  ;;  %v17684_v36 = vperm.slane %v13254_v32, 3  ;;  %v13370_v2 = vpop.f32.mrf.mxu3 }
 0x117   :  { %17681 = vst [vmem:[#allocation46_spill] sm:$0xff] %v13294_v15  ;;  %v1742_v17 = vmul.f32 %v17683_v6, %v13294_v15  ;;  %v13312_v34 = vpop.permute.xlu2 %1928  ;;  %v13321_v15 = vpop.f32.mrf.mxu0 }
 0x118   :  { %v1975_v18 = vmul.f32 %v17684_v36, %v13283_v7  ;;  %1824 = vmatpush.msra.mxu3 %v1739_v0  ;;  %17686 = vst [vmem:[#allocation47_spill] sm:$0xff] %v13321_v15  ;;  %v13340_v36 = vpop.f32.mrf.mxu1  ;;  %v13355_v15 = vld [vmem:[%s17312_s0 + $0x8] sm:$0xff] }
 0x119   :  { %1884 = vmatpush.msrb.mxu2 %v1742_v17  ;;  %11787 = vmatmul.msk.f32.vlgmr.msra.gmra.mxu3 %vm174_vm1, %v13250_v5  ;;  %17687 = vst [vmem:[#allocation48_spill] sm:$0xff] %v13340_v36  ;;  %v17691_v36 = vperm.slane %v13162_v50, 4 }
 0x11a   :  { %1904 = vmatpush.msrb.mxu3 %v1743_v63  ;;  %11790 = vmatmul.msk.f32.vlgmr.msrb.gmra.mxu2 %vm174_vm1, %v13250_v5  ;;  %v13336_v63 = vld [vmem:[%s17312_s0] sm:$0xff]  ;;  %17694 = vst [vmem:[#allocation52_spill] sm:$0xff] %v13370_v2 }
 0x11b   :  { %3304 = vrot.lane.b32.xlu0 %v13329_v20, %s12302_s11 }
 0x11c   :  { %2060 = vmatpush.msra.mxu3 %v1975_v18  ;;  %3298 = vrot.lane.b32.xlu1 %v13336_v63, %s12302_s11  ;;  %v1693_v17 = vpop.permute.xlu0 %1692 }
 0x11d   :  { %v1923_v0 = vpop.permute.xlu1 %1922  ;;  %v13343_v18 = vsel %vm1698_vm8, %v1691_v61, %v1693_v17  ;;  %v13346_v6 = vsel %vm1698_vm8, %v1693_v17, %v1695_v8  ;;  %3300 = vrot.lane.b32.xlu2 %v13355_v15, %s12302_s11  ;;  %v17692_v8 = vperm.slane %v13162_v50, 5 }
 0x11e   :  { %17688 = vst [vmem:[#allocation49_spill] sm:$0xff] %v13343_v18  ;;  %v13350_v3 = vsel %vm1934_vm9, %v1923_v0, %v13210_v37  ;;  %v1740_v61 = vmul.f32 %v17691_v36, %v13343_v18  ;;  %v17693_v37 = vperm.slane %v13254_v32, 2  ;;  %v13407_v36 = vld [vmem:[%s17312_s0 + $0x38] sm:$0xff]  ;;  %v13425_v18 = vpop.f32.mrf.mxu3 }
 0x11f   :  { %17689 = vst [vmem:[#allocation50_spill] sm:$0xff] %v13346_v6  ;;  %v1741_v17 = vmul.f32 %v17692_v8, %v13346_v6  ;;  %v13368_v57 = vpop.permute.xlu2 %2153 }
 0x120   :  { %17690 = vst [vmem:[#allocation51_spill] sm:$0xff] %v13350_v3  ;;  %v1974_v7 = vmul.f32 %v17693_v37, %v13350_v3  ;;  %1844 = vmatpush.msrb.mxu0 %v1740_v61  ;;  %v13396_v37 = vpop.f32.mrf.mxu0  ;;  %v13417_v2 = vpop.f32.mrf.mxu1 }
 0x121   :  { %1864 = vmatpush.msrb.mxu1 %v1741_v17  ;;  %11788 = vmatmul.msk.f32.vlgmr.msrb.gmra.mxu0 %vm174_vm1, %v13250_v5  ;;  %17696 = vst [vmem:[#allocation54_spill] sm:$0xff] %v13396_v37  ;;  %v17700_v37 = vperm.slane %v13254_v32, 1 }
 0x122   :  { %2040 = vmatpush.msra.mxu2 %v1974_v7  ;;  %11789 = vmatmul.msk.f32.vlgmr.msrb.gmra.mxu1 %vm174_vm1, %v13250_v5  ;;  %17701 = vst [vmem:[#allocation57_spill] sm:$0xff] %v13417_v2  ;;  %v11803_v2 = vld [vmem:[%s17313_s3 + $0x41] ss:$8 sm:$0xf] }
 0x123   :  { %11791 = vmatmul.msk.f32.vlgmr.msrb.gmra.mxu3 %vm174_vm1, %v13250_v5  ;;  %11797 = vmatmul.msk.f32.vlgmr.msra.gmra.mxu2 %vm174_vm1, %v11794_v1  ;;  %v13394_v5 = vsel %vm1934_vm9, %v13252_v13, %v13312_v34  ;;  %v17699_v13 = vperm.slane %v13254_v32, 0  ;;  %17703 = vst [vmem:[#allocation58_spill] sm:$0xff] %v13425_v18 }
 0x124   :  { %3306 = vrot.lane.b32.xlu0 %v13276_v10, %s12302_s11  ;;  %3310 = vrot.lane.b32.xlu1 %v13268_v4, %s12302_s11  ;;  %v1918_v7 = vpop.permute.xlu0 %1917  ;;  %17695 = vst [vmem:[#allocation53_spill] sm:$0xff] %v13394_v5 }
 0x125   :  { %v1921_v17 = vpop.permute.xlu1 %1920  ;;  %3312 = vrot.lane.b32.xlu2 %v13407_v36, %s12302_s11 }
 0x126   :  { %v13399_v61 = vsel %vm1934_vm9, %v1921_v17, %v1923_v0  ;;  %v13402_v8 = vsel %vm1934_vm9, %v1918_v7, %v1921_v17  ;;  %v17702_v17 = vperm.slane %v13254_v32, 4 }
 0x127   :  { %17697 = vst [vmem:[#allocation55_spill] sm:$0xff] %v13399_v61  ;;  %v1972_v50 = vmul.f32 %v17699_v13, %v13402_v8  ;;  %v1973_v0 = vmul.f32 %v17700_v37, %v13399_v61  ;;  %v13422_v6 = vpop.permute.xlu2 %2166 }
 0x128   :  { %17698 = vst [vmem:[#allocation56_spill] sm:$0xff] %v13402_v8  ;;  %v1976_v3 = vmul.f32 %v17702_v17, %v13394_v5  ;;  %v13432_v8 = vpop.f32.mrf.mxu2  ;;  %v17707_v5 = vperm.slane %v13254_v32, 5 }
 0x129   :  { %2000 = vmatpush.msra.mxu0 %v1972_v50  ;;  %2020 = vmatpush.msra.mxu1 %v1973_v0  ;;  %v13437_v50 = vld [vmem:[%s17312_s0 + $0x28] sm:$0xff] }
 0x12a   :  { %11795 = vmatmul.msk.f32.vlgmr.msra.gmra.mxu0 %vm174_vm1, %v11794_v1  ;;  %11796 = vmatmul.msk.f32.vlgmr.msra.gmra.mxu1 %vm174_vm1, %v11794_v1 }
 0x12b   :  { %11798 = vmatmul.msk.f32.vlgmr.msra.gmra.mxu3 %vm174_vm1, %v11794_v1  ;;  %2080 = vmatpush.msrb.mxu0 %v1976_v3  ;;  %v11804_v3 = vld [vmem:[%s17313_s3 + $0x41] ss:$8 sm:$0xf0] }
 0x12c   :  { %3308 = vrot.lane.b32.xlu0 %v13437_v50, %s12302_s11  ;;  %3538 = vrot.lane.b32.xlu1 %v13299_v33, %s12303_s18  ;;  %v1931_v0 = vpop.permute.xlu0 %1930  ;;  %v13472_v19 = vor.u32 %v11804_v3, %v11803_v2  ;;  %v13483_v2 = vpop.f32.mrf.mxu3  ;;  %v13499_v3 = vld [vmem:[%s17314_s1 + $0x48] sm:$0xff] }
 0x12d   :  { %v1933_v17 = vpop.permute.xlu1 %1932  ;;  %v13451_v13 = vsel %vm1934_vm9, %v13312_v34, %v1931_v0  ;;  %3540 = vrot.lane.b32.xlu2 %v13329_v20, %s12303_s18  ;;  %v17709_v34 = vperm.slane %v13254_v32, 7  ;;  %17713 = vst [vmem:[#allocation65_spill] sm:$0xff] %v13483_v2 }
 0x12e   :  { %17704 = vst [vmem:[#allocation59_spill] sm:$0xff] %v13451_v13  ;;  %v13454_v37 = vsel %vm1934_vm9, %v1931_v0, %v1933_v17  ;;  %v13457_v18 = vsel %vm1934_vm9, %v1933_v17, %v1918_v7  ;;  %v1977_v61 = vmul.f32 %v17707_v5, %v13451_v13  ;;  %v13470_v0 = vpop.f32.mrf.mxu0  ;;  %v13476_v17 = vpop.f32.mrf.mxu1  ;;  %v17719_v62 = vperm.slane %v13472_v19, 3 }
 0x12f   :  { %17705 = vst [vmem:[#allocation60_spill] sm:$0xff] %v13454_v37  ;;  %v1978_v12 = vmul.f32 %v17708_v54, %v13454_v37  ;;  %v1979_v9 = vmul.f32 %v17709_v34, %v13457_v18  ;;  %v13474_v7 = vpop.permute.xlu2 %2394  ;;  %v17419_v54 = vperm.slane %v13472_v19, 2  ;;  %v17717_v37 = vperm.slane %v13472_v19, 0 }
 0x130   :  { %17706 = vst [vmem:[#allocation61_spill] sm:$0xff] %v13457_v18  ;;  %2100 = vmatpush.msrb.mxu1 %v1977_v61  ;;  %v17718_v18 = vperm.slane %v13472_v19, 1 }
 0x131   :  { %17710 = vst [vmem:[#allocation62_spill] sm:$0xff] %v13470_v0  ;;  %2120 = vmatpush.msrb.mxu2 %v1978_v12  ;;  %2140 = vmatpush.msrb.mxu3 %v1979_v9  ;;  %v13489_v12 = vpop.f32.mrf.mxu2 }
 0x132   :  { %17711 = vst [vmem:[#allocation63_spill] sm:$0xff] %v13472_v19  ;;  %11799 = vmatmul.msk.f32.vlgmr.msrb.gmra.mxu0 %vm174_vm1, %v11794_v1  ;;  %11800 = vmatmul.msk.f32.vlgmr.msrb.gmra.mxu1 %vm174_vm1, %v11794_v1 }
 0x133   :  { %17712 = vst [vmem:[#allocation64_spill] sm:$0xff] %v13476_v17  ;;  %11801 = vmatmul.msk.f32.vlgmr.msrb.gmra.mxu2 %vm174_vm1, %v11794_v1  ;;  %11802 = vmatmul.msk.f32.vlgmr.msrb.gmra.mxu3 %vm174_vm1, %v11794_v1 }
 0x134   :  { %3534 = vrot.lane.b32.xlu0 %v13336_v63, %s12303_s18  ;;  %3536 = vrot.lane.b32.xlu1 %v13355_v15, %s12303_s18  ;;  %v2159_v9 = vpop.permute.xlu0 %2158 }
 0x135   :  { %v2161_v61 = vpop.permute.xlu1 %2160  ;;  %3542 = vrot.lane.b32.xlu2 %v13276_v10, %s12303_s18 }
 0x136   :  { %v2172_v1 = vsel %vm17574_vm10, %v2159_v9, %v2161_v61  ;;  %v13503_v32 = vpop.f32.mrf.mxu0  ;;  %v13507_v2 = vpop.f32.mrf.mxu1 }
 0x137   :  { %v2210_v5 = vmul.f32 %v17419_v54, %v2172_v1  ;;  %v13501_v34 = vpop.permute.xlu2 %2392  ;;  %17714 = vst [vmem:[#allocation66_spill] sm:$0xff] %v13503_v32 }
 0x138   :  { %17715 = vst [vmem:[#allocation67_spill] sm:$0xff] %v13507_v2 }
 0x139   :  { %2276 = vmatpush.msra.mxu2 %v2210_v5  ;;  %v13518_v5 = vpop.f32.mrf.mxu3  ;;  %v13523_v32 = vpop.f32.mrf.mxu2 }
 0x13a   :  { %17716 = vst [vmem:[#allocation68_spill] sm:$0xff] %v13518_v5  ;;  %v11814_v5 = vld [vmem:[%s17313_s3 + $0x42] ss:$8 sm:$0xf] }
 0x13b   :  { %11808 = vmatmul.msk.f32.vlgmr.msra.gmra.mxu2 %vm174_vm1, %v13499_v3 }
 0x13c   :  { %3546 = vrot.lane.b32.xlu0 %v13268_v4, %s12303_s18  ;;  %3548 = vrot.lane.b32.xlu1 %v13407_v36, %s12303_s18 }
 0x13d   :  { %v2157_v54 = vpop.permute.xlu0 %2156  ;;  %3544 = vrot.lane.b32.xlu2 %v13437_v50, %s12303_s18 }
 0x13e   :  { %v2171_v2 = vsel %vm17574_vm10, %v2157_v54, %v2159_v9  ;;  %v2186_v0 = vsel %vm17574_vm10, %v13368_v57, %v2157_v54  ;;  %v2163_v17 = vpop.permute.xlu1 %2162  ;;  %v11815_v9 = vld [vmem:[%s17313_s3 + $0x42] ss:$8 sm:$0xf0] }
 0x13f   :  { %v2208_v13 = vmul.f32 %v17717_v37, %v2186_v0  ;;  %v2209_v1 = vmul.f32 %v17718_v18, %v2171_v2  ;;  %v2173_v31 = vsel %vm17574_vm10, %v2161_v61, %v2163_v17  ;;  %v13536_v54 = vpop.permute.xlu2 %2404  ;;  %v13542_v18 = vor.u32 %v11815_v9, %v11814_v5  ;;  %v13544_v37 = vpop.f32.mrf.mxu0 }
 0x140   :  { %v2211_v60 = vmul.f32 %v17719_v62, %v2173_v31  ;;  %17721 = vst [vmem:[#allocation70_spill] sm:$0xff] %v13544_v37  ;;  %v17433_v0 = vperm.slane %v13472_v19, 6  ;;  %v17432_v62 = vperm.slane %v13472_v19, 7  ;;  %v2406_v31 = vsel %vm174_vm1, %v13501_v34, %v13474_v7 }
 0x141   :  { %2236 = vmatpush.msra.mxu0 %v2208_v13  ;;  %2256 = vmatpush.msra.mxu1 %v2209_v1  ;;  %17720 = vst [vmem:[#allocation69_spill] sm:$0xff] %v13542_v18  ;;  %v13558_v13 = vpop.f32.mrf.mxu1  ;;  %v13577_v41 = vpop.f32.mrf.mxu3  ;;  %v17725_v9 = vperm.slane %v13472_v19, 5 }
 0x142   :  { %2296 = vmatpush.msra.mxu3 %v2211_v60  ;;  %11806 = vmatmul.msk.f32.vlgmr.msra.gmra.mxu0 %vm174_vm1, %v13499_v3  ;;  %17722 = vst [vmem:[#allocation71_spill] sm:$0xff] %v13558_v13  ;;  %v13585_v39 = vpop.f32.mrf.mxu2 }
 0x143   :  { %11807 = vmatmul.msk.f32.vlgmr.msra.gmra.mxu1 %vm174_vm1, %v13499_v3  ;;  %11809 = vmatmul.msk.f32.vlgmr.msra.gmra.mxu3 %vm174_vm1, %v13499_v3  ;;  %17723 = vst [vmem:[#allocation72_spill] sm:$0xff] %v13577_v41 }
 0x144   :  { %3774 = vrot.lane.b32.xlu0 %v13299_v33, %s12304_s12  ;;  %3776 = vrot.lane.b32.xlu1 %v13329_v20, %s12304_s12  ;;  %17726 = vst [vmem:[#allocation73_spill] sm:$0xff] %v13585_v39 }
 0x145   :  { %v2169_v2 = vpop.permute.xlu0 %2168  ;;  %3770 = vrot.lane.b32.xlu2 %v13336_v63, %s12304_s12 }
 0x146   :  { %v2176_v61 = vsel %vm17574_vm10, %v13422_v6, %v2169_v2  ;;  %v2177_v1 = vsel %vm17574_vm10, %v2169_v2, %v13368_v57  ;;  %v2165_v5 = vpop.permute.xlu1 %2164  ;;  %v17724_v57 = vperm.slane %v13472_v19, 4 }
 0x147   :  { %v2214_v60 = vmul.f32 %v17433_v0, %v2176_v61  ;;  %v2215_v37 = vmul.f32 %v17432_v62, %v2177_v1  ;;  %v2174_v13 = vsel %vm17574_vm10, %v2163_v17, %v2165_v5  ;;  %v2175_v40 = vsel %vm17574_vm10, %v2165_v5, %v13422_v6  ;;  %v13583_v55 = vpop.permute.xlu2 %2631  ;;  %v11825_v5 = vld [vmem:[%s17313_s3 + $0x43] ss:$8 sm:$0xf] }
 0x148   :  { %v2212_v2 = vmul.f32 %v17724_v57, %v2174_v13  ;;  %v2213_v38 = vmul.f32 %v17725_v9, %v2175_v40  ;;  %v17727_v17 = vperm.slane %v13542_v18, 1  ;;  %v17431_v6 = vperm.slane %v13542_v18, 2  ;;  %v13626_v57 = vld [vmem:[%s17314_s1 + $0x50] sm:$0xff] }
 0x149   :  { %2356 = vmatpush.msrb.mxu2 %v2214_v60  ;;  %2376 = vmatpush.msrb.mxu3 %v2215_v37  ;;  %v17434_v40 = vperm.slane %v13542_v18, 0 }
 0x14a   :  { %2316 = vmatpush.msrb.mxu0 %v2212_v2  ;;  %2336 = vmatpush.msrb.mxu1 %v2213_v38  ;;  %v2444_v61 = vmul.f32 %v17727_v17, %v2406_v31  ;;  %v13599_v38 = vpop.f32.mrf.mxu0 }
 0x14b   :  { %11810 = vmatmul.msk.f32.vlgmr.msrb.gmra.mxu0 %vm174_vm1, %v13499_v3  ;;  %11811 = vmatmul.msk.f32.vlgmr.msrb.gmra.mxu1 %vm174_vm1, %v13499_v3  ;;  %17728 = vst [vmem:[#allocation74_spill] sm:$0xff] %v13599_v38  ;;  %v17735_v38 = vperm.slane %v13542_v18, 7 }
 0x14c   :  { %11812 = vmatmul.msk.f32.vlgmr.msrb.gmra.mxu2 %vm174_vm1, %v13499_v3  ;;  %11813 = vmatmul.msk.f32.vlgmr.msrb.gmra.mxu3 %vm174_vm1, %v13499_v3  ;;  %v13609_v3 = vpop.f32.mrf.mxu1 }
 0x14d   :  { %3772 = vrot.lane.b32.xlu0 %v13355_v15, %s12304_s12  ;;  %3778 = vrot.lane.b32.xlu1 %v13276_v10, %s12304_s12  ;;  %v2397_v37 = vpop.permute.xlu0 %2396  ;;  %17729 = vst [vmem:[#allocation75_spill] sm:$0xff] %v13609_v3 }
 0x14e   :  { %v2407_v31 = vsel %vm174_vm1, %v13474_v7, %v2397_v37  ;;  %v2390_v60 = vpop.permute.xlu1 %2389  ;;  %2491 = vmatpush.msra.mxu1 %v2444_v61  ;;  %3782 = vrot.lane.b32.xlu2 %v13268_v4, %s12304_s12  ;;  %v11826_v7 = vld [vmem:[%s17313_s3 + $0x43] ss:$8 sm:$0xf0]  ;;  %v13634_v61 = vpop.f32.mrf.mxu2 }
 0x14f   :  { %v2445_v13 = vmul.f32 %v17431_v6, %v2407_v31  ;;  %v2421_v1 = vsel %vm174_vm1, %v2390_v60, %v13501_v34  ;;  %v13628_v2 = vpop.permute.xlu2 %2633  ;;  %v13630_v34 = vpop.f32.mrf.mxu3  ;;  %v13632_v17 = vor.u32 %v11826_v7, %v11825_v5  ;;  %v17437_v31 = vperm.slane %v13542_v18, 3 }
 0x150   :  { %v2443_v9 = vmul.f32 %v17434_v40, %v2421_v1  ;;  %17730 = vst [vmem:[#allocation76_spill] sm:$0xff] %v13630_v34  ;;  %v2412_v6 = vsel %vm174_vm1, %v13536_v54, %v2390_v60 }
 0x151   :  { %2511 = vmatpush.msra.mxu2 %v2445_v13  ;;  %17731 = vst [vmem:[#allocation77_spill] sm:$0xff] %v13632_v17  ;;  %v17438_v13 = vperm.slane %v13542_v18, 6  ;;  %v17733_v60 = vperm.slane %v13632_v17, 3  ;;  %v2450_v41 = vmul.f32 %v17735_v38, %v2412_v6 }
 0x152   :  { %2471 = vmatpush.msra.mxu0 %v2443_v9  ;;  %v2644_v9 = vsel %vm17573_vm11, %v13583_v55, %v13628_v2  ;;  %v13658_v40 = vpop.f32.mrf.mxu0 }
 0x153   :  { %11817 = vmatmul.msk.f32.vlgmr.msra.gmra.mxu0 %vm174_vm1, %v13626_v57  ;;  %11818 = vmatmul.msk.f32.vlgmr.msra.gmra.mxu1 %vm174_vm1, %v13626_v57  ;;  %17732 = vst [vmem:[#allocation78_spill] sm:$0xff] %v13658_v40  ;;  %v2682_v34 = vmul.f32 %v17733_v60, %v2644_v9  ;;  %v17441_v9 = vperm.slane %v13632_v17, 2 }
 0x154   :  { %11819 = vmatmul.msk.f32.vlgmr.msra.gmra.mxu2 %vm174_vm1, %v13626_v57  ;;  %v13670_v3 = vpop.f32.mrf.mxu1 }
 0x155   :  { %3784 = vrot.lane.b32.xlu0 %v13407_v36, %s12304_s12  ;;  %3780 = vrot.lane.b32.xlu1 %v13437_v50, %s12304_s12  ;;  %v2399_v7 = vpop.permute.xlu0 %2398  ;;  %17734 = vst [vmem:[#allocation79_spill] sm:$0xff] %v13670_v3 }
 0x156   :  { %v2408_v62 = vsel %vm174_vm1, %v2397_v37, %v2399_v7  ;;  %v2403_v0 = vpop.permute.xlu1 %2402  ;;  %4010 = vrot.lane.b32.xlu2 %v13299_v33, %s17474_s13  ;;  %v13683_v60 = vpop.f32.mrf.mxu2 }
 0x157   :  { %v2446_v5 = vmul.f32 %v17437_v31, %v2408_v62  ;;  %v2411_v1 = vsel %vm174_vm1, %v2403_v0, %v13536_v54  ;;  %v13668_v37 = vpop.permute.xlu2 %2635  ;;  %v17440_v54 = vperm.slane %v13542_v18, 4  ;;  %v17439_v62 = vperm.slane %v13542_v18, 5  ;;  %17737 = vst [vmem:[#allocation81_spill] sm:$0xff] %v13683_v60 }
 0x158   :  { %v2449_v19 = vmul.f32 %v17438_v13, %v2411_v1  ;;  %v13678_v1 = vpop.f32.mrf.mxu3 }
 0x159   :  { %2531 = vmatpush.msra.mxu3 %v2446_v5  ;;  %17736 = vst [vmem:[#allocation80_spill] sm:$0xff] %v13678_v1 }
 0x15a   :  { %2591 = vmatpush.msrb.mxu2 %v2449_v19  ;;  %11820 = vmatmul.msk.f32.vlgmr.msra.gmra.mxu3 %vm174_vm1, %v13626_v57 }
 0x15b   :  { %2611 = vmatpush.msrb.mxu3 %v2450_v41 }
 0x15c   :  { %11823 = vmatmul.msk.f32.vlgmr.msrb.gmra.mxu2 %vm174_vm1, %v13626_v57 }
 0x15d   :  { %2767 = vmatpush.msra.mxu3 %v2682_v34  ;;  %4012 = vrot.lane.b32.xlu0 %v13329_v20, %s17474_s13  ;;  %v2401_v19 = vpop.permute.xlu0 %2400 }
 0x15e   :  { %4006 = vrot.lane.b32.xlu1 %v13336_v63, %s17474_s13  ;;  %v2409_v41 = vsel %vm174_vm1, %v2399_v7, %v2401_v19  ;;  %v2410_v6 = vsel %vm174_vm1, %v2401_v19, %v2403_v0  ;;  %v2630_v38 = vpop.permute.xlu1 %2629  ;;  %4008 = vrot.lane.b32.xlu2 %v13355_v15, %s17474_s13  ;;  %v13703_v7 = vpop.f32.mrf.mxu0  ;;  %v11827_v0 = vld [vmem:[%s17314_s1 + $0x58] sm:$0xff] }
 0x15f   :  { %v2447_v34 = vmul.f32 %v17440_v54, %v2409_v41  ;;  %v2448_v5 = vmul.f32 %v17439_v62, %v2410_v6  ;;  %v2643_v31 = vsel %vm17573_vm11, %v2630_v38, %v13583_v55  ;;  %v13701_v1 = vpop.permute.xlu2 %2860  ;;  %17738 = vst [vmem:[#allocation82_spill] sm:$0xff] %v13703_v7  ;;  %v13710_v19 = vpop.f32.mrf.mxu1  ;;  %v17444_v55 = vperm.slane %v13632_v17, 0 }
 0x160   :  { %v2681_v13 = vmul.f32 %v17441_v9, %v2643_v31  ;;  %17739 = vst [vmem:[#allocation83_spill] sm:$0xff] %v13710_v19  ;;  %v17445_v31 = vperm.slane %v13632_v17, 1  ;;  %v2645_v6 = vsel %vm17573_vm11, %v13628_v2, %v13668_v37  ;;  %v17742_v2 = vperm.slane %v13632_v17, 4 }
 0x161   :  { %2551 = vmatpush.msrb.mxu0 %v2447_v34  ;;  %2571 = vmatpush.msrb.mxu1 %v2448_v5  ;;  %v13731_v5 = vpop.f32.mrf.mxu2  ;;  %v17746_v7 = vperm.slane %v13632_v17, 6 }
 0x162   :  { %2747 = vmatpush.msra.mxu2 %v2681_v13  ;;  %11821 = vmatmul.msk.f32.vlgmr.msrb.gmra.mxu0 %vm174_vm1, %v13626_v57  ;;  %17741 = vst [vmem:[#allocation85_spill] sm:$0xff] %v13731_v5  ;;  %v2683_v18 = vmul.f32 %v17742_v2, %v2645_v6 }
 0x163   :  { %11822 = vmatmul.msk.f32.vlgmr.msrb.gmra.mxu1 %vm174_vm1, %v13626_v57  ;;  %11824 = vmatmul.msk.f32.vlgmr.msrb.gmra.mxu3 %vm174_vm1, %v13626_v57  ;;  %v13727_v57 = vpop.f32.mrf.mxu3 }
 0x164   :  { %11830 = vmatmul.msk.f32.vlgmr.msra.gmra.mxu2 %vm174_vm1, %v11827_v0  ;;  %17740 = vst [vmem:[#allocation84_spill] sm:$0xff] %v13727_v57 }
 0x165   :  { %4014 = vrot.lane.b32.xlu0 %v13276_v10, %s17474_s13  ;;  %v2625_v13 = vpop.permute.xlu0 %2624 }
 0x166   :  { %4018 = vrot.lane.b32.xlu1 %v13268_v4, %s17474_s13  ;;  %v2628_v34 = vpop.permute.xlu1 %2627  ;;  %4020 = vrot.lane.b32.xlu2 %v13407_v36, %s17474_s13  ;;  %v13743_v19 = vpop.f32.mrf.mxu0 }
 0x167   :  { %v2642_v62 = vsel %vm17573_vm11, %v2628_v34, %v2630_v38  ;;  %v2657_v54 = vsel %vm17573_vm11, %v2625_v13, %v2628_v34  ;;  %v13741_v57 = vpop.permute.xlu2 %2873  ;;  %17743 = vst [vmem:[#allocation86_spill] sm:$0xff] %v13743_v19  ;;  %v17447_v38 = vperm.slane %v13632_v17, 5  ;;  %v13751_v6 = vpop.f32.mrf.mxu1  ;;  %v11837_v34 = vld [vmem:[%s17313_s3 + $0x44] ss:$8 sm:$0xf0]  ;;  %v17747_v19 = vperm.slane %v13632_v17, 7 }
 0x168   :  { %v2679_v9 = vmul.f32 %v17444_v55, %v2657_v54  ;;  %v2680_v41 = vmul.f32 %v17445_v31, %v2642_v62  ;;  %17744 = vst [vmem:[#allocation87_spill] sm:$0xff] %v13751_v6  ;;  %v11847_v17 = vld [vmem:[%s17313_s3 + $0x45] ss:$8 sm:$0xf] }
 0x16a   :  { %2707 = vmatpush.msra.mxu0 %v2679_v9  ;;  %2727 = vmatpush.msra.mxu1 %v2680_v41  ;;  %v11836_v41 = vld [vmem:[%s17313_s3 + $0x44] ss:$8 sm:$0xf] }
 0x16b   :  { %11828 = vmatmul.msk.f32.vlgmr.msra.gmra.mxu0 %vm174_vm1, %v11827_v0  ;;  %11829 = vmatmul.msk.f32.vlgmr.msra.gmra.mxu1 %vm174_vm1, %v11827_v0  ;;  %v13767_v54 = vpop.f32.mrf.mxu3  ;;  %v13773_v3 = vor.u32 %v11837_v34, %v11836_v41 }
 0x16c   :  { %11831 = vmatmul.msk.f32.vlgmr.msra.gmra.mxu3 %vm174_vm1, %v11827_v0  ;;  %2787 = vmatpush.msrb.mxu0 %v2683_v18  ;;  %17745 = vst [vmem:[#allocation88_spill] sm:$0xff] %v13767_v54 }
 0x16d   :  { %4016 = vrot.lane.b32.xlu0 %v13437_v50, %s17474_s13  ;;  %v2638_v9 = vpop.permute.xlu0 %2637  ;;  %17748 = vst [vmem:[#allocation89_spill] sm:$0xff] %v13773_v3  ;;  %v17757_v54 = vperm.slane %v13773_v3, 1 }
 0x16e   :  { %v2646_v2 = vsel %vm17573_vm11, %v13668_v37, %v2638_v9  ;;  %v2640_v55 = vpop.permute.xlu1 %2639  ;;  %v13777_v37 = vpop.f32.mrf.mxu2 }
 0x16f   :  { %v2684_v18 = vmul.f32 %v17447_v38, %v2646_v2  ;;  %v2647_v31 = vsel %vm17573_vm11, %v2638_v9, %v2640_v55  ;;  %v2648_v62 = vsel %vm17573_vm11, %v2640_v55, %v2625_v13  ;;  %v13775_v60 = vpop.permute.xlu2 %3302  ;;  %17749 = vst [vmem:[#allocation90_spill] sm:$0xff] %v13777_v37  ;;  %v13779_v9 = vpop.f32.mrf.mxu0  ;;  %v17758_v37 = vperm.slane %v13773_v3, 3 }
 0x170   :  { %v2685_v6 = vmul.f32 %v17746_v7, %v2647_v31  ;;  %v2686_v40 = vmul.f32 %v17747_v19, %v2648_v62  ;;  %17750 = vst [vmem:[#allocation91_spill] sm:$0xff] %v13779_v9  ;;  %v17446_v7 = vperm.slane %v13773_v3, 2  ;;  %v13786_v19 = vpop.f32.mrf.mxu1 }
 0x171   :  { %2807 = vmatpush.msrb.mxu1 %v2684_v18  ;;  %17751 = vst [vmem:[#allocation92_spill] sm:$0xff] %v13786_v19  ;;  %v17756_v19 = vperm.slane %v13773_v3, 0 }
 0x172   :  { %2827 = vmatpush.msrb.mxu2 %v2685_v6  ;;  %2847 = vmatpush.msrb.mxu3 %v2686_v40  ;;  %v13796_v6 = vld [vmem:[%s17314_s1 + $0x60] sm:$0xff] }
 0x173   :  { %11832 = vmatmul.msk.f32.vlgmr.msrb.gmra.mxu0 %vm174_vm1, %v11827_v0  ;;  %11833 = vmatmul.msk.f32.vlgmr.msrb.gmra.mxu1 %vm174_vm1, %v11827_v0 }
 0x174   :  { %11834 = vmatmul.msk.f32.vlgmr.msrb.gmra.mxu2 %vm174_vm1, %v11827_v0  ;;  %11835 = vmatmul.msk.f32.vlgmr.msrb.gmra.mxu3 %vm174_vm1, %v11827_v0  ;;  %v13798_v0 = vpop.f32.mrf.mxu3 }
 0x175   :  { %v2866_v55 = vpop.permute.xlu0 %2865  ;;  %17752 = vst [vmem:[#allocation93_spill] sm:$0xff] %v13798_v0 }
 0x176   :  { %v2868_v31 = vpop.permute.xlu1 %2867  ;;  %v13800_v41 = vpop.f32.mrf.mxu2 }
 0x177   :  { %v2879_v13 = vsel %vm17572_vm12, %v2866_v55, %v2868_v31  ;;  %v13791_v62 = vpop.permute.xlu2 %3300  ;;  %17753 = vst [vmem:[#allocation94_spill] sm:$0xff] %v13800_v41 }
 0x178   :  { %v2917_v40 = vmul.f32 %v17446_v7, %v2879_v13  ;;  %v13807_v13 = vpop.f32.mrf.mxu0  ;;  %v13815_v0 = vpop.f32.mrf.mxu1 }
 0x179   :  { %17754 = vst [vmem:[#allocation95_spill] sm:$0xff] %v13807_v13 }
 0x17a   :  { %2983 = vmatpush.msra.mxu2 %v2917_v40  ;;  %v11848_v40 = vld [vmem:[%s17313_s3 + $0x45] ss:$8 sm:$0xf0]  ;;  %17755 = vst [vmem:[#allocation96_spill] sm:$0xff] %v13815_v0  ;;  %v17765_v0 = vperm.slane %v13773_v3, 5 }
 0x17b   :  { %v13829_v5 = vor.u32 %v11848_v40, %v11847_v17  ;;  %v17764_v40 = vperm.slane %v13773_v3, 4 }
 0x17c   :  { %11841 = vmatmul.msk.f32.vlgmr.msra.gmra.mxu2 %vm174_vm1, %v13796_v6 }
 0x17d   :  { %v2864_v7 = vpop.permute.xlu0 %2863  ;;  %17759 = vst [vmem:[#allocation97_spill] sm:$0xff] %v13829_v5 }
 0x17e   :  { %v2870_v38 = vpop.permute.xlu1 %2869  ;;  %v2878_v34 = vsel %vm17572_vm12, %v2864_v7, %v2866_v55  ;;  %v2893_v2 = vsel %vm17572_vm12, %v13701_v1, %v2864_v7  ;;  %v13833_v7 = vpop.f32.mrf.mxu3 }
 0x17f   :  { %v2880_v18 = vsel %vm17572_vm12, %v2868_v31, %v2870_v38  ;;  %v2915_v9 = vmul.f32 %v17756_v19, %v2893_v2  ;;  %v2916_v13 = vmul.f32 %v17757_v54, %v2878_v34  ;;  %v13827_v39 = vpop.permute.xlu2 %3312  ;;  %17760 = vst [vmem:[#allocation98_spill] sm:$0xff] %v13833_v7  ;;  %v17450_v54 = vperm.slane %v13773_v3, 6  ;;  %v13843_v19 = vpop.f32.mrf.mxu2 }
 0x180   :  { %v2918_v41 = vmul.f32 %v17758_v37, %v2880_v18  ;;  %17761 = vst [vmem:[#allocation99_spill] sm:$0xff] %v13843_v19  ;;  %v13858_v37 = vpop.f32.mrf.mxu0 }
 0x181   :  { %2943 = vmatpush.msra.mxu0 %v2915_v9  ;;  %2963 = vmatpush.msra.mxu1 %v2916_v13  ;;  %17762 = vst [vmem:[#allocation100_spill] sm:$0xff] %v13858_v37  ;;  %v17763_v13 = vperm.slane %v13773_v3, 7 }
 0x182   :  { %3003 = vmatpush.msra.mxu3 %v2918_v41  ;;  %11839 = vmatmul.msk.f32.vlgmr.msra.gmra.mxu0 %vm174_vm1, %v13796_v6 }
 0x183   :  { %11840 = vmatmul.msk.f32.vlgmr.msra.gmra.mxu1 %vm174_vm1, %v13796_v6  ;;  %11842 = vmatmul.msk.f32.vlgmr.msra.gmra.mxu3 %vm174_vm1, %v13796_v6 }
 0x185   :  { %v2876_v41 = vpop.permute.xlu0 %2875 }
 0x186   :  { %v2872_v34 = vpop.permute.xlu1 %2871  ;;  %v2883_v17 = vsel %vm17572_vm12, %v13741_v57, %v2876_v41  ;;  %v2884_v9 = vsel %vm17572_vm12, %v2876_v41, %v13701_v1  ;;  %v11858_v1 = vld [vmem:[%s17313_s3 + $0x46] ss:$8 sm:$0xf] }
 0x187   :  { %v2881_v55 = vsel %vm17572_vm12, %v2870_v38, %v2872_v34  ;;  %v2882_v31 = vsel %vm17572_vm12, %v2872_v34, %v13741_v57  ;;  %v2921_v18 = vmul.f32 %v17450_v54, %v2883_v17  ;;  %v2922_v2 = vmul.f32 %v17763_v13, %v2884_v9  ;;  %v13871_v38 = vpop.permute.xlu2 %3540  ;;  %v13873_v57 = vpop.f32.mrf.mxu1  ;;  %v11859_v17 = vld [vmem:[%s17313_s3 + $0x46] ss:$8 sm:$0xf0] }
 0x188   :  { %v2919_v7 = vmul.f32 %v17764_v40, %v2881_v55  ;;  %v2920_v19 = vmul.f32 %v17765_v0, %v2882_v31  ;;  %17766 = vst [vmem:[#allocation101_spill] sm:$0xff] %v13873_v57  ;;  %v17455_v9 = vperm.slane %v13829_v5, 4  ;;  %v17767_v55 = vperm.slane %v13829_v5, 1 }
 0x189   :  { %v17768_v31 = vperm.slane %v13829_v5, 2  ;;  %v17454_v34 = vperm.slane %v13829_v5, 7  ;;  %3063 = vmatpush.msrb.mxu2 %v2921_v18  ;;  %3083 = vmatpush.msrb.mxu3 %v2922_v2  ;;  %v17769_v13 = vperm.slane %v13829_v5, 0  ;;  %v17770_v54 = vperm.slane %v13829_v5, 3  ;;  %v13904_v18 = vpop.f32.mrf.mxu2 }
 0x18a   :  { %3023 = vmatpush.msrb.mxu0 %v2919_v7  ;;  %3043 = vmatpush.msrb.mxu1 %v2920_v19  ;;  %v3118_v0 = vmul.f32 %v13355_v15, %v17767_v55  ;;  %v13896_v15 = vor.u32 %v11859_v17, %v11858_v1  ;;  %v17773_v2 = vperm.slane %v13829_v5, 6 }
 0x18b   :  { %v3119_v41 = vmul.f32 %v13299_v33, %v17768_v31  ;;  %v3117_v40 = vmul.f32 %v13336_v63, %v17769_v13  ;;  %v3120_v7 = vmul.f32 %v13329_v20, %v17770_v54  ;;  %11843 = vmatmul.msk.f32.vlgmr.msrb.gmra.mxu0 %vm174_vm1, %v13796_v6  ;;  %11844 = vmatmul.msk.f32.vlgmr.msrb.gmra.mxu1 %vm174_vm1, %v13796_v6  ;;  %v17772_v33 = vperm.slane %v13829_v5, 5  ;;  %v13913_v54 = vpop.f32.mrf.mxu3  ;;  %v11849_v13 = vld [vmem:[%s17314_s1 + $0x68] sm:$0xff] }
 0x18c   :  { %17771 = vst [vmem:[#allocation102_spill] sm:$0xff] %v13896_v15  ;;  %v3123_v63 = vmul.f32 %v13268_v4, %v17773_v2  ;;  %11845 = vmatmul.msk.f32.vlgmr.msrb.gmra.mxu2 %vm174_vm1, %v13796_v6  ;;  %11846 = vmatmul.msk.f32.vlgmr.msrb.gmra.mxu3 %vm174_vm1, %v13796_v6  ;;  %v3121_v20 = vmul.f32 %v13276_v10, %v17455_v9  ;;  %v17452_v6 = vperm.slane %v13896_v15, 0  ;;  %v13922_v10 = vpop.f32.mrf.mxu0  ;;  %v17451_v31 = vperm.slane %v13896_v15, 1 }
 0x18d   :  { %v3122_v19 = vmul.f32 %v13437_v50, %v17772_v33  ;;  %17774 = vst [vmem:[#allocation103_spill] sm:$0xff] %v13913_v54  ;;  %v17453_v50 = vperm.slane %v13896_v15, 2  ;;  %v3305_v1 = vpop.permute.xlu0 %3304  ;;  %3165 = vmatpush.msra.mxu1 %v3118_v0  ;;  %3185 = vmatpush.msra.mxu2 %v3119_v41  ;;  %v3124_v4 = vmul.f32 %v13407_v36, %v17454_v34 }
 0x18e   :  { %v3317_v17 = vsel %vm17571_vm13, %v13775_v60, %v3305_v1  ;;  %v3299_v55 = vpop.permute.xlu1 %3298  ;;  %3145 = vmatpush.msra.mxu0 %v3117_v40  ;;  %3205 = vmatpush.msra.mxu3 %v3120_v7  ;;  %v3316_v36 = vsel %vm17571_vm13, %v13791_v62, %v13775_v60  ;;  %v17458_v60 = vperm.slane %v13896_v15, 3 }
 0x18f   :  { %v3315_v0 = vsel %vm17571_vm13, %v3299_v55, %v13791_v62  ;;  %3245 = vmatpush.msrb.mxu1 %v3122_v19  ;;  %3265 = vmatpush.msrb.mxu2 %v3123_v63  ;;  %v13927_v41 = vpop.f32.mrf.mxu1  ;;  %v3355_v40 = vmul.f32 %v17453_v50, %v3317_v17  ;;  %v13937_v7 = vpop.permute.xlu2 %3542  ;;  %v3354_v19 = vmul.f32 %v17451_v31, %v3316_v36  ;;  %v17457_v63 = vperm.slane %v13896_v15, 6  ;;  %v11869_v17 = vld [vmem:[%s17313_s3 + $0x47] ss:$8 sm:$0xf] }
 0x190   :  { %17775 = vst [vmem:[#allocation104_spill] sm:$0xff] %v13927_v41  ;;  %3225 = vmatpush.msrb.mxu0 %v3121_v20  ;;  %3285 = vmatpush.msrb.mxu3 %v3124_v4  ;;  %v3353_v33 = vmul.f32 %v17452_v6, %v3315_v0  ;;  %v11870_v0 = vld [vmem:[%s17313_s3 + $0x47] ss:$8 sm:$0xf0] }
 0x191   :  { %v13958_v36 = vpop.f32.mrf.mxu2  ;;  %v13971_v50 = vor.u32 %v11870_v0, %v11869_v17 }
 0x193   :  { %11850 = vmatmul.msk.f32.vlgmr.msra.gmra.mxu0 %vm174_vm1, %v11849_v13  ;;  %11851 = vmatmul.msk.f32.vlgmr.msra.gmra.mxu1 %vm174_vm1, %v11849_v13  ;;  %v13948_v62 = vpop.f32.mrf.mxu3  ;;  %17778 = vst [vmem:[#allocation107_spill] sm:$0xff] %v13971_v50  ;;  %v17464_v0 = vperm.slane %v13971_v50, 2  ;;  %v17789_v54 = vperm.slane %v13971_v50, 7 }
 0x194   :  { %11852 = vmatmul.msk.f32.vlgmr.msra.gmra.mxu2 %vm174_vm1, %v11849_v13  ;;  %11853 = vmatmul.msk.f32.vlgmr.msra.gmra.mxu3 %vm174_vm1, %v11849_v13  ;;  %17776 = vst [vmem:[#allocation105_spill] sm:$0xff] %v13948_v62  ;;  %v13967_v31 = vpop.f32.mrf.mxu0 }
 0x195   :  { %3401 = vmatpush.msra.mxu1 %v3354_v19  ;;  %3421 = vmatpush.msra.mxu2 %v3355_v40  ;;  %v17456_v19 = vperm.slane %v13896_v15, 7  ;;  %17777 = vst [vmem:[#allocation106_spill] sm:$0xff] %v13967_v31 }
 0x196   :  { %v3307_v2 = vpop.permute.xlu0 %3306  ;;  %v3311_v4 = vpop.permute.xlu1 %3310  ;;  %3381 = vmatpush.msra.mxu0 %v3353_v33  ;;  %v3331_v33 = vsel %vm17571_vm13, %v13827_v39, %v3299_v55 }
 0x197   :  { %v3318_v20 = vsel %vm17571_vm13, %v3305_v1, %v3307_v2  ;;  %v3321_v1 = vsel %vm17571_vm13, %v3311_v4, %v13827_v39  ;;  %v13973_v34 = vpop.f32.mrf.mxu1  ;;  %v3360_v9 = vmul.f32 %v17456_v19, %v3331_v33  ;;  %v3545_v55 = vpop.permute.xlu2 %3544 }
 0x198   :  { %v3356_v40 = vmul.f32 %v17458_v60, %v3318_v20  ;;  %v3359_v6 = vmul.f32 %v17457_v63, %v3321_v1  ;;  %17779 = vst [vmem:[#allocation108_spill] sm:$0xff] %v13973_v34  ;;  %v17465_v20 = vperm.slane %v13896_v15, 4  ;;  %v3554_v63 = vsel %vm17476_vm14, %v13871_v38, %v13937_v7 }
 0x199   :  { %v13990_v60 = vpop.f32.mrf.mxu2 }
 0x19a   :  { %3441 = vmatpush.msra.mxu3 %v3356_v40  ;;  %v17463_v40 = vperm.slane %v13971_v50, 3 }
 0x19b   :  { %11854 = vmatmul.msk.f32.vlgmr.msrb.gmra.mxu0 %vm174_vm1, %v11849_v13  ;;  %11855 = vmatmul.msk.f32.vlgmr.msrb.gmra.mxu1 %vm174_vm1, %v11849_v13  ;;  %v13992_v39 = vpop.f32.mrf.mxu3 }
 0x19c   :  { %11856 = vmatmul.msk.f32.vlgmr.msrb.gmra.mxu2 %vm174_vm1, %v11849_v13  ;;  %11857 = vmatmul.msk.f32.vlgmr.msrb.gmra.mxu3 %vm174_vm1, %v11849_v13  ;;  %17780 = vst [vmem:[#allocation109_spill] sm:$0xff] %v13992_v39  ;;  %v3592_v5 = vmul.f32 %v17463_v40, %v3554_v63  ;;  %v14007_v3 = vpop.f32.mrf.mxu0  ;;  %v17468_v63 = vperm.slane %v13971_v50, 4 }
 0x19d   :  { %3521 = vmatpush.msrb.mxu3 %v3360_v9  ;;  %3501 = vmatpush.msrb.mxu2 %v3359_v6  ;;  %v17781_v6 = vperm.slane %v13896_v15, 5  ;;  %17782 = vst [vmem:[#allocation110_spill] sm:$0xff] %v14007_v3 }
 0x19e   :  { %v3309_v17 = vpop.permute.xlu0 %3308  ;;  %v3539_v19 = vpop.permute.xlu1 %3538 }
 0x19f   :  { %v3319_v1 = vsel %vm17571_vm13, %v3307_v2, %v3309_v17  ;;  %v3320_v33 = vsel %vm17571_vm13, %v3309_v17, %v3311_v4  ;;  %v3553_v2 = vsel %vm17476_vm14, %v3539_v19, %v13871_v38  ;;  %v11860_v4 = vld [vmem:[%s17314_s1 + $0x70] sm:$0xff]  ;;  %v17469_v38 = vperm.slane %v13971_v50, 0 }
 0x1a0   :  { %v3357_v9 = vmul.f32 %v17465_v20, %v3319_v1  ;;  %v3358_v13 = vmul.f32 %v17781_v6, %v3320_v33  ;;  %v3591_v17 = vmul.f32 %v17464_v0, %v3553_v2  ;;  %v14011_v1 = vpop.f32.mrf.mxu1  ;;  %v14018_v6 = vpop.permute.xlu2 %3770  ;;  %v3555_v2 = vsel %vm17476_vm14, %v13937_v7, %v3545_v55 }
 0x1a1   :  { %17783 = vst [vmem:[#allocation111_spill] sm:$0xff] %v14011_v1  ;;  %v14030_v15 = vpop.f32.mrf.mxu2  ;;  %v3593_v39 = vmul.f32 %v17468_v63, %v3555_v2  ;;  %v11880_v2 = vld [vmem:[%s17313_s3 + $0x80] ss:$8 sm:$0xf] }
 0x1a2   :  { %3461 = vmatpush.msrb.mxu0 %v3357_v9  ;;  %3481 = vmatpush.msrb.mxu1 %v3358_v13 }
 0x1a3   :  { %11861 = vmatmul.msk.f32.vlgmr.msra.gmra.mxu0 %vm174_vm1, %v11860_v4  ;;  %11862 = vmatmul.msk.f32.vlgmr.msra.gmra.mxu1 %vm174_vm1, %v11860_v4  ;;  %v14022_v40 = vpop.f32.mrf.mxu3 }
 0x1a4   :  { %11863 = vmatmul.msk.f32.vlgmr.msra.gmra.mxu2 %vm174_vm1, %v11860_v4  ;;  %11864 = vmatmul.msk.f32.vlgmr.msra.gmra.mxu3 %vm174_vm1, %v11860_v4  ;;  %17784 = vst [vmem:[#allocation112_spill] sm:$0xff] %v14022_v40  ;;  %v14034_v7 = vpop.f32.mrf.mxu0 }
 0x1a5   :  { %3657 = vmatpush.msra.mxu2 %v3591_v17  ;;  %3677 = vmatpush.msra.mxu3 %v3592_v5  ;;  %v17785_v17 = vperm.slane %v13971_v50, 1  ;;  %17786 = vst [vmem:[#allocation113_spill] sm:$0xff] %v14034_v7 }
 0x1a6   :  { %v3535_v9 = vpop.permute.xlu0 %3534  ;;  %v3537_v13 = vpop.permute.xlu1 %3536 }
 0x1a7   :  { %v3551_v0 = vsel %vm17476_vm14, %v3535_v9, %v3537_v13  ;;  %v3552_v20 = vsel %vm17476_vm14, %v3537_v13, %v3539_v19  ;;  %v17471_v19 = vperm.slane %v13971_v50, 5 }
 0x1a8   :  { %v3589_v33 = vmul.f32 %v17469_v38, %v3551_v0  ;;  %v3590_v5 = vmul.f32 %v17785_v17, %v3552_v20  ;;  %v14039_v13 = vpop.f32.mrf.mxu1  ;;  %v11881_v17 = vld [vmem:[%s17313_s3 + $0x80] ss:$8 sm:$0xf0]  ;;  %v14056_v20 = vpop.permute.xlu2 %3782 }
 0x1a9   :  { %17787 = vst [vmem:[#allocation114_spill] sm:$0xff] %v14039_v13  ;;  %v14065_v7 = vor.u32 %v11881_v17, %v11880_v2 }
 0x1aa   :  { %3617 = vmatpush.msra.mxu0 %v3589_v33  ;;  %3637 = vmatpush.msra.mxu1 %v3590_v5 }
 0x1ab   :  { %11865 = vmatmul.msk.f32.vlgmr.msrb.gmra.mxu0 %vm174_vm1, %v11860_v4  ;;  %11866 = vmatmul.msk.f32.vlgmr.msrb.gmra.mxu1 %vm174_vm1, %v11860_v4  ;;  %17790 = vst [vmem:[#allocation115_spill] sm:$0xff] %v14065_v7  ;;  %v14067_v40 = vpop.f32.mrf.mxu3  ;;  %v17797_v57 = vperm.slane %v14065_v7, 1  ;;  %v17805_v3 = vperm.slane %v14065_v7, 5 }
 0x1ac   :  { %11867 = vmatmul.msk.f32.vlgmr.msrb.gmra.mxu2 %vm174_vm1, %v11860_v4  ;;  %11868 = vmatmul.msk.f32.vlgmr.msrb.gmra.mxu3 %vm174_vm1, %v11860_v4  ;;  %17791 = vst [vmem:[#allocation116_spill] sm:$0xff] %v14067_v40 }
 0x1ad   :  { %3697 = vmatpush.msrb.mxu0 %v3593_v39  ;;  %v17788_v39 = vperm.slane %v13971_v50, 6 }
 0x1ae   :  { %v3547_v33 = vpop.permute.xlu0 %3546  ;;  %v3549_v63 = vpop.permute.xlu1 %3548 }
 0x1af   :  { %v3556_v5 = vsel %vm17476_vm14, %v3545_v55, %v3547_v33  ;;  %v3557_v38 = vsel %vm17476_vm14, %v3547_v33, %v3549_v63  ;;  %v3567_v0 = vsel %vm17476_vm14, %v3549_v63, %v3535_v9  ;;  %v11871_v55 = vld [vmem:[%s17314_s1 + $0x78] sm:$0xff]  ;;  %v14069_v9 = vpop.f32.mrf.mxu2  ;;  %vm17569_vm14 = vcmask 973824  }
 0x1b0   :  { %v3594_v4 = vmul.f32 %v17471_v19, %v3556_v5  ;;  %v3595_v13 = vmul.f32 %v17788_v39, %v3557_v38  ;;  %v3596_v34 = vmul.f32 %v17789_v54, %v3567_v0  ;;  %v17470_v54 = vperm.slane %v14065_v7, 2  ;;  %v14076_v38 = vpop.f32.mrf.mxu0  ;;  %v14078_v0 = vpop.f32.mrf.mxu1  ;;  %v11892_v39 = vld [vmem:[%s17313_s3 + $0x81] ss:$8 sm:$0xf0] }
 0x1b1   :  { %17792 = vst [vmem:[#allocation117_spill] sm:$0xff] %v14076_v38  ;;  %v14083_v2 = vpop.permute.xlu2 %4010  ;;  %v17477_v5 = vperm.slane %v14065_v7, 0 }
 0x1b2   :  { %3717 = vmatpush.msrb.mxu1 %v3594_v4  ;;  %3737 = vmatpush.msrb.mxu2 %v3595_v13  ;;  %17793 = vst [vmem:[#allocation118_spill] sm:$0xff] %v14078_v0  ;;  %v17803_v0 = vperm.slane %v14065_v7, 7 }
 0x1b3   :  { %3757 = vmatpush.msrb.mxu3 %v3596_v34  ;;  %11872 = vmatmul.msk.f32.vlgmr.msra.gmra.mxu0 %vm174_vm1, %v11871_v55  ;;  %v14085_v17 = vpop.f32.mrf.mxu3 }
 0x1b4   :  { %11873 = vmatmul.msk.f32.vlgmr.msra.gmra.mxu1 %vm174_vm1, %v11871_v55  ;;  %11874 = vmatmul.msk.f32.vlgmr.msra.gmra.mxu2 %vm174_vm1, %v11871_v55  ;;  %17794 = vst [vmem:[#allocation119_spill] sm:$0xff] %v14085_v17 }
 0x1b5   :  { %11875 = vmatmul.msk.f32.vlgmr.msra.gmra.mxu3 %vm174_vm1, %v11871_v55 }
 0x1b6   :  { %v3775_v63 = vpop.permute.xlu0 %3774  ;;  %v3777_v13 = vpop.permute.xlu1 %3776 }
 0x1b7   :  { %v3789_v34 = vsel %vm17570_vm15, %v3775_v63, %v3777_v13 }
 0x1b8   :  { %v3827_v33 = vmul.f32 %v17470_v54, %v3789_v34  ;;  %v14094_v34 = vpop.f32.mrf.mxu2  ;;  %v14096_v19 = vpop.f32.mrf.mxu0 }
 0x1b9   :  { %17795 = vst [vmem:[#allocation120_spill] sm:$0xff] %v14096_v19  ;;  %v14108_v4 = vpop.f32.mrf.mxu1 }
 0x1ba   :  { %3893 = vmatpush.msra.mxu2 %v3827_v33  ;;  %17796 = vst [vmem:[#allocation121_spill] sm:$0xff] %v14108_v4  ;;  %v4009_v4 = vpop.permute.xlu2 %4008 }
 0x1bb   :  { %11876 = vmatmul.msk.f32.vlgmr.msrb.gmra.mxu0 %vm174_vm1, %v11871_v55 }
 0x1bc   :  { %11877 = vmatmul.msk.f32.vlgmr.msrb.gmra.mxu1 %vm174_vm1, %v11871_v55  ;;  %11878 = vmatmul.msk.f32.vlgmr.msrb.gmra.mxu2 %vm174_vm1, %v11871_v55 }
 0x1bd   :  { %11879 = vmatmul.msk.f32.vlgmr.msrb.gmra.mxu3 %vm174_vm1, %v11871_v55  ;;  %v11891_v55 = vld [vmem:[%s17313_s3 + $0x81] ss:$8 sm:$0xf] }
 0x1be   :  { %v14119_v62 = vor.u32 %v11892_v39, %v11891_v55 }
 0x1bf   :  { %v3773_v54 = vpop.permute.xlu0 %3772  ;;  %v3779_v33 = vpop.permute.xlu1 %3778 }
 0x1c0   :  { %v3787_v50 = vsel %vm17570_vm15, %v14018_v6, %v3773_v54  ;;  %v3788_v40 = vsel %vm17570_vm15, %v3773_v54, %v3775_v63  ;;  %v3790_v17 = vsel %vm17570_vm15, %v3777_v13, %v3779_v33  ;;  %v17798_v54 = vperm.slane %v14065_v7, 3  ;;  %v11882_v13 = vld [vmem:[%s17314_s1 + $0x80] sm:$0xff]  ;;  %17799 = vst [vmem:[#allocation122_spill] sm:$0xff] %v14119_v62 }
 0x1c1   :  { %v3825_v19 = vmul.f32 %v17477_v5, %v3787_v50  ;;  %v3826_v31 = vmul.f32 %v17797_v57, %v3788_v40  ;;  %v14136_v5 = vpop.f32.mrf.mxu0 }
 0x1c2   :  { %v3828_v63 = vmul.f32 %v17798_v54, %v3790_v17  ;;  %v14130_v17 = vpop.f32.mrf.mxu3  ;;  %17801 = vst [vmem:[#allocation124_spill] sm:$0xff] %v14136_v5  ;;  %v17802_v54 = vperm.slane %v14065_v7, 6  ;;  %v17804_v5 = vperm.slane %v14065_v7, 4 }
 0x1c3   :  { %3853 = vmatpush.msra.mxu0 %v3825_v19  ;;  %3873 = vmatpush.msra.mxu1 %v3826_v31  ;;  %v14128_v31 = vpop.f32.mrf.mxu2  ;;  %17800 = vst [vmem:[#allocation123_spill] sm:$0xff] %v14130_v17  ;;  %v14145_v17 = vpop.f32.mrf.mxu1 }
 0x1c4   :  { %3913 = vmatpush.msra.mxu3 %v3828_v63  ;;  %11883 = vmatmul.msk.f32.vlgmr.msra.gmra.mxu0 %vm174_vm1, %v11882_v13  ;;  %v4024_v63 = vsel %vm17569_vm14, %v4009_v4, %v14083_v2 }
 0x1c5   :  { %11884 = vmatmul.msk.f32.vlgmr.msra.gmra.mxu1 %vm174_vm1, %v11882_v13  ;;  %11885 = vmatmul.msk.f32.vlgmr.msra.gmra.mxu2 %vm174_vm1, %v11882_v13 }
 0x1c6   :  { %11886 = vmatmul.msk.f32.vlgmr.msra.gmra.mxu3 %vm174_vm1, %v11882_v13 }
 0x1c7   :  { %v3785_v39 = vpop.permute.xlu0 %3784  ;;  %v3781_v55 = vpop.permute.xlu1 %3780 }
 0x1c8   :  { %v3793_v40 = vsel %vm17570_vm15, %v14056_v20, %v3785_v39  ;;  %v3803_v19 = vsel %vm17570_vm15, %v3785_v39, %v14018_v6  ;;  %v3791_v50 = vsel %vm17570_vm15, %v3779_v33, %v3781_v55  ;;  %v3792_v57 = vsel %vm17570_vm15, %v3781_v55, %v14056_v20 }
 0x1c9   :  { %v3831_v37 = vmul.f32 %v17802_v54, %v3793_v40  ;;  %v3832_v38 = vmul.f32 %v17803_v0, %v3803_v19  ;;  %v3829_v1 = vmul.f32 %v17804_v5, %v3791_v50  ;;  %v3830_v41 = vmul.f32 %v17805_v3, %v3792_v57  ;;  %v11902_v5 = vld [vmem:[%s17313_s3 + $0x82] ss:$8 sm:$0xf]  ;;  %v14178_v40 = vpop.f32.mrf.mxu0 }
 0x1ca   :  { %v17806_v6 = vperm.slane %v14119_v62, 1  ;;  %v17478_v20 = vperm.slane %v14119_v62, 2  ;;  %v17479_v0 = vperm.slane %v14119_v62, 0  ;;  %v14163_v3 = vpop.f32.mrf.mxu3  ;;  %v11903_v50 = vld [vmem:[%s17313_s3 + $0x82] ss:$8 sm:$0xf0] }
 0x1cb   :  { %3933 = vmatpush.msrb.mxu0 %v3829_v1  ;;  %3953 = vmatpush.msrb.mxu1 %v3830_v41  ;;  %v14165_v1 = vpop.f32.mrf.mxu2  ;;  %17807 = vst [vmem:[#allocation125_spill] sm:$0xff] %v14178_v40  ;;  %v14187_v39 = vpop.f32.mrf.mxu1  ;;  %v14189_v55 = vor.u32 %v11903_v50, %v11902_v5  ;;  %v17482_v54 = vperm.slane %v14119_v62, 3  ;;  %v11913_v5 = vld [vmem:[%s17313_s3 + $0x83] ss:$8 sm:$0xf] }
 0x1cc   :  { %v4062_v33 = vmul.f32 %v17806_v6, %v4024_v63  ;;  %3973 = vmatpush.msrb.mxu2 %v3831_v37  ;;  %3993 = vmatpush.msrb.mxu3 %v3832_v38  ;;  %17808 = vst [vmem:[#allocation126_spill] sm:$0xff] %v14187_v39 }
 0x1cd   :  { %11887 = vmatmul.msk.f32.vlgmr.msrb.gmra.mxu0 %vm174_vm1, %v11882_v13  ;;  %11888 = vmatmul.msk.f32.vlgmr.msrb.gmra.mxu1 %vm174_vm1, %v11882_v13  ;;  %17809 = vst [vmem:[#allocation127_spill] sm:$0xff] %v14189_v55 }
 0x1ce   :  { %11889 = vmatmul.msk.f32.vlgmr.msrb.gmra.mxu2 %vm174_vm1, %v11882_v13  ;;  %11890 = vmatmul.msk.f32.vlgmr.msrb.gmra.mxu3 %vm174_vm1, %v11882_v13 }
 0x1cf   :  { %v4013_v41 = vpop.permute.xlu0 %4012  ;;  %4109 = vmatpush.msra.mxu1 %v4062_v33 }
 0x1d0   :  { %v4025_v37 = vsel %vm17569_vm14, %v14083_v2, %v4013_v41  ;;  %v4007_v38 = vpop.permute.xlu1 %4006  ;;  %v14185_v2 = vld [vmem:[%s17314_s1 + $0x88] sm:$0xff] }
 0x1d1   :  { %v4063_v57 = vmul.f32 %v17478_v20, %v4025_v37  ;;  %v4023_v13 = vsel %vm17569_vm14, %v4007_v38, %v4009_v4  ;;  %v4021_v4 = vpop.permute.xlu2 %4020  ;;  %v17812_v20 = vperm.slane %v14189_v55, 2  ;;  %v14228_v39 = vpop.f32.mrf.mxu0 }
 0x1d2   :  { %v4061_v19 = vmul.f32 %v17479_v0, %v4023_v13  ;;  %v4039_v13 = vsel %vm17569_vm14, %v4021_v4, %v4007_v38  ;;  %v14207_v0 = vpop.f32.mrf.mxu3  ;;  %v11914_v38 = vld [vmem:[%s17313_s3 + $0x83] ss:$8 sm:$0xf0] }
 0x1d3   :  { %4129 = vmatpush.msra.mxu2 %v4063_v57  ;;  %v14202_v57 = vpop.f32.mrf.mxu2  ;;  %17810 = vst [vmem:[#allocation128_spill] sm:$0xff] %v14207_v0  ;;  %v4265_v7 = vmul.f32 %v17812_v20, %v12652_v23  ;;  %v17813_v0 = vperm.slane %v14119_v62, 7  ;;  %v14232_v40 = vor.u32 %v11914_v38, %v11913_v5  ;;  %v14237_v20 = vpop.f32.mrf.mxu1  ;;  %v17511_v5 = vperm.slane %v14189_v55, 1 }
 0x1d4   :  { %4089 = vmatpush.msra.mxu0 %v4061_v19  ;;  %v17503_v38 = vperm.slane %v14189_v55, 7 }
 0x1d5   :  { %11894 = vmatmul.msk.f32.vlgmr.msra.gmra.mxu0 %vm174_vm1, %v14185_v2  ;;  %11895 = vmatmul.msk.f32.vlgmr.msra.gmra.mxu1 %vm174_vm1, %v14185_v2  ;;  %17815 = vst [vmem:[#allocation129_spill] sm:$0xff] %v14232_v40 }
 0x1d6   :  { %11896 = vmatmul.msk.f32.vlgmr.msra.gmra.mxu2 %vm174_vm1, %v14185_v2 }
 0x1d7   :  { %v4015_v37 = vpop.permute.xlu0 %4014 }
 0x1d8   :  { %v4026_v50 = vsel %vm17569_vm14, %v4013_v41, %v4015_v37  ;;  %v4019_v19 = vpop.permute.xlu1 %4018  ;;  %v17811_v41 = vperm.slane %v14119_v62, 6 }
 0x1d9   :  { %v4064_v63 = vmul.f32 %v17482_v54, %v4026_v50  ;;  %v4029_v6 = vsel %vm17569_vm14, %v4019_v19, %v4021_v4  ;;  %v4068_v50 = vmul.f32 %v17813_v0, %v4039_v13  ;;  %v17814_v4 = vperm.slane %v14189_v55, 3 }
 0x1da   :  { %v4067_v33 = vmul.f32 %v17811_v41, %v4029_v6  ;;  %v17816_v6 = vperm.slane %v14189_v55, 6  ;;  %v17532_v0 = vperm.slane %v14119_v62, 4 }
 0x1db   :  { %4149 = vmatpush.msra.mxu3 %v4064_v63  ;;  %v4266_v54 = vmul.f32 %v17814_v4, %v12688_v52  ;;  %v17531_v52 = vperm.slane %v14119_v62, 5  ;;  %v17512_v63 = vperm.slane %v14189_v55, 0  ;;  %v17502_v4 = vperm.slane %v14189_v55, 5 }
 0x1dc   :  { %4209 = vmatpush.msrb.mxu2 %v4067_v33  ;;  %11897 = vmatmul.msk.f32.vlgmr.msra.gmra.mxu3 %vm174_vm1, %v14185_v2  ;;  %v4269_v23 = vmul.f32 %v17816_v6, %v12646_v14  ;;  %v17485_v6 = vperm.slane %v14189_v55, 4 }
 0x1dd   :  { %4229 = vmatpush.msrb.mxu3 %v4068_v50  ;;  %v14253_v50 = vpop.f32.mrf.mxu3 }
 0x1de   :  { %4331 = vmatpush.msra.mxu2 %v4265_v7  ;;  %v17506_v7 = vperm.slane %v14232_v40, 2 }
 0x1df   :  { %11900 = vmatmul.msk.f32.vlgmr.msrb.gmra.mxu2 %vm174_vm1, %v14185_v2  ;;  %4351 = vmatpush.msra.mxu3 %v4266_v54  ;;  %v4017_v33 = vpop.permute.xlu0 %4016 }
 0x1e0   :  { %4411 = vmatpush.msrb.mxu2 %v4269_v23  ;;  %v4027_v14 = vsel %vm17569_vm14, %v4015_v37, %v4017_v33  ;;  %v4028_v13 = vsel %vm17569_vm14, %v4017_v33, %v4019_v19  ;;  %v14257_v23 = vpop.f32.mrf.mxu2  ;;  %v4263_v37 = vmul.f32 %v17512_v63, %v12561_v43  ;;  %v11904_v19 = vld [vmem:[%s17314_s1 + $0x90] sm:$0xff]  ;;  %v4264_v33 = vmul.f32 %v17511_v5, %v12610_v58 }
 0x1e1   :  { %v4065_v41 = vmul.f32 %v17532_v0, %v4027_v14  ;;  %v4066_v54 = vmul.f32 %v17531_v52, %v4028_v13  ;;  %v14268_v14 = vpop.f32.mrf.mxu0  ;;  %v4467_v43 = vmul.f32 %v17506_v7, %v12520_v26  ;;  %v4270_v13 = vmul.f32 %v17503_v38, %v12614_v59  ;;  %v17824_v38 = vld [vmem:[#allocation94_spill] sm:$0xff]  ;;  %v17835_v63 = vld [vmem:[#allocation16_spill] sm:$0xff] }
 0x1e2   :  { %v4268_v58 = vmul.f32 %v17502_v4, %v12656_v24  ;;  %v17483_v26 = vperm.slane %v14232_v40, 0  ;;  %v17484_v59 = vperm.slane %v14232_v40, 1  ;;  %v11924_v24 = vld [vmem:[%s17313_s3 + $0x84] ss:$8 sm:$0xf] }
 0x1e3   :  { %4169 = vmatpush.msrb.mxu0 %v4065_v41  ;;  %4189 = vmatpush.msrb.mxu1 %v4066_v54  ;;  %v14280_v41 = vpop.f32.mrf.mxu1  ;;  %v4267_v54 = vmul.f32 %v17485_v6, %v12691_v53  ;;  %v11925_v53 = vld [vmem:[%s17313_s3 + $0x84] ss:$8 sm:$0xf0] }
 0x1e4   :  { %11898 = vmatmul.msk.f32.vlgmr.msrb.gmra.mxu0 %vm174_vm1, %v14185_v2  ;;  %11899 = vmatmul.msk.f32.vlgmr.msrb.gmra.mxu1 %vm174_vm1, %v14185_v2 }
 0x1e5   :  { %11901 = vmatmul.msk.f32.vlgmr.msrb.gmra.mxu3 %vm174_vm1, %v14185_v2  ;;  %4291 = vmatpush.msra.mxu0 %v4263_v37  ;;  %v17492_v2 = vperm.slane %v14232_v40, 6  ;;  %v17501_v37 = vperm.slane %v14232_v40, 3 }
 0x1e6   :  { %4311 = vmatpush.msra.mxu1 %v4264_v33  ;;  %4431 = vmatpush.msrb.mxu3 %v4270_v13  ;;  %v4465_v33 = vmul.f32 %v17483_v26, %v12526_v28  ;;  %v4466_v13 = vmul.f32 %v17484_v59, %v12516_v25  ;;  %v14319_v26 = vor.u32 %v11925_v53, %v11924_v24  ;;  %v17486_v59 = vperm.slane %v14232_v40, 4 }
 0x1e7   :  { %11907 = vmatmul.msk.f32.vlgmr.msra.gmra.mxu2 %vm174_vm1, %v11904_v19  ;;  %4371 = vmatpush.msrb.mxu0 %v4267_v54  ;;  %v4471_v54 = vmul.f32 %v17492_v2, %v12570_v45  ;;  %v4468_v28 = vmul.f32 %v17501_v37, %v12574_v46  ;;  %v17489_v45 = vperm.slane %v14232_v40, 5  ;;  %v17487_v46 = vperm.slane %v14232_v40, 7  ;;  %v17823_v37 = vld [vmem:[#allocation73_spill] sm:$0xff] }
 0x1e8   :  { %4533 = vmatpush.msra.mxu2 %v4467_v43  ;;  %4391 = vmatpush.msrb.mxu1 %v4268_v58  ;;  %v14304_v43 = vpop.f32.mrf.mxu3  ;;  %v14309_v58 = vpop.f32.mrf.mxu2  ;;  %17817 = vst [vmem:[#allocation130_spill] sm:$0xff] %v14319_v26  ;;  %v17488_v24 = vperm.slane %v14319_v26, 2  ;;  %v4469_v53 = vmul.f32 %v17486_v59, %v12578_v47 }
 0x1e9   :  { %v14322_v25 = vpop.f32.mrf.mxu0 }
 0x1ea   :  { %v4669_v47 = vmul.f32 %v17488_v24, %v12660_v29  ;;  %v17493_v29 = vperm.slane %v14319_v26, 3  ;;  %v17494_v24 = vperm.slane %v14319_v26, 6 }
 0x1eb   :  { %v14326_v6 = vpop.f32.mrf.mxu1 }
 0x1ec   :  { %11905 = vmatmul.msk.f32.vlgmr.msra.gmra.mxu0 %vm174_vm1, %v11904_v19  ;;  %11906 = vmatmul.msk.f32.vlgmr.msra.gmra.mxu1 %vm174_vm1, %v11904_v19 }
 0x1ed   :  { %11908 = vmatmul.msk.f32.vlgmr.msra.gmra.mxu3 %vm174_vm1, %v11904_v19  ;;  %4493 = vmatpush.msra.mxu0 %v4465_v33  ;;  %v11915_v33 = vld [vmem:[%s17314_s1 + $0x98] sm:$0xff] }
 0x1ee   :  { %4513 = vmatpush.msra.mxu1 %v4466_v13  ;;  %4553 = vmatpush.msra.mxu3 %v4468_v28  ;;  %v4470_v13 = vmul.f32 %v17489_v45, %v12567_v44  ;;  %v17491_v44 = vperm.slane %v14319_v26, 0 }
 0x1ef   :  { %11911 = vmatmul.msk.f32.vlgmr.msrb.gmra.mxu2 %vm174_vm1, %v11904_v19 }
 0x1f0   :  { %4613 = vmatpush.msrb.mxu2 %v4471_v54  ;;  %v4472_v54 = vmul.f32 %v17487_v46, %v12523_v27  ;;  %v14348_v28 = vpop.f32.mrf.mxu3  ;;  %v14351_v59 = vpop.f32.mrf.mxu2  ;;  %v17490_v27 = vperm.slane %v14319_v26, 1 }
 0x1f1   :  { %v14356_v46 = vpop.f32.mrf.mxu0 }
 0x1f3   :  { %v14360_v45 = vpop.f32.mrf.mxu1 }
 0x1f4   :  { %11909 = vmatmul.msk.f32.vlgmr.msrb.gmra.mxu0 %vm174_vm1, %v11904_v19  ;;  %11910 = vmatmul.msk.f32.vlgmr.msrb.gmra.mxu1 %vm174_vm1, %v11904_v19 }
 0x1f5   :  { %11912 = vmatmul.msk.f32.vlgmr.msrb.gmra.mxu3 %vm174_vm1, %v11904_v19  ;;  %4573 = vmatpush.msrb.mxu0 %v4469_v53  ;;  %v4667_v19 = vmul.f32 %v17491_v44, %v12729_v35  ;;  %v4668_v53 = vmul.f32 %v17490_v27, %v12695_v56  ;;  %v4670_v35 = vmul.f32 %v17493_v29, %v12723_v30  ;;  %v17500_v27 = vperm.slane %v14319_v26, 4 }
 0x1f6   :  { %4593 = vmatpush.msrb.mxu1 %v4470_v13  ;;  %4633 = vmatpush.msrb.mxu3 %v4472_v54  ;;  %v11935_v13 = vld [vmem:[%s17313_s3 + $0x85] ss:$8 sm:$0xf]  ;;  %v4673_v56 = vmul.f32 %v17494_v24, %v12771_v42  ;;  %v17495_v30 = vperm.slane %v14319_v26, 5  ;;  %v17496_v42 = vperm.slane %v14319_v26, 7 }
 0x1f7   :  { %11918 = vmatmul.msk.f32.vlgmr.msra.gmra.mxu2 %vm174_vm1, %v11915_v33  ;;  %v11936_v54 = vld [vmem:[%s17313_s3 + $0x85] ss:$8 sm:$0xf0] }
 0x1f8   :  { %4735 = vmatpush.msra.mxu2 %v4669_v47  ;;  %v14383_v47 = vpop.f32.mrf.mxu2  ;;  %v14387_v44 = vor.u32 %v11936_v54, %v11935_v13  ;;  %v14389_v2 = vpop.f32.mrf.mxu3  ;;  %v11926_v13 = vld [vmem:[%s17314_s1 + $0xa0] sm:$0xff]  ;;  %v4672_v54 = vmul.f32 %v17495_v30, %v12768_v21 }
 0x1fa   :  { %17818 = vst [vmem:[#allocation131_spill] sm:$0xff] %v14387_v44  ;;  %v17499_v21 = vperm.slane %v14387_v44, 0 }
 0x1fc   :  { %11916 = vmatmul.msk.f32.vlgmr.msra.gmra.mxu0 %vm174_vm1, %v11915_v33  ;;  %11917 = vmatmul.msk.f32.vlgmr.msra.gmra.mxu1 %vm174_vm1, %v11915_v33 }
 0x1fd   :  { %11919 = vmatmul.msk.f32.vlgmr.msra.gmra.mxu3 %vm174_vm1, %v11915_v33  ;;  %4695 = vmatpush.msra.mxu0 %v4667_v19  ;;  %v17497_v19 = vperm.slane %v14387_v44, 2 }
 0x1fe   :  { %4715 = vmatpush.msra.mxu1 %v4668_v53  ;;  %4755 = vmatpush.msra.mxu3 %v4670_v35  ;;  %v4671_v53 = vmul.f32 %v17500_v27, %v12765_v16  ;;  %v4674_v35 = vmul.f32 %v17496_v42, %v12732_v49  ;;  %v17498_v49 = vperm.slane %v14387_v44, 1 }
 0x1ff   :  { %11922 = vmatmul.msk.f32.vlgmr.msrb.gmra.mxu2 %vm174_vm1, %v11915_v33  ;;  %v14392_v29 = vpop.f32.mrf.mxu0  ;;  %v4871_v16 = vmul.f32 %v17497_v19, %v12829_v48  ;;  %v17504_v48 = vperm.slane %v14387_v44, 6  ;;  %v11946_v19 = vld [vmem:[%s17313_s3 + $0x86] ss:$8 sm:$0xf] }
 0x200   :  { %4815 = vmatpush.msrb.mxu2 %v4673_v56  ;;  %v14396_v24 = vpop.f32.mrf.mxu1  ;;  %v479_v56 = vadd.f32 %v13523_v32, %v13432_v8  ;;  %v14423_v42 = vpop.f32.mrf.mxu2  ;;  %v17505_v32 = vperm.slane %v14387_v44, 3 }
 0x202   :  { %v735_v8 = vadd.f32 %v13634_v61, %v479_v56  ;;  %v11947_v61 = vld [vmem:[%s17313_s3 + $0x86] ss:$8 sm:$0xf0] }
 0x203   :  { %v17821_v56 = vld [vmem:[#allocation85_spill] sm:$0xff]  ;;  %v14458_v27 = vor.u32 %v11947_v61, %v11946_v19 }
 0x204   :  { %11920 = vmatmul.msk.f32.vlgmr.msrb.gmra.mxu0 %vm174_vm1, %v11915_v33  ;;  %11921 = vmatmul.msk.f32.vlgmr.msrb.gmra.mxu1 %vm174_vm1, %v11915_v33 }
 0x205   :  { %11923 = vmatmul.msk.f32.vlgmr.msrb.gmra.mxu3 %vm174_vm1, %v11915_v33  ;;  %4775 = vmatpush.msrb.mxu0 %v4671_v53 }
 0x206   :  { %4795 = vmatpush.msrb.mxu1 %v4672_v54  ;;  %4835 = vmatpush.msrb.mxu3 %v4674_v35  ;;  %v14420_v30 = vpop.f32.mrf.mxu3  ;;  %v4869_v54 = vmul.f32 %v17499_v21, %v12822_v11  ;;  %v399_v35 = vadd.f32 %v13489_v12, %v13375_v51  ;;  %v17819_v11 = vld [vmem:[#allocation10_spill] sm:$0xff]  ;;  %v17820_v12 = vld [vmem:[#allocation11_spill] sm:$0xff]  ;;  %v17510_v21 = vperm.slane %v14387_v44, 4 }
 0x207   :  { %11929 = vmatmul.msk.f32.vlgmr.msra.gmra.mxu2 %vm174_vm1, %v11926_v13  ;;  %v4875_v51 = vmul.f32 %v17504_v48, %v17819_v11  ;;  %17822 = vst [vmem:[#allocation10_spill] sm:$0xff] %v14458_v27 }
 0x208   :  { %4937 = vmatpush.msra.mxu2 %v4871_v16  ;;  %v14428_v33 = vpop.f32.mrf.mxu0  ;;  %v14430_v53 = vpop.f32.mrf.mxu1  ;;  %v4870_v16 = vmul.f32 %v17498_v49, %v12798_v22  ;;  %v4872_v22 = vmul.f32 %v17505_v32, %v17820_v12  ;;  %v971_v49 = vadd.f32 %v17821_v56, %v735_v8  ;;  %v731_v4 = vadd.f32 %v17823_v37, %v399_v35  ;;  %v17826_v37 = vld [vmem:[#allocation12_spill] sm:$0xff] }
 0x209   :  { %v17507_v12 = vperm.slane %v14387_v44, 7  ;;  %v17508_v8 = vperm.slane %v14387_v44, 5  ;;  %v17874_v44 = vld [vmem:[#allocation49_spill] sm:$0xff] }
 0x20a   :  { %v1207_v11 = vadd.f32 %v17824_v38, %v971_v49  ;;  %v4873_v38 = vmul.f32 %v17510_v21, %v17826_v37  ;;  %v17827_v49 = vld [vmem:[#allocation81_spill] sm:$0xff] }
 0x20b   :  { %v967_v35 = vadd.f32 %v17827_v49, %v731_v4  ;;  %v17830_v4 = vld [vmem:[#allocation17_spill] sm:$0xff] }
 0x20c   :  { %11927 = vmatmul.msk.f32.vlgmr.msra.gmra.mxu0 %vm174_vm1, %v11926_v13  ;;  %11928 = vmatmul.msk.f32.vlgmr.msra.gmra.mxu1 %vm174_vm1, %v11926_v13  ;;  %v17834_v21 = vld [vmem:[#allocation13_spill] sm:$0xff] }
 0x20d   :  { %11930 = vmatmul.msk.f32.vlgmr.msra.gmra.mxu3 %vm174_vm1, %v11926_v13  ;;  %4897 = vmatpush.msra.mxu0 %v4869_v54  ;;  %v17509_v54 = vperm.slane %v14458_v27, 2 }
 0x20e   :  { %4917 = vmatpush.msra.mxu1 %v4870_v16  ;;  %4957 = vmatpush.msra.mxu3 %v4872_v22  ;;  %v1443_v16 = vadd.f32 %v13904_v18, %v1207_v11  ;;  %v17828_v22 = vld [vmem:[#allocation6_spill] sm:$0xff]  ;;  %v17829_v11 = vld [vmem:[#allocation9_spill] sm:$0xff] }
 0x20f   :  { %11933 = vmatmul.msk.f32.vlgmr.msrb.gmra.mxu2 %vm174_vm1, %v11926_v13  ;;  %v3065_v56 = vpop.f32.mrf.mxu2  ;;  %v14464_v48 = vpop.f32.mrf.mxu3  ;;  %v4876_v18 = vmul.f32 %v17507_v12, %v17828_v22  ;;  %v4874_v7 = vmul.f32 %v17508_v8, %v17829_v11  ;;  %v17530_v22 = vperm.slane %v14458_v27, 0  ;;  %v17832_v11 = vld [vmem:[#allocation99_spill] sm:$0xff] }
 0x210   :  { %5017 = vmatpush.msrb.mxu2 %v4875_v51  ;;  %17825 = vst [vmem:[#allocation11_spill] sm:$0xff] %v14464_v48  ;;  %v14468_v32 = vpop.f32.mrf.mxu0  ;;  %v14470_v19 = vpop.f32.mrf.mxu1  ;;  %v1679_v61 = vadd.f32 %v13990_v60, %v1443_v16  ;;  %v14480_v51 = vld [vmem:[%s17314_s1 + $0xa8] sm:$0xff]  ;;  %v5073_v60 = vmul.f32 %v17509_v54, %v17830_v4  ;;  %v17831_v16 = vld [vmem:[#allocation90_spill] sm:$0xff]  ;;  %v17528_v4 = vperm.slane %v14458_v27, 1 }
 0x211   :  { %v1203_v37 = vadd.f32 %v17831_v16, %v967_v35  ;;  %v17526_v35 = vperm.slane %v14458_v27, 6 }
 0x212   :  { %v1915_v49 = vadd.f32 %v14069_v9, %v1679_v61  ;;  %v17524_v9 = vperm.slane %v14458_v27, 3  ;;  %v11958_v61 = vld [vmem:[%s17313_s3 + $0x87] ss:$8 sm:$0xf0]  ;;  %v5072_v5 = vmul.f32 %v17528_v4, %v17834_v21 }
 0x213   :  { %v1439_v12 = vadd.f32 %v17832_v11, %v1203_v37  ;;  %v17833_v37 = vld [vmem:[#allocation8_spill] sm:$0xff]  ;;  %v17861_v4 = vld [vmem:[#allocation37_spill] sm:$0xff] }
 0x214   :  { %11931 = vmatmul.msk.f32.vlgmr.msrb.gmra.mxu0 %vm174_vm1, %v11926_v13  ;;  %11932 = vmatmul.msk.f32.vlgmr.msrb.gmra.mxu1 %vm174_vm1, %v11926_v13  ;;  %v2151_v8 = vadd.f32 %v14128_v31, %v1915_v49  ;;  %v5071_v49 = vmul.f32 %v17530_v22, %v17833_v37 }
 0x215   :  { %11934 = vmatmul.msk.f32.vlgmr.msrb.gmra.mxu3 %vm174_vm1, %v11926_v13  ;;  %4977 = vmatpush.msrb.mxu0 %v4873_v38  ;;  %v1675_v31 = vadd.f32 %v13958_v36, %v1439_v12  ;;  %v5077_v36 = vmul.f32 %v17526_v35, %v17835_v63  ;;  %v17837_v12 = vld [vmem:[#allocation20_spill] sm:$0xff]  ;;  %v17520_v63 = vperm.slane %v14458_v27, 4 }
 0x216   :  { %4997 = vmatpush.msrb.mxu1 %v4874_v7  ;;  %5037 = vmatpush.msrb.mxu3 %v4876_v18  ;;  %v11957_v7 = vld [vmem:[%s17313_s3 + $0x87] ss:$8 sm:$0xf]  ;;  %v2387_v18 = vadd.f32 %v14202_v57, %v2151_v8 }
 0x217   :  { %11940 = vmatmul.msk.f32.vlgmr.msra.gmra.mxu2 %vm174_vm1, %v14480_v51  ;;  %v3187_v13 = vpop.f32.mrf.mxu2  ;;  %v14504_v38 = vpop.f32.mrf.mxu3  ;;  %v1911_v11 = vadd.f32 %v14030_v15, %v1675_v31  ;;  %v14529_v57 = vor.u32 %v11958_v61, %v11957_v7  ;;  %v5074_v15 = vmul.f32 %v17524_v9, %v17837_v12  ;;  %v17519_v61 = vperm.slane %v14458_v27, 5  ;;  %v17840_v12 = vld [vmem:[#allocation18_spill] sm:$0xff] }
 0x218   :  { %5139 = vmatpush.msra.mxu2 %v5073_v60  ;;  %v14514_v60 = vpop.f32.mrf.mxu0  ;;  %v14516_v16 = vpop.f32.mrf.mxu1  ;;  %v2622_v54 = vadd.f32 %v14309_v58, %v2387_v18 }
 0x219   :  { %17836 = vst [vmem:[#allocation85_spill] sm:$0xff] %v14529_v57  ;;  %v2147_v58 = vadd.f32 %v14094_v34, %v1911_v11 }
 0x21a   :  { %v2858_v21 = vadd.f32 %v14383_v47, %v2622_v54  ;;  %v17516_v47 = vperm.slane %v14458_v27, 7  ;;  %v17515_v54 = vperm.slane %v14529_v57, 2 }
 0x21b   :  { %v2383_v8 = vadd.f32 %v14165_v1, %v2147_v58  ;;  %v17839_v1 = vld [vmem:[#allocation21_spill] sm:$0xff] }
 0x21c   :  { %11938 = vmatmul.msk.f32.vlgmr.msra.gmra.mxu0 %vm174_vm1, %v14480_v51  ;;  %11939 = vmatmul.msk.f32.vlgmr.msra.gmra.mxu1 %vm174_vm1, %v14480_v51  ;;  %v3094_v7 = vadd.f32 %v3065_v56, %v2858_v21  ;;  %v5075_v56 = vmul.f32 %v17520_v63, %v17839_v1  ;;  %v17842_v21 = vld [vmem:[#allocation19_spill] sm:$0xff]  ;;  %v17854_v63 = vld [vmem:[#allocation33_spill] sm:$0xff] }
 0x21d   :  { %11941 = vmatmul.msk.f32.vlgmr.msra.gmra.mxu3 %vm174_vm1, %v14480_v51  ;;  %5099 = vmatpush.msra.mxu0 %v5071_v49  ;;  %v2618_v18 = vadd.f32 %v14257_v23, %v2383_v8  ;;  %v17841_v23 = vld [vmem:[#allocation14_spill] sm:$0xff] }
 0x21e   :  { %5119 = vmatpush.msra.mxu1 %v5072_v5  ;;  %5159 = vmatpush.msra.mxu3 %v5074_v15  ;;  %v5076_v15 = vmul.f32 %v17519_v61, %v17840_v12  ;;  %v5078_v58 = vmul.f32 %v17516_v47, %v17841_v23  ;;  %v17517_v23 = vperm.slane %v14529_v57, 3  ;;  %v17851_v61 = vld [vmem:[#allocation26_spill] sm:$0xff] }
 0x21f   :  { %11944 = vmatmul.msk.f32.vlgmr.msrb.gmra.mxu2 %vm174_vm1, %v14480_v51  ;;  %v3267_v34 = vpop.f32.mrf.mxu2  ;;  %v14547_v31 = vpop.f32.mrf.mxu3  ;;  %v2854_v11 = vadd.f32 %v14351_v59, %v2618_v18  ;;  %v5275_v59 = vmul.f32 %v17515_v54, %v17842_v21  ;;  %v17513_v18 = vperm.slane %v14529_v57, 1  ;;  %v17521_v54 = vperm.slane %v14529_v57, 5 }
 0x220   :  { %5219 = vmatpush.msrb.mxu2 %v5077_v36  ;;  %17838 = vst [vmem:[#allocation73_spill] sm:$0xff] %v14547_v31  ;;  %v3296_v37 = vadd.f32 %v3267_v34, %v3094_v7  ;;  %v14552_v5 = vpop.f32.mrf.mxu0  ;;  %v14554_v49 = vpop.f32.mrf.mxu1  ;;  %v11948_v36 = vld [vmem:[%s17314_s1 + $0xb0] sm:$0xff]  ;;  %v17514_v7 = vperm.slane %v14529_v57, 0 }
 0x221   :  { %v3090_v8 = vadd.f32 %v14423_v42, %v2854_v11  ;;  %v17518_v42 = vperm.slane %v14529_v57, 6 }
 0x223   :  { %v3292_v34 = vadd.f32 %v3187_v13, %v3090_v8  ;;  %v11969_v8 = vld [vmem:[%s17313_s3 + $0xc0] ss:$8 sm:$0xf0] }
 0x224   :  { %11942 = vmatmul.msk.f32.vlgmr.msrb.gmra.mxu0 %vm174_vm1, %v14480_v51  ;;  %11943 = vmatmul.msk.f32.vlgmr.msrb.gmra.mxu1 %vm174_vm1, %v14480_v51 }
 0x225   :  { %11945 = vmatmul.msk.f32.vlgmr.msrb.gmra.mxu3 %vm174_vm1, %v14480_v51  ;;  %5179 = vmatpush.msrb.mxu0 %v5075_v56 }
 0x226   :  { %5199 = vmatpush.msrb.mxu1 %v5076_v15  ;;  %5239 = vmatpush.msrb.mxu3 %v5078_v58  ;;  %v17844_v15 = vld [vmem:[#allocation24_spill] sm:$0xff]  ;;  %v17845_v58 = vld [vmem:[#allocation22_spill] sm:$0xff] }
 0x227   :  { %11951 = vmatmul.msk.f32.vlgmr.msra.gmra.mxu2 %vm174_vm1, %v11948_v36  ;;  %v3423_v1 = vpop.f32.mrf.mxu2  ;;  %v14582_v12 = vpop.f32.mrf.mxu3  ;;  %v5273_v13 = vmul.f32 %v17514_v7, %v17844_v15  ;;  %v5274_v21 = vmul.f32 %v17513_v18, %v17845_v58  ;;  %v17847_v15 = vld [vmem:[#allocation28_spill] sm:$0xff]  ;;  %v17522_v18 = vperm.slane %v14529_v57, 4 }
 0x228   :  { %5341 = vmatpush.msra.mxu2 %v5275_v59  ;;  %v14586_v11 = vadd.f32 %v3423_v1, %v3292_v34  ;;  %v14588_v51 = vpop.f32.mrf.mxu0  ;;  %v14590_v56 = vpop.f32.mrf.mxu1  ;;  %v11968_v59 = vld [vmem:[%s17313_s3 + $0xc0] ss:$8 sm:$0xf]  ;;  %v5279_v58 = vmul.f32 %v17518_v42, %v17847_v15 }
 0x229   :  { %17843 = vst [vmem:[#allocation94_spill] sm:$0xff] %v14590_v56  ;;  %v17846_v34 = vld [vmem:[#allocation23_spill] sm:$0xff]  ;;  %v14615_v7 = vor.u32 %v11969_v8, %v11968_v59  ;;  %v5277_v59 = vmul.f32 %v17522_v18, %v17851_v61  ;;  %v11959_v8 = vld [vmem:[%s17314_s1 + $0xb8] sm:$0xff] }
 0x22a   :  { %v5276_v1 = vmul.f32 %v17517_v23, %v17846_v34  ;;  %v17523_v23 = vperm.slane %v14529_v57, 7 }
 0x22b   :  { %17848 = vst [vmem:[#allocation12_spill] sm:$0xff] %v14615_v7  ;;  %v17525_v15 = vperm.slane %v14615_v7, 2  ;;  %v17540_v52 = vperm.slane %v14615_v7, 5 }
 0x22c   :  { %11949 = vmatmul.msk.f32.vlgmr.msra.gmra.mxu0 %vm174_vm1, %v11948_v36  ;;  %11950 = vmatmul.msk.f32.vlgmr.msra.gmra.mxu1 %vm174_vm1, %v11948_v36 }
 0x22d   :  { %11952 = vmatmul.msk.f32.vlgmr.msra.gmra.mxu3 %vm174_vm1, %v11948_v36  ;;  %5301 = vmatpush.msra.mxu0 %v5273_v13  ;;  %v5477_v61 = vmul.f32 %v17525_v15, %v17854_v63  ;;  %v17856_v63 = vld [vmem:[#allocation31_spill] sm:$0xff] }
 0x22e   :  { %5321 = vmatpush.msra.mxu1 %v5274_v21  ;;  %5361 = vmatpush.msra.mxu3 %v5276_v1  ;;  %v17852_v1 = vld [vmem:[#allocation27_spill] sm:$0xff] }
 0x22f   :  { %11955 = vmatmul.msk.f32.vlgmr.msrb.gmra.mxu2 %vm174_vm1, %v11948_v36  ;;  %v3503_v47 = vpop.f32.mrf.mxu2  ;;  %v14618_v34 = vpop.f32.mrf.mxu3  ;;  %v11980_v15 = vld [vmem:[%s17313_s3 + $0xc1] ss:$8 sm:$0xf0] }
 0x230   :  { %5421 = vmatpush.msrb.mxu2 %v5279_v58  ;;  %17849 = vst [vmem:[#allocation81_spill] sm:$0xff] %v14618_v34  ;;  %v14622_v42 = vadd.f32 %v3503_v47, %v3296_v37  ;;  %v14624_v13 = vpop.f32.mrf.mxu0  ;;  %v5278_v58 = vmul.f32 %v17521_v54, %v17852_v1  ;;  %v17853_v47 = vld [vmem:[#allocation25_spill] sm:$0xff]  ;;  %v17527_v1 = vperm.slane %v14615_v7, 0  ;;  %v17529_v54 = vperm.slane %v14615_v7, 1 }
 0x231   :  { %v14626_v21 = vpop.f32.mrf.mxu1  ;;  %v5280_v37 = vmul.f32 %v17523_v23, %v17853_v47  ;;  %v17533_v47 = vperm.slane %v14615_v7, 6  ;;  %v17534_v23 = vperm.slane %v14615_v7, 3 }
 0x232   :  { %17850 = vst [vmem:[#allocation6_spill] sm:$0xff] %v14622_v42 }
 0x234   :  { %11953 = vmatmul.msk.f32.vlgmr.msrb.gmra.mxu0 %vm174_vm1, %v11948_v36  ;;  %11954 = vmatmul.msk.f32.vlgmr.msrb.gmra.mxu1 %vm174_vm1, %v11948_v36 }
 0x235   :  { %11956 = vmatmul.msk.f32.vlgmr.msrb.gmra.mxu3 %vm174_vm1, %v11948_v36  ;;  %5381 = vmatpush.msrb.mxu0 %v5277_v59  ;;  %v5475_v36 = vmul.f32 %v17527_v1, %v17856_v63  ;;  %v17860_v63 = vld [vmem:[#allocation36_spill] sm:$0xff] }
 0x236   :  { %5401 = vmatpush.msrb.mxu1 %v5278_v58  ;;  %5441 = vmatpush.msrb.mxu3 %v5280_v37  ;;  %v17858_v58 = vld [vmem:[#allocation30_spill] sm:$0xff]  ;;  %v5481_v1 = vmul.f32 %v17533_v47, %v17860_v63  ;;  %v17541_v63 = vperm.slane %v14615_v7, 7 }
 0x237   :  { %11962 = vmatmul.msk.f32.vlgmr.msra.gmra.mxu2 %vm174_vm1, %v11959_v8  ;;  %v14649_v18 = vpop.f32.mrf.mxu2  ;;  %v5476_v37 = vmul.f32 %v17529_v54, %v17858_v58  ;;  %v5478_v58 = vmul.f32 %v17534_v23, %v17861_v4  ;;  %v17535_v54 = vperm.slane %v14615_v7, 4  ;;  %v17864_v47 = vld [vmem:[#allocation38_spill] sm:$0xff]  ;;  %v17868_v4 = vld [vmem:[#allocation45_spill] sm:$0xff] }
 0x238   :  { %5543 = vmatpush.msra.mxu2 %v5477_v61  ;;  %v14653_v9 = vpop.f32.mrf.mxu3  ;;  %v14658_v59 = vpop.f32.mrf.mxu0  ;;  %v11979_v61 = vld [vmem:[%s17313_s3 + $0xc1] ss:$8 sm:$0xf] }
 0x239   :  { %17855 = vst [vmem:[#allocation9_spill] sm:$0xff] %v14653_v9  ;;  %v14669_v35 = vpop.f32.mrf.mxu1  ;;  %v14682_v22 = vor.u32 %v11980_v15, %v11979_v61  ;;  %v11970_v15 = vld [vmem:[%s17314_s1 + $0xc0] sm:$0xff]  ;;  %v17867_v61 = vld [vmem:[#allocation32_spill] sm:$0xff]  ;;  %v17980_v9 = vld [vmem:[#allocation83_spill] sm:$0xff] }
 0x23a   :  { %17857 = vst [vmem:[#allocation17_spill] sm:$0xff] %v14658_v59 }
 0x23b   :  { %17859 = vst [vmem:[#allocation90_spill] sm:$0xff] %v14669_v35  ;;  %v17875_v26 = vperm.slane %v14682_v22, 3  ;;  %v17943_v35 = vld [vmem:[#allocation62_spill] sm:$0xff] }
 0x23c   :  { %11960 = vmatmul.msk.f32.vlgmr.msra.gmra.mxu0 %vm174_vm1, %v11959_v8  ;;  %11961 = vmatmul.msk.f32.vlgmr.msra.gmra.mxu1 %vm174_vm1, %v11959_v8  ;;  %17862 = vst [vmem:[#allocation99_spill] sm:$0xff] %v14682_v22 }
 0x23d   :  { %11963 = vmatmul.msk.f32.vlgmr.msra.gmra.mxu3 %vm174_vm1, %v11959_v8  ;;  %5503 = vmatpush.msra.mxu0 %v5475_v36  ;;  %v5479_v36 = vmul.f32 %v17535_v54, %v17864_v47  ;;  %v17869_v47 = vperm.slane %v14682_v22, 2  ;;  %v5680_v40 = vmul.f32 %v17875_v26, %v17874_v44  ;;  %v17559_v26 = vperm.slane %v14682_v22, 7  ;;  %v17884_v44 = vld [vmem:[#allocation43_spill] sm:$0xff] }
 0x23e   :  { %5523 = vmatpush.msra.mxu1 %v5476_v37  ;;  %5563 = vmatpush.msra.mxu3 %v5478_v58  ;;  %v17866_v37 = vld [vmem:[#allocation35_spill] sm:$0xff]  ;;  %v5482_v58 = vmul.f32 %v17541_v63, %v17867_v61  ;;  %v17555_v61 = vperm.slane %v14682_v22, 1 }
 0x23f   :  { %11966 = vmatmul.msk.f32.vlgmr.msrb.gmra.mxu2 %vm174_vm1, %v11959_v8  ;;  %v14685_v0 = vpop.f32.mrf.mxu2  ;;  %v5679_v54 = vmul.f32 %v17869_v47, %v17868_v4  ;;  %v17554_v4 = vperm.slane %v14682_v22, 6  ;;  %v17873_v47 = vld [vmem:[#allocation44_spill] sm:$0xff] }
 0x240   :  { %5623 = vmatpush.msrb.mxu2 %v5481_v1  ;;  %17863 = vst [vmem:[#allocation8_spill] sm:$0xff] %v14685_v0  ;;  %v14692_v23 = vpop.f32.mrf.mxu3  ;;  %v5480_v1 = vmul.f32 %v17540_v52, %v17866_v37  ;;  %v17556_v37 = vperm.slane %v14682_v22, 0 }
 0x241   :  { %17865 = vst [vmem:[#allocation13_spill] sm:$0xff] %v14692_v23  ;;  %v14708_v57 = vpop.f32.mrf.mxu0  ;;  %v5683_v7 = vmul.f32 %v17554_v4, %v17873_v47  ;;  %v17557_v47 = vperm.slane %v14682_v22, 5 }
 0x242   :  { %v14711_v27 = vpop.f32.mrf.mxu1 }
 0x244   :  { %11964 = vmatmul.msk.f32.vlgmr.msrb.gmra.mxu0 %vm174_vm1, %v11959_v8  ;;  %11965 = vmatmul.msk.f32.vlgmr.msrb.gmra.mxu1 %vm174_vm1, %v11959_v8 }
 0x245   :  { %11967 = vmatmul.msk.f32.vlgmr.msrb.gmra.mxu3 %vm174_vm1, %v11959_v8  ;;  %5583 = vmatpush.msrb.mxu0 %v5479_v36  ;;  %v11990_v8 = vld [vmem:[%s17313_s3 + $0xc2] ss:$8 sm:$0xf] }
 0x246   :  { %5603 = vmatpush.msrb.mxu1 %v5480_v1  ;;  %5643 = vmatpush.msrb.mxu3 %v5482_v58  ;;  %v11991_v36 = vld [vmem:[%s17313_s3 + $0xc2] ss:$8 sm:$0xf0] }
 0x247   :  { %11973 = vmatmul.msk.f32.vlgmr.msra.gmra.mxu2 %vm174_vm1, %v11970_v15  ;;  %v17871_v1 = vld [vmem:[#allocation39_spill] sm:$0xff]  ;;  %v17872_v58 = vld [vmem:[#allocation40_spill] sm:$0xff]  ;;  %v14740_v55 = vor.u32 %v11991_v36, %v11990_v8  ;;  %v17881_v36 = vld [vmem:[#allocation50_spill] sm:$0xff] }
 0x248   :  { %5745 = vmatpush.msra.mxu2 %v5679_v54  ;;  %v14716_v52 = vpop.f32.mrf.mxu2  ;;  %v5677_v54 = vmul.f32 %v17556_v37, %v17871_v1  ;;  %v5678_v63 = vmul.f32 %v17555_v61, %v17872_v58  ;;  %v17558_v1 = vperm.slane %v14682_v22, 4  ;;  %v17883_v61 = vld [vmem:[#allocation41_spill] sm:$0xff] }
 0x249   :  { %17870 = vst [vmem:[#allocation16_spill] sm:$0xff] %v14716_v52  ;;  %v14742_v62 = vpop.f32.mrf.mxu3  ;;  %v5684_v37 = vmul.f32 %v17559_v26, %v17883_v61  ;;  %v17563_v61 = vperm.slane %v14740_v55, 3  ;;  %v17892_v23 = vperm.slane %v14740_v55, 6  ;;  %v17977_v52 = vld [vmem:[#allocation76_spill] sm:$0xff] }
 0x24a   :  { %17876 = vst [vmem:[#allocation20_spill] sm:$0xff] %v14740_v55  ;;  %v14747_v58 = vpop.f32.mrf.mxu0  ;;  %v14750_v4 = vpop.f32.mrf.mxu1 }
 0x24b   :  { %17877 = vst [vmem:[#allocation21_spill] sm:$0xff] %v14742_v62  ;;  %v17954_v62 = vld [vmem:[#allocation66_spill] sm:$0xff] }
 0x24c   :  { %11971 = vmatmul.msk.f32.vlgmr.msra.gmra.mxu0 %vm174_vm1, %v11970_v15  ;;  %11972 = vmatmul.msk.f32.vlgmr.msra.gmra.mxu1 %vm174_vm1, %v11970_v15  ;;  %17878 = vst [vmem:[#allocation18_spill] sm:$0xff] %v14747_v58  ;;  %v17945_v58 = vld [vmem:[#allocation70_spill] sm:$0xff] }
 0x24d   :  { %11974 = vmatmul.msk.f32.vlgmr.msra.gmra.mxu3 %vm174_vm1, %v11970_v15  ;;  %5705 = vmatpush.msra.mxu0 %v5677_v54  ;;  %17879 = vst [vmem:[#allocation14_spill] sm:$0xff] %v14750_v4  ;;  %v11981_v54 = vld [vmem:[%s17314_s1 + $0xc8] sm:$0xff] }
 0x24e   :  { %5725 = vmatpush.msra.mxu1 %v5678_v63  ;;  %5765 = vmatpush.msra.mxu3 %v5680_v40  ;;  %v5681_v63 = vmul.f32 %v17558_v1, %v17881_v36  ;;  %v17882_v40 = vld [vmem:[#allocation46_spill] sm:$0xff]  ;;  %v17562_v1 = vperm.slane %v14740_v55, 1 }
 0x24f   :  { %11977 = vmatmul.msk.f32.vlgmr.msrb.gmra.mxu2 %vm174_vm1, %v11970_v15 }
 0x250   :  { %5825 = vmatpush.msrb.mxu2 %v5683_v7  ;;  %v5682_v7 = vmul.f32 %v17557_v47, %v17882_v40  ;;  %v17564_v40 = vperm.slane %v14740_v55, 0 }
 0x251   :  { %v14754_v8 = vpop.f32.mrf.mxu2  ;;  %v14776_v47 = vpop.f32.mrf.mxu3 }
 0x252   :  { %17880 = vst [vmem:[#allocation19_spill] sm:$0xff] %v14754_v8  ;;  %v17885_v8 = vperm.slane %v14740_v55, 2  ;;  %v14781_v22 = vpop.f32.mrf.mxu0 }
 0x253   :  { %17886 = vst [vmem:[#allocation24_spill] sm:$0xff] %v14776_v47  ;;  %v17891_v47 = vld [vmem:[#allocation61_spill] sm:$0xff] }
 0x254   :  { %11975 = vmatmul.msk.f32.vlgmr.msrb.gmra.mxu0 %vm174_vm1, %v11970_v15  ;;  %11976 = vmatmul.msk.f32.vlgmr.msrb.gmra.mxu1 %vm174_vm1, %v11970_v15  ;;  %v5881_v36 = vmul.f32 %v17885_v8, %v17884_v44  ;;  %v17888_v8 = vld [vmem:[#allocation55_spill] sm:$0xff]  ;;  %v5885_v4 = vmul.f32 %v17892_v23, %v17891_v47 }
 0x255   :  { %11978 = vmatmul.msk.f32.vlgmr.msrb.gmra.mxu3 %vm174_vm1, %v11970_v15  ;;  %5785 = vmatpush.msrb.mxu0 %v5681_v63  ;;  %v14785_v15 = vpop.f32.mrf.mxu1  ;;  %v5879_v63 = vmul.f32 %v17564_v40, %v17888_v8  ;;  %v17565_v8 = vperm.slane %v14740_v55, 4  ;;  %v17897_v47 = vld [vmem:[#allocation59_spill] sm:$0xff] }
 0x256   :  { %5805 = vmatpush.msrb.mxu1 %v5682_v7  ;;  %5845 = vmatpush.msrb.mxu3 %v5684_v37  ;;  %v17889_v7 = vld [vmem:[#allocation51_spill] sm:$0xff] }
 0x257   :  { %11984 = vmatmul.msk.f32.vlgmr.msra.gmra.mxu2 %vm174_vm1, %v11981_v54  ;;  %v5880_v37 = vmul.f32 %v17562_v1, %v17889_v7  ;;  %v17566_v1 = vperm.slane %v14740_v55, 5 }
 0x258   :  { %5947 = vmatpush.msra.mxu2 %v5881_v36  ;;  %v17890_v36 = vld [vmem:[#allocation53_spill] sm:$0xff] }
 0x259   :  { %v14783_v44 = vpop.f32.mrf.mxu2  ;;  %v5882_v26 = vmul.f32 %v17563_v61, %v17890_v36  ;;  %v17899_v36 = vld [vmem:[#allocation56_spill] sm:$0xff] }
 0x25a   :  { %17887 = vst [vmem:[#allocation22_spill] sm:$0xff] %v14783_v44  ;;  %v17952_v44 = vld [vmem:[#allocation79_spill] sm:$0xff] }
 0x25c   :  { %11982 = vmatmul.msk.f32.vlgmr.msra.gmra.mxu0 %vm174_vm1, %v11981_v54  ;;  %11983 = vmatmul.msk.f32.vlgmr.msra.gmra.mxu1 %vm174_vm1, %v11981_v54 }
 0x25d   :  { %11985 = vmatmul.msk.f32.vlgmr.msra.gmra.mxu3 %vm174_vm1, %v11981_v54  ;;  %5907 = vmatpush.msra.mxu0 %v5879_v63  ;;  %v5883_v63 = vmul.f32 %v17565_v8, %v17897_v47 }
 0x25e   :  { %5927 = vmatpush.msra.mxu1 %v5880_v37  ;;  %5967 = vmatpush.msra.mxu3 %v5882_v26  ;;  %v17898_v26 = vld [vmem:[#allocation60_spill] sm:$0xff] }
 0x25f   :  { %11988 = vmatmul.msk.f32.vlgmr.msrb.gmra.mxu2 %vm174_vm1, %v11981_v54  ;;  %v14804_v7 = vpop.f32.mrf.mxu3  ;;  %v5884_v37 = vmul.f32 %v17566_v1, %v17898_v26 }
 0x260   :  { %6027 = vmatpush.msrb.mxu2 %v5885_v4  ;;  %17893 = vst [vmem:[#allocation23_spill] sm:$0xff] %v14804_v7  ;;  %v11992_v4 = vld [vmem:[%s17314_s1 + $0xd0] sm:$0xff]  ;;  %s18220_s1 = smov 119  }
 0x261   :  { %v14810_v40 = vpop.f32.mrf.mxu0  ;;  %v14812_v23 = vpop.f32.mrf.mxu1 }
 0x262   :  { %v14808_v61 = vpop.f32.mrf.mxu2  ;;  %17895 = vst [vmem:[#allocation26_spill] sm:$0xff] %v14810_v40 }
 0x263   :  { %17894 = vst [vmem:[#allocation28_spill] sm:$0xff] %v14808_v61  ;;  %v17900_v61 = vperm.slane %v14740_v55, 7 }
 0x264   :  { %17896 = vst [vmem:[#allocation27_spill] sm:$0xff] %v14812_v23  ;;  %11986 = vmatmul.msk.f32.vlgmr.msrb.gmra.mxu0 %vm174_vm1, %v11981_v54  ;;  %11987 = vmatmul.msk.f32.vlgmr.msrb.gmra.mxu1 %vm174_vm1, %v11981_v54 }
 0x265   :  { %v5886_v23 = vmul.f32 %v17900_v61, %v17899_v36  ;;  %11989 = vmatmul.msk.f32.vlgmr.msrb.gmra.mxu3 %vm174_vm1, %v11981_v54  ;;  %5987 = vmatpush.msrb.mxu0 %v5883_v63 }
 0x266   :  { %6007 = vmatpush.msrb.mxu1 %v5884_v37 }
 0x267   :  { %11995 = vmatmul.msk.f32.vlgmr.msra.gmra.mxu2 %vm174_vm1, %v11992_v4  ;;  %6047 = vmatpush.msrb.mxu3 %v5886_v23 }
 0x268   :  { %v14830_v47 = vpop.f32.mrf.mxu3 }
 0x269   :  { %17901 = vst [vmem:[#allocation25_spill] sm:$0xff] %v14830_v47  ;;  %v14834_v26 = vpop.f32.mrf.mxu0  ;;  %v14836_v1 = vpop.f32.mrf.mxu1 }
 0x26a   :  { %v14832_v8 = vpop.f32.mrf.mxu2  ;;  %17903 = vst [vmem:[#allocation31_spill] sm:$0xff] %v14836_v1  ;;  %v17962_v1 = vld [vmem:[#allocation95_spill] sm:$0xff] }
 0x26b   :  { %17902 = vst [vmem:[#allocation33_spill] sm:$0xff] %v14832_v8 }
 0x26c   :  { %11993 = vmatmul.msk.f32.vlgmr.msra.gmra.mxu0 %vm174_vm1, %v11992_v4  ;;  %11994 = vmatmul.msk.f32.vlgmr.msra.gmra.mxu1 %vm174_vm1, %v11992_v4 }
 0x26d   :  { %11996 = vmatmul.msk.f32.vlgmr.msra.gmra.mxu3 %vm174_vm1, %v11992_v4 }
 0x26f   :  { %11999 = vmatmul.msk.f32.vlgmr.msrb.gmra.mxu2 %vm174_vm1, %v11992_v4 }
 0x270   :  { %v14842_v54 = vpop.f32.mrf.mxu3 }
 0x271   :  { %17904 = vst [vmem:[#allocation30_spill] sm:$0xff] %v14842_v54  ;;  %v14846_v36 = vpop.f32.mrf.mxu0  ;;  %v14848_v23 = vpop.f32.mrf.mxu1 }
 0x272   :  { %v14844_v61 = vpop.f32.mrf.mxu2  ;;  %17906 = vst [vmem:[#allocation37_spill] sm:$0xff] %v14846_v36 }
 0x273   :  { %17905 = vst [vmem:[#allocation36_spill] sm:$0xff] %v14844_v61 }
 0x274   :  { %17907 = vst [vmem:[#allocation38_spill] sm:$0xff] %v14848_v23  ;;  %11997 = vmatmul.msk.f32.vlgmr.msrb.gmra.mxu0 %vm174_vm1, %v11992_v4  ;;  %11998 = vmatmul.msk.f32.vlgmr.msrb.gmra.mxu1 %vm174_vm1, %v11992_v4 }
 0x275   :  { %12000 = vmatmul.msk.f32.vlgmr.msrb.gmra.mxu3 %vm174_vm1, %v11992_v4 }
 0x278   :  { %v14853_v63 = vpop.f32.mrf.mxu3 }
 0x279   :  { %17908 = vst [vmem:[#allocation35_spill] sm:$0xff] %v14853_v63  ;;  %v14857_v55 = vpop.f32.mrf.mxu0  ;;  %v14859_v47 = vpop.f32.mrf.mxu1 }
 0x27a   :  { %v14855_v37 = vpop.f32.mrf.mxu2  ;;  %17910 = vst [vmem:[#allocation45_spill] sm:$0xff] %v14857_v55 }
 0x27b   :  { %17909 = vst [vmem:[#allocation32_spill] sm:$0xff] %v14855_v37 }
 0x27c   :  { %17911 = vst [vmem:[#allocation39_spill] sm:$0xff] %v14859_v47 }
 0x280   :  { %v14861_v54 = vpop.f32.mrf.mxu3 }
 0x281   :  { %17912 = vst [vmem:[#allocation40_spill] sm:$0xff] %v14861_v54  ;;  %v14865_v36 = vpop.f32.mrf.mxu0  ;;  %v14867_v23 = vpop.f32.mrf.mxu1 }
 0x282   :  { %v14863_v61 = vpop.f32.mrf.mxu2  ;;  %17914 = vst [vmem:[#allocation49_spill] sm:$0xff] %v14865_v36 }
 0x283   :  { %17913 = vst [vmem:[#allocation44_spill] sm:$0xff] %v14863_v61 }
 0x284   :  { %17915 = vst [vmem:[#allocation50_spill] sm:$0xff] %v14867_v23 }
 0x288   :  { %v14869_v40 = vpop.f32.mrf.mxu3 }
 0x289   :  { %17916 = vst [vmem:[#allocation46_spill] sm:$0xff] %v14869_v40  ;;  %v14873_v4 = vpop.f32.mrf.mxu0  ;;  %v14875_v63 = vpop.f32.mrf.mxu1 }
 0x28a   :  { %v14871_v0 = vpop.f32.mrf.mxu2  ;;  %17918 = vst [vmem:[#allocation43_spill] sm:$0xff] %v14873_v4  ;;  %v17944_v4 = vld [vmem:[#allocation71_spill] sm:$0xff] }
 0x28b   :  { %17917 = vst [vmem:[#allocation41_spill] sm:$0xff] %v14871_v0 }
 0x28c   :  { %17919 = vst [vmem:[#allocation55_spill] sm:$0xff] %v14875_v63 }
 0x290   :  { %v14877_v37 = vpop.f32.mrf.mxu3 }
 0x291   :  { %17920 = vst [vmem:[#allocation51_spill] sm:$0xff] %v14877_v37  ;;  %v14881_v34 = vpop.f32.mrf.mxu0  ;;  %v14883_v54 = vpop.f32.mrf.mxu1 }
 0x292   :  { %v14879_v42 = vpop.f32.mrf.mxu2  ;;  %17922 = vst [vmem:[#allocation61_spill] sm:$0xff] %v14881_v34 }
 0x293   :  { %17921 = vst [vmem:[#allocation53_spill] sm:$0xff] %v14879_v42 }
 0x294   :  { %17923 = vst [vmem:[#allocation59_spill] sm:$0xff] %v14883_v54 }
 0x298   :  { %v14885_v61 = vpop.f32.mrf.mxu3 }
 0x299   :  { %17924 = vst [vmem:[#allocation60_spill] sm:$0xff] %v14885_v61  ;;  %v14889_v23 = vpop.f32.mrf.mxu0  ;;  %v14891_v40 = vpop.f32.mrf.mxu1 }
 0x29a   :  { %v14887_v36 = vpop.f32.mrf.mxu2  ;;  %17926 = vst [vmem:[#allocation132_spill] sm:$0xff] %v14889_v23 }
 0x29b   :  { %17925 = vst [vmem:[#allocation56_spill] sm:$0xff] %v14887_v36 }
 0x29c   :  { %17927 = vst [vmem:[#allocation133_spill] sm:$0xff] %v14891_v40 }
 0x2a0   :  { %v14893_v0 = vpop.f32.mrf.mxu3 }
 0x2a1   :  { %17928 = vst [vmem:[#allocation134_spill] sm:$0xff] %v14893_v0  ;;  %v14897_v63 = vpop.f32.mrf.mxu0  ;;  %v14899_v37 = vpop.f32.mrf.mxu1 }
 0x2a2   :  { %v14895_v8 = vpop.f32.mrf.mxu2  ;;  %17930 = vst [vmem:[#allocation136_spill] sm:$0xff] %v14897_v63  ;;  %v17941_v63 = vld [vmem:[#allocation64_spill] sm:$0xff] }
 0x2a3   :  { %17929 = vst [vmem:[#allocation135_spill] sm:$0xff] %v14895_v8  ;;  %v17940_v8 = vld [vmem:[#allocation48_spill] sm:$0xff] }
 0x2a4   :  { %17931 = vst [vmem:[#allocation137_spill] sm:$0xff] %v14899_v37  ;;  %v379_v7 = vadd.f32 %v17941_v63, %v17940_v8  ;;  %v17942_v37 = vld [vmem:[#allocation47_spill] sm:$0xff]  ;;  %v17953_v63 = vld [vmem:[#allocation54_spill] sm:$0xff] }
 0x2a8   :  { %v14901_v42 = vpop.f32.mrf.mxu3 }
 0x2a9   :  { %17932 = vst [vmem:[#allocation138_spill] sm:$0xff] %v14901_v42  ;;  %v14905_v54 = vpop.f32.mrf.mxu0  ;;  %v14907_v61 = vpop.f32.mrf.mxu1  ;;  %v359_v42 = vadd.f32 %v17943_v35, %v17942_v37  ;;  %v439_v35 = vadd.f32 %v17954_v62, %v17953_v63  ;;  %v17955_v37 = vld [vmem:[#allocation78_spill] sm:$0xff] }
 0x2aa   :  { %v14903_v34 = vpop.f32.mrf.mxu2  ;;  %17934 = vst [vmem:[#allocation140_spill] sm:$0xff] %v14905_v54  ;;  %v17967_v63 = vld [vmem:[#allocation58_spill] sm:$0xff] }
 0x2ab   :  { %17933 = vst [vmem:[#allocation139_spill] sm:$0xff] %v14903_v34  ;;  %v730_v34 = vadd.f32 %v17944_v4, %v379_v7  ;;  %v729_v54 = vadd.f32 %v17945_v58, %v359_v42  ;;  %v17956_v4 = vld [vmem:[#allocation86_spill] sm:$0xff]  ;;  %v17957_v58 = vld [vmem:[#allocation57_spill] sm:$0xff] }
 0x2ac   :  { %17935 = vst [vmem:[#allocation141_spill] sm:$0xff] %v14907_v61 }
 0x2ad   :  { %v966_v8 = vadd.f32 %v17952_v44, %v730_v34  ;;  %v965_v7 = vadd.f32 %v17955_v37, %v729_v54  ;;  %v17964_v34 = vld [vmem:[#allocation96_spill] sm:$0xff] }
 0x2ae   :  { %v17968_v37 = vld [vmem:[#allocation68_spill] sm:$0xff] }
 0x2af   :  { %v1201_v42 = vadd.f32 %v17956_v4, %v965_v7  ;;  %v499_v7 = vadd.f32 %v17968_v37, %v17967_v63  ;;  %v17973_v4 = vld [vmem:[#allocation82_spill] sm:$0xff]  ;;  %v17978_v37 = vld [vmem:[#allocation91_spill] sm:$0xff] }
 0x2b0   :  { %v14909_v36 = vpop.f32.mrf.mxu3 }
 0x2b1   :  { %17936 = vst [vmem:[#allocation142_spill] sm:$0xff] %v14909_v36  ;;  %v14913_v40 = vpop.f32.mrf.mxu0  ;;  %v14915_v0 = vpop.f32.mrf.mxu1  ;;  %v736_v63 = vadd.f32 %v17977_v52, %v499_v7 }
 0x2b2   :  { %v14911_v23 = vpop.f32.mrf.mxu2  ;;  %17938 = vst [vmem:[#allocation144_spill] sm:$0xff] %v14913_v40  ;;  %v17950_v40 = vld [vmem:[#allocation52_spill] sm:$0xff] }
 0x2b3   :  { %17937 = vst [vmem:[#allocation143_spill] sm:$0xff] %v14911_v23 }
 0x2b4   :  { %17939 = vst [vmem:[#allocation145_spill] sm:$0xff] %v14915_v0  ;;  %v17951_v0 = vld [vmem:[#allocation65_spill] sm:$0xff] }
 0x2b5   :  { %v419_v47 = vadd.f32 %v17951_v0, %v17950_v40  ;;  %v1437_v0 = vadd.f32 %v17962_v1, %v1201_v42  ;;  %v17972_v1 = vld [vmem:[#allocation104_spill] sm:$0xff] }
 0x2b8   :  { %v14923_v31 = vpop.f32.mrf.mxu3 }
 0x2b9   :  { %17946 = vst [vmem:[#allocation48_spill] sm:$0xff] %v14923_v31  ;;  %v14927_v36 = vpop.f32.mrf.mxu0  ;;  %v14929_v23 = vpop.f32.mrf.mxu1  ;;  %v17958_v31 = vld [vmem:[#allocation67_spill] sm:$0xff] }
 0x2ba   :  { %v14925_v61 = vpop.f32.mrf.mxu2  ;;  %17948 = vst [vmem:[#allocation47_spill] sm:$0xff] %v14927_v36  ;;  %v459_v56 = vadd.f32 %v17958_v31, %v17957_v58  ;;  %v17960_v36 = vld [vmem:[#allocation87_spill] sm:$0xff]  ;;  %v1673_v31 = vadd.f32 %v13922_v10, %v1437_v0  ;;  %v17979_v0 = vld [vmem:[#allocation117_spill] sm:$0xff] }
 0x2bb   :  { %17947 = vst [vmem:[#allocation64_spill] sm:$0xff] %v14925_v61  ;;  %v17959_v61 = vld [vmem:[#allocation72_spill] sm:$0xff]  ;;  %v1202_v59 = vadd.f32 %v17960_v36, %v966_v8 }
 0x2bc   :  { %17949 = vst [vmem:[#allocation62_spill] sm:$0xff] %v14929_v23  ;;  %v732_v55 = vadd.f32 %v17959_v61, %v419_v47  ;;  %v17961_v23 = vld [vmem:[#allocation74_spill] sm:$0xff]  ;;  %v17970_v61 = vld [vmem:[#allocation75_spill] sm:$0xff] }
 0x2bd   :  { %v733_v48 = vadd.f32 %v17961_v23, %v439_v35  ;;  %v1438_v44 = vadd.f32 %v17964_v34, %v1202_v59  ;;  %v734_v36 = vadd.f32 %v17970_v61, %v459_v56  ;;  %v17971_v23 = vld [vmem:[#allocation80_spill] sm:$0xff]  ;;  %v17974_v59 = vld [vmem:[#allocation110_spill] sm:$0xff] }
 0x2be   :  { %v968_v8 = vadd.f32 %v17971_v23, %v732_v55  ;;  %v1909_v58 = vadd.f32 %v17974_v59, %v1673_v31  ;;  %v17975_v34 = vld [vmem:[#allocation88_spill] sm:$0xff]  ;;  %v17981_v61 = vld [vmem:[#allocation98_spill] sm:$0xff] }
 0x2bf   :  { %v1674_v35 = vadd.f32 %v17972_v1, %v1438_v44  ;;  %v969_v42 = vadd.f32 %v17973_v4, %v733_v48  ;;  %v970_v56 = vadd.f32 %v17980_v9, %v734_v36  ;;  %v17982_v23 = vld [vmem:[#allocation118_spill] sm:$0xff]  ;;  %v17983_v1 = vld [vmem:[#allocation100_spill] sm:$0xff] }
 0x2c0   :  { %v14944_v40 = vpop.f32.mrf.mxu3  ;;  %v17984_v4 = vld [vmem:[#allocation124_spill] sm:$0xff]  ;;  %v17988_v36 = vld [vmem:[#allocation106_spill] sm:$0xff] }
 0x2c1   :  { %17963 = vst [vmem:[#allocation71_spill] sm:$0xff] %v14944_v40  ;;  %v14949_v54 = vpop.f32.mrf.mxu0  ;;  %v14954_v47 = vpop.f32.mrf.mxu1  ;;  %v1205_v10 = vadd.f32 %v17978_v37, %v969_v42  ;;  %v17987_v9 = vld [vmem:[#allocation84_spill] sm:$0xff] }
 0x2c2   :  { %v14947_v62 = vpop.f32.mrf.mxu2  ;;  %17966 = vst [vmem:[#allocation52_spill] sm:$0xff] %v14949_v54  ;;  %v17976_v54 = vld [vmem:[#allocation111_spill] sm:$0xff] }
 0x2c3   :  { %17965 = vst [vmem:[#allocation70_spill] sm:$0xff] %v14947_v62  ;;  %v1204_v62 = vadd.f32 %v17975_v34, %v968_v8  ;;  %v1910_v40 = vadd.f32 %v17976_v54, %v1674_v35  ;;  %v1441_v48 = vadd.f32 %v17983_v1, %v1205_v10  ;;  %v17985_v8 = vld [vmem:[#allocation92_spill] sm:$0xff]  ;;  %v17986_v35 = vld [vmem:[#allocation105_spill] sm:$0xff] }
 0x2c4   :  { %17969 = vst [vmem:[#allocation65_spill] sm:$0xff] %v14954_v47  ;;  %v2145_v47 = vadd.f32 %v17979_v0, %v1909_v58  ;;  %v1206_v54 = vadd.f32 %v17985_v8, %v970_v56  ;;  %v17990_v0 = vld [vmem:[#allocation112_spill] sm:$0xff]  ;;  %v17994_v8 = vld [vmem:[#allocation119_spill] sm:$0xff] }
 0x2c5   :  { %v1440_v55 = vadd.f32 %v17981_v61, %v1204_v62  ;;  %v2146_v44 = vadd.f32 %v17982_v23, %v1910_v40  ;;  %v972_v62 = vadd.f32 %v17987_v9, %v736_v63  ;;  %v1677_v40 = vadd.f32 %v17988_v36, %v1441_v48  ;;  %v17992_v23 = vld [vmem:[#allocation113_spill] sm:$0xff]  ;;  %v17996_v9 = vld [vmem:[#allocation120_spill] sm:$0xff]  ;;  %v17997_v36 = vld [vmem:[#allocation114_spill] sm:$0xff] }
 0x2c6   :  { %v2381_v31 = vadd.f32 %v17984_v4, %v2145_v47  ;;  %v17989_v47 = vld [vmem:[#allocation101_spill] sm:$0xff]  ;;  %v17993_v4 = vld [vmem:[#allocation108_spill] sm:$0xff] }
 0x2c7   :  { %v1676_v52 = vadd.f32 %v17986_v35, %v1440_v55  ;;  %v2382_v7 = vadd.f32 %v14145_v17, %v2146_v44  ;;  %v1442_v10 = vadd.f32 %v17989_v47, %v1206_v54  ;;  %v17991_v55 = vld [vmem:[#allocation93_spill] sm:$0xff]  ;;  %v1913_v44 = vadd.f32 %v17992_v23, %v1677_v40 }
 0x2c8   :  { %v14971_v59 = vpop.f32.mrf.mxu3  ;;  %v2616_v34 = vadd.f32 %v14228_v39, %v2381_v31  ;;  %v1208_v17 = vadd.f32 %v17991_v55, %v972_v62  ;;  %v17995_v31 = vld [vmem:[#allocation103_spill] sm:$0xff]  ;;  %v17998_v40 = vld [vmem:[#allocation109_spill] sm:$0xff] }
 0x2c9   :  { %v14978_v58 = vpop.f32.mrf.mxu0  ;;  %v14983_v37 = vpop.f32.mrf.mxu1  ;;  %v1912_v56 = vadd.f32 %v17990_v0, %v1676_v52  ;;  %v2617_v61 = vadd.f32 %v14237_v20, %v2382_v7  ;;  %v1678_v63 = vadd.f32 %v17993_v4, %v1442_v10  ;;  %v2149_v54 = vadd.f32 %v17996_v9, %v1913_v44 }
 0x2ca   :  { %v14976_v42 = vpop.f32.mrf.mxu2  ;;  %v2852_v1 = vadd.f32 %v14322_v25, %v2616_v34  ;;  %v1444_v35 = vadd.f32 %v17995_v31, %v1208_v17  ;;  %v17999_v34 = vld [vmem:[#allocation125_spill] sm:$0xff] }
 0x2cb   :  { %v2148_v48 = vadd.f32 %v17994_v8, %v1912_v56  ;;  %v2853_v39 = vadd.f32 %v14326_v6, %v2617_v61  ;;  %v1914_v20 = vadd.f32 %v17997_v36, %v1678_v63  ;;  %v2385_v47 = vadd.f32 %v17999_v34, %v2149_v54  ;;  %v18000_v6 = vld [vmem:[#allocation121_spill] sm:$0xff]  ;;  %v18003_v8 = vld [vmem:[#allocation123_spill] sm:$0xff] }
 0x2cc   :  { %v3088_v52 = vadd.f32 %v14392_v29, %v2852_v1  ;;  %v1680_v25 = vadd.f32 %v17998_v40, %v1444_v35  ;;  %v18004_v35 = vld [vmem:[#allocation128_spill] sm:$0xff]  ;;  %v18009_v34 = vld [vmem:[#allocation17_spill] sm:$0xff] }
 0x2cd   :  { %v2384_v7 = vadd.f32 %v14163_v3, %v2148_v48  ;;  %v3089_v62 = vadd.f32 %v14396_v24, %v2853_v39  ;;  %v2150_v56 = vadd.f32 %v18000_v6, %v1914_v20  ;;  %v18001_v3 = vld [vmem:[#allocation116_spill] sm:$0xff]  ;;  %v2620_v23 = vadd.f32 %v14268_v14, %v2385_v47  ;;  %v18011_v6 = vld [vmem:[#allocation94_spill] sm:$0xff] }
 0x2ce   :  { %v3290_v10 = vadd.f32 %v14468_v32, %v3088_v52  ;;  %v1916_v24 = vadd.f32 %v18001_v3, %v1680_v25  ;;  %v18002_v32 = vld [vmem:[#allocation126_spill] sm:$0xff]  ;;  %v18014_v3 = vld [vmem:[#allocation39_spill] sm:$0xff] }
 0x2cf   :  { %v2619_v61 = vadd.f32 %v14253_v50, %v2384_v7  ;;  %v3291_v29 = vadd.f32 %v14470_v19, %v3089_v62  ;;  %v2386_v4 = vadd.f32 %v18002_v32, %v2150_v56  ;;  %v2856_v48 = vadd.f32 %v14356_v46, %v2620_v23  ;;  %v18005_v7 = vld [vmem:[#allocation9_spill] sm:$0xff]  ;;  %v18006_v62 = vld [vmem:[#allocation16_spill] sm:$0xff] }
 0x2d0   :  { %v15003_v0 = vpop.f32.mrf.mxu3  ;;  %v3526_v44 = vadd.f32 %v14552_v5, %v3290_v10  ;;  %v2152_v19 = vadd.f32 %v18003_v8, %v1916_v24  ;;  %v18010_v10 = vld [vmem:[#allocation45_spill] sm:$0xff] }
 0x2d1   :  { %v15010_v17 = vpop.f32.mrf.mxu0  ;;  %v15015_v1 = vpop.f32.mrf.mxu1  ;;  %v2855_v63 = vadd.f32 %v14348_v28, %v2619_v61  ;;  %v3527_v50 = vadd.f32 %v14554_v49, %v3291_v29  ;;  %v2621_v31 = vadd.f32 %v14280_v41, %v2386_v4  ;;  %v3092_v54 = vadd.f32 %v14428_v33, %v2856_v48  ;;  %v18012_v56 = vld [vmem:[#allocation21_spill] sm:$0xff]  ;;  %v18013_v61 = vld [vmem:[#allocation22_spill] sm:$0xff]  ;;  %v18017_v4 = vld [vmem:[#allocation43_spill] sm:$0xff] }
 0x2d2   :  { %v15008_v55 = vpop.f32.mrf.mxu2  ;;  %v3762_v39 = vadd.f32 %v14624_v13, %v3526_v44  ;;  %v2388_v9 = vadd.f32 %v18004_v35, %v2152_v19  ;;  %v18015_v24 = vld [vmem:[#allocation73_spill] sm:$0xff]  ;;  %v18016_v44 = vld [vmem:[#allocation18_spill] sm:$0xff]  ;;  %v18019_v19 = vld [vmem:[#allocation23_spill] sm:$0xff] }
 0x2d3   :  { %v3091_v14 = vadd.f32 %v14420_v30, %v2855_v63  ;;  %v3763_v5 = vadd.f32 %v14626_v21, %v3527_v50  ;;  %v2857_v49 = vadd.f32 %v14360_v45, %v2621_v31  ;;  %v3294_v41 = vadd.f32 %v14514_v60, %v3092_v54  ;;  %v18018_v50 = vld [vmem:[#allocation90_spill] sm:$0xff]  ;;  %v18022_v35 = vld [vmem:[#allocation81_spill] sm:$0xff] }
 0x2d4   :  { %v3998_v28 = vadd.f32 %v14708_v57, %v3762_v39  ;;  %v2623_v13 = vadd.f32 %v14304_v43, %v2388_v9  ;;  %v3764_v57 = vadd.f32 %v14649_v18, %v14586_v11  ;;  %v18007_v18 = vld [vmem:[#allocation31_spill] sm:$0xff]  ;;  %v18020_v39 = vld [vmem:[#allocation33_spill] sm:$0xff]  ;;  %v18023_v54 = vld [vmem:[#allocation6_spill] sm:$0xff] }
 0x2d5   :  { %v3293_v52 = vadd.f32 %v14504_v38, %v3091_v14  ;;  %v3999_v46 = vadd.f32 %v14711_v27, %v3763_v5  ;;  %v3093_v21 = vadd.f32 %v14430_v53, %v2857_v49  ;;  %v3530_v60 = vadd.f32 %v14588_v51, %v3294_v41  ;;  %v18021_v14 = vld [vmem:[#allocation55_spill] sm:$0xff] }
 0x2d6   :  { %v4234_v30 = vadd.f32 %v14781_v22, %v3998_v28  ;;  %v2859_v43 = vadd.f32 %v14389_v2, %v2623_v13  ;;  %v4000_v40 = vadd.f32 %v18006_v62, %v3764_v57  ;;  %v18024_v28 = vld [vmem:[#allocation8_spill] sm:$0xff]  ;;  %v18028_v57 = vld [vmem:[#allocation30_spill] sm:$0xff]  ;;  %v18031_v62 = vld [vmem:[#allocation13_spill] sm:$0xff] }
 0x2d7   :  { %v3529_v33 = vadd.f32 %v14582_v12, %v3293_v52  ;;  %v4235_v45 = vadd.f32 %v14785_v15, %v3999_v46  ;;  %v3295_v53 = vadd.f32 %v14516_v16, %v3093_v21  ;;  %v18008_v15 = vld [vmem:[#allocation11_spill] sm:$0xff]  ;;  %v3766_v47 = vadd.f32 %v18009_v34, %v3530_v60  ;;  %v18025_v52 = vld [vmem:[#allocation26_spill] sm:$0xff]  ;;  %v18026_v13 = vld [vmem:[#allocation132_spill] sm:$0xff] }
 0x2d8   :  { %v15035_v36 = vpop.f32.mrf.mxu3  ;;  %v4436_v22 = vadd.f32 %v14834_v26, %v4234_v30  ;;  %v3095_v25 = vadd.f32 %v18008_v15, %v2859_v43  ;;  %v4236_v29 = vadd.f32 %v18013_v61, %v4000_v40  ;;  %v3768_v49 = vadd.f32 %v18024_v28, %v18023_v54  ;;  %v18027_v21 = vld [vmem:[#allocation14_spill] sm:$0xff]  ;;  %v18029_v43 = vld [vmem:[#allocation32_spill] sm:$0xff]  ;;  %v18033_v15 = vld [vmem:[#allocation37_spill] sm:$0xff] }
 0x2d9   :  { %v5707_v27 = vpop.f32.mrf.mxu0  ;;  %v15047_v20 = vpop.f32.mrf.mxu1  ;;  %v3765_v12 = vadd.f32 %v18005_v7, %v3529_v33  ;;  %v4437_v11 = vadd.f32 %v18007_v18, %v4235_v45  ;;  %v3531_v51 = vadd.f32 %v18011_v6, %v3295_v53  ;;  %v4002_v32 = vadd.f32 %v18016_v44, %v3766_v47  ;;  %v18032_v18 = vld [vmem:[#allocation19_spill] sm:$0xff]  ;;  %v18034_v34 = vld [vmem:[#allocation140_spill] sm:$0xff] }
 0x2da   :  { %v15042_v38 = vpop.f32.mrf.mxu2  ;;  %v4638_v2 = vadd.f32 %v18010_v10, %v4436_v22  ;;  %v3297_v23 = vadd.f32 %v18015_v24, %v3095_v25  ;;  %v4438_v31 = vadd.f32 %v18020_v39, %v4236_v29  ;;  %v18030_v22 = vld [vmem:[#allocation133_spill] sm:$0xff]  ;;  %v18048_v28 = vld [vmem:[#allocation36_spill] sm:$0xff] }
 0x2db   :  { %v4001_v26 = vadd.f32 %v18012_v56, %v3765_v12  ;;  %v4639_v16 = vadd.f32 %v18014_v3, %v4437_v11  ;;  %v3767_v8 = vadd.f32 %v18018_v50, %v3531_v51  ;;  %v4238_v46 = vadd.f32 %v18025_v52, %v4002_v32  ;;  %v18036_v51 = vld [vmem:[#allocation40_spill] sm:$0xff]  ;;  %v18038_v29 = vld [vmem:[#allocation141_spill] sm:$0xff] }
 0x2dc   :  { %v4840_v63 = vadd.f32 %v18017_v4, %v4638_v2  ;;  %v3533_v9 = vadd.f32 %v18022_v35, %v3297_v23  ;;  %v4640_v60 = vadd.f32 %v18029_v43, %v4438_v31  ;;  %v4004_v11 = vadd.f32 %v18032_v18, %v3768_v49  ;;  %v18035_v2 = vld [vmem:[#allocation27_spill] sm:$0xff]  ;;  %v18040_v23 = vld [vmem:[#allocation28_spill] sm:$0xff]  ;;  %v18041_v32 = vld [vmem:[#allocation49_spill] sm:$0xff] }
 0x2dd   :  { %v4237_v48 = vadd.f32 %v18019_v19, %v4001_v26  ;;  %v4841_v5 = vadd.f32 %v18021_v14, %v4639_v16  ;;  %v4003_v33 = vadd.f32 %v18027_v21, %v3767_v8  ;;  %v4440_v25 = vadd.f32 %v18033_v15, %v4238_v46  ;;  %v18037_v26 = vld [vmem:[#allocation41_spill] sm:$0xff]  ;;  %v18039_v16 = vld [vmem:[#allocation24_spill] sm:$0xff]  ;;  %v18043_v8 = vld [vmem:[#allocation38_spill] sm:$0xff] }
 0x2de   :  { %v5042_v41 = vadd.f32 %v18026_v13, %v4840_v63  ;;  %v3769_v40 = vadd.f32 %v18031_v62, %v3533_v9  ;;  %v4842_v61 = vadd.f32 %v18037_v26, %v4640_v60  ;;  %v4240_v44 = vadd.f32 %v18040_v23, %v4004_v11  ;;  %v18042_v63 = vld [vmem:[#allocation47_spill] sm:$0xff]  ;;  %v18045_v31 = vld [vmem:[#allocation56_spill] sm:$0xff]  ;;  %v18047_v9 = vld [vmem:[#allocation25_spill] sm:$0xff] }
 0x2df   :  { %v4439_v45 = vadd.f32 %v18028_v57, %v4237_v48  ;;  %v5043_v53 = vadd.f32 %v18030_v22, %v4841_v5  ;;  %v4239_v6 = vadd.f32 %v18035_v2, %v4003_v33  ;;  %v4642_v4 = vadd.f32 %v18041_v32, %v4440_v25  ;;  %v18044_v48 = vld [vmem:[#allocation51_spill] sm:$0xff]  ;;  %v18046_v5 = vld [vmem:[#allocation62_spill] sm:$0xff]  ;;  %v18049_v52 = vld [vmem:[#allocation61_spill] sm:$0xff] }
 0x2e0   :  { %v15072_v30 = vpop.f32.mrf.mxu3  ;;  %v5244_v47 = vadd.f32 %v18034_v34, %v5042_v41  ;;  %v4005_v24 = vadd.f32 %v18039_v16, %v3769_v40  ;;  %v5044_v14 = vadd.f32 %v18045_v31, %v4842_v61  ;;  %v4442_v49 = vadd.f32 %v18048_v28, %v4240_v44  ;;  %v18050_v41 = vld [vmem:[#allocation50_spill] sm:$0xff]  ;;  %v18053_v22 = vld [vmem:[#allocation35_spill] sm:$0xff]  ;;  %v18054_v62 = vld [vmem:[#allocation44_spill] sm:$0xff] }
 0x2e1   :  { %v5787_v12 = vpop.f32.mrf.mxu0  ;;  %v15084_v10 = vpop.f32.mrf.mxu1  ;;  %v4641_v56 = vadd.f32 %v18036_v51, %v4439_v45  ;;  %v5245_v3 = vadd.f32 %v18038_v29, %v5043_v53  ;;  %v4441_v19 = vadd.f32 %v18043_v8, %v4239_v6  ;;  %v4844_v46 = vadd.f32 %v18049_v52, %v4642_v4  ;;  %v18051_v33 = vld [vmem:[#allocation134_spill] sm:$0xff]  ;;  %v18052_v45 = vld [vmem:[#allocation139_spill] sm:$0xff]  ;;  %v18055_v18 = vld [vmem:[#allocation136_spill] sm:$0xff] }
 0x2e2   :  { %v15078_v7 = vpop.f32.mrf.mxu2  ;;  %v5446_v50 = vadd.f32 %v18042_v63, %v5244_v47  ;;  %v4241_v54 = vadd.f32 %v18047_v9, %v4005_v24  ;;  %v5246_v43 = vadd.f32 %v18052_v45, %v5044_v14  ;;  %v4644_v40 = vadd.f32 %v18054_v62, %v4442_v49  ;;  %v18056_v34 = vld [vmem:[#allocation59_spill] sm:$0xff]  ;;  %v18057_v2 = vld [vmem:[#allocation142_spill] sm:$0xff]  ;;  %v18058_v6 = vld [vmem:[#allocation64_spill] sm:$0xff] }
 0x2e3   :  { %v4843_v39 = vadd.f32 %v18044_v48, %v4641_v56  ;;  %v5447_v35 = vadd.f32 %v18046_v5, %v5245_v3  ;;  %v4643_v21 = vadd.f32 %v18050_v41, %v4441_v19  ;;  %v5046_v11 = vadd.f32 %v18055_v18, %v4844_v46  ;;  %v18059_v61 = vld [vmem:[#allocation46_spill] sm:$0xff]  ;;  %v18061_v16 = vld [vmem:[#allocation144_spill] sm:$0xff]  ;;  %v18063_v63 = vld [vmem:[#allocation71_spill] sm:$0xff] }
 0x2e4   :  { %v5648_v13 = vadd.f32 %v14978_v58, %v5446_v50  ;;  %v4443_v53 = vadd.f32 %v18053_v22, %v4241_v54  ;;  %v5448_v51 = vadd.f32 %v18058_v6, %v5246_v43  ;;  %v18064_v48 = vld [vmem:[#allocation60_spill] sm:$0xff]  ;;  %v18068_v52 = vld [vmem:[#allocation138_spill] sm:$0xff]  ;;  %v18069_v41 = vld [vmem:[#allocation143_spill] sm:$0xff] }
 0x2e5   :  { %v5045_v57 = vadd.f32 %v18051_v33, %v4843_v39  ;;  %v5649_v60 = vadd.f32 %v14983_v37, %v5447_v35  ;;  %v4845_v47 = vadd.f32 %v18056_v34, %v4643_v21  ;;  %v18060_v37 = vld [vmem:[#allocation53_spill] sm:$0xff]  ;;  %v5248_v24 = vadd.f32 %v18061_v16, %v5046_v11  ;;  %v18066_v14 = vld [vmem:[#allocation52_spill] sm:$0xff]  ;;  %v18072_v62 = vld [vmem:[#allocation70_spill] sm:$0xff] }
 0x2e6   :  { %v5850_v15 = vadd.f32 %v5707_v27, %v5648_v13  ;;  %v4645_v29 = vadd.f32 %v18059_v61, %v4443_v53  ;;  %v4846_v3 = vadd.f32 %v18060_v37, %v4644_v40  ;;  %v18062_v27 = vld [vmem:[#allocation137_spill] sm:$0xff]  ;;  %v5650_v8 = vadd.f32 %v14976_v42, %v5448_v51  ;;  %v18071_v43 = vld [vmem:[#allocation48_spill] sm:$0xff] }
 0x2e7   :  { %v5247_v58 = vadd.f32 %v18057_v2, %v5045_v57  ;;  %v5851_v56 = vadd.f32 %v15047_v20, %v5649_v60  ;;  %v5047_v4 = vadd.f32 %v18062_v27, %v4845_v47  ;;  %v18065_v20 = vld [vmem:[#allocation135_spill] sm:$0xff]  ;;  %v5450_v5 = vadd.f32 %v18066_v14, %v5248_v24  ;;  %v18067_v35 = vld [vmem:[#allocation145_spill] sm:$0xff] }
 0x2e8   :  { %v5847_v25 = vpop.f32.mrf.mxu3  ;;  %v4847_v39 = vadd.f32 %v18064_v48, %v4645_v29  ;;  %v5048_v31 = vadd.f32 %v18065_v20, %v4846_v3  ;;  %v5852_v28 = vadd.f32 %v15042_v38, %v5650_v8  ;;  %v18070_v21 = vld [vmem:[#allocation65_spill] sm:$0xff] }
 0x2e9   :  { %v5909_v26 = vpop.f32.mrf.mxu0  ;;  %v5929_v32 = vpop.f32.mrf.mxu1  ;;  %v5449_v50 = vadd.f32 %v18063_v63, %v5247_v58  ;;  %v5249_v9 = vadd.f32 %v18067_v35, %v5047_v4  ;;  %v5652_v13 = vadd.f32 %v15010_v17, %v5450_v5 }
 0x2ea   :  { %v5949_v23 = vpop.f32.mrf.mxu2  ;;  %v6052_v44 = vadd.f32 %v5909_v26, %v5850_v15  ;;  %v6053_v19 = vadd.f32 %v5929_v32, %v5851_v56  ;;  %v5049_v46 = vadd.f32 %v18068_v52, %v4847_v39  ;;  %v5250_v42 = vadd.f32 %v18069_v41, %v5048_v31 }
 0x2eb   :  { %v5651_v54 = vadd.f32 %v15003_v0, %v5449_v50  ;;  %v5451_v33 = vadd.f32 %v18070_v21, %v5249_v9  ;;  %v6054_v45 = vadd.f32 %v5949_v23, %v5852_v28  ;;  %v5854_v22 = vadd.f32 %v5787_v12, %v5652_v13 }
 0x2ec   :  { %v6060_v49 = vadd.f32 %v6053_v19, %v6052_v44  ;;  %v5251_v60 = vadd.f32 %v18071_v43, %v5049_v46  ;;  %v5452_v0 = vadd.f32 %v18072_v62, %v5250_v42  ;;  %v12307_v21 = vmov 0  }
 0x2ed   :  { %v5853_v57 = vadd.f32 %v15072_v30, %v5651_v54  ;;  %v5653_v38 = vadd.f32 %v15015_v1, %v5451_v33  ;;  %12266 = vset.pattern.permute.xlu0 %v12307_v21  ;;  %v6129_v33 = vld [vmem:[%s17315_s5] sm:$0xff] }
 0x2ee   :  { %v6061_v18 = vadd.f32 %v6060_v49, %v6054_v45  ;;  %v5453_v34 = vadd.f32 %v14971_v59, %v5251_v60  ;;  %v5654_v47 = vadd.f32 %v15008_v55, %v5452_v0  ;;  %v12306_v59 = vmov 1024.0   ;;  %6132 = vperm.xlu0 %12266, %v6129_v33  }
 0x2ef   :  { %v5855_v30 = vadd.f32 %v15084_v10, %v5653_v38  ;;  %12267 = vrcp.f32 %v12306_v59  ;;  %v6103_v38 = vld [vmem:[%s17316_s4] sm:$0xff] }
 0x2f0   :  { %v5969_v53 = vpop.f32.mrf.mxu3  ;;  %v5655_v12 = vadd.f32 %v15035_v36, %v5453_v34  ;;  %v5856_v6 = vadd.f32 %v15078_v7, %v5654_v47 }
 0x2f1   :  { %v6055_v40 = vadd.f32 %v5969_v53, %v5853_v57  ;;  %v5989_v11 = vpop.f32.mrf.mxu0  ;;  %v6009_v17 = vpop.f32.mrf.mxu1 }
 0x2f2   :  { %v6056_v15 = vadd.f32 %v5989_v11, %v5854_v22  ;;  %v6029_v58 = vpop.f32.mrf.mxu2  ;;  %v6057_v56 = vadd.f32 %v6009_v17, %v5855_v30  ;;  %v5857_v1 = vadd.f32 %v5847_v25, %v5655_v12 }
 0x2f3   :  { %v6062_v2 = vadd.f32 %v6061_v18, %v6055_v40  ;;  %v6058_v26 = vadd.f32 %v6029_v58, %v5856_v6 }
 0x2f5   :  { %v6063_v51 = vadd.f32 %v6062_v2, %v6056_v15  ;;  %v12268_v55 = vpop.eup %12267 }
 0x2f6   :  { %v6070_v10 = vmul.f32 1024.0, %v12268_v55  ;;  %vm6074_vm14 = vweird.f32 %v12268_v55 }
 0x2f7   :  { %v6064_v61 = vadd.f32 %v6063_v51, %v6057_v56 }
 0x2f8   :  { %v6049_v29 = vpop.f32.mrf.mxu3  ;;  %v6071_v24 = vsub.f32 1.0, %v6070_v10 }
 0x2f9   :  { %v6059_v37 = vadd.f32 %v6049_v29, %v5857_v1  ;;  %v6065_v3 = vadd.f32 %v6064_v61, %v6058_v26 }
 0x2fa   :  { %v6072_v23 = vmul.f32 %v12268_v55, %v6071_v24 }
 0x2fb   :  { %v6066_v16 = vadd.f32 %v6065_v3, %v6059_v37 }
 0x2fc   :  { %v6073_v32 = vadd.f32 %v12268_v55, %v6072_v23 }
 0x2fd   :  { %6067 = vadd.xlane.f32.xlu1 %v6066_v16 }
 0x2fe   :  { %v15138_v36 = vsel %vm6074_vm14, %v12268_v55, %v6073_v32 }
 0x2ff   :  { %18073 = vst [vmem:[#allocation79_spill] sm:$0xff] %v15138_v36 }
 0x370   :  { %v6068_v7 = vpop.xlane.xlu1 %6067 }
 0x371   :  { %v6076_v25 = vmul.f32 %v15138_v36, %v6068_v7 }
 0x373   :  { %v6077_v27 = vsub.f32 %v6052_v44, %v6076_v25  ;;  %v6078_v4 = vsub.f32 %v6053_v19, %v6076_v25  ;;  %v6079_v63 = vsub.f32 %v6054_v45, %v6076_v25  ;;  %v15141_v50 = vsub.f32 %v6055_v40, %v6076_v25 }
 0x374   :  { %v6081_v39 = vsub.f32 %v6056_v15, %v6076_v25  ;;  %v15143_v14 = vsub.f32 %v6057_v56, %v6076_v25  ;;  %v15147_v9 = vsub.f32 %v6058_v26, %v6076_v25  ;;  %v6084_v44 = vsub.f32 %v6059_v37, %v6076_v25  ;;  %v6133_v15 = vpop.permute.xlu0 %6132 }
 0x375   :  { %v6085_v8 = vmul.f32 %v6077_v27, %v6077_v27  ;;  %v6086_v48 = vmul.f32 %v6078_v4, %v6078_v4  ;;  %v6087_v20 = vmul.f32 %v6079_v63, %v6079_v63  ;;  %v6088_v5 = vmul.f32 %v15141_v50, %v15141_v50 }
 0x376   :  { %v6089_v54 = vmul.f32 %v6081_v39, %v6081_v39  ;;  %v6090_v19 = vmul.f32 %v15143_v14, %v15143_v14  ;;  %v6091_v52 = vmul.f32 %v15147_v9, %v15147_v9  ;;  %v6092_v13 = vmul.f32 %v6084_v44, %v6084_v44 }
 0x377   :  { %v6093_v31 = vadd.f32 %v6086_v48, %v6085_v8 }
 0x379   :  { %v6094_v35 = vadd.f32 %v6093_v31, %v6087_v20 }
 0x37b   :  { %v6095_v28 = vadd.f32 %v6094_v35, %v6088_v5 }
 0x37d   :  { %v6096_v49 = vadd.f32 %v6095_v28, %v6089_v54 }
 0x37f   :  { %v6097_v46 = vadd.f32 %v6096_v49, %v6090_v19  ;;  %v18074_v19 = vld [vmem:[#allocation2_spill] sm:$0xff] }
 0x380   :  { %v18075_v49 = vperm.slane %v18074_v19, 0 }
 0x381   :  { %v6098_v41 = vadd.f32 %v6097_v46, %v6091_v52  ;;  %v18076_v46 = vperm.slane %v18074_v19, 1 }
 0x383   :  { %v6099_v42 = vadd.f32 %v6098_v41, %v6092_v13  ;;  %v12001_v41 = vld [vmem:[%s17317_s2 + $0x8] sm:$0xff] }
 0x385   :  { %6100 = vadd.xlane.f32.xlu2 %v6099_v42 }
 0x3f8   :  { %v6101_v57 = vpop.xlane.xlu2 %6100 }
 0x3f9   :  { %v6102_v45 = vmul.f32 %v6101_v57, %v15138_v36 }
 0x3fb   :  { %v6104_v43 = vadd.f32 1e-05, %v6102_v45  ;;  %v18077_v45 = vperm.slane %v18074_v19, 2 }
 0x3fd   :  { %12269 = vrsqrt.f32 %v6104_v43  ;;  %vm6111_vm15 = vweird.f32 %v6104_v43 }
 0x403   :  { %v12270_v60 = vpop.eup %12269 }
 0x404   :  { %v6106_v22 = vmul.f32 %v12270_v60, %v6104_v43  ;;  %vm6112_vm14 = vweird.f32 %v12270_v60 }
 0x405   :  { %vm6113_vm13 = vmor %vm6111_vm15, %vm6112_vm14 }
 0x406   :  { %v6107_v53 = vmul.f32 %v12270_v60, %v6106_v22 }
 0x408   :  { %v6108_v62 = vmul.f32 0.5, %v6107_v53 }
 0x40a   :  { %v6109_v0 = vsub.f32 1.5, %v6108_v62 }
 0x40c   :  { %v6110_v40 = vmul.f32 %v12270_v60, %v6109_v0  ;;  %v18078_v0 = vperm.slane %v18074_v19, 3 }
 0x40e   :  { %v6114_v18 = vsel %vm6113_vm13, %v12270_v60, %v6110_v40  ;;  %v18079_v40 = vperm.slane %v18074_v19, 4 }
 0x40f   :  { %v6115_v11 = vmul.f32 %v6114_v18, %v6103_v38 }
 0x411   :  { %6118 = vperm.xlu0 %12266, %v6115_v11  }
 0x483   :  { %v6119_v17 = vpop.permute.xlu0 %6118 }
 0x484   :  { %v6121_v34 = vmul.f32 %v6119_v17, %v6077_v27  ;;  %v6122_v47 = vmul.f32 %v6119_v17, %v6078_v4  ;;  %v6128_v30 = vmul.f32 %v6119_v17, %v6084_v44  ;;  %v6123_v6 = vmul.f32 %v6119_v17, %v6079_v63 }
 0x485   :  { %v6125_v51 = vmul.f32 %v6119_v17, %v6081_v39  ;;  %v6124_v59 = vmul.f32 %v6119_v17, %v15141_v50  ;;  %v6126_v7 = vmul.f32 %v6119_v17, %v15143_v14  ;;  %v6127_v27 = vmul.f32 %v6119_v17, %v15147_v9  ;;  %v18080_v17 = vld [vmem:[#allocation3_spill] sm:$0xff] }
 0x486   :  { %v6135_v2 = vadd.f32 %v6133_v15, %v6121_v34  ;;  %v6136_v58 = vadd.f32 %v6133_v15, %v6122_v47  ;;  %v6142_v12 = vadd.f32 %v6133_v15, %v6128_v30  ;;  %v6137_v26 = vadd.f32 %v6133_v15, %v6123_v6 }
 0x487   :  { %v6139_v3 = vadd.f32 %v6133_v15, %v6125_v51  ;;  %v6138_v24 = vadd.f32 %v6133_v15, %v6124_v59  ;;  %v6140_v4 = vadd.f32 %v6133_v15, %v6126_v7  ;;  %v6141_v50 = vadd.f32 %v6133_v15, %v6127_v27 }
 0x488   :  { %vm6143_vm12 = vcmp.ge.f32.partialorder %v6135_v2, 0.0  ;;  %vm6144_vm11 = vcmp.ge.f32.partialorder %v6136_v58, 0.0  ;;  %v6151_v56 = vmul.f32 0.01, %v6135_v2  ;;  %v6152_v1 = vmul.f32 0.01, %v6136_v58 }
 0x489   :  { %vm6150_vm10 = vcmp.ge.f32.partialorder %v6142_v12, 0.0  ;;  %v6158_v61 = vmul.f32 0.01, %v6142_v12  ;;  %v6153_v55 = vmul.f32 0.01, %v6137_v26  ;;  %vm6145_vm13 = vcmp.ge.f32.partialorder %v6137_v26, 0.0 }
 0x48a   :  { %v15160_v29 = vsel %vm6143_vm12, %v6135_v2, %v6151_v56  ;;  %v15162_v37 = vsel %vm6144_vm11, %v6136_v58, %v6152_v1  ;;  %v6155_v10 = vmul.f32 0.01, %v6139_v3  ;;  %vm6147_vm12 = vcmp.ge.f32.partialorder %v6139_v3, 0.0 }
 0x48b   :  { %6222 = vrot.lane.b32.xlu0 %v15162_v37, %s12289_s9  ;;  %v15166_v16 = vsel %vm6150_vm10, %v6142_v12, %v6158_v61  ;;  %6220 = vrot.lane.b32.xlu1 %v15160_v29, %s12289_s9  ;;  %v15173_v23 = vsel %vm6145_vm13, %v6137_v26, %v6153_v55  ;;  %v6154_v25 = vmul.f32 0.01, %v6138_v24  ;;  %vm6146_vm10 = vcmp.ge.f32.partialorder %v6138_v24, 0.0  ;;  %v15362_v61 = vld [vmem:[%s17317_s2] sm:$0xff] }
 0x48c   :  { %6217 = vrot.lane.b32.xlu2 %v15166_v16, %s12289_s9  ;;  %v15177_v32 = vsel %vm6147_vm12, %v6139_v3, %v6155_v10  ;;  %v6156_v8 = vmul.f32 0.01, %v6140_v4  ;;  %vm6148_vm11 = vcmp.ge.f32.partialorder %v6140_v4, 0.0  ;;  %v6157_v48 = vmul.f32 0.01, %v6141_v50 }
 0x48d   :  { %v15185_v63 = vsel %vm6146_vm10, %v6138_v24, %v6154_v25  ;;  %vm6149_vm15 = vcmp.ge.f32.partialorder %v6141_v50, 0.0  ;;  %v18081_v34 = vperm.slane %v18080_v17, 0  ;;  %v18082_v6 = vperm.slane %v18074_v19, 5 }
 0x48e   :  { %v15193_v39 = vsel %vm6148_vm11, %v6140_v4, %v6156_v8  ;;  %v15195_v20 = vsel %vm6149_vm15, %v6141_v50, %v6157_v48  ;;  %v18083_v1 = vperm.slane %v18080_v17, 1  ;;  %v18084_v24 = vperm.slane %v18074_v19, 6 }
 0x48f   :  { %v18085_v25 = vperm.slane %v18074_v19, 7  ;;  %vm18265_vm15 = vcmask 7168  }
 0x493   :  { %6224 = vrot.lane.b32.xlu0 %v15173_v23, %s12289_s9  ;;  %6180 = vrot.lane.b32.xlu1 %v15162_v37, %s12290_s22 }
 0x494   :  { %6228 = vrot.lane.b32.xlu2 %v15177_v32, %s12289_s9 }
 0x49b   :  { %6226 = vrot.lane.b32.xlu0 %v15185_v63, %s12289_s9  ;;  %6178 = vrot.lane.b32.xlu1 %v15160_v29, %s12290_s22 }
 0x49c   :  { %6168 = vrot.lane.b32.xlu2 %v15166_v16, %s12290_s22 }
 0x4a3   :  { %6230 = vrot.lane.b32.xlu0 %v15193_v39, %s12289_s9  ;;  %6190 = vrot.lane.b32.xlu1 %v15195_v20, %s12290_s22 }
 0x4a4   :  { %6188 = vrot.lane.b32.xlu2 %v15193_v39, %s12290_s22 }
 0x4ab   :  { %6232 = vrot.lane.b32.xlu0 %v15195_v20, %s12289_s9  ;;  %6593 = vrot.lane.b32.xlu1 %v15173_v23, %s12291_s23 }
 0x4ac   :  { %6591 = vrot.lane.b32.xlu2 %v15162_v37, %s12291_s23 }
 0x4b3   :  { %6182 = vrot.lane.b32.xlu0 %v15173_v23, %s12290_s22  ;;  %6595 = vrot.lane.b32.xlu1 %v15185_v63, %s12291_s23 }
 0x4b4   :  { %6589 = vrot.lane.b32.xlu2 %v15160_v29, %s12291_s23 }
 0x4bb   :  { %6184 = vrot.lane.b32.xlu0 %v15185_v63, %s12290_s22  ;;  %6597 = vrot.lane.b32.xlu1 %v15177_v32, %s12291_s23 }
 0x4bc   :  { %6601 = vrot.lane.b32.xlu2 %v15195_v20, %s12291_s23 }
 0x4c3   :  { %6186 = vrot.lane.b32.xlu0 %v15177_v32, %s12290_s22  ;;  %6800 = vrot.lane.b32.xlu1 %v15166_v16, %s12292_s24 }
 0x4c4   :  { %6807 = vrot.lane.b32.xlu2 %v15173_v23, %s12292_s24 }
 0x4cb   :  { %6586 = vrot.lane.b32.xlu0 %v15166_v16, %s12291_s23  ;;  %6813 = vrot.lane.b32.xlu1 %v15193_v39, %s12292_s24 }
 0x4cc   :  { %6809 = vrot.lane.b32.xlu2 %v15185_v63, %s12292_s24 }
 0x4d3   :  { %6599 = vrot.lane.b32.xlu0 %v15193_v39, %s12291_s23  ;;  %7019 = vrot.lane.b32.xlu1 %v15162_v37, %s12293_s25 }
 0x4d4   :  { %6811 = vrot.lane.b32.xlu2 %v15177_v32, %s12292_s24 }
 0x4db   :  { %6805 = vrot.lane.b32.xlu0 %v15162_v37, %s12292_s24  ;;  %7017 = vrot.lane.b32.xlu1 %v15160_v29, %s12293_s25 }
 0x4dc   :  { %7014 = vrot.lane.b32.xlu2 %v15166_v16, %s12293_s25 }
 0x4e3   :  { %6803 = vrot.lane.b32.xlu0 %v15160_v29, %s12292_s24  ;;  %7029 = vrot.lane.b32.xlu1 %v15195_v20, %s12293_s25 }
 0x4e4   :  { %7027 = vrot.lane.b32.xlu2 %v15193_v39, %s12293_s25 }
 0x4e6   :  { %v15251_v31 = vpop.permute.xlu2 %6217 }
 0x4eb   :  { %6815 = vrot.lane.b32.xlu0 %v15195_v20, %s12292_s24  ;;  %7235 = vrot.lane.b32.xlu1 %v15173_v23, %s12294_s26 }
 0x4ec   :  { %7233 = vrot.lane.b32.xlu2 %v15162_v37, %s12294_s26 }
 0x4ee   :  { %v6229_v14 = vpop.permute.xlu2 %6228 }
 0x4f3   :  { %7021 = vrot.lane.b32.xlu0 %v15173_v23, %s12293_s25  ;;  %7237 = vrot.lane.b32.xlu1 %v15185_v63, %s12294_s26 }
 0x4f4   :  { %7231 = vrot.lane.b32.xlu2 %v15160_v29, %s12294_s26 }
 0x4f6   :  { %v15265_v5 = vpop.permute.xlu2 %6168 }
 0x4fb   :  { %7023 = vrot.lane.b32.xlu0 %v15185_v63, %s12293_s25  ;;  %7239 = vrot.lane.b32.xlu1 %v15177_v32, %s12294_s26 }
 0x4fc   :  { %7243 = vrot.lane.b32.xlu2 %v15195_v20, %s12294_s26 }
 0x4fd   :  { %v6223_v35 = vpop.permute.xlu0 %6222  ;;  %v6221_v9 = vpop.permute.xlu1 %6220 }
 0x4fe   :  { %v15273_v54 = vpop.permute.xlu2 %6188  ;;  %v15276_v28 = vsel %vm126_vm0, %v6221_v9, %v6223_v35  ;;  %v15280_v44 = vsel %vm126_vm0, %v15251_v31, %v6221_v9 }
 0x4ff   :  { %v6250_v52 = vmul.f32 %v15280_v44, %v18075_v49  ;;  %v6251_v13 = vmul.f32 %v15276_v28, %v18076_v46  ;;  %v18087_v49 = vperm.slane %v18080_v17, 6  ;;  %v18088_v46 = vld [vmem:[#allocation4_spill] sm:$0xff] }
 0x501   :  { %6278 = vmatpush.msra.mxu0 %v6250_v52  ;;  %6298 = vmatpush.msra.mxu1 %v6251_v13  ;;  %v18089_v13 = vperm.slane %v18088_v46, 2 }
 0x502   :  { %12002 = vmatmul.msk.f32.vlgmr.msra.gmra.mxu0 %vm174_vm1, %v12001_v41  ;;  %12003 = vmatmul.msk.f32.vlgmr.msra.gmra.mxu1 %vm174_vm1, %v12001_v41 }
 0x503   :  { %7025 = vrot.lane.b32.xlu0 %v15177_v32, %s12293_s25  ;;  %7442 = vrot.lane.b32.xlu1 %v15166_v16, %s12295_s16 }
 0x504   :  { %7449 = vrot.lane.b32.xlu2 %v15173_v23, %s12295_s16 }
 0x505   :  { %v6225_v42 = vpop.permute.xlu0 %6224  ;;  %v6181_v33 = vpop.permute.xlu1 %6180 }
 0x506   :  { %v15300_v21 = vsel %vm126_vm0, %v6223_v35, %v6225_v42  ;;  %v15302_v57 = vpop.permute.xlu2 %6591  ;;  %v18086_v35 = vperm.slane %v18080_v17, 2 }
 0x507   :  { %v6252_v43 = vmul.f32 %v15300_v21, %v18077_v45 }
 0x509   :  { %6318 = vmatpush.msra.mxu2 %v6252_v43 }
 0x50a   :  { %12004 = vmatmul.msk.f32.vlgmr.msra.gmra.mxu2 %vm174_vm1, %v12001_v41 }
 0x50b   :  { %7228 = vrot.lane.b32.xlu0 %v15166_v16, %s12294_s26  ;;  %7455 = vrot.lane.b32.xlu1 %v15193_v39, %s12295_s16 }
 0x50c   :  { %7451 = vrot.lane.b32.xlu2 %v15185_v63, %s12295_s16 }
 0x50d   :  { %v6227_v60 = vpop.permute.xlu0 %6226  ;;  %v6179_v62 = vpop.permute.xlu1 %6178 }
 0x50e   :  { %v15315_v22 = vsel %vm126_vm0, %v6225_v42, %v6227_v60  ;;  %v15318_v53 = vsel %vm126_vm0, %v6227_v60, %v6229_v14  ;;  %v15326_v11 = vpop.permute.xlu2 %6589  ;;  %v15330_v15 = vsel %vm63_vm2, %v15265_v5, %v6179_v62  ;;  %v15342_v30 = vsel %vm63_vm2, %v6179_v62, %v6181_v33 }
 0x50f   :  { %v6253_v38 = vmul.f32 %v15315_v22, %v18078_v0  ;;  %v6254_v18 = vmul.f32 %v15318_v53, %v18079_v40  ;;  %v6208_v47 = vmul.f32 %v15330_v15, %v18081_v34  ;;  %v6209_v26 = vmul.f32 %v15342_v30, %v18083_v1 }
 0x510   :  { %v18090_v62 = vperm.slane %v18080_v17, 3  ;;  %v18091_v40 = vperm.slane %v18080_v17, 7  ;;  %v18093_v1 = vperm.slane %v18080_v17, 4 }
 0x511   :  { %6338 = vmatpush.msra.mxu3 %v6253_v38  ;;  %6358 = vmatpush.msrb.mxu0 %v6254_v18 }
 0x512   :  { %12005 = vmatmul.msk.f32.vlgmr.msra.gmra.mxu3 %vm174_vm1, %v12001_v41  ;;  %12006 = vmatmul.msk.f32.vlgmr.msrb.gmra.mxu0 %vm174_vm1, %v12001_v41 }
 0x513   :  { %6441 = vmatpush.msra.mxu0 %v6208_v47  ;;  %7241 = vrot.lane.b32.xlu0 %v15193_v39, %s12294_s26  ;;  %v15456_v47 = vsel %vm518_vm3, %v15326_v11, %v15302_v57 }
 0x514   :  { %7661 = vrot.lane.b32.xlu1 %v15162_v37, %s12296_s28  ;;  %7453 = vrot.lane.b32.xlu2 %v15177_v32, %s12295_s16 }
 0x515   :  { %v6231_v2 = vpop.permute.xlu0 %6230  ;;  %v6191_v12 = vpop.permute.xlu1 %6190 }
 0x516   :  { %v15347_v58 = vsel %vm126_vm0, %v6229_v14, %v6231_v2  ;;  %v15352_v56 = vpop.permute.xlu2 %6601  ;;  %v15396_v50 = vsel %vm63_vm2, %v15273_v54, %v6191_v12 }
 0x517   :  { %v6255_v51 = vmul.f32 %v15347_v58, %v18082_v6  ;;  %v6214_v52 = vmul.f32 %v15396_v50, %v18087_v49  ;;  %v18097_v49 = vperm.slane %v18088_v46, 7 }
 0x519   :  { %6378 = vmatpush.msrb.mxu1 %v6255_v51 }
 0x51a   :  { %12007 = vmatmul.msk.f32.vlgmr.msrb.gmra.mxu1 %vm174_vm1, %v12001_v41  ;;  %12010 = vmatmul.msk.f32.vlgmr.msra.gmra.mxu0 %vm174_vm1, %v15362_v61 }
 0x51b   :  { %6461 = vmatpush.msra.mxu1 %v6209_v26  ;;  %7447 = vrot.lane.b32.xlu0 %v15162_v37, %s12295_s16  ;;  %v18094_v26 = vperm.slane %v18080_v17, 5 }
 0x51c   :  { %7659 = vrot.lane.b32.xlu1 %v15160_v29, %s12296_s28  ;;  %7656 = vrot.lane.b32.xlu2 %v15166_v16, %s12296_s28 }
 0x51d   :  { %v6233_v3 = vpop.permute.xlu0 %6232  ;;  %v6594_v10 = vpop.permute.xlu1 %6593 }
 0x51e   :  { %v15372_v59 = vsel %vm126_vm0, %v6231_v2, %v6233_v3  ;;  %v15376_v55 = vsel %vm126_vm0, %v6233_v3, %v15251_v31  ;;  %v15384_v4 = vpop.permute.xlu2 %6807  ;;  %v15405_v14 = vsel %vm518_vm3, %v15302_v57, %v6594_v10  ;;  %vm18200_vm0 = vcmask 72704  }
 0x51f   :  { %v6256_v7 = vmul.f32 %v15372_v59, %v18084_v24  ;;  %v6257_v27 = vmul.f32 %v15376_v55, %v18085_v25  ;;  %v18095_v24 = vperm.slane %v18088_v46, 1 }
 0x521   :  { %6398 = vmatpush.msrb.mxu2 %v6256_v7  ;;  %6418 = vmatpush.msrb.mxu3 %v6257_v27  ;;  %v6620_v7 = vmul.f32 %v15456_v47, %v18095_v24 }
 0x522   :  { %12008 = vmatmul.msk.f32.vlgmr.msrb.gmra.mxu2 %vm174_vm1, %v12001_v41  ;;  %12009 = vmatmul.msk.f32.vlgmr.msrb.gmra.mxu3 %vm174_vm1, %v12001_v41  ;;  %v6621_v41 = vmul.f32 %v15405_v14, %v18089_v13 }
 0x523   :  { %7445 = vrot.lane.b32.xlu0 %v15160_v29, %s12295_s16  ;;  %12011 = vmatmul.msk.f32.vlgmr.msra.gmra.mxu1 %vm174_vm1, %v15362_v61 }
 0x524   :  { %7671 = vrot.lane.b32.xlu1 %v15195_v20, %s12296_s28  ;;  %7669 = vrot.lane.b32.xlu2 %v15193_v39, %s12296_s28 }
 0x525   :  { %v6183_v8 = vpop.permute.xlu0 %6182  ;;  %v6596_v31 = vpop.permute.xlu1 %6595 }
 0x526   :  { %v15401_v48 = vsel %vm63_vm2, %v6181_v33, %v6183_v8  ;;  %v15410_v19 = vpop.permute.xlu2 %6809  ;;  %v15428_v33 = vsel %vm63_vm2, %v6191_v12, %v15265_v5  ;;  %v15434_v60 = vsel %vm518_vm3, %v6594_v10, %v6596_v31  ;;  %v18092_v5 = vperm.slane %v18088_v46, 3 }
 0x527   :  { %v6210_v9 = vmul.f32 %v15401_v48, %v18086_v35  ;;  %v6215_v18 = vmul.f32 %v15428_v33, %v18091_v40  ;;  %v15504_v27 = vsel %vm754_vm4, %v15384_v4, %v15410_v19  ;;  %v18096_v35 = vperm.slane %v18088_v46, 0 }
 0x528   :  { %v6622_v34 = vmul.f32 %v15434_v60, %v18092_v5 }
 0x529   :  { %6481 = vmatpush.msra.mxu2 %v6210_v9 }
 0x52a   :  { %12012 = vmatmul.msk.f32.vlgmr.msra.gmra.mxu2 %vm174_vm1, %v15362_v61 }
 0x52b   :  { %6561 = vmatpush.msrb.mxu2 %v6214_v52  ;;  %7457 = vrot.lane.b32.xlu0 %v15195_v20, %s12295_s16 }
 0x52c   :  { %7877 = vrot.lane.b32.xlu1 %v15173_v23, %s12297_s10  ;;  %7875 = vrot.lane.b32.xlu2 %v15162_v37, %s12297_s10 }
 0x52d   :  { %6687 = vmatpush.msra.mxu2 %v6621_v41  ;;  %v6185_v42 = vpop.permute.xlu0 %6184  ;;  %v6598_v43 = vpop.permute.xlu1 %6597  ;;  %v18098_v41 = vperm.slane %v18088_v46, 4 }
 0x52e   :  { %v15431_v45 = vsel %vm63_vm2, %v6183_v8, %v6185_v42  ;;  %v15439_v38 = vpop.permute.xlu2 %6811  ;;  %v15496_v17 = vsel %vm518_vm3, %v6596_v31, %v6598_v43 }
 0x52f   :  { %v6211_v0 = vmul.f32 %v15431_v45, %v18090_v62  ;;  %v18099_v62 = vld [vmem:[#allocation5_spill] sm:$0xff] }
 0x530   :  { %v18104_v24 = vperm.slane %v18099_v62, 2 }
 0x531   :  { %6501 = vmatpush.msra.mxu3 %v6211_v0  ;;  %v18100_v0 = vperm.slane %v18099_v62, 3 }
 0x532   :  { %12013 = vmatmul.msk.f32.vlgmr.msra.gmra.mxu3 %vm174_vm1, %v15362_v61  ;;  %12016 = vmatmul.msk.f32.vlgmr.msrb.gmra.mxu2 %vm174_vm1, %v15362_v61 }
 0x533   :  { %6581 = vmatpush.msrb.mxu3 %v6215_v18  ;;  %7663 = vrot.lane.b32.xlu0 %v15173_v23, %s12296_s28 }
 0x534   :  { %7879 = vrot.lane.b32.xlu1 %v15185_v63, %s12297_s10  ;;  %7873 = vrot.lane.b32.xlu2 %v15160_v29, %s12297_s10 }
 0x535   :  { %6707 = vmatpush.msra.mxu3 %v6622_v34  ;;  %v6187_v2 = vpop.permute.xlu0 %6186  ;;  %v15469_v51 = vpop.permute.xlu1 %6800 }
 0x536   :  { %v15463_v12 = vsel %vm63_vm2, %v6185_v42, %v6187_v2  ;;  %v15467_v6 = vsel %vm63_vm2, %v6187_v2, %v15273_v54  ;;  %v15477_v10 = vpop.permute.xlu2 %7014  ;;  %v12018_v54 = vld [vmem:[%s17317_s2 + $0x10] sm:$0xff]  ;;  %v6623_v42 = vmul.f32 %v15496_v17, %v18098_v41  ;;  %v18101_v2 = vperm.slane %v18088_v46, 5  ;;  %vm18215_vm2 = vmmov %vm18200_vm0 }
 0x537   :  { %v6212_v57 = vmul.f32 %v15463_v12, %v18093_v1  ;;  %v6213_v3 = vmul.f32 %v15467_v6, %v18094_v26 }
 0x539   :  { %6521 = vmatpush.msrb.mxu0 %v6212_v57  ;;  %6541 = vmatpush.msrb.mxu1 %v6213_v3  ;;  %v18102_v57 = vperm.slane %v18088_v46, 6 }
 0x53a   :  { %12017 = vmatmul.msk.f32.vlgmr.msrb.gmra.mxu3 %vm174_vm1, %v15362_v61  ;;  %12014 = vmatmul.msk.f32.vlgmr.msrb.gmra.mxu0 %vm174_vm1, %v15362_v61 }
 0x53b   :  { %6667 = vmatpush.msra.mxu1 %v6620_v7  ;;  %7665 = vrot.lane.b32.xlu0 %v15185_v63, %s12296_s28 }
 0x53c   :  { %7881 = vrot.lane.b32.xlu1 %v15177_v32, %s12297_s10  ;;  %12015 = vmatmul.msk.f32.vlgmr.msrb.gmra.mxu1 %vm174_vm1, %v15362_v61 }
 0x53d   :  { %7885 = vrot.lane.b32.xlu2 %v15195_v20, %s12297_s10  ;;  %v6587_v25 = vpop.permute.xlu0 %6586  ;;  %12021 = vmatmul.msk.f32.vlgmr.msra.gmra.mxu2 %vm174_vm1, %v12018_v54  ;;  %v15514_v31 = vpop.permute.xlu1 %6813 }
 0x53e   :  { %v15508_v8 = vsel %vm518_vm3, %v15352_v56, %v6587_v25  ;;  %v15512_v61 = vsel %vm518_vm3, %v6587_v25, %v15326_v11  ;;  %v15522_v13 = vpop.permute.xlu2 %7027  ;;  %v6836_v11 = vmul.f32 %v15504_v27, %v18100_v0  ;;  %v18110_v0 = vperm.slane %v18099_v62, 1 }
 0x53f   :  { %v6619_v9 = vmul.f32 %v15512_v61, %v18096_v35  ;;  %v6626_v52 = vmul.f32 %v15508_v8, %v18097_v49  ;;  %v12027_v35 = vld [vmem:[%s17317_s2 + $0x18] sm:$0xff] }
 0x541   :  { %6647 = vmatpush.msra.mxu0 %v6619_v9  ;;  %6787 = vmatpush.msrb.mxu3 %v6626_v52  ;;  %v15594_v9 = vsel %vm754_vm4, %v15439_v38, %v15514_v31 }
 0x542   :  { %12022 = vmatmul.msk.f32.vlgmr.msra.gmra.mxu3 %vm174_vm1, %v12018_v54  ;;  %12019 = vmatmul.msk.f32.vlgmr.msra.gmra.mxu0 %vm174_vm1, %v12018_v54  ;;  %18106 = vst [vmem:[#allocation78_spill] sm:$0xff] %v15594_v9 }
 0x543   :  { %6727 = vmatpush.msrb.mxu0 %v6623_v42  ;;  %6921 = vmatpush.msra.mxu3 %v6836_v11 }
 0x544   :  { %7667 = vrot.lane.b32.xlu0 %v15177_v32, %s12296_s28  ;;  %8084 = vrot.lane.b32.xlu1 %v15166_v16, %s12298_s27 }
 0x545   :  { %8091 = vrot.lane.b32.xlu2 %v15173_v23, %s12298_s27  ;;  %v6600_v40 = vpop.permute.xlu0 %6599  ;;  %12020 = vmatmul.msk.f32.vlgmr.msra.gmra.mxu1 %vm174_vm1, %v12018_v54  ;;  %v15546_v34 = vpop.permute.xlu1 %7019 }
 0x546   :  { %v15540_v18 = vsel %vm518_vm3, %v6598_v43, %v6600_v40  ;;  %v15544_v5 = vsel %vm518_vm3, %v6600_v40, %v15352_v56  ;;  %v15554_v3 = vpop.permute.xlu2 %7233  ;;  %vm18221_vm3 = vmmov %vm18200_vm0 }
 0x547   :  { %v6624_v1 = vmul.f32 %v15540_v18, %v18101_v2  ;;  %v6625_v26 = vmul.f32 %v15544_v5, %v18102_v57 }
 0x549   :  { %6747 = vmatpush.msrb.mxu1 %v6624_v1  ;;  %6767 = vmatpush.msrb.mxu2 %v6625_v26  ;;  %v18112_v1 = vperm.slane %v18099_v62, 5 }
 0x54a   :  { %12025 = vmatmul.msk.f32.vlgmr.msrb.gmra.mxu2 %vm174_vm1, %v12018_v54  ;;  %12026 = vmatmul.msk.f32.vlgmr.msrb.gmra.mxu3 %vm174_vm1, %v12018_v54 }
 0x54b   :  { %12023 = vmatmul.msk.f32.vlgmr.msrb.gmra.mxu0 %vm174_vm1, %v12018_v54  ;;  %v6838_v57 = vmul.f32 %v15594_v9, %v18112_v1 }
 0x54c   :  { %7870 = vrot.lane.b32.xlu0 %v15166_v16, %s12297_s10  ;;  %8097 = vrot.lane.b32.xlu1 %v15193_v39, %s12298_s27 }
 0x54d   :  { %8093 = vrot.lane.b32.xlu2 %v15185_v63, %s12298_s27  ;;  %v6806_v56 = vpop.permute.xlu0 %6805  ;;  %12024 = vmatmul.msk.f32.vlgmr.msrb.gmra.mxu1 %vm174_vm1, %v12018_v54  ;;  %v7018_v43 = vpop.permute.xlu1 %7017 }
 0x54e   :  { %v15568_v46 = vsel %vm754_vm4, %v6806_v56, %v15384_v4  ;;  %v15573_v25 = vpop.permute.xlu2 %7231  ;;  %v15587_v4 = vsel %vm754_vm4, %v15410_v19, %v15439_v38  ;;  %v18109_v19 = vperm.slane %v18099_v62, 0  ;;  %v18111_v38 = vperm.slane %v18099_v62, 4 }
 0x54f   :  { %18103 = vst [vmem:[#allocation54_spill] sm:$0xff] %v15568_v46  ;;  %v6835_v7 = vmul.f32 %v15568_v46, %v18104_v24  ;;  %v15619_v26 = vsel %vm990_vm5, %v7018_v43, %v15546_v34  ;;  %v18115_v24 = vld [vmem:[#allocation7_spill] sm:$0xff]  ;;  %v18229_v46 = vld [vmem:[#allocation69_spill] sm:$0xff] }
 0x550   :  { %18105 = vst [vmem:[#allocation66_spill] sm:$0xff] %v15587_v4  ;;  %v6837_v2 = vmul.f32 %v15587_v4, %v18111_v38 }
 0x551   :  { %6901 = vmatpush.msra.mxu2 %v6835_v7  ;;  %18113 = vst [vmem:[#allocation67_spill] sm:$0xff] %v15619_v26  ;;  %v18116_v7 = vperm.slane %v18115_v24, 0 }
 0x552   :  { %12030 = vmatmul.msk.f32.vlgmr.msra.gmra.mxu2 %vm174_vm1, %v12027_v35  ;;  %12031 = vmatmul.msk.f32.vlgmr.msra.gmra.mxu3 %vm174_vm1, %v12027_v35 }
 0x554   :  { %7883 = vrot.lane.b32.xlu0 %v15193_v39, %s12297_s10  ;;  %8303 = vrot.lane.b32.xlu1 %v15162_v37, %s12299_s15 }
 0x555   :  { %8095 = vrot.lane.b32.xlu2 %v15177_v32, %s12298_s27  ;;  %v6804_v54 = vpop.permute.xlu0 %6803  ;;  %v7030_v41 = vpop.permute.xlu1 %7029 }
 0x556   :  { %v15597_v49 = vsel %vm754_vm4, %v6804_v54, %v6806_v56  ;;  %v15601_v52 = vsel %vm754_vm4, %v15469_v51, %v6804_v54  ;;  %v15609_v40 = vpop.permute.xlu2 %7243  ;;  %v15623_v56 = vsel %vm990_vm5, %v15477_v10, %v7018_v43 }
 0x557   :  { %18107 = vst [vmem:[#allocation86_spill] sm:$0xff] %v15597_v49  ;;  %v6833_v42 = vmul.f32 %v15601_v52, %v18109_v19  ;;  %v6834_v11 = vmul.f32 %v15597_v49, %v18110_v0  ;;  %v7047_v54 = vmul.f32 %v15623_v56, %v18116_v7  ;;  %v18117_v19 = vperm.slane %v18115_v24, 1 }
 0x558   :  { %18108 = vst [vmem:[#allocation57_spill] sm:$0xff] %v15601_v52  ;;  %v18230_v49 = vperm.slane %v18229_v46, 0 }
 0x559   :  { %18114 = vst [vmem:[#allocation72_spill] sm:$0xff] %v15623_v56  ;;  %6861 = vmatpush.msra.mxu0 %v6833_v42  ;;  %6881 = vmatpush.msra.mxu1 %v6834_v11  ;;  %v7048_v0 = vmul.f32 %v15619_v26, %v18117_v19 }
 0x55a   :  { %12028 = vmatmul.msk.f32.vlgmr.msra.gmra.mxu0 %vm174_vm1, %v12027_v35  ;;  %12029 = vmatmul.msk.f32.vlgmr.msra.gmra.mxu1 %vm174_vm1, %v12027_v35 }
 0x55b   :  { %6941 = vmatpush.msrb.mxu0 %v6837_v2  ;;  %6961 = vmatpush.msrb.mxu1 %v6838_v57  ;;  %v18120_v2 = vperm.slane %v18099_v62, 6  ;;  %v18121_v57 = vperm.slane %v18099_v62, 7 }
 0x55c   :  { %8089 = vrot.lane.b32.xlu0 %v15162_v37, %s12298_s27  ;;  %8301 = vrot.lane.b32.xlu1 %v15160_v29, %s12299_s15 }
 0x55d   :  { %8298 = vrot.lane.b32.xlu2 %v15166_v16, %s12299_s15  ;;  %v6816_v43 = vpop.permute.xlu0 %6815  ;;  %7075 = vmatpush.msra.mxu0 %v7047_v54  ;;  %v7236_v38 = vpop.permute.xlu1 %7235 }
 0x55e   :  { %7095 = vmatpush.msra.mxu1 %v7048_v0  ;;  %v15641_v42 = vsel %vm754_vm4, %v15514_v31, %v6816_v43  ;;  %v15645_v11 = vsel %vm754_vm4, %v6816_v43, %v15469_v51  ;;  %v15653_v19 = vpop.permute.xlu2 %7449  ;;  %v15667_v31 = vsel %vm990_vm5, %v15522_v13, %v7030_v41  ;;  %v15675_v0 = vsel %vm1226_vm6, %v15554_v3, %v7236_v38  ;;  %vm18222_vm4 = vmmov %vm18200_vm0 }
 0x55f   :  { %18118 = vst [vmem:[#allocation87_spill] sm:$0xff] %v15641_v42  ;;  %v6839_v1 = vmul.f32 %v15641_v42, %v18120_v2  ;;  %v6840_v7 = vmul.f32 %v15645_v11, %v18121_v57  ;;  %v18125_v43 = vperm.slane %v18115_v24, 2  ;;  %v18126_v57 = vperm.slane %v18115_v24, 6 }
 0x560   :  { %18119 = vst [vmem:[#allocation74_spill] sm:$0xff] %v15645_v11 }
 0x561   :  { %6981 = vmatpush.msrb.mxu2 %v6839_v1  ;;  %7001 = vmatpush.msrb.mxu3 %v6840_v7  ;;  %18122 = vst [vmem:[#allocation95_spill] sm:$0xff] %v15667_v31  ;;  %v18127_v7 = vld [vmem:[#allocation15_spill] sm:$0xff] }
 0x562   :  { %12034 = vmatmul.msk.f32.vlgmr.msrb.gmra.mxu2 %vm174_vm1, %v12027_v35  ;;  %12035 = vmatmul.msk.f32.vlgmr.msrb.gmra.mxu3 %vm174_vm1, %v12027_v35  ;;  %18124 = vst [vmem:[#allocation58_spill] sm:$0xff] %v15675_v0  ;;  %v18128_v36 = vperm.slane %v18127_v7, 2 }
 0x563   :  { %12032 = vmatmul.msk.f32.vlgmr.msrb.gmra.mxu0 %vm174_vm1, %v12027_v35  ;;  %12033 = vmatmul.msk.f32.vlgmr.msrb.gmra.mxu1 %vm174_vm1, %v12027_v35  ;;  %v12036_v35 = vld [vmem:[%s17317_s2 + $0x20] sm:$0xff] }
 0x564   :  { %8087 = vrot.lane.b32.xlu0 %v15160_v29, %s12298_s27  ;;  %8313 = vrot.lane.b32.xlu1 %v15195_v20, %s12299_s15  ;;  %v7263_v56 = vmul.f32 %v15675_v0, %v18128_v36 }
 0x565   :  { %8311 = vrot.lane.b32.xlu2 %v15193_v39, %s12299_s15  ;;  %v7022_v51 = vpop.permute.xlu0 %7021  ;;  %v7238_v54 = vpop.permute.xlu1 %7237 }
 0x566   :  { %v15671_v62 = vsel %vm990_vm5, %v15546_v34, %v7022_v51  ;;  %v15680_v1 = vpop.permute.xlu2 %7451  ;;  %v7053_v34 = vmul.f32 %v15667_v31, %v18126_v57 }
 0x567   :  { %18123 = vst [vmem:[#allocation96_spill] sm:$0xff] %v15671_v62  ;;  %v7049_v2 = vmul.f32 %v15671_v62, %v18125_v43  ;;  %v18133_v62 = vperm.slane %v18115_v24, 7 }
 0x569   :  { %7115 = vmatpush.msra.mxu2 %v7049_v2  ;;  %v15701_v2 = vsel %vm990_vm5, %v7030_v41, %v15477_v10  ;;  %v18134_v41 = vperm.slane %v18127_v7, 3 }
 0x56a   :  { %12039 = vmatmul.msk.f32.vlgmr.msra.gmra.mxu2 %vm174_vm1, %v12036_v35  ;;  %18129 = vst [vmem:[#allocation68_spill] sm:$0xff] %v15701_v2  ;;  %v7054_v10 = vmul.f32 %v15701_v2, %v18133_v62  ;;  %v15732_v62 = vsel %vm1226_vm6, %v15573_v25, %v15554_v3  ;;  %v18140_v3 = vperm.slane %v18127_v7, 1 }
 0x56b   :  { %7195 = vmatpush.msrb.mxu2 %v7053_v34  ;;  %12037 = vmatmul.msk.f32.vlgmr.msra.gmra.mxu0 %vm174_vm1, %v12036_v35  ;;  %v15708_v34 = vsel %vm1226_vm6, %v7236_v38, %v7238_v54  ;;  %18135 = vst [vmem:[#allocation104_spill] sm:$0xff] %v15732_v62 }
 0x56c   :  { %8099 = vrot.lane.b32.xlu0 %v15195_v20, %s12298_s27  ;;  %8519 = vrot.lane.b32.xlu1 %v15173_v23, %s12300_s30  ;;  %18131 = vst [vmem:[#allocation80_spill] sm:$0xff] %v15708_v34 }
 0x56d   :  { %7329 = vmatpush.msra.mxu2 %v7263_v56  ;;  %8517 = vrot.lane.b32.xlu2 %v15162_v37, %s12300_s30  ;;  %v7024_v43 = vpop.permute.xlu0 %7023  ;;  %v7240_v57 = vpop.permute.xlu1 %7239  ;;  %v18132_v56 = vperm.slane %v18115_v24, 3 }
 0x56e   :  { %v15704_v36 = vsel %vm990_vm5, %v7022_v51, %v7024_v43  ;;  %12038 = vmatmul.msk.f32.vlgmr.msra.gmra.mxu1 %vm174_vm1, %v12036_v35  ;;  %v15713_v31 = vpop.permute.xlu2 %7453  ;;  %v7264_v51 = vmul.f32 %v15708_v34, %v18134_v41  ;;  %v18138_v41 = vperm.slane %v18115_v24, 4  ;;  %v18139_v34 = vperm.slane %v18115_v24, 5 }
 0x56f   :  { %18130 = vst [vmem:[#allocation75_spill] sm:$0xff] %v15704_v36  ;;  %v7050_v0 = vmul.f32 %v15704_v36, %v18132_v56 }
 0x571   :  { %7135 = vmatpush.msra.mxu3 %v7050_v0 }
 0x572   :  { %12040 = vmatmul.msk.f32.vlgmr.msra.gmra.mxu3 %vm174_vm1, %v12036_v35  ;;  %12043 = vmatmul.msk.f32.vlgmr.msrb.gmra.mxu2 %vm174_vm1, %v12036_v35 }
 0x573   :  { %7215 = vmatpush.msrb.mxu3 %v7054_v10 }
 0x574   :  { %8305 = vrot.lane.b32.xlu0 %v15173_v23, %s12299_s15  ;;  %8521 = vrot.lane.b32.xlu1 %v15185_v63, %s12300_s30 }
 0x575   :  { %7349 = vmatpush.msra.mxu3 %v7264_v51  ;;  %8515 = vrot.lane.b32.xlu2 %v15160_v29, %s12300_s30  ;;  %v7026_v38 = vpop.permute.xlu0 %7025  ;;  %v15741_v10 = vpop.permute.xlu1 %7442 }
 0x576   :  { %v15735_v0 = vsel %vm990_vm5, %v7024_v43, %v7026_v38  ;;  %v15739_v56 = vsel %vm990_vm5, %v7026_v38, %v15522_v13  ;;  %v15749_v26 = vpop.permute.xlu2 %7656  ;;  %v7262_v43 = vmul.f32 %v15732_v62, %v18140_v3  ;;  %v12045_v13 = vld [vmem:[%s17317_s2 + $0x28] sm:$0xff]  ;;  %v18146_v3 = vperm.slane %v18127_v7, 7  ;;  %vm18223_vm5 = vmmov %vm18200_vm0 }
 0x577   :  { %18136 = vst [vmem:[#allocation82_spill] sm:$0xff] %v15735_v0  ;;  %v7051_v51 = vmul.f32 %v15735_v0, %v18138_v41  ;;  %v7052_v2 = vmul.f32 %v15739_v56, %v18139_v34  ;;  %v15783_v41 = vsel %vm1462_vm7, %v15653_v19, %v15680_v1 }
 0x578   :  { %18137 = vst [vmem:[#allocation110_spill] sm:$0xff] %v15739_v56  ;;  %v18148_v56 = vld [vmem:[#allocation29_spill] sm:$0xff] }
 0x579   :  { %7155 = vmatpush.msrb.mxu0 %v7051_v51  ;;  %7175 = vmatpush.msrb.mxu1 %v7052_v2  ;;  %v15768_v2 = vsel %vm1226_vm6, %v7238_v54, %v7240_v57  ;;  %18144 = vst [vmem:[#allocation91_spill] sm:$0xff] %v15783_v41  ;;  %v18145_v51 = vperm.slane %v18127_v7, 0  ;;  %v18149_v0 = vperm.slane %v18148_v56, 3 }
 0x57a   :  { %12041 = vmatmul.msk.f32.vlgmr.msrb.gmra.mxu0 %vm174_vm1, %v12036_v35  ;;  %12042 = vmatmul.msk.f32.vlgmr.msrb.gmra.mxu1 %vm174_vm1, %v12036_v35  ;;  %18141 = vst [vmem:[#allocation88_spill] sm:$0xff] %v15768_v2 }
 0x57b   :  { %12044 = vmatmul.msk.f32.vlgmr.msrb.gmra.mxu3 %vm174_vm1, %v12036_v35  ;;  %7309 = vmatpush.msra.mxu1 %v7262_v43  ;;  %v7478_v36 = vmul.f32 %v15783_v41, %v18149_v0 }
 0x57c   :  { %12048 = vmatmul.msk.f32.vlgmr.msra.gmra.mxu2 %vm174_vm1, %v12045_v13  ;;  %8307 = vrot.lane.b32.xlu0 %v15185_v63, %s12299_s15 }
 0x57d   :  { %8527 = vrot.lane.b32.xlu2 %v15195_v20, %s12300_s30  ;;  %8523 = vrot.lane.b32.xlu1 %v15177_v32, %s12300_s30  ;;  %v7229_v24 = vpop.permute.xlu0 %7228  ;;  %v15778_v38 = vpop.permute.xlu1 %7455 }
 0x57e   :  { %v15772_v34 = vsel %vm1226_vm6, %v15609_v40, %v7229_v24  ;;  %v15776_v35 = vsel %vm1226_vm6, %v7229_v24, %v15573_v25  ;;  %v15791_v62 = vpop.permute.xlu2 %7669  ;;  %v18147_v25 = vperm.slane %v18127_v7, 4 }
 0x57f   :  { %18142 = vst [vmem:[#allocation111_spill] sm:$0xff] %v15772_v34  ;;  %v7261_v54 = vmul.f32 %v15776_v35, %v18145_v51  ;;  %v7268_v43 = vmul.f32 %v15772_v34, %v18146_v3  ;;  %v18162_v34 = vperm.slane %v18148_v56, 4 }
 0x580   :  { %18143 = vst [vmem:[#allocation76_spill] sm:$0xff] %v15776_v35  ;;  %v7265_v24 = vmul.f32 %v15768_v2, %v18147_v25  ;;  %v18153_v25 = vperm.slane %v18127_v7, 6 }
 0x581   :  { %7289 = vmatpush.msra.mxu0 %v7261_v54  ;;  %7429 = vmatpush.msrb.mxu3 %v7268_v43 }
 0x582   :  { %12046 = vmatmul.msk.f32.vlgmr.msra.gmra.mxu0 %vm174_vm1, %v12045_v13  ;;  %12047 = vmatmul.msk.f32.vlgmr.msra.gmra.mxu1 %vm174_vm1, %v12045_v13 }
 0x583   :  { %12049 = vmatmul.msk.f32.vlgmr.msra.gmra.mxu3 %vm174_vm1, %v12045_v13  ;;  %7369 = vmatpush.msrb.mxu0 %v7265_v24 }
 0x584   :  { %7563 = vmatpush.msra.mxu3 %v7478_v36  ;;  %8309 = vrot.lane.b32.xlu0 %v15177_v32, %s12299_s15  ;;  %v18152_v36 = vperm.slane %v18127_v7, 5 }
 0x585   :  { %8733 = vrot.lane.b32.xlu2 %v15173_v23, %s12301_s19  ;;  %8726 = vrot.lane.b32.xlu1 %v15166_v16, %s12301_s19  ;;  %v7242_v51 = vpop.permute.xlu0 %7241 }
 0x586   :  { %v15809_v0 = vsel %vm1226_vm6, %v7240_v57, %v7242_v51  ;;  %v15813_v54 = vsel %vm1226_vm6, %v7242_v51, %v15609_v40  ;;  %v15815_v3 = vpop.permute.xlu1 %7661  ;;  %v15823_v35 = vpop.permute.xlu2 %7875  ;;  %v18155_v51 = vperm.slane %v18148_v56, 2  ;;  %vm18224_vm6 = vmmov %vm18200_vm0 }
 0x587   :  { %18150 = vst [vmem:[#allocation117_spill] sm:$0xff] %v15809_v0  ;;  %v7266_v43 = vmul.f32 %v15809_v0, %v18152_v36  ;;  %v7267_v24 = vmul.f32 %v15813_v54, %v18153_v25  ;;  %v15858_v25 = vsel %vm1462_vm7, %v15680_v1, %v15713_v31  ;;  %v18161_v1 = vperm.slane %v18148_v56, 1 }
 0x588   :  { %18151 = vst [vmem:[#allocation83_spill] sm:$0xff] %v15813_v54  ;;  %v18160_v54 = vperm.slane %v18148_v56, 0 }
 0x589   :  { %7389 = vmatpush.msrb.mxu1 %v7266_v43  ;;  %7409 = vmatpush.msrb.mxu2 %v7267_v24  ;;  %v12054_v43 = vld [vmem:[%s17317_s2 + $0x30] sm:$0xff]  ;;  %18156 = vst [vmem:[#allocation118_spill] sm:$0xff] %v15858_v25 }
 0x58a   :  { %12050 = vmatmul.msk.f32.vlgmr.msrb.gmra.mxu0 %vm174_vm1, %v12045_v13  ;;  %12051 = vmatmul.msk.f32.vlgmr.msrb.gmra.mxu1 %vm174_vm1, %v12045_v13 }
 0x58b   :  { %12052 = vmatmul.msk.f32.vlgmr.msrb.gmra.mxu2 %vm174_vm1, %v12045_v13  ;;  %12053 = vmatmul.msk.f32.vlgmr.msrb.gmra.mxu3 %vm174_vm1, %v12045_v13 }
 0x58c   :  { %8512 = vrot.lane.b32.xlu0 %v15166_v16, %s12300_s30 }
 0x58d   :  { %8735 = vrot.lane.b32.xlu2 %v15185_v63, %s12301_s19  ;;  %8739 = vrot.lane.b32.xlu1 %v15193_v39, %s12301_s19  ;;  %v7448_v40 = vpop.permute.xlu0 %7447 }
 0x58e   :  { %v15837_v7 = vsel %vm1462_vm7, %v7448_v40, %v15653_v19  ;;  %v7660_v57 = vpop.permute.xlu1 %7659  ;;  %v15842_v13 = vpop.permute.xlu2 %7873 }
 0x58f   :  { %18154 = vst [vmem:[#allocation98_spill] sm:$0xff] %v15837_v7  ;;  %v7477_v36 = vmul.f32 %v15837_v7, %v18155_v51  ;;  %v15870_v7 = vsel %vm1462_vm7, %v15713_v31, %v15778_v38  ;;  %v15885_v2 = vsel %vm1698_vm8, %v7660_v57, %v15815_v3  ;;  %v15889_v31 = vsel %vm1698_vm8, %v15749_v26, %v7660_v57 }
 0x590   :  { %18159 = vst [vmem:[#allocation92_spill] sm:$0xff] %v15870_v7 }
 0x591   :  { %7543 = vmatpush.msra.mxu2 %v7477_v36  ;;  %18163 = vst [vmem:[#allocation105_spill] sm:$0xff] %v15885_v2 }
 0x592   :  { %18164 = vst [vmem:[#allocation84_spill] sm:$0xff] %v15889_v31 }
 0x593   :  { %12057 = vmatmul.msk.f32.vlgmr.msra.gmra.mxu2 %vm174_vm1, %v12054_v43  ;;  %12058 = vmatmul.msk.f32.vlgmr.msra.gmra.mxu3 %vm174_vm1, %v12054_v43 }
 0x594   :  { %8525 = vrot.lane.b32.xlu0 %v15193_v39, %s12300_s30 }
 0x595   :  { %8737 = vrot.lane.b32.xlu2 %v15177_v32, %s12301_s19  ;;  %9125 = vrot.lane.b32.xlu1 %v15173_v23, %s12302_s11  ;;  %v7446_v19 = vpop.permute.xlu0 %7445 }
 0x596   :  { %v15861_v24 = vsel %vm1462_vm7, %v7446_v19, %v7448_v40  ;;  %v15865_v51 = vsel %vm1462_vm7, %v15741_v10, %v7446_v19  ;;  %v7672_v36 = vpop.permute.xlu1 %7671  ;;  %v7479_v19 = vmul.f32 %v15858_v25, %v18162_v34  ;;  %v18166_v34 = vld [vmem:[#allocation34_spill] sm:$0xff] }
 0x597   :  { %18157 = vst [vmem:[#allocation100_spill] sm:$0xff] %v15861_v24  ;;  %v7475_v0 = vmul.f32 %v15865_v51, %v18160_v54  ;;  %v7476_v41 = vmul.f32 %v15861_v24, %v18161_v1  ;;  %v15878_v40 = vpop.permute.xlu2 %7885  ;;  %v18165_v54 = vperm.slane %v18148_v56, 5  ;;  %v18167_v1 = vperm.slane %v18166_v34, 0 }
 0x598   :  { %18158 = vst [vmem:[#allocation124_spill] sm:$0xff] %v15865_v51  ;;  %v18168_v25 = vperm.slane %v18166_v34, 1 }
 0x599   :  { %7503 = vmatpush.msra.mxu0 %v7475_v0  ;;  %v7480_v51 = vmul.f32 %v15870_v7, %v18165_v54  ;;  %7523 = vmatpush.msra.mxu1 %v7476_v41  ;;  %v7689_v24 = vmul.f32 %v15889_v31, %v18167_v1  ;;  %v18172_v1 = vperm.slane %v18148_v56, 7 }
 0x59a   :  { %12055 = vmatmul.msk.f32.vlgmr.msra.gmra.mxu0 %vm174_vm1, %v12054_v43  ;;  %12056 = vmatmul.msk.f32.vlgmr.msra.gmra.mxu1 %vm174_vm1, %v12054_v43  ;;  %v7690_v57 = vmul.f32 %v15885_v2, %v18168_v25 }
 0x59b   :  { %7583 = vmatpush.msrb.mxu0 %v7479_v19  ;;  %7603 = vmatpush.msrb.mxu1 %v7480_v51  ;;  %v18171_v19 = vperm.slane %v18148_v56, 6 }
 0x59c   :  { %8731 = vrot.lane.b32.xlu0 %v15162_v37, %s12301_s19 }
 0x59d   :  { %9121 = vrot.lane.b32.xlu2 %v15160_v29, %s12302_s11  ;;  %9123 = vrot.lane.b32.xlu1 %v15162_v37, %s12302_s11  ;;  %v7458_v41 = vpop.permute.xlu0 %7457 }
 0x59e   :  { %7717 = vmatpush.msra.mxu0 %v7689_v24  ;;  %7737 = vmatpush.msra.mxu1 %v7690_v57  ;;  %v15910_v0 = vsel %vm1462_vm7, %v15778_v38, %v7458_v41  ;;  %v15914_v25 = vsel %vm1462_vm7, %v7458_v41, %v15741_v10  ;;  %v7878_v51 = vpop.permute.xlu1 %7877  ;;  %v15936_v10 = vsel %vm1698_vm8, %v15791_v62, %v7672_v36  ;;  %vm18234_vm7 = vmmov %vm18200_vm0 }
 0x59f   :  { %18169 = vst [vmem:[#allocation106_spill] sm:$0xff] %v15910_v0  ;;  %v7481_v54 = vmul.f32 %v15910_v0, %v18171_v19  ;;  %v7482_v31 = vmul.f32 %v15914_v25, %v18172_v1  ;;  %v15922_v2 = vpop.permute.xlu2 %8091  ;;  %v12063_v19 = vld [vmem:[%s17317_s2 + $0x38] sm:$0xff]  ;;  %v18178_v1 = vld [vmem:[#allocation42_spill] sm:$0xff] }
 0x5a0   :  { %18170 = vst [vmem:[#allocation101_spill] sm:$0xff] %v15914_v25  ;;  %v18179_v0 = vperm.slane %v18178_v1, 2 }
 0x5a1   :  { %7623 = vmatpush.msrb.mxu2 %v7481_v54  ;;  %7643 = vmatpush.msrb.mxu3 %v7482_v31  ;;  %18173 = vst [vmem:[#allocation112_spill] sm:$0xff] %v15936_v10  ;;  %v18176_v31 = vperm.slane %v18166_v34, 2  ;;  %v18177_v54 = vperm.slane %v18166_v34, 6 }
 0x5a2   :  { %12059 = vmatmul.msk.f32.vlgmr.msrb.gmra.mxu0 %vm174_vm1, %v12054_v43  ;;  %12061 = vmatmul.msk.f32.vlgmr.msrb.gmra.mxu2 %vm174_vm1, %v12054_v43 }
 0x5a3   :  { %12060 = vmatmul.msk.f32.vlgmr.msrb.gmra.mxu1 %vm174_vm1, %v12054_v43  ;;  %12062 = vmatmul.msk.f32.vlgmr.msrb.gmra.mxu3 %vm174_vm1, %v12054_v43  ;;  %v15944_v43 = vsel %vm1934_vm9, %v15823_v35, %v7878_v51 }
 0x5a4   :  { %8729 = vrot.lane.b32.xlu0 %v15160_v29, %s12301_s19  ;;  %18175 = vst [vmem:[#allocation113_spill] sm:$0xff] %v15944_v43  ;;  %v7905_v7 = vmul.f32 %v15944_v43, %v18179_v0  ;;  %v15971_v0 = vsel %vm1698_vm8, %v7672_v36, %v15749_v26  ;;  %v18185_v26 = vperm.slane %v18178_v1, 3 }
 0x5a5   :  { %9133 = vrot.lane.b32.xlu2 %v15195_v20, %s12302_s11  ;;  %9135 = vrot.lane.b32.xlu1 %v15166_v16, %s12302_s11  ;;  %v7664_v56 = vpop.permute.xlu0 %7663  ;;  %18180 = vst [vmem:[#allocation108_spill] sm:$0xff] %v15971_v0 }
 0x5a6   :  { %v15940_v38 = vsel %vm1698_vm8, %v15815_v3, %v7664_v56  ;;  %v7880_v24 = vpop.permute.xlu1 %7879  ;;  %v7695_v3 = vmul.f32 %v15936_v10, %v18177_v54 }
 0x5a7   :  { %18174 = vst [vmem:[#allocation93_spill] sm:$0xff] %v15940_v38  ;;  %v7691_v57 = vmul.f32 %v15940_v38, %v18176_v31  ;;  %v15949_v41 = vpop.permute.xlu2 %8093  ;;  %v18184_v38 = vperm.slane %v18166_v34, 7 }
 0x5a9   :  { %7757 = vmatpush.msra.mxu2 %v7691_v57  ;;  %v7696_v25 = vmul.f32 %v15971_v0, %v18184_v38 }
 0x5aa   :  { %12064 = vmatmul.msk.f32.vlgmr.msra.gmra.mxu0 %vm174_vm1, %v12063_v19  ;;  %12066 = vmatmul.msk.f32.vlgmr.msra.gmra.mxu2 %vm174_vm1, %v12063_v19 }
 0x5ab   :  { %12065 = vmatmul.msk.f32.vlgmr.msra.gmra.mxu1 %vm174_vm1, %v12063_v19  ;;  %7837 = vmatpush.msrb.mxu2 %v7695_v3  ;;  %v15979_v3 = vsel %vm1934_vm9, %v7878_v51, %v7880_v24  ;;  %v15994_v51 = vpop.f32.mrf.mxu0 }
 0x5ac   :  { %8741 = vrot.lane.b32.xlu0 %v15195_v20, %s12301_s19  ;;  %18182 = vst [vmem:[#allocation103_spill] sm:$0xff] %v15979_v3  ;;  %v7906_v36 = vmul.f32 %v15979_v3, %v18185_v26  ;;  %v18192_v3 = vperm.slane %v18166_v34, 4 }
 0x5ad   :  { %7971 = vmatpush.msra.mxu2 %v7905_v7  ;;  %9339 = vrot.lane.b32.xlu2 %v15173_v23, %s12303_s18  ;;  %v7666_v31 = vpop.permute.xlu0 %7665  ;;  %v18183_v7 = vperm.slane %v18166_v34, 3  ;;  %18186 = vst [vmem:[#allocation120_spill] sm:$0xff] %v15994_v51 }
 0x5ae   :  { %9341 = vrot.lane.b32.xlu1 %v15185_v63, %s12303_s18  ;;  %v15974_v57 = vsel %vm1698_vm8, %v7664_v56, %v7666_v31  ;;  %v15976_v54 = vpop.permute.xlu1 %7881  ;;  %v15996_v56 = vpop.f32.mrf.mxu1 }
 0x5af   :  { %18181 = vst [vmem:[#allocation119_spill] sm:$0xff] %v15974_v57  ;;  %v7692_v43 = vmul.f32 %v15974_v57, %v18183_v7  ;;  %v15984_v10 = vpop.permute.xlu2 %8095  ;;  %v16009_v7 = vpop.f32.mrf.mxu3  ;;  %v18193_v57 = vperm.slane %v18166_v34, 5 }
 0x5b0   :  { %18187 = vst [vmem:[#allocation114_spill] sm:$0xff] %v15996_v56 }
 0x5b1   :  { %7777 = vmatpush.msra.mxu3 %v7692_v43  ;;  %v16007_v43 = vsel %vm1934_vm9, %v15842_v13, %v15823_v35  ;;  %18189 = vst [vmem:[#allocation125_spill] sm:$0xff] %v16009_v7  ;;  %v16028_v7 = vpop.f32.mrf.mxu2 }
 0x5b2   :  { %12067 = vmatmul.msk.f32.vlgmr.msra.gmra.mxu3 %vm174_vm1, %v12063_v19  ;;  %12070 = vmatmul.msk.f32.vlgmr.msrb.gmra.mxu2 %vm174_vm1, %v12063_v19  ;;  %18188 = vst [vmem:[#allocation109_spill] sm:$0xff] %v16007_v43 }
 0x5b3   :  { %7857 = vmatpush.msrb.mxu3 %v7696_v25  ;;  %v16042_v34 = vpop.f32.mrf.mxu0 }
 0x5b4   :  { %9127 = vrot.lane.b32.xlu0 %v15185_v63, %s12302_s11  ;;  %18195 = vst [vmem:[#allocation126_spill] sm:$0xff] %v16042_v34  ;;  %v18205_v34 = vld [vmem:[#allocation63_spill] sm:$0xff] }
 0x5b5   :  { %7991 = vmatpush.msra.mxu3 %v7906_v36  ;;  %9337 = vrot.lane.b32.xlu2 %v15162_v37, %s12303_s18  ;;  %v18206_v52 = vperm.slane %v18205_v34, 3  ;;  %v18228_v4 = vperm.slane %v18205_v34, 5 }
 0x5b6   :  { %9343 = vrot.lane.b32.xlu1 %v15177_v32, %s12303_s18  ;;  %v7668_v38 = vpop.permute.xlu0 %7667  ;;  %v16018_v36 = vpop.permute.xlu1 %8084 }
 0x5b7   :  { %v16012_v25 = vsel %vm1698_vm8, %v7666_v31, %v7668_v38  ;;  %v16016_v26 = vsel %vm1698_vm8, %v7668_v38, %v15791_v62  ;;  %v16026_v51 = vpop.permute.xlu2 %8298  ;;  %v18194_v31 = vperm.slane %v18178_v1, 1  ;;  %v12072_v62 = vld [vmem:[%s17317_s2 + $0x40] sm:$0xff]  ;;  %vm18235_vm8 = vmmov %vm18200_vm0 }
 0x5b8   :  { %18190 = vst [vmem:[#allocation121_spill] sm:$0xff] %v16012_v25  ;;  %v7693_v0 = vmul.f32 %v16012_v25, %v18192_v3  ;;  %v7694_v35 = vmul.f32 %v16016_v26, %v18193_v57  ;;  %v16050_v57 = vsel %vm1934_vm9, %v7880_v24, %v15976_v54  ;;  %v16073_v25 = vpop.f32.mrf.mxu3 }
 0x5b9   :  { %18191 = vst [vmem:[#allocation116_spill] sm:$0xff] %v16016_v26  ;;  %v7904_v56 = vmul.f32 %v16007_v43, %v18194_v31  ;;  %v18201_v31 = vperm.slane %v18178_v1, 0  ;;  %v18202_v43 = vperm.slane %v18178_v1, 7  ;;  %v16082_v9 = vpop.f32.mrf.mxu2 }
 0x5ba   :  { %7797 = vmatpush.msrb.mxu0 %v7693_v0  ;;  %7817 = vmatpush.msrb.mxu1 %v7694_v35  ;;  %18196 = vst [vmem:[#allocation123_spill] sm:$0xff] %v16050_v57  ;;  %v8103_v35 = vsel %vm18200_vm0, %v15922_v2, %v15949_v41 }
 0x5bb   :  { %12068 = vmatmul.msk.f32.vlgmr.msrb.gmra.mxu0 %vm174_vm1, %v12063_v19  ;;  %12069 = vmatmul.msk.f32.vlgmr.msrb.gmra.mxu1 %vm174_vm1, %v12063_v19  ;;  %18203 = vst [vmem:[#allocation31_spill] sm:$0xff] %v16073_v25  ;;  %v8120_v42 = vmul.f32 %v8103_v35, %v18206_v52  ;;  %v18210_v35 = vperm.slane %v18178_v1, 5 }
 0x5bc   :  { %12071 = vmatmul.msk.f32.vlgmr.msrb.gmra.mxu3 %vm174_vm1, %v12063_v19  ;;  %7951 = vmatpush.msra.mxu1 %v7904_v56  ;;  %v16052_v19 = vpop.f32.mrf.mxu1 }
 0x5bd   :  { %12075 = vmatmul.msk.f32.vlgmr.msra.gmra.mxu2 %vm174_vm1, %v12072_v62  ;;  %9129 = vrot.lane.b32.xlu0 %v15177_v32, %s12302_s11  ;;  %18197 = vst [vmem:[#allocation128_spill] sm:$0xff] %v16052_v19  ;;  %v18204_v19 = vperm.slane %v18178_v1, 4 }
 0x5be   :  { %9349 = vrot.lane.b32.xlu2 %v15166_v16, %s12303_s18  ;;  %9345 = vrot.lane.b32.xlu1 %v15193_v39, %s12303_s18  ;;  %v7871_v0 = vpop.permute.xlu0 %7870  ;;  %v16062_v38 = vpop.permute.xlu1 %8097 }
 0x5bf   :  { %v16056_v3 = vsel %vm1934_vm9, %v15878_v40, %v7871_v0  ;;  %v16060_v56 = vsel %vm1934_vm9, %v7871_v0, %v15842_v13  ;;  %v7907_v13 = vmul.f32 %v16050_v57, %v18204_v19  ;;  %v16078_v0 = vpop.permute.xlu2 %8311 }
 0x5c0   :  { %18198 = vst [vmem:[#allocation9_spill] sm:$0xff] %v16056_v3  ;;  %v7903_v24 = vmul.f32 %v16060_v56, %v18201_v31  ;;  %v7910_v26 = vmul.f32 %v16056_v3, %v18202_v43 }
 0x5c1   :  { %18199 = vst [vmem:[#allocation16_spill] sm:$0xff] %v16060_v56 }
 0x5c2   :  { %7931 = vmatpush.msra.mxu0 %v7903_v24  ;;  %8071 = vmatpush.msrb.mxu3 %v7910_v26  ;;  %v18211_v24 = vperm.slane %v18178_v1, 6 }
 0x5c3   :  { %12073 = vmatmul.msk.f32.vlgmr.msra.gmra.mxu0 %vm174_vm1, %v12072_v62  ;;  %12074 = vmatmul.msk.f32.vlgmr.msra.gmra.mxu1 %vm174_vm1, %v12072_v62 }
 0x5c4   :  { %12076 = vmatmul.msk.f32.vlgmr.msra.gmra.mxu3 %vm174_vm1, %v12072_v62  ;;  %8011 = vmatpush.msrb.mxu0 %v7907_v13  ;;  %v16111_v56 = vpop.f32.mrf.mxu1 }
 0x5c5   :  { %8205 = vmatpush.msra.mxu3 %v8120_v42  ;;  %9131 = vrot.lane.b32.xlu0 %v15193_v39, %s12302_s11  ;;  %v16103_v42 = vpop.f32.mrf.mxu0  ;;  %18212 = vst [vmem:[#allocation94_spill] sm:$0xff] %v16111_v56 }
 0x5c6   :  { %9555 = vrot.lane.b32.xlu2 %v15185_v63, %s12304_s12  ;;  %9549 = vrot.lane.b32.xlu1 %v15160_v29, %s12304_s12  ;;  %v7884_v52 = vpop.permute.xlu0 %7883  ;;  %v16101_v19 = vpop.permute.xlu1 %8303  ;;  %18209 = vst [vmem:[#allocation45_spill] sm:$0xff] %v16103_v42 }
 0x5c7   :  { %v16095_v43 = vsel %vm1934_vm9, %v15976_v54, %v7884_v52  ;;  %v16099_v26 = vsel %vm1934_vm9, %v7884_v52, %v15878_v40  ;;  %v16113_v54 = vpop.f32.mrf.mxu3  ;;  %v16117_v40 = vpop.permute.xlu2 %8517  ;;  %vm18242_vm9 = vcmask 56320  }
 0x5c8   :  { %18207 = vst [vmem:[#allocation11_spill] sm:$0xff] %v16095_v43  ;;  %v7908_v31 = vmul.f32 %v16095_v43, %v18210_v35  ;;  %v7909_v13 = vmul.f32 %v16099_v26, %v18211_v24  ;;  %v16121_v52 = vpop.f32.mrf.mxu2  ;;  %v18216_v24 = vperm.slane %v18205_v34, 2  ;;  %vm18249_vm14 = vmmov %vm18242_vm9 }
 0x5c9   :  { %18208 = vst [vmem:[#allocation17_spill] sm:$0xff] %v16099_v26  ;;  %vm18255_vm13 = vmmov %vm18242_vm9 }
 0x5ca   :  { %8031 = vmatpush.msrb.mxu1 %v7908_v31  ;;  %8051 = vmatpush.msrb.mxu2 %v7909_v13  ;;  %18213 = vst [vmem:[#allocation21_spill] sm:$0xff] %v16113_v54  ;;  %vm18262_vm12 = vmmov %vm18242_vm9 }
 0x5cb   :  { %12077 = vmatmul.msk.f32.vlgmr.msrb.gmra.mxu0 %vm174_vm1, %v12072_v62  ;;  %12078 = vmatmul.msk.f32.vlgmr.msrb.gmra.mxu1 %vm174_vm1, %v12072_v62  ;;  %18214 = vst [vmem:[#allocation22_spill] sm:$0xff] %v16121_v52  ;;  %vm18263_vm10 = vmmov %vm18242_vm9 }
 0x5cc   :  { %12079 = vmatmul.msk.f32.vlgmr.msrb.gmra.mxu2 %vm174_vm1, %v12072_v62  ;;  %12080 = vmatmul.msk.f32.vlgmr.msrb.gmra.mxu3 %vm174_vm1, %v12072_v62  ;;  %v12081_v62 = vld [vmem:[%s17317_s2 + $0x48] sm:$0xff]  ;;  %v16138_v43 = vpop.f32.mrf.mxu1  ;;  %vm18264_vm11 = vmmov %vm18242_vm9 }
 0x5cd   :  { %9335 = vrot.lane.b32.xlu0 %v15160_v29, %s12303_s18  ;;  %v16136_v26 = vpop.f32.mrf.mxu0  ;;  %18218 = vst [vmem:[#allocation73_spill] sm:$0xff] %v16138_v43  ;;  %vm18274_vm0 = vmmov %vm18242_vm9 }
 0x5ce   :  { %9557 = vrot.lane.b32.xlu2 %v15177_v32, %s12304_s12  ;;  %9561 = vrot.lane.b32.xlu1 %v15195_v20, %s12304_s12  ;;  %v8090_v1 = vpop.permute.xlu0 %8089  ;;  %v8302_v31 = vpop.permute.xlu1 %8301  ;;  %18217 = vst [vmem:[#allocation39_spill] sm:$0xff] %v16136_v26  ;;  %v18225_v26 = vperm.slane %v18205_v34, 0 }
 0x5cf   :  { %v8102_v35 = vsel %vm18215_vm2, %v8090_v1, %v15922_v2  ;;  %v16142_v3 = vpop.f32.mrf.mxu3  ;;  %v16146_v2 = vpop.permute.xlu2 %8515  ;;  %v8330_v54 = vsel %vm174_vm1, %v16026_v51, %v8302_v31  ;;  %vm18275_vm2 = vmmov %vm18274_vm0 }
 0x5d0   :  { %v8119_v13 = vmul.f32 %v8102_v35, %v18216_v24  ;;  %18219 = vst [vmem:[#allocation18_spill] sm:$0xff] %v16142_v3  ;;  %v8104_v24 = vsel %vm18221_vm3, %v15949_v41, %v15984_v10  ;;  %v16158_v57 = vpop.f32.mrf.mxu2  ;;  %v18226_v41 = vperm.slane %v18205_v34, 1  ;;  %v8331_v52 = vmul.f32 %v8330_v54, %v18230_v49  ;;  %vm18281_vm3 = vmmov %vm18265_vm15 }
 0x5d2   :  { %8185 = vmatpush.msra.mxu2 %v8119_v13  ;;  %v8105_v13 = vsel %vm18222_vm4, %v15984_v10, %v16062_v38  ;;  %v18227_v10 = vperm.slane %v18205_v34, 4  ;;  %vm18286_vm4 = vmmov %vm18281_vm3 }
 0x5d4   :  { %12084 = vmatmul.msk.f32.vlgmr.msra.gmra.mxu2 %vm174_vm1, %v12081_v62  ;;  %12085 = vmatmul.msk.f32.vlgmr.msra.gmra.mxu3 %vm174_vm1, %v12081_v62  ;;  %v8121_v11 = vmul.f32 %v8104_v24, %v18227_v10 }
 0x5d5   :  { %9347 = vrot.lane.b32.xlu0 %v15195_v20, %s12303_s18 }
 0x5d6   :  { %9559 = vrot.lane.b32.xlu2 %v15193_v39, %s12304_s12  ;;  %9767 = vrot.lane.b32.xlu1 %v15173_v23, %s18220_s1  ;;  %v8088_v35 = vpop.permute.xlu0 %8087  ;;  %v16163_v43 = vpop.permute.xlu1 %8313 }
 0x5d7   :  { %v8101_v3 = vsel %vm18223_vm5, %v8088_v35, %v8090_v1  ;;  %v8116_v25 = vsel %vm18224_vm6, %v16018_v36, %v8088_v35  ;;  %v8122_v1 = vmul.f32 %v8105_v13, %v18228_v4  ;;  %v8315_v35 = vsel %vm174_vm1, %v8302_v31, %v16101_v19  ;;  %v16185_v4 = vpop.f32.mrf.mxu1  ;;  %v16197_v54 = vpop.permute.xlu2 %8527  ;;  %vm18287_vm5 = vmmov %vm18281_vm3 }
 0x5d8   :  { %v8117_v42 = vmul.f32 %v8116_v25, %v18225_v26  ;;  %v8118_v56 = vmul.f32 %v8101_v3, %v18226_v41  ;;  %v16181_v25 = vpop.f32.mrf.mxu0  ;;  %v18232_v3 = vperm.slane %v18229_v46, 1  ;;  %18233 = vst [vmem:[#allocation90_spill] sm:$0xff] %v16185_v4  ;;  %v16199_v31 = vpop.f32.mrf.mxu3  ;;  %v18238_v13 = vperm.slane %v18205_v34, 7  ;;  %vm18288_vm6 = vmmov %vm18281_vm3 }
 0x5d9   :  { %18231 = vst [vmem:[#allocation43_spill] sm:$0xff] %v16181_v25  ;;  %v16205_v10 = vpop.f32.mrf.mxu2 }
 0x5da   :  { %8145 = vmatpush.msra.mxu0 %v8117_v42  ;;  %8165 = vmatpush.msra.mxu1 %v8118_v56  ;;  %v8332_v26 = vmul.f32 %v8315_v35, %v18232_v3  ;;  %18236 = vst [vmem:[#allocation23_spill] sm:$0xff] %v16199_v31  ;;  %v18241_v3 = vperm.slane %v18229_v46, 2 }
 0x5db   :  { %12082 = vmatmul.msk.f32.vlgmr.msra.gmra.mxu0 %vm174_vm1, %v12081_v62  ;;  %12083 = vmatmul.msk.f32.vlgmr.msra.gmra.mxu1 %vm174_vm1, %v12081_v62 }
 0x5dc   :  { %8225 = vmatpush.msrb.mxu0 %v8121_v11  ;;  %8245 = vmatpush.msrb.mxu1 %v8122_v1 }
 0x5dd   :  { %9553 = vrot.lane.b32.xlu0 %v15173_v23, %s12304_s12 }
 0x5de   :  { %8359 = vmatpush.msra.mxu0 %v8331_v52  ;;  %9763 = vrot.lane.b32.xlu2 %v15160_v29, %s18220_s1  ;;  %v8100_v49 = vpop.permute.xlu0 %8099  ;;  %v8520_v42 = vpop.permute.xlu1 %8519  ;;  %v18237_v52 = vperm.slane %v18205_v34, 6 }
 0x5df   :  { %9765 = vrot.lane.b32.xlu1 %v15162_v37, %s18220_s1  ;;  %8379 = vmatpush.msra.mxu1 %v8332_v26  ;;  %v8106_v11 = vsel %vm18234_vm7, %v16062_v38, %v8100_v49  ;;  %v8107_v56 = vsel %vm18235_vm8, %v8100_v49, %v16018_v36  ;;  %v16219_v38 = vpop.f32.mrf.mxu1  ;;  %v12090_v49 = vld [vmem:[%s17317_s2 + $0x50] sm:$0xff]  ;;  %vm18289_vm7 = vmmov %vm18281_vm3 }
 0x5e0   :  { %v8123_v24 = vmul.f32 %v8106_v11, %v18237_v52  ;;  %v8124_v41 = vmul.f32 %v8107_v56, %v18238_v13  ;;  %v16213_v36 = vpop.f32.mrf.mxu0  ;;  %18240 = vst [vmem:[#allocation55_spill] sm:$0xff] %v16219_v38  ;;  %v8530_v11 = vsel %vm18242_vm9, %v16117_v40, %v8520_v42  ;;  %v16233_v56 = vpop.permute.xlu2 %8733  ;;  %vm18299_vm8 = vmmov %vm18281_vm3 }
 0x5e1   :  { %18239 = vst [vmem:[#allocation33_spill] sm:$0xff] %v16213_v36  ;;  %v16235_v52 = vpop.f32.mrf.mxu3  ;;  %v18251_v36 = vperm.slane %v18229_v46, 7  ;;  %vm18300_vm9 = vmmov %vm18281_vm3 }
 0x5e2   :  { %8265 = vmatpush.msrb.mxu2 %v8123_v24  ;;  %8285 = vmatpush.msrb.mxu3 %v8124_v41  ;;  %18243 = vst [vmem:[#allocation81_spill] sm:$0xff] %v16235_v52  ;;  %v18244_v24 = vperm.slane %v18229_v46, 6  ;;  %v18245_v41 = vld [vmem:[#allocation77_spill] sm:$0xff]  ;;  %v8321_v52 = vsel %vm174_vm1, %v16163_v43, %v16026_v51 }
 0x5e3   :  { %12086 = vmatmul.msk.f32.vlgmr.msrb.gmra.mxu0 %vm174_vm1, %v12081_v62  ;;  %12087 = vmatmul.msk.f32.vlgmr.msrb.gmra.mxu1 %vm174_vm1, %v12081_v62  ;;  %v18253_v51 = vperm.slane %v18245_v41, 3 }
 0x5e4   :  { %12088 = vmatmul.msk.f32.vlgmr.msrb.gmra.mxu2 %vm174_vm1, %v12081_v62  ;;  %12089 = vmatmul.msk.f32.vlgmr.msrb.gmra.mxu3 %vm174_vm1, %v12081_v62  ;;  %v8320_v62 = vsel %vm174_vm1, %v16078_v0, %v16163_v43 }
 0x5e5   :  { %9551 = vrot.lane.b32.xlu0 %v15162_v37, %s12304_s12  ;;  %v8337_v13 = vmul.f32 %v8320_v62, %v18244_v24 }
 0x5e6   :  { %9775 = vrot.lane.b32.xlu2 %v15195_v20, %s18220_s1  ;;  %v8306_v34 = vpop.permute.xlu0 %8305  ;;  %v8522_v35 = vpop.permute.xlu1 %8521 }
 0x5e7   :  { %9777 = vrot.lane.b32.xlu1 %v15166_v16, %s18220_s1  ;;  %v8316_v1 = vsel %vm174_vm1, %v16101_v19, %v8306_v34  ;;  %v16237_v19 = vpop.f32.mrf.mxu2  ;;  %v16254_v31 = vpop.f32.mrf.mxu1 }
 0x5e8   :  { %v8333_v26 = vmul.f32 %v8316_v1, %v18241_v3  ;;  %v18246_v1 = vperm.slane %v18245_v41, 2  ;;  %v16251_v62 = vpop.f32.mrf.mxu0  ;;  %18248 = vst [vmem:[#allocation8_spill] sm:$0xff] %v16254_v31  ;;  %v16261_v25 = vpop.permute.xlu2 %8735 }
 0x5e9   :  { %18247 = vst [vmem:[#allocation6_spill] sm:$0xff] %v16251_v62  ;;  %v16263_v4 = vpop.f32.mrf.mxu3 }
 0x5ea   :  { %8399 = vmatpush.msra.mxu2 %v8333_v26  ;;  %v8547_v3 = vmul.f32 %v8530_v11, %v18246_v1  ;;  %v8531_v11 = vsel %vm18249_vm14, %v8520_v42, %v8522_v35  ;;  %18252 = vst [vmem:[#allocation26_spill] sm:$0xff] %v16263_v4  ;;  %vm18311_vm14 = vcmask 1039360  }
 0x5eb   :  { %12091 = vmatmul.msk.f32.vlgmr.msra.gmra.mxu0 %vm174_vm1, %v12090_v49  ;;  %12092 = vmatmul.msk.f32.vlgmr.msra.gmra.mxu1 %vm174_vm1, %v12090_v49  ;;  %v8548_v43 = vmul.f32 %v8531_v11, %v18253_v51 }
 0x5ec   :  { %12093 = vmatmul.msk.f32.vlgmr.msra.gmra.mxu2 %vm174_vm1, %v12090_v49 }
 0x5ed   :  { %8479 = vmatpush.msrb.mxu2 %v8337_v13  ;;  %9563 = vrot.lane.b32.xlu0 %v15166_v16, %s12304_s12  ;;  %v18250_v13 = vperm.slane %v18229_v46, 3 }
 0x5ee   :  { %v8308_v26 = vpop.permute.xlu0 %8307 }
 0x5ef   :  { %8613 = vmatpush.msra.mxu2 %v8547_v3  ;;  %v8317_v24 = vsel %vm174_vm1, %v8306_v34, %v8308_v26  ;;  %v8524_v38 = vpop.permute.xlu1 %8523  ;;  %v8338_v3 = vmul.f32 %v8321_v52, %v18251_v36  ;;  %v16269_v34 = vpop.f32.mrf.mxu2  ;;  %v8529_v36 = vsel %vm18255_vm13, %v16146_v2, %v16117_v40  ;;  %vm18312_vm13 = vmmov %vm18311_vm14 }
 0x5f0   :  { %v8334_v1 = vmul.f32 %v8317_v24, %v18250_v13  ;;  %18254 = vst [vmem:[#allocation132_spill] sm:$0xff] %v16269_v34  ;;  %v18256_v13 = vperm.slane %v18229_v46, 4  ;;  %v16285_v4 = vpop.f32.mrf.mxu0  ;;  %v16289_v31 = vpop.f32.mrf.mxu1 }
 0x5f1   :  { %18258 = vst [vmem:[#allocation14_spill] sm:$0xff] %v16285_v4  ;;  %v16297_v40 = vpop.f32.mrf.mxu3 }
 0x5f2   :  { %8419 = vmatpush.msra.mxu3 %v8334_v1  ;;  %18260 = vst [vmem:[#allocation30_spill] sm:$0xff] %v16289_v31 }
 0x5f3   :  { %12094 = vmatmul.msk.f32.vlgmr.msra.gmra.mxu3 %vm174_vm1, %v12090_v49  ;;  %18261 = vst [vmem:[#allocation32_spill] sm:$0xff] %v16297_v40  ;;  %v18269_v40 = vld [vmem:[#allocation89_spill] sm:$0xff] }
 0x5f4   :  { %12097 = vmatmul.msk.f32.vlgmr.msrb.gmra.mxu2 %vm174_vm1, %v12090_v49  ;;  %8499 = vmatpush.msrb.mxu3 %v8338_v3  ;;  %v18257_v3 = vperm.slane %v18229_v46, 5  ;;  %v8738_v46 = vpop.permute.xlu2 %8737  ;;  %v18270_v31 = vperm.slane %v18269_v40, 3 }
 0x5f5   :  { %9769 = vrot.lane.b32.xlu0 %v15185_v63, %s18220_s1 }
 0x5f6   :  { %8633 = vmatpush.msra.mxu3 %v8548_v43  ;;  %v8310_v42 = vpop.permute.xlu0 %8309  ;;  %v18259_v43 = vperm.slane %v18245_v41, 1 }
 0x5f7   :  { %v8318_v52 = vsel %vm174_vm1, %v8308_v26, %v8310_v42  ;;  %v8319_v24 = vsel %vm174_vm1, %v8310_v42, %v16078_v0  ;;  %v16279_v11 = vpop.permute.xlu1 %8726  ;;  %v12099_v0 = vld [vmem:[%s17317_s2 + $0x58] sm:$0xff]  ;;  %v16302_v26 = vpop.f32.mrf.mxu2 }
 0x5f8   :  { %v8335_v1 = vmul.f32 %v8318_v52, %v18256_v13  ;;  %v8336_v51 = vmul.f32 %v8319_v24, %v18257_v3  ;;  %v8546_v62 = vmul.f32 %v8529_v36, %v18259_v43  ;;  %v8532_v36 = vsel %vm18262_vm12, %v8522_v35, %v8524_v38  ;;  %vm18313_vm12 = vmmov %vm18312_vm13 }
 0x5f9   :  { %v18266_v24 = vperm.slane %v18245_v41, 0  ;;  %v18268_v35 = vperm.slane %v18245_v41, 4 }
 0x5fa   :  { %8439 = vmatpush.msrb.mxu0 %v8335_v1  ;;  %8459 = vmatpush.msrb.mxu1 %v8336_v51  ;;  %v18267_v1 = vperm.slane %v18245_v41, 7 }
 0x5fb   :  { %12095 = vmatmul.msk.f32.vlgmr.msrb.gmra.mxu0 %vm174_vm1, %v12090_v49  ;;  %12096 = vmatmul.msk.f32.vlgmr.msrb.gmra.mxu1 %vm174_vm1, %v12090_v49  ;;  %v8549_v43 = vmul.f32 %v8532_v36, %v18268_v35  ;;  %v18278_v35 = vperm.slane %v18245_v41, 6 }
 0x5fc   :  { %12098 = vmatmul.msk.f32.vlgmr.msrb.gmra.mxu3 %vm174_vm1, %v12090_v49  ;;  %8593 = vmatpush.msra.mxu1 %v8546_v62  ;;  %v8745_v62 = vsel %vm18265_vm15, %v16233_v56, %v16261_v25 }
 0x5fd   :  { %12102 = vmatmul.msk.f32.vlgmr.msra.gmra.mxu2 %vm174_vm1, %v12099_v0  ;;  %9771 = vrot.lane.b32.xlu0 %v15177_v32, %s18220_s1 }
 0x5fe   :  { %v8513_v42 = vpop.permute.xlu0 %8512 }
 0x5ff   :  { %v8535_v52 = vsel %vm18263_vm10, %v16197_v54, %v8513_v42  ;;  %v8544_v49 = vsel %vm18264_vm11, %v8513_v42, %v16146_v2  ;;  %v16316_v51 = vpop.permute.xlu1 %8739  ;;  %v8762_v2 = vmul.f32 %v8745_v62, %v18270_v31  ;;  %v16322_v42 = vpop.f32.mrf.mxu0  ;;  %vm18319_vm10 = vmmov %vm18313_vm12 }
 0x600   :  { %v8545_v13 = vmul.f32 %v8544_v49, %v18266_v24  ;;  %v8552_v3 = vmul.f32 %v8535_v52, %v18267_v1  ;;  %18271 = vst [vmem:[#allocation133_spill] sm:$0xff] %v16322_v42  ;;  %v16326_v49 = vpop.f32.mrf.mxu1  ;;  %v16331_v52 = vpop.permute.xlu2 %9121  ;;  %v18277_v1 = vperm.slane %v18245_v41, 5  ;;  %vm18320_vm11 = vmmov %vm18319_vm10 }
 0x601   :  { %18272 = vst [vmem:[#allocation13_spill] sm:$0xff] %v16326_v49  ;;  %v16333_v24 = vpop.f32.mrf.mxu3  ;;  %v18291_v49 = vperm.slane %v18269_v40, 1  ;;  %vm18321_vm15 = vmmov %vm18319_vm10 }
 0x602   :  { %8573 = vmatpush.msra.mxu0 %v8545_v13  ;;  %8713 = vmatpush.msrb.mxu3 %v8552_v3  ;;  %18273 = vst [vmem:[#allocation19_spill] sm:$0xff] %v16333_v24  ;;  %v16338_v13 = vpop.f32.mrf.mxu2 }
 0x603   :  { %12100 = vmatmul.msk.f32.vlgmr.msra.gmra.mxu0 %vm174_vm1, %v12099_v0  ;;  %12101 = vmatmul.msk.f32.vlgmr.msra.gmra.mxu1 %vm174_vm1, %v12099_v0  ;;  %18276 = vst [vmem:[#allocation37_spill] sm:$0xff] %v16338_v13 }
 0x604   :  { %12103 = vmatmul.msk.f32.vlgmr.msra.gmra.mxu3 %vm174_vm1, %v12099_v0  ;;  %8653 = vmatpush.msrb.mxu0 %v8549_v43 }
 0x605   :  { %8847 = vmatpush.msra.mxu3 %v8762_v2  ;;  %9773 = vrot.lane.b32.xlu0 %v15193_v39, %s18220_s1 }
 0x606   :  { %v8526_v36 = vpop.permute.xlu0 %8525 }
 0x607   :  { %v8533_v31 = vsel %vm18274_vm0, %v8524_v38, %v8526_v36  ;;  %v8534_v62 = vsel %vm18275_vm2, %v8526_v36, %v16197_v54  ;;  %v16344_v2 = vpop.permute.xlu1 %9125  ;;  %v16346_v4 = vpop.f32.mrf.mxu0  ;;  %v18282_v36 = vperm.slane %v18269_v40, 2  ;;  %vm18328_vm0 = vmmov %vm18319_vm10 }
 0x608   :  { %v8550_v3 = vmul.f32 %v8533_v31, %v18277_v1  ;;  %v8551_v43 = vmul.f32 %v8534_v62, %v18278_v35  ;;  %18279 = vst [vmem:[#allocation140_spill] sm:$0xff] %v16346_v4  ;;  %v16350_v38 = vpop.f32.mrf.mxu1  ;;  %v16360_v1 = vpop.permute.xlu2 %9133  ;;  %v12108_v35 = vld [vmem:[%s17317_s2 + $0x60] sm:$0xff]  ;;  %v18290_v4 = vperm.slane %v18269_v40, 0  ;;  %vm18329_vm2 = vmmov %vm18328_vm0 }
 0x609   :  { %18280 = vst [vmem:[#allocation27_spill] sm:$0xff] %v16350_v38 }
 0x60a   :  { %8673 = vmatpush.msrb.mxu1 %v8550_v3  ;;  %8693 = vmatpush.msrb.mxu2 %v8551_v43  ;;  %v16362_v3 = vpop.f32.mrf.mxu3  ;;  %v16367_v43 = vpop.f32.mrf.mxu2 }
 0x60b   :  { %12104 = vmatmul.msk.f32.vlgmr.msrb.gmra.mxu0 %vm174_vm1, %v12099_v0  ;;  %12105 = vmatmul.msk.f32.vlgmr.msrb.gmra.mxu1 %vm174_vm1, %v12099_v0  ;;  %18283 = vst [vmem:[#allocation40_spill] sm:$0xff] %v16362_v3  ;;  %v8747_v3 = vsel %vm18287_vm5, %v8738_v46, %v16316_v51 }
 0x60c   :  { %12106 = vmatmul.msk.f32.vlgmr.msrb.gmra.mxu2 %vm174_vm1, %v12099_v0  ;;  %12107 = vmatmul.msk.f32.vlgmr.msrb.gmra.mxu3 %vm174_vm1, %v12099_v0 }
 0x60e   :  { %v8732_v54 = vpop.permute.xlu0 %8731 }
 0x60f   :  { %v8744_v41 = vsel %vm18281_vm3, %v8732_v54, %v16233_v56  ;;  %v16358_v62 = vpop.permute.xlu1 %9123  ;;  %v16371_v56 = vpop.f32.mrf.mxu0  ;;  %vm18330_vm3 = vcmask 990208  }
 0x610   :  { %v8761_v31 = vmul.f32 %v8744_v41, %v18282_v36  ;;  %18284 = vst [vmem:[#allocation41_spill] sm:$0xff] %v16371_v56  ;;  %v16373_v0 = vpop.f32.mrf.mxu1  ;;  %v8746_v36 = vsel %vm18286_vm4, %v16261_v25, %v8738_v46  ;;  %v18293_v25 = vperm.slane %v18269_v40, 5  ;;  %v16392_v46 = vpop.permute.xlu2 %9339  ;;  %vm18331_vm4 = vmmov %vm18330_vm3 }
 0x611   :  { %18285 = vst [vmem:[#allocation141_spill] sm:$0xff] %v16373_v0  ;;  %v18292_v0 = vperm.slane %v18269_v40, 4  ;;  %vm18334_vm5 = vmmov %vm18330_vm3 }
 0x612   :  { %8827 = vmatpush.msra.mxu2 %v8761_v31  ;;  %v8764_v34 = vmul.f32 %v8747_v3, %v18293_v25  ;;  %v18302_v25 = vperm.slane %v18269_v40, 6 }
 0x613   :  { %v8763_v13 = vmul.f32 %v8746_v36, %v18292_v0  ;;  %v16404_v36 = vpop.f32.mrf.mxu2 }
 0x614   :  { %12111 = vmatmul.msk.f32.vlgmr.msra.gmra.mxu2 %vm174_vm1, %v12108_v35  ;;  %12112 = vmatmul.msk.f32.vlgmr.msra.gmra.mxu3 %vm174_vm1, %v12108_v35 }
 0x616   :  { %v8730_v41 = vpop.permute.xlu0 %8729 }
 0x617   :  { %v8743_v38 = vsel %vm18288_vm6, %v8730_v41, %v8732_v54  ;;  %v8758_v31 = vsel %vm18289_vm7, %v16279_v11, %v8730_v41  ;;  %v16386_v42 = vpop.permute.xlu1 %9135  ;;  %v16394_v54 = vpop.f32.mrf.mxu3  ;;  %vm18341_vm6 = vmmov %vm18330_vm3 }
 0x618   :  { %v8759_v24 = vmul.f32 %v8758_v31, %v18290_v4  ;;  %v8760_v56 = vmul.f32 %v8743_v38, %v18291_v49  ;;  %18294 = vst [vmem:[#allocation24_spill] sm:$0xff] %v16394_v54  ;;  %v18295_v4 = vld [vmem:[#allocation97_spill] sm:$0xff]  ;;  %v16406_v3 = vpop.f32.mrf.mxu0  ;;  %vm18342_vm7 = vmmov %vm18330_vm3 }
 0x619   :  { %v18296_v49 = vperm.slane %v18295_v4, 0  ;;  %v18297_v41 = vperm.slane %v18295_v4, 1  ;;  %18298 = vst [vmem:[#allocation28_spill] sm:$0xff] %v16406_v3 }
 0x61a   :  { %8787 = vmatpush.msra.mxu0 %v8759_v24  ;;  %8807 = vmatpush.msra.mxu1 %v8760_v56 }
 0x61b   :  { %12109 = vmatmul.msk.f32.vlgmr.msra.gmra.mxu0 %vm174_vm1, %v12108_v35  ;;  %12110 = vmatmul.msk.f32.vlgmr.msra.gmra.mxu1 %vm174_vm1, %v12108_v35  ;;  %v8940_v38 = vmul.f32 %v15160_v29, %v18296_v49  ;;  %v8941_v0 = vmul.f32 %v15162_v37, %v18297_v41  ;;  %v16412_v29 = vpop.f32.mrf.mxu1  ;;  %v18303_v49 = vperm.slane %v18269_v40, 7  ;;  %v18306_v40 = vperm.slane %v18295_v4, 4 }
 0x61c   :  { %8867 = vmatpush.msrb.mxu0 %v8763_v13  ;;  %8887 = vmatpush.msrb.mxu1 %v8764_v34  ;;  %18301 = vst [vmem:[#allocation49_spill] sm:$0xff] %v16412_v29 }
 0x61e   :  { %8968 = vmatpush.msra.mxu0 %v8940_v38  ;;  %8988 = vmatpush.msra.mxu1 %v8941_v0  ;;  %v8742_v24 = vpop.permute.xlu0 %8741  ;;  %v18305_v38 = vperm.slane %v18295_v4, 3  ;;  %v16428_v0 = vpop.f32.mrf.mxu2 }
 0x61f   :  { %v8748_v56 = vsel %vm18299_vm8, %v16316_v51, %v8742_v24  ;;  %v8749_v31 = vsel %vm18300_vm9, %v8742_v24, %v16279_v11  ;;  %v18304_v51 = vperm.slane %v18295_v4, 2  ;;  %v8944_v24 = vmul.f32 %v15177_v32, %v18306_v40  ;;  %vm18343_vm8 = vmmov %vm18330_vm3 }
 0x620   :  { %v8765_v37 = vmul.f32 %v8748_v56, %v18302_v25  ;;  %v8766_v13 = vmul.f32 %v8749_v31, %v18303_v49  ;;  %v16418_v34 = vpop.permute.xlu1 %9341  ;;  %v8943_v41 = vmul.f32 %v15185_v63, %v18305_v38  ;;  %v18307_v56 = vperm.slane %v18295_v4, 5  ;;  %v16438_v25 = vpop.permute.xlu2 %9337  ;;  %v18314_v38 = vld [vmem:[#allocation102_spill] sm:$0xff]  ;;  %vm18349_vm9 = vmmov %vm18330_vm3 }
 0x621   :  { %v8942_v11 = vmul.f32 %v15173_v23, %v18304_v51  ;;  %v16440_v23 = vpop.f32.mrf.mxu3  ;;  %v18309_v63 = vperm.slane %v18295_v4, 6  ;;  %v9137_v51 = vsel %vm18312_vm13, %v16331_v52, %v16358_v62  ;;  %vm18351_vm13 = vcmask 982016  }
 0x622   :  { %8907 = vmatpush.msrb.mxu2 %v8765_v37  ;;  %8927 = vmatpush.msrb.mxu3 %v8766_v13  ;;  %v8945_v31 = vmul.f32 %v15193_v39, %v18307_v56  ;;  %18308 = vst [vmem:[#allocation47_spill] sm:$0xff] %v16440_v23  ;;  %v16448_v13 = vpop.f32.mrf.mxu0 }
 0x623   :  { %12113 = vmatmul.msk.f32.vlgmr.msrb.gmra.mxu0 %vm174_vm1, %v12108_v35  ;;  %12114 = vmatmul.msk.f32.vlgmr.msrb.gmra.mxu1 %vm174_vm1, %v12108_v35  ;;  %v8946_v37 = vmul.f32 %v15195_v20, %v18309_v63  ;;  %v9138_v20 = vsel %vm18313_vm12, %v16358_v62, %v16344_v2  ;;  %vm18359_vm12 = vmmov %vm18351_vm13 }
 0x624   :  { %12115 = vmatmul.msk.f32.vlgmr.msrb.gmra.mxu2 %vm174_vm1, %v12108_v35  ;;  %12116 = vmatmul.msk.f32.vlgmr.msrb.gmra.mxu3 %vm174_vm1, %v12108_v35  ;;  %v18310_v35 = vperm.slane %v18295_v4, 7  ;;  %v16458_v4 = vpop.f32.mrf.mxu1 }
 0x625   :  { %9008 = vmatpush.msra.mxu2 %v8942_v11  ;;  %9028 = vmatpush.msra.mxu3 %v8943_v41  ;;  %v12117_v11 = vld [vmem:[%s17317_s2 + $0x68] sm:$0xff]  ;;  %v18315_v41 = vperm.slane %v18314_v38, 2 }
 0x626   :  { %v8947_v49 = vmul.f32 %v15166_v16, %v18310_v35  ;;  %9048 = vmatpush.msrb.mxu0 %v8944_v24  ;;  %9068 = vmatpush.msrb.mxu1 %v8945_v31  ;;  %v9128_v32 = vpop.permute.xlu0 %9127  ;;  %v18316_v24 = vperm.slane %v18314_v38, 0  ;;  %v18317_v31 = vperm.slane %v18314_v38, 1 }
 0x627   :  { %9088 = vmatpush.msrb.mxu2 %v8946_v37  ;;  %v9139_v39 = vsel %vm18311_vm14, %v16344_v2, %v9128_v32  ;;  %v16475_v2 = vpop.f32.mrf.mxu2  ;;  %vm18350_vm14 = vmmov %vm18330_vm3 }
 0x628   :  { %9108 = vmatpush.msrb.mxu3 %v8947_v49  ;;  %v16460_v16 = vpop.permute.xlu1 %9343  ;;  %v9156_v40 = vmul.f32 %v9139_v39, %v18315_v41  ;;  %v9154_v56 = vmul.f32 %v9137_v51, %v18316_v24  ;;  %v9155_v63 = vmul.f32 %v9138_v20, %v18317_v31  ;;  %v16477_v37 = vpop.permute.xlu2 %9349  ;;  %v9143_v39 = vsel %vm18320_vm11, %v16360_v1, %v16386_v42 }
 0x629   :  { %v16479_v35 = vpop.f32.mrf.mxu3  ;;  %v9153_v51 = vsel %vm18321_vm15, %v16386_v42, %v16331_v52  ;;  %v18322_v20 = vperm.slane %v18314_v38, 3  ;;  %v18325_v31 = vperm.slane %v18314_v38, 6 }
 0x62a   :  { %18318 = vst [vmem:[#allocation38_spill] sm:$0xff] %v16479_v35 }
 0x62b   :  { %12118 = vmatmul.msk.f32.vlgmr.msra.gmra.mxu0 %vm174_vm1, %v12117_v11  ;;  %12119 = vmatmul.msk.f32.vlgmr.msra.gmra.mxu1 %vm174_vm1, %v12117_v11 }
 0x62c   :  { %12120 = vmatmul.msk.f32.vlgmr.msra.gmra.mxu2 %vm174_vm1, %v12117_v11  ;;  %12121 = vmatmul.msk.f32.vlgmr.msra.gmra.mxu3 %vm174_vm1, %v12117_v11 }
 0x62d   :  { %9182 = vmatpush.msra.mxu0 %v9154_v56  ;;  %9202 = vmatpush.msra.mxu1 %v9155_v63  ;;  %v16492_v56 = vpop.f32.mrf.mxu1  ;;  %v18326_v63 = vperm.slane %v18314_v38, 7 }
 0x62e   :  { %9222 = vmatpush.msra.mxu2 %v9156_v40  ;;  %v16490_v40 = vpop.f32.mrf.mxu0  ;;  %18324 = vst [vmem:[#allocation56_spill] sm:$0xff] %v16492_v56 }
 0x62f   :  { %v9130_v62 = vpop.permute.xlu0 %9129  ;;  %18323 = vst [vmem:[#allocation51_spill] sm:$0xff] %v16490_v40  ;;  %v9161_v23 = vmul.f32 %v9153_v51, %v18326_v63  ;;  %v16502_v42 = vpop.f32.mrf.mxu2 }
 0x630   :  { %v9140_v49 = vsel %vm18319_vm10, %v9128_v32, %v9130_v62  ;;  %v9346_v24 = vpop.permute.xlu1 %9345  ;;  %v9160_v32 = vmul.f32 %v9143_v39, %v18325_v31  ;;  %v18333_v31 = vperm.slane %v18314_v38, 5  ;;  %vm18362_vm10 = vmmov %vm18359_vm12 }
 0x631   :  { %v9157_v41 = vmul.f32 %v9140_v49, %v18322_v20  ;;  %v16504_v49 = vpop.f32.mrf.mxu3  ;;  %v9352_v20 = vsel %vm18330_vm3, %v16438_v25, %v16392_v46  ;;  %vm18363_vm11 = vmmov %vm18362_vm10 }
 0x632   :  { %18327 = vst [vmem:[#allocation62_spill] sm:$0xff] %v16504_v49  ;;  %vm18364_vm15 = vmmov %vm18362_vm10 }
 0x633   :  { %9242 = vmatpush.msra.mxu3 %v9157_v41  ;;  %12122 = vmatmul.msk.f32.vlgmr.msrb.gmra.mxu0 %vm174_vm1, %v12117_v11 }
 0x634   :  { %12123 = vmatmul.msk.f32.vlgmr.msrb.gmra.mxu1 %vm174_vm1, %v12117_v11  ;;  %12124 = vmatmul.msk.f32.vlgmr.msrb.gmra.mxu2 %vm174_vm1, %v12117_v11 }
 0x635   :  { %12125 = vmatmul.msk.f32.vlgmr.msrb.gmra.mxu3 %vm174_vm1, %v12117_v11  ;;  %9302 = vmatpush.msrb.mxu2 %v9160_v32  ;;  %v9353_v11 = vsel %vm18331_vm4, %v16392_v46, %v16418_v34  ;;  %v18335_v46 = vld [vmem:[#allocation107_spill] sm:$0xff]  ;;  %v16537_v40 = vpop.f32.mrf.mxu1 }
 0x636   :  { %9322 = vmatpush.msrb.mxu3 %v9161_v23  ;;  %v18332_v23 = vperm.slane %v18314_v38, 4  ;;  %v18336_v49 = vperm.slane %v18335_v46, 1  ;;  %18339 = vst [vmem:[#allocation25_spill] sm:$0xff] %v16537_v40 }
 0x637   :  { %v9132_v52 = vpop.permute.xlu0 %9131 }
 0x638   :  { %v9141_v39 = vsel %vm18328_vm0, %v9130_v62, %v9132_v52  ;;  %v9142_v51 = vsel %vm18329_vm2, %v9132_v52, %v16360_v1  ;;  %v16519_v63 = vpop.permute.xlu1 %9549  ;;  %v12126_v1 = vld [vmem:[%s17317_s2 + $0x70] sm:$0xff]  ;;  %v9556_v62 = vpop.permute.xlu2 %9555  ;;  %v9354_v52 = vsel %vm18334_vm5, %v16418_v34, %v16460_v16  ;;  %v9369_v56 = vmul.f32 %v9352_v20, %v18336_v49  ;;  %vm18365_vm0 = vmmov %vm18362_vm10 }
 0x639   :  { %v9158_v41 = vmul.f32 %v9141_v39, %v18332_v23  ;;  %v9159_v32 = vmul.f32 %v9142_v51, %v18333_v31  ;;  %v18337_v39 = vperm.slane %v18335_v46, 2  ;;  %v16531_v51 = vpop.f32.mrf.mxu0  ;;  %v18338_v23 = vperm.slane %v18335_v46, 3  ;;  %v16541_v49 = vpop.f32.mrf.mxu3  ;;  %vm18378_vm4 = vmmov %vm18365_vm0 }
 0x63a   :  { %18340 = vst [vmem:[#allocation36_spill] sm:$0xff] %v16541_v49  ;;  %vm18370_vm2 = vcmask 973824   ;;  %vm18379_vm5 = vmmov %vm18365_vm0 }
 0x63b   :  { %9262 = vmatpush.msrb.mxu0 %v9158_v41  ;;  %9282 = vmatpush.msrb.mxu1 %v9159_v32  ;;  %v9370_v38 = vmul.f32 %v9353_v11, %v18337_v39  ;;  %v9371_v31 = vmul.f32 %v9354_v52, %v18338_v23  ;;  %v16547_v41 = vpop.f32.mrf.mxu2  ;;  %v9355_v32 = vsel %vm18343_vm8, %v16460_v16, %v9346_v24  ;;  %v18344_v52 = vperm.slane %v18335_v46, 0  ;;  %vm18371_vm3 = vmmov %vm18370_vm2 }
 0x63c   :  { %12127 = vmatmul.msk.f32.vlgmr.msra.gmra.mxu0 %vm174_vm1, %v12126_v1  ;;  %12128 = vmatmul.msk.f32.vlgmr.msra.gmra.mxu1 %vm174_vm1, %v12126_v1  ;;  %vm18393_vm8 = vmmov %vm18370_vm2 }
 0x63d   :  { %12129 = vmatmul.msk.f32.vlgmr.msra.gmra.mxu2 %vm174_vm1, %v12126_v1  ;;  %12130 = vmatmul.msk.f32.vlgmr.msra.gmra.mxu3 %vm174_vm1, %v12126_v1  ;;  %v16563_v16 = vpop.f32.mrf.mxu1 }
 0x63e   :  { %9416 = vmatpush.msra.mxu1 %v9369_v56  ;;  %9436 = vmatpush.msra.mxu2 %v9370_v38  ;;  %v18345_v56 = vperm.slane %v18335_v46, 7  ;;  %18348 = vst [vmem:[#allocation50_spill] sm:$0xff] %v16563_v16 }
 0x63f   :  { %9456 = vmatpush.msra.mxu3 %v9371_v31  ;;  %v9336_v34 = vpop.permute.xlu0 %9335 }
 0x640   :  { %v9351_v20 = vsel %vm18341_vm6, %v9336_v34, %v16438_v25  ;;  %v9367_v11 = vsel %vm18342_vm7, %v16477_v37, %v9336_v34  ;;  %v16555_v23 = vpop.permute.xlu1 %9561  ;;  %v9558_v31 = vpop.permute.xlu2 %9557  ;;  %v18346_v25 = vperm.slane %v18335_v46, 4  ;;  %vm18384_vm6 = vmmov %vm18370_vm2 }
 0x641   :  { %v9368_v39 = vmul.f32 %v9351_v20, %v18344_v52  ;;  %v9375_v38 = vmul.f32 %v9367_v11, %v18345_v56  ;;  %v16559_v35 = vpop.f32.mrf.mxu0  ;;  %v18352_v52 = vperm.slane %v18335_v46, 5  ;;  %v18353_v56 = vperm.slane %v18335_v46, 6  ;;  %vm18385_vm7 = vmmov %vm18370_vm2 }
 0x642   :  { %v9372_v49 = vmul.f32 %v9355_v32, %v18346_v25  ;;  %18347 = vst [vmem:[#allocation61_spill] sm:$0xff] %v16559_v35  ;;  %v9568_v32 = vsel %vm18351_vm13, %v9556_v62, %v9558_v31  ;;  %vm18400_vm13 = vmmov %vm18370_vm2 }
 0x643   :  { %9396 = vmatpush.msra.mxu0 %v9368_v39 }
 0x644   :  { %12131 = vmatmul.msk.f32.vlgmr.msrb.gmra.mxu0 %vm174_vm1, %v12126_v1  ;;  %12132 = vmatmul.msk.f32.vlgmr.msrb.gmra.mxu1 %vm174_vm1, %v12126_v1 }
 0x645   :  { %12133 = vmatmul.msk.f32.vlgmr.msrb.gmra.mxu2 %vm174_vm1, %v12126_v1  ;;  %12134 = vmatmul.msk.f32.vlgmr.msrb.gmra.mxu3 %vm174_vm1, %v12126_v1  ;;  %v12135_v1 = vld [vmem:[%s17317_s2 + $0x78] sm:$0xff] }
 0x646   :  { %9476 = vmatpush.msrb.mxu0 %v9372_v49  ;;  %9536 = vmatpush.msrb.mxu3 %v9375_v38  ;;  %v16578_v49 = vpop.f32.mrf.mxu3  ;;  %v16580_v38 = vpop.f32.mrf.mxu2 }
 0x647   :  { %v9348_v34 = vpop.permute.xlu0 %9347  ;;  %18354 = vst [vmem:[#allocation134_spill] sm:$0xff] %v16578_v49 }
 0x648   :  { %v9356_v20 = vsel %vm18349_vm9, %v9346_v24, %v9348_v34  ;;  %v9357_v11 = vsel %vm18350_vm14, %v9348_v34, %v16477_v37  ;;  %v18355_v24 = vld [vmem:[#allocation115_spill] sm:$0xff]  ;;  %v9560_v46 = vpop.permute.xlu2 %9559  ;;  %vm18394_vm9 = vmmov %vm18370_vm2 }
 0x649   :  { %v9373_v39 = vmul.f32 %v9356_v20, %v18352_v52  ;;  %v9374_v25 = vmul.f32 %v9357_v11, %v18353_v56  ;;  %v18356_v37 = vperm.slane %v18355_v24, 3  ;;  %v16586_v20 = vpop.permute.xlu1 %9767  ;;  %v16590_v11 = vpop.f32.mrf.mxu0  ;;  %v18369_v54 = vperm.slane %v18355_v24, 1  ;;  %vm18399_vm14 = vmmov %vm18370_vm2 }
 0x64a   :  { %18357 = vst [vmem:[#allocation139_spill] sm:$0xff] %v16590_v11  ;;  %v16592_v52 = vpop.f32.mrf.mxu1  ;;  %v12144_v11 = vld [vmem:[%s17317_s2 + $0x80] sm:$0xff] }
 0x64b   :  { %9496 = vmatpush.msrb.mxu1 %v9373_v39  ;;  %9516 = vmatpush.msrb.mxu2 %v9374_v25  ;;  %v9585_v34 = vmul.f32 %v9568_v32, %v18356_v37  ;;  %18358 = vst [vmem:[#allocation35_spill] sm:$0xff] %v16592_v52  ;;  %v18360_v32 = vperm.slane %v18355_v24, 2 }
 0x64c   :  { %12136 = vmatmul.msk.f32.vlgmr.msra.gmra.mxu0 %vm174_vm1, %v12135_v1  ;;  %12137 = vmatmul.msk.f32.vlgmr.msra.gmra.mxu1 %vm174_vm1, %v12135_v1 }
 0x64d   :  { %12138 = vmatmul.msk.f32.vlgmr.msra.gmra.mxu2 %vm174_vm1, %v12135_v1  ;;  %12139 = vmatmul.msk.f32.vlgmr.msra.gmra.mxu3 %vm174_vm1, %v12135_v1 }
 0x64e   :  { %9670 = vmatpush.msra.mxu3 %v9585_v34  ;;  %v16597_v37 = vpop.f32.mrf.mxu3  ;;  %v16601_v49 = vpop.f32.mrf.mxu2 }
 0x64f   :  { %v9554_v39 = vpop.permute.xlu0 %9553  ;;  %18361 = vst [vmem:[#allocation44_spill] sm:$0xff] %v16597_v37 }
 0x650   :  { %v9567_v56 = vsel %vm18359_vm12, %v9554_v39, %v9556_v62  ;;  %v16605_v35 = vpop.permute.xlu2 %9763 }
 0x651   :  { %v9584_v25 = vmul.f32 %v9567_v56, %v18360_v32  ;;  %v9766_v34 = vpop.permute.xlu1 %9765  ;;  %v9569_v32 = vsel %vm18364_vm15, %v9558_v31, %v9560_v46  ;;  %v16613_v37 = vpop.f32.mrf.mxu0 }
 0x652   :  { %18366 = vst [vmem:[#allocation136_spill] sm:$0xff] %v16613_v37  ;;  %v16615_v29 = vpop.f32.mrf.mxu1  ;;  %v9779_v31 = vsel %vm18370_vm2, %v16605_v35, %v9766_v34 }
 0x653   :  { %9650 = vmatpush.msra.mxu2 %v9584_v25  ;;  %v9570_v25 = vsel %vm18365_vm0, %v9560_v46, %v16555_v23  ;;  %18367 = vst [vmem:[#allocation59_spill] sm:$0xff] %v16615_v29  ;;  %v18372_v46 = vperm.slane %v18355_v24, 4 }
 0x654   :  { %12140 = vmatmul.msk.f32.vlgmr.msrb.gmra.mxu0 %vm174_vm1, %v12135_v1  ;;  %12141 = vmatmul.msk.f32.vlgmr.msrb.gmra.mxu1 %vm174_vm1, %v12135_v1 }
 0x655   :  { %12142 = vmatmul.msk.f32.vlgmr.msrb.gmra.mxu2 %vm174_vm1, %v12135_v1  ;;  %12143 = vmatmul.msk.f32.vlgmr.msrb.gmra.mxu3 %vm174_vm1, %v12135_v1  ;;  %v18368_v1 = vperm.slane %v18355_v24, 0 }
 0x657   :  { %v9552_v16 = vpop.permute.xlu0 %9551 }
 0x658   :  { %v9565_v62 = vsel %vm18362_vm10, %v16519_v63, %v9552_v16  ;;  %v9566_v56 = vsel %vm18363_vm11, %v9552_v16, %v9554_v39  ;;  %v9780_v16 = vsel %vm18371_vm3, %v9766_v34, %v16586_v20  ;;  %v9586_v39 = vmul.f32 %v9569_v32, %v18372_v46 }
 0x659   :  { %v9582_v3 = vmul.f32 %v9565_v62, %v18368_v1  ;;  %v9583_v52 = vmul.f32 %v9566_v56, %v18369_v54  ;;  %v18373_v62 = vperm.slane %v18355_v24, 5  ;;  %v16634_v54 = vpop.f32.mrf.mxu2  ;;  %v18374_v56 = vld [vmem:[#allocation122_spill] sm:$0xff]  ;;  %v18382_v46 = vperm.slane %v18355_v24, 7 }
 0x65a   :  { %v18375_v29 = vperm.slane %v18374_v56, 0  ;;  %v18376_v40 = vperm.slane %v18374_v56, 1 }
 0x65b   :  { %9610 = vmatpush.msra.mxu0 %v9582_v3  ;;  %9630 = vmatpush.msra.mxu1 %v9583_v52  ;;  %v9587_v1 = vmul.f32 %v9570_v25, %v18373_v62  ;;  %v16642_v3 = vpop.f32.mrf.mxu3  ;;  %v16648_v25 = vpop.f32.mrf.mxu0 }
 0x65c   :  { %12145 = vmatmul.msk.f32.vlgmr.msra.gmra.mxu0 %vm174_vm1, %v12144_v11  ;;  %12146 = vmatmul.msk.f32.vlgmr.msra.gmra.mxu1 %vm174_vm1, %v12144_v11  ;;  %v9796_v37 = vmul.f32 %v9779_v31, %v18375_v29  ;;  %v9797_v34 = vmul.f32 %v9780_v16, %v18376_v40  ;;  %18377 = vst [vmem:[#allocation142_spill] sm:$0xff] %v16642_v3  ;;  %v16650_v40 = vpop.f32.mrf.mxu1  ;;  %v18381_v31 = vperm.slane %v18355_v24, 6  ;;  %v9776_v62 = vpop.permute.xlu2 %9775 }
 0x65d   :  { %12147 = vmatmul.msk.f32.vlgmr.msra.gmra.mxu2 %vm174_vm1, %v12144_v11  ;;  %12148 = vmatmul.msk.f32.vlgmr.msra.gmra.mxu3 %vm174_vm1, %v12144_v11  ;;  %18380 = vst [vmem:[#allocation64_spill] sm:$0xff] %v16650_v40 }
 0x65e   :  { %9690 = vmatpush.msrb.mxu0 %v9586_v39  ;;  %9710 = vmatpush.msrb.mxu1 %v9587_v1 }
 0x65f   :  { %v9564_v52 = vpop.permute.xlu0 %9563 }
 0x660   :  { %9824 = vmatpush.msra.mxu0 %v9796_v37  ;;  %9844 = vmatpush.msra.mxu1 %v9797_v34  ;;  %v9571_v32 = vsel %vm18378_vm4, %v16555_v23, %v9564_v52  ;;  %v9581_v29 = vsel %vm18379_vm5, %v9564_v52, %v16519_v63  ;;  %v9778_v63 = vpop.permute.xlu1 %9777  ;;  %v18386_v52 = vperm.slane %v18374_v56, 2 }
 0x661   :  { %v9588_v16 = vmul.f32 %v9571_v32, %v18381_v31  ;;  %v9589_v39 = vmul.f32 %v9581_v29, %v18382_v46  ;;  %v16660_v23 = vpop.f32.mrf.mxu2  ;;  %v9785_v34 = vsel %vm18385_vm7, %v9776_v62, %v9778_v63  ;;  %v12153_v29 = vld [vmem:[%s17317_s2 + $0x88] sm:$0xff] }
 0x663   :  { %9730 = vmatpush.msrb.mxu2 %v9588_v16  ;;  %9750 = vmatpush.msrb.mxu3 %v9589_v39  ;;  %v16662_v1 = vpop.f32.mrf.mxu3  ;;  %v18389_v16 = vperm.slane %v18374_v56, 6 }
 0x664   :  { %12149 = vmatmul.msk.f32.vlgmr.msrb.gmra.mxu0 %vm174_vm1, %v12144_v11  ;;  %12150 = vmatmul.msk.f32.vlgmr.msrb.gmra.mxu1 %vm174_vm1, %v12144_v11  ;;  %18383 = vst [vmem:[#allocation46_spill] sm:$0xff] %v16662_v1  ;;  %v16674_v31 = vpop.f32.mrf.mxu1 }
 0x665   :  { %12151 = vmatmul.msk.f32.vlgmr.msrb.gmra.mxu2 %vm174_vm1, %v12144_v11  ;;  %12152 = vmatmul.msk.f32.vlgmr.msrb.gmra.mxu3 %vm174_vm1, %v12144_v11  ;;  %v16672_v11 = vpop.f32.mrf.mxu0  ;;  %18388 = vst [vmem:[#allocation144_spill] sm:$0xff] %v16674_v31  ;;  %v9802_v46 = vmul.f32 %v9785_v34, %v18389_v16  ;;  %v9795_v34 = vsel %vm18393_vm8, %v9778_v63, %v16605_v35  ;;  %v18395_v31 = vperm.slane %v18374_v56, 3 }
 0x666   :  { %18387 = vst [vmem:[#allocation53_spill] sm:$0xff] %v16672_v11 }
 0x667   :  { %v9770_v37 = vpop.permute.xlu0 %9769 }
 0x668   :  { %v9781_v24 = vsel %vm18384_vm6, %v16586_v20, %v9770_v37  ;;  %v18390_v20 = vld [vmem:[#allocation127_spill] sm:$0xff] }
 0x669   :  { %v9798_v32 = vmul.f32 %v9781_v24, %v18386_v52  ;;  %v18391_v39 = vperm.slane %v18390_v20, 2  ;;  %v16684_v52 = vpop.f32.mrf.mxu2  ;;  %v18396_v1 = vperm.slane %v18390_v20, 6 }
 0x66b   :  { %9864 = vmatpush.msra.mxu2 %v9798_v32  ;;  %v9979_v24 = vmul.f32 %v15431_v45, %v18391_v39  ;;  %v16686_v3 = vpop.f32.mrf.mxu3  ;;  %v9983_v45 = vmul.f32 %v15428_v33, %v18396_v1 }
 0x66c   :  { %12154 = vmatmul.msk.f32.vlgmr.msra.gmra.mxu0 %vm174_vm1, %v12153_v29  ;;  %12155 = vmatmul.msk.f32.vlgmr.msra.gmra.mxu1 %vm174_vm1, %v12153_v29  ;;  %18392 = vst [vmem:[#allocation137_spill] sm:$0xff] %v16686_v3  ;;  %v16703_v35 = vpop.f32.mrf.mxu1 }
 0x66d   :  { %12156 = vmatmul.msk.f32.vlgmr.msra.gmra.mxu2 %vm174_vm1, %v12153_v29  ;;  %v16701_v40 = vpop.f32.mrf.mxu0 }
 0x66e   :  { %9944 = vmatpush.msrb.mxu2 %v9802_v46  ;;  %v18397_v46 = vperm.slane %v18374_v56, 7 }
 0x66f   :  { %v9772_v32 = vpop.permute.xlu0 %9771 }
 0x670   :  { %10045 = vmatpush.msra.mxu2 %v9979_v24  ;;  %v9782_v16 = vsel %vm18394_vm9, %v9770_v37, %v9772_v32  ;;  %v9803_v39 = vmul.f32 %v9795_v34, %v18397_v46  ;;  %v18398_v24 = vperm.slane %v18390_v20, 3  ;;  %v18402_v34 = vperm.slane %v18374_v56, 5 }
 0x671   :  { %v9799_v11 = vmul.f32 %v9782_v16, %v18395_v31  ;;  %v18403_v46 = vperm.slane %v18390_v20, 0 }
 0x672   :  { %v9980_v3 = vmul.f32 %v15463_v12, %v18398_v24  ;;  %v18401_v12 = vperm.slane %v18374_v56, 4  ;;  %v18405_v56 = vld [vmem:[#allocation129_spill] sm:$0xff] }
 0x673   :  { %9884 = vmatpush.msra.mxu3 %v9799_v11  ;;  %v16711_v11 = vpop.f32.mrf.mxu2 }
 0x674   :  { %12157 = vmatmul.msk.f32.vlgmr.msra.gmra.mxu3 %vm174_vm1, %v12153_v29 }
 0x675   :  { %12160 = vmatmul.msk.f32.vlgmr.msrb.gmra.mxu2 %vm174_vm1, %v12153_v29  ;;  %9964 = vmatpush.msrb.mxu3 %v9803_v39 }
 0x676   :  { %10125 = vmatpush.msrb.mxu2 %v9983_v45  ;;  %v16707_v63 = vpop.f32.mrf.mxu3  ;;  %v9977_v45 = vmul.f32 %v15342_v30, %v18403_v46  ;;  %v18406_v30 = vperm.slane %v18405_v56, 2 }
 0x677   :  { %10065 = vmatpush.msra.mxu3 %v9980_v3  ;;  %v9774_v33 = vpop.permute.xlu0 %9773  ;;  %v12162_v3 = vld [vmem:[%s17317_s2 + $0x90] sm:$0xff] }
 0x678   :  { %v9783_v37 = vsel %vm18399_vm14, %v9772_v32, %v9774_v33  ;;  %v9784_v1 = vsel %vm18400_vm13, %v9774_v33, %v9776_v62  ;;  %v18404_v62 = vperm.slane %v18390_v20, 1  ;;  %v16726_v39 = vpop.f32.mrf.mxu0  ;;  %v16728_v24 = vpop.f32.mrf.mxu1  ;;  %v10160_v33 = vmul.f32 %v15315_v22, %v18406_v30 }
 0x679   :  { %v9800_v31 = vmul.f32 %v9783_v37, %v18401_v12  ;;  %v9801_v16 = vmul.f32 %v9784_v1, %v18402_v34  ;;  %v18407_v37 = vperm.slane %v18390_v20, 7 }
 0x67a   :  { %v9978_v32 = vmul.f32 %v15401_v48, %v18404_v62  ;;  %v18408_v48 = vperm.slane %v18390_v20, 5 }
 0x67b   :  { %9904 = vmatpush.msrb.mxu0 %v9800_v31  ;;  %9924 = vmatpush.msrb.mxu1 %v9801_v16  ;;  %v9984_v1 = vmul.f32 %v15330_v15, %v18407_v37  ;;  %v18409_v31 = vperm.slane %v18390_v20, 4  ;;  %v18410_v15 = vperm.slane %v18405_v56, 0  ;;  %v16751_v16 = vpop.f32.mrf.mxu2 }
 0x67c   :  { %12158 = vmatmul.msk.f32.vlgmr.msrb.gmra.mxu0 %vm174_vm1, %v12153_v29  ;;  %12159 = vmatmul.msk.f32.vlgmr.msrb.gmra.mxu1 %vm174_vm1, %v12153_v29  ;;  %v9982_v12 = vmul.f32 %v15396_v50, %v18408_v48  ;;  %v18411_v50 = vperm.slane %v18405_v56, 1 }
 0x67d   :  { %12161 = vmatmul.msk.f32.vlgmr.msrb.gmra.mxu3 %vm174_vm1, %v12153_v29  ;;  %10005 = vmatpush.msra.mxu0 %v9977_v45  ;;  %v9981_v34 = vmul.f32 %v15467_v6, %v18409_v31  ;;  %v10158_v29 = vmul.f32 %v15276_v28, %v18410_v15  ;;  %v18412_v6 = vperm.slane %v18405_v56, 3  ;;  %v18413_v45 = vperm.slane %v18405_v56, 6 }
 0x67e   :  { %10025 = vmatpush.msra.mxu1 %v9978_v32  ;;  %12165 = vmatmul.msk.f32.vlgmr.msra.gmra.mxu2 %vm174_vm1, %v12162_v3  ;;  %v10159_v20 = vmul.f32 %v15300_v21, %v18411_v50  ;;  %v18414_v21 = vperm.slane %v18405_v56, 4 }
 0x67f   :  { %10145 = vmatpush.msrb.mxu3 %v9984_v1  ;;  %10226 = vmatpush.msra.mxu2 %v10160_v33  ;;  %v16746_v22 = vpop.f32.mrf.mxu3  ;;  %v10161_v46 = vmul.f32 %v15318_v53, %v18412_v6  ;;  %v10164_v62 = vmul.f32 %v15376_v55, %v18413_v45  ;;  %v12171_v55 = vld [vmem:[%s17317_s2 + $0x98] sm:$0xff]  ;;  %v18415_v33 = vperm.slane %v18405_v56, 5  ;;  %v18416_v1 = vperm.slane %v18405_v56, 7 }
 0x680   :  { %10085 = vmatpush.msrb.mxu0 %v9981_v34  ;;  %10105 = vmatpush.msrb.mxu1 %v9982_v12  ;;  %v16765_v28 = vpop.f32.mrf.mxu0  ;;  %v16767_v32 = vpop.f32.mrf.mxu1  ;;  %v10162_v53 = vmul.f32 %v15347_v58, %v18414_v21  ;;  %v18417_v12 = vld [vmem:[#allocation130_spill] sm:$0xff] }
 0x681   :  { %v10163_v37 = vmul.f32 %v15372_v59, %v18415_v33  ;;  %v10165_v48 = vmul.f32 %v15280_v44, %v18416_v1  ;;  %v18418_v58 = vperm.slane %v18417_v12, 2  ;;  %v18419_v44 = vperm.slane %v18417_v12, 0 }
 0x682   :  { %v18424_v21 = vperm.slane %v18417_v12, 5  ;;  %v6564_v33 = vadd.f32 %v16158_v57, %v16082_v9 }
 0x683   :  { %v10341_v31 = vmul.f32 %v15434_v60, %v18418_v58  ;;  %v16789_v34 = vpop.f32.mrf.mxu2  ;;  %v10339_v56 = vmul.f32 %v15456_v47, %v18419_v44  ;;  %v18420_v60 = vperm.slane %v18417_v12, 1  ;;  %v18430_v44 = vld [vmem:[#allocation86_spill] sm:$0xff] }
 0x684   :  { %12163 = vmatmul.msk.f32.vlgmr.msra.gmra.mxu0 %vm174_vm1, %v12162_v3  ;;  %12164 = vmatmul.msk.f32.vlgmr.msra.gmra.mxu1 %vm174_vm1, %v12162_v3  ;;  %v6798_v57 = vadd.f32 %v16237_v19, %v6564_v33 }
 0x685   :  { %12166 = vmatmul.msk.f32.vlgmr.msra.gmra.mxu3 %vm174_vm1, %v12162_v3  ;;  %10186 = vmatpush.msra.mxu0 %v10158_v29  ;;  %v10340_v29 = vmul.f32 %v15405_v14, %v18420_v60 }
 0x686   :  { %12169 = vmatmul.msk.f32.vlgmr.msrb.gmra.mxu2 %vm174_vm1, %v12162_v3  ;;  %10206 = vmatpush.msra.mxu1 %v10159_v20  ;;  %v18422_v20 = vperm.slane %v18417_v12, 6 }
 0x687   :  { %10246 = vmatpush.msra.mxu3 %v10161_v46  ;;  %10306 = vmatpush.msrb.mxu2 %v10164_v62  ;;  %v16773_v30 = vpop.f32.mrf.mxu3  ;;  %v12180_v62 = vld [vmem:[%s17317_s2 + $0xa0] sm:$0xff] }
 0x688   :  { %v16793_v59 = vpop.f32.mrf.mxu0  ;;  %v16795_v15 = vpop.f32.mrf.mxu1  ;;  %v10345_v6 = vmul.f32 %v15508_v8, %v18422_v20  ;;  %v18434_v20 = vld [vmem:[#allocation66_spill] sm:$0xff] }
 0x68c   :  { %12167 = vmatmul.msk.f32.vlgmr.msrb.gmra.mxu0 %vm174_vm1, %v12162_v3  ;;  %12168 = vmatmul.msk.f32.vlgmr.msrb.gmra.mxu1 %vm174_vm1, %v12162_v3 }
 0x68d   :  { %12170 = vmatmul.msk.f32.vlgmr.msrb.gmra.mxu3 %vm174_vm1, %v12162_v3  ;;  %10266 = vmatpush.msrb.mxu0 %v10162_v53  ;;  %v18421_v3 = vperm.slane %v18417_v12, 3  ;;  %v10344_v53 = vmul.f32 %v15544_v5, %v18424_v21 }
 0x68e   :  { %12174 = vmatmul.msk.f32.vlgmr.msra.gmra.mxu2 %vm174_vm1, %v12171_v55  ;;  %10286 = vmatpush.msrb.mxu1 %v10163_v37  ;;  %v18425_v37 = vld [vmem:[#allocation131_spill] sm:$0xff] }
 0x68f   :  { %10326 = vmatpush.msrb.mxu3 %v10165_v48  ;;  %10407 = vmatpush.msra.mxu2 %v10341_v31  ;;  %v10342_v50 = vmul.f32 %v15496_v17, %v18421_v3  ;;  %v16811_v46 = vpop.f32.mrf.mxu2  ;;  %v16813_v45 = vpop.f32.mrf.mxu3  ;;  %v18423_v17 = vperm.slane %v18417_v12, 4  ;;  %v18426_v1 = vperm.slane %v18425_v37, 2  ;;  %v18431_v60 = vperm.slane %v18425_v37, 1 }
 0x690   :  { %v18433_v19 = vperm.slane %v18425_v37, 3 }
 0x691   :  { %v10343_v8 = vmul.f32 %v15540_v18, %v18423_v17  ;;  %v10522_v48 = vmul.f32 %v15504_v27, %v18426_v1  ;;  %v18427_v18 = vperm.slane %v18417_v12, 7  ;;  %v18436_v17 = vld [vmem:[#allocation74_spill] sm:$0xff] }
 0x693   :  { %v10346_v58 = vmul.f32 %v15512_v61, %v18427_v18  ;;  %v18428_v61 = vld [vmem:[#allocation22_spill] sm:$0xff] }
 0x694   :  { %12172 = vmatmul.msk.f32.vlgmr.msra.gmra.mxu0 %vm174_vm1, %v12171_v55  ;;  %12173 = vmatmul.msk.f32.vlgmr.msra.gmra.mxu1 %vm174_vm1, %v12171_v55  ;;  %v6484_v12 = vadd.f32 %v18428_v61, %v16028_v7  ;;  %v18435_v7 = vperm.slane %v18425_v37, 6  ;;  %v18439_v61 = vld [vmem:[#allocation78_spill] sm:$0xff] }
 0x695   :  { %12175 = vmatmul.msk.f32.vlgmr.msra.gmra.mxu3 %vm174_vm1, %v12171_v55  ;;  %10367 = vmatpush.msra.mxu0 %v10339_v56 }
 0x696   :  { %12178 = vmatmul.msk.f32.vlgmr.msrb.gmra.mxu2 %vm174_vm1, %v12171_v55  ;;  %10387 = vmatpush.msra.mxu1 %v10340_v29  ;;  %v18432_v29 = vld [vmem:[#allocation54_spill] sm:$0xff]  ;;  %v6794_v21 = vadd.f32 %v16205_v10, %v6484_v12 }
 0x697   :  { %10427 = vmatpush.msra.mxu3 %v10342_v50  ;;  %10487 = vmatpush.msrb.mxu2 %v10345_v6  ;;  %v16842_v5 = vpop.f32.mrf.mxu2  ;;  %v16844_v9 = vpop.f32.mrf.mxu3  ;;  %v10521_v3 = vmul.f32 %v18432_v29, %v18431_v60  ;;  %v7012_v50 = vadd.f32 %v16302_v26, %v6798_v57  ;;  %v10523_v6 = vmul.f32 %v18434_v20, %v18433_v19  ;;  %v18442_v60 = vld [vmem:[#allocation37_spill] sm:$0xff]  ;;  %v18445_v20 = vld [vmem:[#allocation10_spill] sm:$0xff] }
 0x698   :  { %v16817_v14 = vpop.f32.mrf.mxu0  ;;  %v16819_v47 = vpop.f32.mrf.mxu1 }
 0x69c   :  { %12176 = vmatmul.msk.f32.vlgmr.msrb.gmra.mxu0 %vm174_vm1, %v12171_v55  ;;  %12177 = vmatmul.msk.f32.vlgmr.msrb.gmra.mxu1 %vm174_vm1, %v12171_v55 }
 0x69d   :  { %12179 = vmatmul.msk.f32.vlgmr.msrb.gmra.mxu3 %vm174_vm1, %v12171_v55  ;;  %10447 = vmatpush.msrb.mxu0 %v10343_v8  ;;  %v18429_v55 = vperm.slane %v18425_v37, 0  ;;  %v10526_v8 = vmul.f32 %v18436_v17, %v18435_v7  ;;  %v18447_v7 = vld [vmem:[#allocation75_spill] sm:$0xff] }
 0x69e   :  { %12183 = vmatmul.msk.f32.vlgmr.msra.gmra.mxu2 %vm174_vm1, %v12180_v62  ;;  %10467 = vmatpush.msrb.mxu1 %v10344_v53  ;;  %v7226_v53 = vadd.f32 %v16367_v43, %v7012_v50  ;;  %v18438_v43 = vperm.slane %v18425_v37, 4  ;;  %v18444_v50 = vld [vmem:[#allocation57_spill] sm:$0xff] }
 0x69f   :  { %10507 = vmatpush.msrb.mxu3 %v10346_v58  ;;  %10588 = vmatpush.msra.mxu2 %v10522_v48  ;;  %v10520_v56 = vmul.f32 %v18430_v44, %v18429_v55  ;;  %v18437_v58 = vld [vmem:[#allocation132_spill] sm:$0xff]  ;;  %v12189_v55 = vld [vmem:[%s17317_s2 + $0xa8] sm:$0xff]  ;;  %v18440_v44 = vperm.slane %v18425_v37, 5 }
 0x6a0   :  { %v16847_v31 = vpop.f32.mrf.mxu0  ;;  %v16849_v27 = vpop.f32.mrf.mxu1  ;;  %v7440_v1 = vadd.f32 %v16428_v0, %v7226_v53  ;;  %v7008_v57 = vadd.f32 %v18437_v58, %v6794_v21  ;;  %v10524_v12 = vmul.f32 %v18439_v61, %v18438_v43  ;;  %v18450_v61 = vperm.slane %v18445_v20, 1 }
 0x6a2   :  { %v7654_v10 = vadd.f32 %v16502_v42, %v7440_v1  ;;  %v7222_v29 = vadd.f32 %v18442_v60, %v7008_v57  ;;  %v18443_v42 = vperm.slane %v18425_v37, 7  ;;  %v18448_v57 = vperm.slane %v18445_v20, 0  ;;  %v18455_v60 = vld [vmem:[#allocation82_spill] sm:$0xff] }
 0x6a4   :  { %12181 = vmatmul.msk.f32.vlgmr.msra.gmra.mxu0 %vm174_vm1, %v12180_v62  ;;  %12182 = vmatmul.msk.f32.vlgmr.msra.gmra.mxu1 %vm174_vm1, %v12180_v62  ;;  %v10527_v19 = vmul.f32 %v18444_v50, %v18443_v42  ;;  %v18457_v42 = vld [vmem:[#allocation94_spill] sm:$0xff] }
 0x6a5   :  { %12184 = vmatmul.msk.f32.vlgmr.msra.gmra.mxu3 %vm174_vm1, %v12180_v62  ;;  %10548 = vmatpush.msra.mxu0 %v10520_v56  ;;  %v18441_v56 = vld [vmem:[#allocation87_spill] sm:$0xff] }
 0x6a6   :  { %12187 = vmatmul.msk.f32.vlgmr.msrb.gmra.mxu2 %vm174_vm1, %v12180_v62  ;;  %10568 = vmatpush.msra.mxu1 %v10521_v3  ;;  %v10525_v0 = vmul.f32 %v18441_v56, %v18440_v44  ;;  %v7868_v3 = vadd.f32 %v16580_v38, %v7654_v10  ;;  %v18449_v10 = vld [vmem:[#allocation67_spill] sm:$0xff]  ;;  %v18453_v56 = vld [vmem:[#allocation68_spill] sm:$0xff] }
 0x6a7   :  { %10608 = vmatpush.msra.mxu3 %v10523_v6  ;;  %10668 = vmatpush.msrb.mxu2 %v10526_v8  ;;  %v8909_v26 = vpop.f32.mrf.mxu2  ;;  %v16872_v33 = vpop.f32.mrf.mxu3  ;;  %v18446_v6 = vperm.slane %v18445_v20, 2  ;;  %v7436_v8 = vadd.f32 %v16404_v36, %v7222_v29  ;;  %v10701_v43 = vmul.f32 %v18449_v10, %v18448_v57  ;;  %v18461_v57 = vperm.slane %v18445_v20, 4  ;;  %v18462_v10 = vld [vmem:[#allocation110_spill] sm:$0xff] }
 0x6a8   :  { %v16875_v48 = vpop.f32.mrf.mxu0  ;;  %v16877_v18 = vpop.f32.mrf.mxu1  ;;  %v8082_v21 = vadd.f32 %v16634_v54, %v7868_v3  ;;  %v18456_v3 = vld [vmem:[#allocation114_spill] sm:$0xff] }
 0x6a9   :  { %v10703_v17 = vmul.f32 %v18447_v7, %v18446_v6  ;;  %v7650_v53 = vadd.f32 %v16475_v2, %v7436_v8  ;;  %v6464_v50 = vadd.f32 %v18457_v42, %v18456_v3  ;;  %v18459_v6 = vld [vmem:[#allocation45_spill] sm:$0xff]  ;;  %v18471_v42 = vld [vmem:[#allocation8_spill] sm:$0xff] }
 0x6aa   :  { %v8296_v1 = vadd.f32 %v16684_v52, %v8082_v21 }
 0x6ab   :  { %v7864_v36 = vadd.f32 %v16547_v41, %v7650_v53  ;;  %v18452_v41 = vperm.slane %v18445_v20, 6 }
 0x6ac   :  { %12185 = vmatmul.msk.f32.vlgmr.msrb.gmra.mxu0 %vm174_vm1, %v12180_v62  ;;  %12186 = vmatmul.msk.f32.vlgmr.msrb.gmra.mxu1 %vm174_vm1, %v12180_v62  ;;  %v8510_v54 = vadd.f32 %v16751_v16, %v8296_v1 }
 0x6ad   :  { %12188 = vmatmul.msk.f32.vlgmr.msrb.gmra.mxu3 %vm174_vm1, %v12180_v62  ;;  %10628 = vmatpush.msrb.mxu0 %v10524_v12  ;;  %v18451_v12 = vld [vmem:[#allocation96_spill] sm:$0xff]  ;;  %v8078_v2 = vadd.f32 %v16601_v49, %v7864_v36  ;;  %v10707_v16 = vmul.f32 %v18453_v56, %v18452_v41 }
 0x6ae   :  { %12192 = vmatmul.msk.f32.vlgmr.msra.gmra.mxu2 %vm174_vm1, %v12189_v55  ;;  %10648 = vmatpush.msrb.mxu1 %v10525_v0  ;;  %v10702_v44 = vmul.f32 %v18451_v12, %v18450_v61  ;;  %v8724_v52 = vadd.f32 %v16811_v46, %v8510_v54  ;;  %v18454_v0 = vperm.slane %v18445_v20, 3  ;;  %v18463_v61 = vld [vmem:[#allocation43_spill] sm:$0xff]  ;;  %v18467_v56 = vld [vmem:[#allocation72_spill] sm:$0xff] }
 0x6af   :  { %10688 = vmatpush.msrb.mxu3 %v10527_v19  ;;  %10769 = vmatpush.msra.mxu2 %v10703_v17  ;;  %v9010_v38 = vpop.f32.mrf.mxu2  ;;  %v16904_v37 = vpop.f32.mrf.mxu3  ;;  %v8292_v49 = vadd.f32 %v16660_v23, %v8078_v2  ;;  %v18458_v19 = vld [vmem:[#allocation120_spill] sm:$0xff]  ;;  %v18460_v23 = vld [vmem:[#allocation90_spill] sm:$0xff]  ;;  %v18465_v2 = vld [vmem:[#allocation95_spill] sm:$0xff] }
 0x6b0   :  { %v16908_v58 = vpop.f32.mrf.mxu0  ;;  %v10704_v29 = vmul.f32 %v18455_v60, %v18454_v0  ;;  %v8938_v46 = vadd.f32 %v8909_v26, %v8724_v52  ;;  %v6444_v7 = vadd.f32 %v18459_v6, %v18458_v19  ;;  %v6793_v26 = vadd.f32 %v18460_v23, %v6464_v50  ;;  %v18468_v0 = vld [vmem:[#allocation85_spill] sm:$0xff] }
 0x6b1   :  { %v16910_v62 = vpop.f32.mrf.mxu1  ;;  %v8506_v21 = vadd.f32 %v16711_v11, %v8292_v49  ;;  %v16955_v11 = vld [vmem:[%s17317_s2 + $0xb0] sm:$0xff]  ;;  %v18469_v60 = vperm.slane %v18468_v0, 2  ;;  %v18472_v49 = vld [vmem:[#allocation126_spill] sm:$0xff]  ;;  %v18474_v19 = vld [vmem:[#allocation125_spill] sm:$0xff] }
 0x6b2   :  { %v6792_v12 = vadd.f32 %v18463_v61, %v6444_v7  ;;  %v7007_v50 = vadd.f32 %v18471_v42, %v6793_v26  ;;  %v18475_v6 = vld [vmem:[#allocation21_spill] sm:$0xff] }
 0x6b3   :  { %v8720_v54 = vadd.f32 %v16789_v34, %v8506_v21  ;;  %v18466_v34 = vperm.slane %v18445_v20, 7  ;;  %v6504_v7 = vadd.f32 %v18475_v6, %v18474_v19  ;;  %v18477_v21 = vld [vmem:[#allocation73_spill] sm:$0xff] }
 0x6b4   :  { %12190 = vmatmul.msk.f32.vlgmr.msra.gmra.mxu0 %vm174_vm1, %v12189_v55  ;;  %12191 = vmatmul.msk.f32.vlgmr.msra.gmra.mxu1 %vm174_vm1, %v12189_v55  ;;  %v18487_v19 = vld [vmem:[#allocation141_spill] sm:$0xff] }
 0x6b5   :  { %12193 = vmatmul.msk.f32.vlgmr.msra.gmra.mxu3 %vm174_vm1, %v12189_v55  ;;  %10729 = vmatpush.msra.mxu0 %v10701_v43  ;;  %v10705_v43 = vmul.f32 %v18462_v10, %v18461_v57  ;;  %v8934_v41 = vadd.f32 %v16842_v5, %v8720_v54  ;;  %v18478_v54 = vld [vmem:[#allocation6_spill] sm:$0xff] }
 0x6b6   :  { %12196 = vmatmul.msk.f32.vlgmr.msrb.gmra.mxu2 %vm174_vm1, %v12189_v55  ;;  %10749 = vmatpush.msra.mxu1 %v10702_v44  ;;  %v18464_v44 = vperm.slane %v18445_v20, 5  ;;  %v18476_v20 = vld [vmem:[#allocation128_spill] sm:$0xff]  ;;  %v7006_v57 = vadd.f32 %v18478_v54, %v6792_v12  ;;  %v18483_v12 = vperm.slane %v18468_v0, 0 }
 0x6b7   :  { %10789 = vmatpush.msra.mxu3 %v10704_v29  ;;  %10849 = vmatpush.msrb.mxu2 %v10707_v16  ;;  %v9090_v17 = vpop.f32.mrf.mxu2  ;;  %v10708_v16 = vmul.f32 %v18467_v56, %v18466_v34  ;;  %v18470_v29 = vld [vmem:[#allocation80_spill] sm:$0xff]  ;;  %v6544_v23 = vadd.f32 %v18477_v21, %v18476_v20  ;;  %v18482_v56 = vld [vmem:[#allocation23_spill] sm:$0xff]  ;;  %v18489_v20 = vld [vmem:[#allocation58_spill] sm:$0xff] }
 0x6b8   :  { %v16937_v8 = vpop.f32.mrf.mxu3  ;;  %v16940_v53 = vadd.f32 %v9090_v17, %v8938_v46  ;;  %v10706_v52 = vmul.f32 %v18465_v2, %v18464_v44  ;;  %v10884_v3 = vmul.f32 %v18470_v29, %v18469_v60  ;;  %v18473_v46 = vld [vmem:[#allocation39_spill] sm:$0xff]  ;;  %v9115_v17 = vadd.f32 %v9010_v38, %v8934_v41  ;;  %v18479_v38 = vld [vmem:[#allocation133_spill] sm:$0xff]  ;;  %v18491_v54 = vld [vmem:[#allocation88_spill] sm:$0xff] }
 0x6b9   :  { %v16942_v1 = vpop.f32.mrf.mxu0  ;;  %v16944_v36 = vpop.f32.mrf.mxu1  ;;  %v6524_v5 = vadd.f32 %v18473_v46, %v18472_v49  ;;  %v7220_v44 = vadd.f32 %v18479_v38, %v7006_v57  ;;  %v18480_v2 = vld [vmem:[#allocation13_spill] sm:$0xff]  ;;  %v6795_v60 = vadd.f32 %v18482_v56, %v6504_v7  ;;  %v18492_v7 = vperm.slane %v18468_v0, 6 }
 0x6ba   :  { %v18481_v41 = vld [vmem:[#allocation33_spill] sm:$0xff] }
 0x6bb   :  { %v6796_v34 = vadd.f32 %v18481_v41, %v6524_v5  ;;  %v18486_v49 = vld [vmem:[#allocation41_spill] sm:$0xff]  ;;  %v18496_v41 = vld [vmem:[#allocation14_spill] sm:$0xff] }
 0x6bc   :  { %12194 = vmatmul.msk.f32.vlgmr.msrb.gmra.mxu0 %vm174_vm1, %v12189_v55  ;;  %12195 = vmatmul.msk.f32.vlgmr.msrb.gmra.mxu1 %vm174_vm1, %v12189_v55  ;;  %v7434_v46 = vadd.f32 %v18486_v49, %v7220_v44  ;;  %v18494_v44 = vld [vmem:[#allocation31_spill] sm:$0xff] }
 0x6bd   :  { %12197 = vmatmul.msk.f32.vlgmr.msrb.gmra.mxu3 %vm174_vm1, %v12189_v55  ;;  %10809 = vmatpush.msrb.mxu0 %v10705_v43  ;;  %v7010_v56 = vadd.f32 %v18496_v41, %v6796_v34  ;;  %v18503_v34 = vld [vmem:[#allocation91_spill] sm:$0xff] }
 0x6be   :  { %12201 = vmatmul.msk.f32.vlgmr.msra.gmra.mxu2 %vm174_vm1, %v16955_v11  ;;  %10829 = vmatpush.msrb.mxu1 %v10706_v52  ;;  %v7221_v52 = vadd.f32 %v18480_v2, %v7007_v50  ;;  %v18490_v50 = vperm.slane %v18468_v0, 3  ;;  %v18495_v2 = vld [vmem:[#allocation18_spill] sm:$0xff]  ;;  %v18510_v41 = vld [vmem:[#allocation35_spill] sm:$0xff] }
 0x6bf   :  { %10869 = vmatpush.msrb.mxu3 %v10708_v16  ;;  %10950 = vmatpush.msra.mxu2 %v10884_v3  ;;  %v18484_v16 = vld [vmem:[#allocation104_spill] sm:$0xff]  ;;  %v18485_v3 = vld [vmem:[#allocation55_spill] sm:$0xff] }
 0x6c0   :  { %v9224_v55 = vpop.f32.mrf.mxu2  ;;  %v16980_v26 = vpop.f32.mrf.mxu3  ;;  %v10882_v29 = vmul.f32 %v18484_v16, %v18483_v12  ;;  %v6797_v42 = vadd.f32 %v18485_v3, %v6544_v23  ;;  %v7435_v6 = vadd.f32 %v18487_v19, %v7221_v52  ;;  %v10885_v5 = vmul.f32 %v18491_v54, %v18490_v50  ;;  %v18493_v23 = vld [vmem:[#allocation111_spill] sm:$0xff]  ;;  %v18497_v12 = vld [vmem:[#allocation26_spill] sm:$0xff]  ;;  %v18505_v54 = vld [vmem:[#allocation140_spill] sm:$0xff] }
 0x6c1   :  { %v16982_v10 = vadd.f32 %v9224_v55, %v9115_v17  ;;  %v16984_v43 = vpop.f32.mrf.mxu0  ;;  %v16986_v61 = vpop.f32.mrf.mxu1  ;;  %v18488_v17 = vperm.slane %v18468_v0, 1  ;;  %v10888_v57 = vmul.f32 %v18493_v23, %v18492_v7  ;;  %v7648_v55 = vadd.f32 %v16448_v13, %v7434_v46  ;;  %v18498_v3 = vld [vmem:[#allocation30_spill] sm:$0xff] }
 0x6c2   :  { %v7649_v38 = vadd.f32 %v16458_v4, %v7435_v6  ;;  %v6584_v52 = vadd.f32 %v18495_v2, %v18494_v44  ;;  %v7009_v16 = vadd.f32 %v18497_v12, %v6795_v60  ;;  %v7011_v49 = vadd.f32 %v18498_v3, %v6797_v42  ;;  %v18499_v4 = vld [vmem:[#allocation25_spill] sm:$0xff]  ;;  %v18501_v6 = vld [vmem:[#allocation12_spill] sm:$0xff]  ;;  %v18504_v60 = vld [vmem:[#allocation19_spill] sm:$0xff] }
 0x6c3   :  { %v10883_v21 = vmul.f32 %v18489_v20, %v18488_v17  ;;  %v7862_v13 = vadd.f32 %v16531_v51, %v7648_v55  ;;  %v18502_v17 = vperm.slane %v18501_v6, 2  ;;  %v7224_v7 = vadd.f32 %v18505_v54, %v7010_v56  ;;  %v18507_v23 = vld [vmem:[#allocation118_spill] sm:$0xff]  ;;  %v18508_v55 = vld [vmem:[#allocation27_spill] sm:$0xff]  ;;  %v18513_v3 = vld [vmem:[#allocation81_spill] sm:$0xff] }
 0x6c4   :  { %12199 = vmatmul.msk.f32.vlgmr.msra.gmra.mxu0 %vm174_vm1, %v16955_v11  ;;  %12200 = vmatmul.msk.f32.vlgmr.msra.gmra.mxu1 %vm174_vm1, %v16955_v11  ;;  %v7863_v46 = vadd.f32 %v18499_v4, %v7649_v38  ;;  %v7223_v50 = vadd.f32 %v18504_v60, %v7009_v16  ;;  %v7225_v38 = vadd.f32 %v18508_v55, %v7011_v49  ;;  %v18509_v44 = vld [vmem:[#allocation139_spill] sm:$0xff]  ;;  %v18511_v56 = vperm.slane %v18468_v0, 7  ;;  %v18512_v16 = vld [vmem:[#allocation76_spill] sm:$0xff] }
 0x6c5   :  { %12202 = vmatmul.msk.f32.vlgmr.msra.gmra.mxu3 %vm174_vm1, %v16955_v11  ;;  %10910 = vmatpush.msra.mxu0 %v10882_v29  ;;  %v11065_v20 = vmul.f32 %v18503_v34, %v18502_v17  ;;  %v8076_v2 = vadd.f32 %v18509_v44, %v7862_v13  ;;  %v6799_v4 = vadd.f32 %v18513_v3, %v6584_v52  ;;  %v18515_v34 = vld [vmem:[#allocation28_spill] sm:$0xff]  ;;  %v18516_v54 = vperm.slane %v18468_v0, 4  ;;  %v17061_v44 = vld [vmem:[%s17317_s2 + $0xb8] sm:$0xff] }
 0x6c6   :  { %12205 = vmatmul.msk.f32.vlgmr.msrb.gmra.mxu2 %vm174_vm1, %v16955_v11  ;;  %10930 = vmatpush.msra.mxu1 %v10883_v21  ;;  %v8077_v12 = vadd.f32 %v18510_v41, %v7863_v46  ;;  %v7438_v60 = vadd.f32 %v18515_v34, %v7224_v7  ;;  %v18519_v55 = vld [vmem:[#allocation64_spill] sm:$0xff]  ;;  %v18520_v52 = vperm.slane %v18468_v0, 5  ;;  %v18522_v7 = vld [vmem:[#allocation38_spill] sm:$0xff]  ;;  %v18527_v34 = vld [vmem:[#allocation61_spill] sm:$0xff] }
 0x6c7   :  { %10970 = vmatpush.msra.mxu3 %v10885_v5  ;;  %11030 = vmatpush.msrb.mxu2 %v10888_v57  ;;  %v18506_v5 = vperm.slane %v18501_v6, 3  ;;  %v8290_v13 = vadd.f32 %v16648_v25, %v8076_v2  ;;  %v18524_v25 = vld [vmem:[#allocation56_spill] sm:$0xff] }
 0x6c8   :  { %v9304_v29 = vpop.f32.mrf.mxu2  ;;  %v17024_v19 = vpop.f32.mrf.mxu3  ;;  %v8291_v46 = vadd.f32 %v18519_v55, %v8077_v12  ;;  %v18525_v0 = vld [vmem:[#allocation32_spill] sm:$0xff] }
 0x6c9   :  { %18500 = vst [vmem:[#allocation71_spill] sm:$0xff] %v17024_v19  ;;  %v17032_v21 = vadd.f32 %v9304_v29, %v16940_v53  ;;  %v17034_v42 = vpop.f32.mrf.mxu0  ;;  %v17036_v51 = vpop.f32.mrf.mxu1  ;;  %v17041_v57 = vmul.f32 %v18507_v23, %v18506_v5  ;;  %v10889_v53 = vmul.f32 %v18512_v16, %v18511_v56  ;;  %v18514_v29 = vld [vmem:[#allocation24_spill] sm:$0xff]  ;;  %v18517_v5 = vld [vmem:[#allocation117_spill] sm:$0xff]  ;;  %v18523_v16 = vld [vmem:[#allocation51_spill] sm:$0xff]  ;;  %v7013_v12 = vadd.f32 %v18525_v0, %v6799_v4 }
 0x6ca   :  { %v7437_v17 = vadd.f32 %v18514_v29, %v7223_v50  ;;  %v10886_v23 = vmul.f32 %v18517_v5, %v18516_v54  ;;  %v18518_v19 = vld [vmem:[#allocation49_spill] sm:$0xff]  ;;  %v18521_v50 = vld [vmem:[#allocation83_spill] sm:$0xff]  ;;  %v7652_v3 = vadd.f32 %v18523_v16, %v7438_v60  ;;  %v8505_v2 = vadd.f32 %v16703_v35, %v8291_v46  ;;  %v18526_v29 = vld [vmem:[#allocation36_spill] sm:$0xff] }
 0x6cb   :  { %v7439_v49 = vadd.f32 %v18518_v19, %v7225_v38  ;;  %v10887_v41 = vmul.f32 %v18521_v50, %v18520_v52  ;;  %v8504_v38 = vadd.f32 %v16701_v40, %v8290_v13  ;;  %v18528_v54 = vld [vmem:[#allocation50_spill] sm:$0xff]  ;;  %v18529_v4 = vld [vmem:[#allocation40_spill] sm:$0xff] }
 0x6cc   :  { %v7651_v56 = vadd.f32 %v18522_v7, %v7437_v17  ;;  %12203 = vmatmul.msk.f32.vlgmr.msrb.gmra.mxu0 %vm174_vm1, %v16955_v11  ;;  %12204 = vmatmul.msk.f32.vlgmr.msrb.gmra.mxu1 %vm174_vm1, %v16955_v11  ;;  %v7866_v60 = vadd.f32 %v18527_v34, %v7652_v3  ;;  %v8719_v35 = vadd.f32 %v16767_v32, %v8505_v2  ;;  %v18530_v13 = vld [vmem:[#allocation44_spill] sm:$0xff]  ;;  %v18533_v32 = vld [vmem:[#allocation98_spill] sm:$0xff]  ;;  %v18540_v34 = vperm.slane %v18501_v6, 6 }
 0x6cd   :  { %v7653_v19 = vadd.f32 %v18524_v25, %v7439_v49  ;;  %12206 = vmatmul.msk.f32.vlgmr.msrb.gmra.mxu3 %vm174_vm1, %v16955_v11  ;;  %10990 = vmatpush.msrb.mxu0 %v10886_v23  ;;  %v8718_v40 = vadd.f32 %v16765_v28, %v8504_v38  ;;  %v7227_v49 = vadd.f32 %v18529_v4, %v7013_v12  ;;  %v18531_v46 = vld [vmem:[#allocation136_spill] sm:$0xff]  ;;  %v18532_v28 = vperm.slane %v18501_v6, 1  ;;  %v18538_v0 = vld [vmem:[#allocation46_spill] sm:$0xff] }
 0x6ce   :  { %v7865_v17 = vadd.f32 %v18526_v29, %v7651_v56  ;;  %12210 = vmatmul.msk.f32.vlgmr.msra.gmra.mxu2 %vm174_vm1, %v17061_v44  ;;  %11010 = vmatpush.msrb.mxu1 %v10887_v41  ;;  %v8080_v52 = vadd.f32 %v18531_v46, %v7866_v60  ;;  %v8933_v3 = vadd.f32 %v16819_v47, %v8719_v35  ;;  %v18535_v25 = vperm.slane %v18501_v6, 0  ;;  %v18539_v29 = vld [vmem:[#allocation53_spill] sm:$0xff] }
 0x6cf   :  { %v7867_v5 = vadd.f32 %v18528_v54, %v7653_v19  ;;  %11050 = vmatpush.msrb.mxu3 %v10889_v53  ;;  %11131 = vmatpush.msra.mxu2 %v11065_v20  ;;  %v11064_v20 = vmul.f32 %v18533_v32, %v18532_v28  ;;  %v18534_v53 = vld [vmem:[#allocation59_spill] sm:$0xff]  ;;  %v8932_v16 = vadd.f32 %v16817_v14, %v8718_v40  ;;  %v18536_v19 = vld [vmem:[#allocation100_spill] sm:$0xff]  ;;  %v18541_v60 = vld [vmem:[#allocation101_spill] sm:$0xff] }
 0x6d0   :  { %v9438_v11 = vpop.f32.mrf.mxu2  ;;  %v17085_v23 = vpop.f32.mrf.mxu3  ;;  %v8079_v55 = vadd.f32 %v18530_v13, %v7865_v17  ;;  %v11063_v38 = vmul.f32 %v18536_v19, %v18535_v25  ;;  %v8294_v17 = vadd.f32 %v18539_v29, %v8080_v52  ;;  %v11069_v54 = vmul.f32 %v18541_v60, %v18540_v34  ;;  %v18543_v40 = vld [vmem:[#allocation62_spill] sm:$0xff]  ;;  %v18555_v60 = vld [vmem:[#allocation119_spill] sm:$0xff] }
 0x6d1   :  { %v17091_v50 = vadd.f32 %v9438_v11, %v16982_v10  ;;  %v17093_v41 = vpop.f32.mrf.mxu0  ;;  %v17095_v7 = vpop.f32.mrf.mxu1  ;;  %v8081_v56 = vadd.f32 %v18534_v53, %v7867_v5  ;;  %v18537_v10 = vld [vmem:[#allocation47_spill] sm:$0xff]  ;;  %v18542_v11 = vld [vmem:[#allocation144_spill] sm:$0xff]  ;;  %v9113_v14 = vadd.f32 %v16875_v48, %v8932_v16  ;;  %v9114_v47 = vadd.f32 %v16877_v18, %v8933_v3  ;;  %v18544_v18 = vld [vmem:[#allocation134_spill] sm:$0xff] }
 0x6d2   :  { %v7441_v2 = vadd.f32 %v18537_v10, %v7227_v49  ;;  %v8293_v12 = vadd.f32 %v18538_v0, %v8079_v55  ;;  %v8508_v49 = vadd.f32 %v16726_v39, %v8294_v17  ;;  %v18545_v32 = vld [vmem:[#allocation142_spill] sm:$0xff]  ;;  %v18547_v19 = vperm.slane %v18501_v6, 4 }
 0x6d3   :  { %v8295_v5 = vadd.f32 %v18542_v11, %v8081_v56  ;;  %v9327_v55 = vadd.f32 %v16942_v1, %v9113_v14  ;;  %v9328_v48 = vadd.f32 %v16944_v36, %v9114_v47  ;;  %v18552_v29 = vld [vmem:[#allocation106_spill] sm:$0xff] }
 0x6d4   :  { %v7655_v35 = vadd.f32 %v18543_v40, %v7441_v2  ;;  %v8507_v4 = vadd.f32 %v16707_v63, %v8293_v12  ;;  %12208 = vmatmul.msk.f32.vlgmr.msra.gmra.mxu0 %vm174_vm1, %v17061_v44  ;;  %12209 = vmatmul.msk.f32.vlgmr.msra.gmra.mxu1 %vm174_vm1, %v17061_v44  ;;  %v8722_v46 = vadd.f32 %v16793_v59, %v8508_v49  ;;  %v18550_v2 = vld [vmem:[#allocation124_spill] sm:$0xff]  ;;  %v18551_v12 = vperm.slane %v18501_v6, 5 }
 0x6d5   :  { %v8509_v13 = vadd.f32 %v16728_v24, %v8295_v5  ;;  %12211 = vmatmul.msk.f32.vlgmr.msra.gmra.mxu3 %vm174_vm1, %v17061_v44  ;;  %11091 = vmatpush.msra.mxu0 %v11063_v38  ;;  %v9541_v1 = vadd.f32 %v17034_v42, %v9327_v55  ;;  %v9542_v36 = vadd.f32 %v17036_v51, %v9328_v48  ;;  %v18546_v51 = vld [vmem:[#allocation137_spill] sm:$0xff]  ;;  %v18548_v38 = vld [vmem:[#allocation92_spill] sm:$0xff] }
 0x6d6   :  { %v7869_v63 = vadd.f32 %v18544_v18, %v7655_v35  ;;  %v8721_v39 = vadd.f32 %v16773_v30, %v8507_v4  ;;  %12214 = vmatmul.msk.f32.vlgmr.msrb.gmra.mxu2 %vm174_vm1, %v17061_v44  ;;  %11111 = vmatpush.msra.mxu1 %v11064_v20  ;;  %v8936_v20 = vadd.f32 %v16847_v31, %v8722_v46  ;;  %v18559_v48 = vld [vmem:[#allocation93_spill] sm:$0xff] }
 0x6d7   :  { %v8723_v24 = vadd.f32 %v16795_v15, %v8509_v13  ;;  %11151 = vmatpush.msra.mxu3 %v17041_v57  ;;  %11211 = vmatpush.msrb.mxu2 %v11069_v54  ;;  %v11067_v10 = vmul.f32 %v18548_v38, %v18547_v19  ;;  %v18568_v38 = vld [vmem:[#allocation112_spill] sm:$0xff] }
 0x6d8   :  { %v9518_v52 = vpop.f32.mrf.mxu2  ;;  %v9538_v28 = vpop.f32.mrf.mxu3  ;;  %v8083_v53 = vadd.f32 %v18545_v32, %v7869_v63  ;;  %v8935_v30 = vadd.f32 %v16844_v9, %v8721_v39  ;;  %v18549_v9 = vperm.slane %v18501_v6, 7  ;;  %v9117_v0 = vadd.f32 %v16908_v58, %v8936_v20  ;;  %v18553_v58 = vld [vmem:[#allocation99_spill] sm:$0xff] }
 0x6d9   :  { %v9547_v59 = vadd.f32 %v9518_v52, %v17032_v21  ;;  %v9612_v56 = vpop.f32.mrf.mxu0  ;;  %v9632_v16 = vpop.f32.mrf.mxu1  ;;  %v8937_v15 = vadd.f32 %v16849_v27, %v8723_v24  ;;  %v12216_v27 = vld [vmem:[%s17317_s2 + $0xc0] sm:$0xff]  ;;  %v18556_v13 = vperm.slane %v18553_v58, 0  ;;  %v18560_v63 = vld [vmem:[#allocation71_spill] sm:$0xff]  ;;  %v18564_v24 = vld [vmem:[#allocation121_spill] sm:$0xff]  ;;  %v18567_v19 = vperm.slane %v18553_v58, 5 }
 0x6da   :  { %v9755_v42 = vadd.f32 %v9612_v56, %v9541_v1  ;;  %v9756_v3 = vadd.f32 %v9632_v16, %v9542_v36  ;;  %v8297_v25 = vadd.f32 %v18546_v51, %v8083_v53  ;;  %v9116_v57 = vadd.f32 %v16904_v37, %v8935_v30 }
 0x6db   :  { %v11070_v21 = vmul.f32 %v18550_v2, %v18549_v9  ;;  %v9118_v31 = vadd.f32 %v16910_v62, %v8937_v15  ;;  %v11068_v37 = vmul.f32 %v18552_v29, %v18551_v12  ;;  %v18554_v62 = vperm.slane %v18553_v58, 2  ;;  %v18571_v9 = vld [vmem:[#allocation20_spill] sm:$0xff] }
 0x6dc   :  { %v8511_v17 = vadd.f32 %v16746_v22, %v8297_v25  ;;  %v9330_v34 = vadd.f32 %v16980_v26, %v9116_v57  ;;  %12212 = vmatmul.msk.f32.vlgmr.msrb.gmra.mxu0 %vm174_vm1, %v17061_v44  ;;  %12213 = vmatmul.msk.f32.vlgmr.msrb.gmra.mxu1 %vm174_vm1, %v17061_v44  ;;  %v9331_v11 = vadd.f32 %v16984_v43, %v9117_v0  ;;  %v18565_v51 = vperm.slane %v18553_v58, 4  ;;  %v18566_v25 = vld [vmem:[#allocation116_spill] sm:$0xff] }
 0x6dd   :  { %v11246_v54 = vmul.f32 %v18555_v60, %v18554_v62  ;;  %v9332_v6 = vadd.f32 %v16986_v61, %v9118_v31  ;;  %12215 = vmatmul.msk.f32.vlgmr.msrb.gmra.mxu3 %vm174_vm1, %v17061_v44  ;;  %11171 = vmatpush.msrb.mxu0 %v11067_v10  ;;  %v11249_v10 = vmul.f32 %v18568_v38, %v18567_v19  ;;  %v18572_v2 = vperm.slane %v18571_v9, 2  ;;  %v18579_v60 = vld [vmem:[#allocation123_spill] sm:$0xff] }
 0x6de   :  { %v8725_v22 = vadd.f32 %v16813_v45, %v8511_v17  ;;  %v9544_v26 = vadd.f32 %v17085_v23, %v9330_v34  ;;  %12219 = vmatmul.msk.f32.vlgmr.msra.gmra.mxu2 %vm174_vm1, %v12216_v27  ;;  %11191 = vmatpush.msrb.mxu1 %v11068_v37  ;;  %v9545_v5 = vadd.f32 %v17093_v41, %v9331_v11  ;;  %v18557_v41 = vld [vmem:[#allocation105_spill] sm:$0xff]  ;;  %v18574_v29 = vperm.slane %v18571_v9, 0 }
 0x6df   :  { %v9546_v14 = vadd.f32 %v17095_v7, %v9332_v6  ;;  %11231 = vmatpush.msrb.mxu3 %v11070_v21  ;;  %11312 = vmatpush.msra.mxu2 %v11246_v54  ;;  %v11244_v55 = vmul.f32 %v18557_v41, %v18556_v13  ;;  %v18558_v7 = vperm.slane %v18553_v58, 1  ;;  %v11248_v57 = vmul.f32 %v18566_v25, %v18565_v51  ;;  %v18573_v21 = vld [vmem:[#allocation103_spill] sm:$0xff]  ;;  %v18575_v37 = vld [vmem:[#allocation109_spill] sm:$0xff]  ;;  %v12234_v41 = vld [vmem:[%s17317_s2 + $0xd0] sm:$0xff] }
 0x6e0   :  { %v9652_v43 = vpop.f32.mrf.mxu2  ;;  %v9672_v47 = vpop.f32.mrf.mxu3  ;;  %v8939_v61 = vadd.f32 %v16872_v33, %v8725_v22  ;;  %v18561_v33 = vperm.slane %v18553_v58, 6  ;;  %v11427_v0 = vmul.f32 %v18573_v21, %v18572_v2  ;;  %v11425_v17 = vmul.f32 %v18575_v37, %v18574_v29  ;;  %v18581_v6 = vld [vmem:[#allocation9_spill] sm:$0xff] }
 0x6e1   :  { %v9757_v44 = vadd.f32 %v9652_v43, %v17091_v50  ;;  %v9758_v40 = vadd.f32 %v9672_v47, %v9544_v26  ;;  %v9692_v35 = vpop.f32.mrf.mxu0  ;;  %v9712_v45 = vpop.f32.mrf.mxu1  ;;  %v11245_v18 = vmul.f32 %v18559_v48, %v18558_v7  ;;  %v18562_v50 = vld [vmem:[#allocation108_spill] sm:$0xff]  ;;  %v18576_v34 = vperm.slane %v18571_v9, 1  ;;  %v18585_v7 = vld [vmem:[#allocation17_spill] sm:$0xff] }
 0x6e2   :  { %v9759_v4 = vadd.f32 %v9692_v35, %v9545_v5  ;;  %v9760_v23 = vadd.f32 %v9712_v45, %v9546_v14  ;;  %v9120_v49 = vadd.f32 %v16937_v8, %v8939_v61  ;;  %v11250_v46 = vmul.f32 %v18562_v50, %v18561_v33 }
 0x6e3   :  { %v18563_v8 = vperm.slane %v18553_v58, 3  ;;  %v18580_v11 = vperm.slane %v18571_v9, 6  ;;  %v18582_v45 = vperm.slane %v18571_v9, 4 }
 0x6e4   :  { %v9334_v39 = vadd.f32 %v18560_v63, %v9120_v49  ;;  %12217 = vmatmul.msk.f32.vlgmr.msra.gmra.mxu0 %vm174_vm1, %v12216_v27  ;;  %12218 = vmatmul.msk.f32.vlgmr.msra.gmra.mxu1 %vm174_vm1, %v12216_v27  ;;  %v18583_v49 = vld [vmem:[#allocation11_spill] sm:$0xff] }
 0x6e5   :  { %v11247_v1 = vmul.f32 %v18564_v24, %v18563_v8  ;;  %12220 = vmatmul.msk.f32.vlgmr.msra.gmra.mxu3 %vm174_vm1, %v12216_v27  ;;  %11272 = vmatpush.msra.mxu0 %v11244_v55  ;;  %v11431_v22 = vmul.f32 %v18581_v6, %v18580_v11  ;;  %v11429_v13 = vmul.f32 %v18583_v49, %v18582_v45  ;;  %v18584_v55 = vperm.slane %v18571_v9, 5 }
 0x6e6   :  { %v9548_v36 = vadd.f32 %v9538_v28, %v9334_v39  ;;  %12223 = vmatmul.msk.f32.vlgmr.msrb.gmra.mxu2 %vm174_vm1, %v12216_v27  ;;  %11292 = vmatpush.msra.mxu1 %v11245_v18  ;;  %v12225_v28 = vld [vmem:[%s17317_s2 + $0xc8] sm:$0xff] }
 0x6e7   :  { %11332 = vmatpush.msra.mxu3 %v11247_v1  ;;  %11392 = vmatpush.msrb.mxu2 %v11250_v46  ;;  %v11430_v48 = vmul.f32 %v18585_v7, %v18584_v55 }
 0x6e8   :  { %v9732_v52 = vpop.f32.mrf.mxu2  ;;  %v9752_v32 = vpop.f32.mrf.mxu3 }
 0x6e9   :  { %v9761_v53 = vadd.f32 %v9732_v52, %v9547_v59  ;;  %v9762_v30 = vadd.f32 %v9752_v32, %v9548_v36  ;;  %v9826_v56 = vpop.f32.mrf.mxu0  ;;  %v9846_v16 = vpop.f32.mrf.mxu1  ;;  %v18569_v59 = vperm.slane %v18553_v58, 7  ;;  %v18577_v58 = vld [vmem:[#allocation113_spill] sm:$0xff] }
 0x6ea   :  { %v9969_v20 = vadd.f32 %v9826_v56, %v9755_v42  ;;  %v9970_v15 = vadd.f32 %v9846_v16, %v9756_v3  ;;  %v18570_v42 = vld [vmem:[#allocation84_spill] sm:$0xff]  ;;  %v11426_v62 = vmul.f32 %v18577_v58, %v18576_v34 }
 0x6eb   :  { %v11251_v3 = vmul.f32 %v18570_v42, %v18569_v59 }
 0x6ec   :  { %12221 = vmatmul.msk.f32.vlgmr.msrb.gmra.mxu0 %vm174_vm1, %v12216_v27  ;;  %12222 = vmatmul.msk.f32.vlgmr.msrb.gmra.mxu1 %vm174_vm1, %v12216_v27 }
 0x6ed   :  { %12224 = vmatmul.msk.f32.vlgmr.msrb.gmra.mxu3 %vm174_vm1, %v12216_v27  ;;  %11352 = vmatpush.msrb.mxu0 %v11248_v57  ;;  %v18578_v27 = vperm.slane %v18571_v9, 3 }
 0x6ee   :  { %12228 = vmatmul.msk.f32.vlgmr.msra.gmra.mxu2 %vm174_vm1, %v12225_v28  ;;  %11372 = vmatpush.msrb.mxu1 %v11249_v10 }
 0x6ef   :  { %11412 = vmatpush.msrb.mxu3 %v11251_v3  ;;  %11493 = vmatpush.msra.mxu2 %v11427_v0  ;;  %v11428_v54 = vmul.f32 %v18579_v60, %v18578_v27 }
 0x6f0   :  { %v9866_v31 = vpop.f32.mrf.mxu2 }
 0x6f1   :  { %v9971_v12 = vadd.f32 %v9866_v31, %v9757_v44 }
 0x6f4   :  { %12226 = vmatmul.msk.f32.vlgmr.msra.gmra.mxu0 %vm174_vm1, %v12225_v28  ;;  %12227 = vmatmul.msk.f32.vlgmr.msra.gmra.mxu1 %vm174_vm1, %v12225_v28 }
 0x6f5   :  { %12229 = vmatmul.msk.f32.vlgmr.msra.gmra.mxu3 %vm174_vm1, %v12225_v28  ;;  %11453 = vmatpush.msra.mxu0 %v11425_v17 }
 0x6f6   :  { %12232 = vmatmul.msk.f32.vlgmr.msrb.gmra.mxu2 %vm174_vm1, %v12225_v28  ;;  %11473 = vmatpush.msra.mxu1 %v11426_v62 }
 0x6f7   :  { %11513 = vmatpush.msra.mxu3 %v11428_v54  ;;  %11573 = vmatpush.msrb.mxu2 %v11431_v22  ;;  %v9886_v26 = vpop.f32.mrf.mxu3 }
 0x6f8   :  { %v9946_v5 = vpop.f32.mrf.mxu2  ;;  %v9972_v14 = vadd.f32 %v9886_v26, %v9758_v40  ;;  %v18586_v40 = vperm.slane %v18571_v9, 7 }
 0x6f9   :  { %v9975_v43 = vadd.f32 %v9946_v5, %v9761_v53  ;;  %v9906_v47 = vpop.f32.mrf.mxu0  ;;  %v9926_v61 = vpop.f32.mrf.mxu1 }
 0x6fa   :  { %v9973_v44 = vadd.f32 %v9906_v47, %v9759_v4  ;;  %v9974_v35 = vadd.f32 %v9926_v61, %v9760_v23  ;;  %v18587_v4 = vld [vmem:[#allocation16_spill] sm:$0xff] }
 0x6fb   :  { %v11432_v23 = vmul.f32 %v18587_v4, %v18586_v40 }
 0x6fc   :  { %12230 = vmatmul.msk.f32.vlgmr.msrb.gmra.mxu0 %vm174_vm1, %v12225_v28  ;;  %12231 = vmatmul.msk.f32.vlgmr.msrb.gmra.mxu1 %vm174_vm1, %v12225_v28 }
 0x6fd   :  { %12233 = vmatmul.msk.f32.vlgmr.msrb.gmra.mxu3 %vm174_vm1, %v12225_v28  ;;  %11533 = vmatpush.msrb.mxu0 %v11429_v13 }
 0x6fe   :  { %12237 = vmatmul.msk.f32.vlgmr.msra.gmra.mxu2 %vm174_vm1, %v12234_v41  ;;  %11553 = vmatpush.msrb.mxu1 %v11430_v48 }
 0x6ff   :  { %11593 = vmatpush.msrb.mxu3 %v11432_v23 }
 0x700   :  { %v9966_v18 = vpop.f32.mrf.mxu3 }
 0x701   :  { %v9976_v63 = vadd.f32 %v9966_v18, %v9762_v30  ;;  %v10047_v39 = vpop.f32.mrf.mxu2  ;;  %v10007_v33 = vpop.f32.mrf.mxu0 }
 0x702   :  { %v10152_v50 = vadd.f32 %v10047_v39, %v9971_v12  ;;  %v10150_v46 = vadd.f32 %v10007_v33, %v9969_v20  ;;  %v10027_v8 = vpop.f32.mrf.mxu1 }
 0x703   :  { %v10151_v24 = vadd.f32 %v10027_v8, %v9970_v15 }
 0x704   :  { %12235 = vmatmul.msk.f32.vlgmr.msra.gmra.mxu0 %vm174_vm1, %v12234_v41  ;;  %12236 = vmatmul.msk.f32.vlgmr.msra.gmra.mxu1 %vm174_vm1, %v12234_v41 }
 0x705   :  { %12238 = vmatmul.msk.f32.vlgmr.msra.gmra.mxu3 %vm174_vm1, %v12234_v41 }
 0x706   :  { %12241 = vmatmul.msk.f32.vlgmr.msrb.gmra.mxu2 %vm174_vm1, %v12234_v41 }
 0x708   :  { %v10067_v1 = vpop.f32.mrf.mxu3 }
 0x709   :  { %v10153_v36 = vadd.f32 %v10067_v1, %v9972_v14  ;;  %v10127_v52 = vpop.f32.mrf.mxu2  ;;  %v10087_v32 = vpop.f32.mrf.mxu0 }
 0x70a   :  { %v10156_v53 = vadd.f32 %v10127_v52, %v9975_v43  ;;  %v10154_v30 = vadd.f32 %v10087_v32, %v9973_v44  ;;  %v10107_v56 = vpop.f32.mrf.mxu1 }
 0x70b   :  { %v10155_v16 = vadd.f32 %v10107_v56, %v9974_v35 }
 0x70c   :  { %12239 = vmatmul.msk.f32.vlgmr.msrb.gmra.mxu0 %vm174_vm1, %v12234_v41  ;;  %12240 = vmatmul.msk.f32.vlgmr.msrb.gmra.mxu1 %vm174_vm1, %v12234_v41 }
 0x70d   :  { %12242 = vmatmul.msk.f32.vlgmr.msrb.gmra.mxu3 %vm174_vm1, %v12234_v41 }
 0x710   :  { %v10147_v20 = vpop.f32.mrf.mxu3 }
 0x711   :  { %v10157_v15 = vadd.f32 %v10147_v20, %v9976_v63  ;;  %v10228_v51 = vpop.f32.mrf.mxu2  ;;  %v10188_v25 = vpop.f32.mrf.mxu0 }
 0x712   :  { %v10333_v57 = vadd.f32 %v10228_v51, %v10152_v50  ;;  %v10331_v28 = vadd.f32 %v10188_v25, %v10150_v46  ;;  %v10208_v19 = vpop.f32.mrf.mxu1 }
 0x713   :  { %v10332_v38 = vadd.f32 %v10208_v19, %v10151_v24 }
 0x718   :  { %v10248_v10 = vpop.f32.mrf.mxu3 }
 0x719   :  { %v10334_v59 = vadd.f32 %v10248_v10, %v10153_v36  ;;  %v10308_v42 = vpop.f32.mrf.mxu2  ;;  %v10268_v3 = vpop.f32.mrf.mxu0 }
 0x71a   :  { %v10337_v9 = vadd.f32 %v10308_v42, %v10156_v53  ;;  %v10335_v2 = vadd.f32 %v10268_v3, %v10154_v30  ;;  %v10288_v21 = vpop.f32.mrf.mxu1 }
 0x71b   :  { %v10336_v0 = vadd.f32 %v10288_v21, %v10155_v16 }
 0x720   :  { %v10328_v31 = vpop.f32.mrf.mxu3 }
 0x721   :  { %v10338_v12 = vadd.f32 %v10328_v31, %v10157_v15  ;;  %v10409_v29 = vpop.f32.mrf.mxu2  ;;  %v10369_v37 = vpop.f32.mrf.mxu0 }
 0x722   :  { %v10514_v17 = vadd.f32 %v10409_v29, %v10333_v57  ;;  %v10512_v34 = vadd.f32 %v10369_v37, %v10331_v28  ;;  %v10389_v58 = vpop.f32.mrf.mxu1 }
 0x723   :  { %v10513_v62 = vadd.f32 %v10389_v58, %v10332_v38 }
 0x728   :  { %v10429_v27 = vpop.f32.mrf.mxu3 }
 0x729   :  { %v10515_v60 = vadd.f32 %v10429_v27, %v10334_v59  ;;  %v10489_v54 = vpop.f32.mrf.mxu2  ;;  %v10449_v11 = vpop.f32.mrf.mxu0 }
 0x72a   :  { %v10518_v6 = vadd.f32 %v10489_v54, %v10337_v9  ;;  %v10516_v22 = vadd.f32 %v10449_v11, %v10335_v2  ;;  %v10469_v26 = vpop.f32.mrf.mxu1 }
 0x72b   :  { %v10517_v5 = vadd.f32 %v10469_v26, %v10336_v0 }
 0x730   :  { %v10509_v14 = vpop.f32.mrf.mxu3 }
 0x731   :  { %v10519_v43 = vadd.f32 %v10509_v14, %v10338_v12  ;;  %v10590_v47 = vpop.f32.mrf.mxu2  ;;  %v10550_v61 = vpop.f32.mrf.mxu0 }
 0x732   :  { %v10695_v44 = vadd.f32 %v10590_v47, %v10514_v17  ;;  %v10693_v35 = vadd.f32 %v10550_v61, %v10512_v34  ;;  %v10570_v45 = vpop.f32.mrf.mxu1 }
 0x733   :  { %v10694_v49 = vadd.f32 %v10570_v45, %v10513_v62 }
 0x738   :  { %v10610_v13 = vpop.f32.mrf.mxu3 }
 0x739   :  { %v10696_v41 = vadd.f32 %v10610_v13, %v10515_v60  ;;  %v10670_v55 = vpop.f32.mrf.mxu2  ;;  %v10630_v7 = vpop.f32.mrf.mxu0 }
 0x73a   :  { %v17253_v48 = vadd.f32 %v10670_v55, %v10518_v6  ;;  %v10697_v40 = vadd.f32 %v10630_v7, %v10516_v22  ;;  %v10650_v4 = vpop.f32.mrf.mxu1 }
 0x73b   :  { %v10698_v23 = vadd.f32 %v10650_v4, %v10517_v5 }
 0x740   :  { %v10690_v18 = vpop.f32.mrf.mxu3 }
 0x741   :  { %v10700_v63 = vadd.f32 %v10690_v18, %v10519_v43  ;;  %v10771_v39 = vpop.f32.mrf.mxu2  ;;  %v10731_v33 = vpop.f32.mrf.mxu0 }
 0x742   :  { %v10751_v50 = vpop.f32.mrf.mxu1  ;;  %v10874_v31 = vadd.f32 %v10731_v33, %v10693_v35  ;;  %v10876_v58 = vadd.f32 %v10771_v39, %v10695_v44 }
 0x743   :  { %v10875_v29 = vadd.f32 %v10751_v50, %v10694_v49 }
 0x748   :  { %v10791_v46 = vpop.f32.mrf.mxu3 }
 0x749   :  { %v10851_v8 = vpop.f32.mrf.mxu2  ;;  %v10811_v24 = vpop.f32.mrf.mxu0  ;;  %v10877_v54 = vadd.f32 %v10791_v46, %v10696_v41 }
 0x74a   :  { %v10831_v1 = vpop.f32.mrf.mxu1  ;;  %v10878_v26 = vadd.f32 %v10811_v24, %v10697_v40  ;;  %v10880_v4 = vadd.f32 %v10851_v8, %v17253_v48 }
 0x74b   :  { %v10879_v49 = vadd.f32 %v10831_v1, %v10698_v23 }
 0x750   :  { %v10871_v36 = vpop.f32.mrf.mxu3 }
 0x751   :  { %v10952_v52 = vpop.f32.mrf.mxu2  ;;  %v10912_v32 = vpop.f32.mrf.mxu0  ;;  %v10881_v33 = vadd.f32 %v10871_v36, %v10700_v63 }
 0x752   :  { %v10932_v53 = vpop.f32.mrf.mxu1  ;;  %v11055_v37 = vadd.f32 %v10912_v32, %v10874_v31  ;;  %v11057_v11 = vadd.f32 %v10952_v52, %v10876_v58 }
 0x753   :  { %v11056_v17 = vadd.f32 %v10932_v53, %v10875_v29 }
 0x758   :  { %v10972_v30 = vpop.f32.mrf.mxu3 }
 0x759   :  { %v11032_v56 = vpop.f32.mrf.mxu2  ;;  %v10992_v16 = vpop.f32.mrf.mxu0  ;;  %v11058_v47 = vadd.f32 %v10972_v30, %v10877_v54 }
 0x75a   :  { %v11012_v20 = vpop.f32.mrf.mxu1  ;;  %v11059_v45 = vadd.f32 %v10992_v16, %v10878_v26  ;;  %v11061_v46 = vadd.f32 %v11032_v56, %v10880_v4 }
 0x75b   :  { %v11060_v18 = vadd.f32 %v11012_v20, %v10879_v49 }
 0x760   :  { %v11052_v15 = vpop.f32.mrf.mxu3 }
 0x761   :  { %v11133_v51 = vpop.f32.mrf.mxu2  ;;  %v11093_v25 = vpop.f32.mrf.mxu0  ;;  %v11062_v23 = vadd.f32 %v11052_v15, %v10881_v33  ;;  %v11668_v33 = vld [vmem:[%s17319_s7] sm:$0xff] }
 0x762   :  { %v11113_v57 = vpop.f32.mrf.mxu1  ;;  %v11236_v34 = vadd.f32 %v11093_v25, %v11055_v37  ;;  %v11238_v61 = vadd.f32 %v11133_v51, %v11057_v11 }
 0x763   :  { %v11237_v62 = vadd.f32 %v11113_v57, %v11056_v17 }
 0x768   :  { %v11153_v28 = vpop.f32.mrf.mxu3 }
 0x769   :  { %v11213_v19 = vpop.f32.mrf.mxu2  ;;  %v11173_v38 = vpop.f32.mrf.mxu0  ;;  %v11239_v13 = vadd.f32 %v11153_v28, %v11058_v47 }
 0x76a   :  { %v11193_v10 = vpop.f32.mrf.mxu1  ;;  %v11240_v44 = vadd.f32 %v11173_v38, %v11059_v45  ;;  %v11242_v1 = vadd.f32 %v11213_v19, %v11061_v46 }
 0x76b   :  { %v11241_v24 = vadd.f32 %v11193_v10, %v11060_v18  ;;  %v11642_v18 = vld [vmem:[%s17318_s6] sm:$0xff] }
 0x770   :  { %v11233_v59 = vpop.f32.mrf.mxu3 }
 0x771   :  { %v11314_v42 = vpop.f32.mrf.mxu2  ;;  %v11274_v3 = vpop.f32.mrf.mxu0  ;;  %v11243_v28 = vadd.f32 %v11233_v59, %v11062_v23 }
 0x772   :  { %v11294_v9 = vpop.f32.mrf.mxu1  ;;  %v11417_v27 = vadd.f32 %v11274_v3, %v11236_v34  ;;  %v11419_v55 = vadd.f32 %v11314_v42, %v11238_v61 }
 0x773   :  { %v11418_v6 = vadd.f32 %v11294_v9, %v11237_v62 }
 0x778   :  { %v11334_v2 = vpop.f32.mrf.mxu3 }
 0x779   :  { %v11394_v21 = vpop.f32.mrf.mxu2  ;;  %v11354_v0 = vpop.f32.mrf.mxu0  ;;  %v11420_v41 = vadd.f32 %v11334_v2, %v11239_v13  ;;  %v18588_v2 = vld [vmem:[#allocation79_spill] sm:$0xff] }
 0x77a   :  { %v11374_v12 = vpop.f32.mrf.mxu1  ;;  %v11421_v50 = vadd.f32 %v11354_v0, %v11240_v44  ;;  %v11423_v48 = vadd.f32 %v11394_v21, %v11242_v1 }
 0x77b   :  { %v11422_v51 = vadd.f32 %v11374_v12, %v11241_v24 }
 0x780   :  { %v11414_v60 = vpop.f32.mrf.mxu3 }
 0x781   :  { %v11455_v22 = vpop.f32.mrf.mxu0  ;;  %v11495_v5 = vpop.f32.mrf.mxu2  ;;  %v11424_v38 = vadd.f32 %v11414_v60, %v11243_v28 }
 0x782   :  { %v11598_v14 = vadd.f32 %v11455_v22, %v11417_v27  ;;  %v11475_v43 = vpop.f32.mrf.mxu1  ;;  %v11600_v39 = vadd.f32 %v11495_v5, %v11419_v55 }
 0x783   :  { %v11599_v35 = vadd.f32 %v11475_v43, %v11418_v6 }
 0x785   :  { %v11606_v7 = vadd.f32 %v11599_v35, %v11598_v14 }
 0x787   :  { %v11607_v32 = vadd.f32 %v11606_v7, %v11600_v39 }
 0x788   :  { %v11515_v40 = vpop.f32.mrf.mxu3 }
 0x789   :  { %v11601_v52 = vadd.f32 %v11515_v40, %v11420_v41  ;;  %v11535_v53 = vpop.f32.mrf.mxu0  ;;  %v11575_v57 = vpop.f32.mrf.mxu2 }
 0x78a   :  { %v11602_v30 = vadd.f32 %v11535_v53, %v11421_v50  ;;  %v11555_v16 = vpop.f32.mrf.mxu1  ;;  %v11604_v63 = vadd.f32 %v11575_v57, %v11423_v48 }
 0x78b   :  { %v11608_v25 = vadd.f32 %v11607_v32, %v11601_v52  ;;  %v11603_v20 = vadd.f32 %v11555_v16, %v11422_v51 }
 0x78d   :  { %v11609_v8 = vadd.f32 %v11608_v25, %v11602_v30 }
 0x78f   :  { %v11610_v36 = vadd.f32 %v11609_v8, %v11603_v20 }
 0x790   :  { %v11595_v42 = vpop.f32.mrf.mxu3 }
 0x791   :  { %v11605_v56 = vadd.f32 %v11595_v42, %v11424_v38  ;;  %v11611_v10 = vadd.f32 %v11610_v36, %v11604_v63  ;;  %v12283_v42 = vld [vmem:[%s17312_s0 + $0x10] sm:$0xff] }
 0x793   :  { %v11612_v3 = vadd.f32 %v11611_v10, %v11605_v56 }
 0x795   :  { %11613 = vadd.xlane.f32.xlu2 %v11612_v3  ;;  %v12284_v3 = vld [vmem:[%s17312_s0 + $0x18] sm:$0xff] }
 0x808   :  { %v11614_v9 = vpop.xlane.xlu2 %11613 }
 0x809   :  { %v11615_v0 = vmul.f32 %v11614_v9, %v18588_v2 }
 0x80b   :  { %v11616_v15 = vsub.f32 %v11598_v14, %v11615_v0  ;;  %v11617_v19 = vsub.f32 %v11599_v35, %v11615_v0  ;;  %v11618_v31 = vsub.f32 %v11600_v39, %v11615_v0  ;;  %v11619_v12 = vsub.f32 %v11601_v52, %v11615_v0 }
 0x80c   :  { %v11620_v21 = vsub.f32 %v11602_v30, %v11615_v0  ;;  %v11621_v34 = vsub.f32 %v11603_v20, %v11615_v0  ;;  %v11622_v27 = vsub.f32 %v11604_v63, %v11615_v0  ;;  %v11623_v11 = vsub.f32 %v11605_v56, %v11615_v0  ;;  %v12281_v20 = vld [vmem:[%s17312_s0] sm:$0xff]  ;;  %v12282_v63 = vld [vmem:[%s17312_s0 + $0x8] sm:$0xff] }
 0x80d   :  { %v11624_v29 = vmul.f32 %v11616_v15, %v11616_v15  ;;  %v11625_v59 = vmul.f32 %v11617_v19, %v11617_v19  ;;  %v11626_v37 = vmul.f32 %v11618_v31, %v11618_v31  ;;  %v11627_v58 = vmul.f32 %v11619_v12, %v11619_v12 }
 0x80e   :  { %v11628_v60 = vmul.f32 %v11620_v21, %v11620_v21  ;;  %v11629_v6 = vmul.f32 %v11621_v34, %v11621_v34  ;;  %v11630_v26 = vmul.f32 %v11622_v27, %v11622_v27  ;;  %v11631_v14 = vmul.f32 %v11623_v11, %v11623_v11 }
 0x80f   :  { %v11632_v17 = vadd.f32 %v11625_v59, %v11624_v29  ;;  %v12288_v29 = vld [vmem:[%s17312_s0 + $0x38] sm:$0xff] }
 0x811   :  { %v11633_v62 = vadd.f32 %v11632_v17, %v11626_v37 }
 0x813   :  { %v11634_v54 = vadd.f32 %v11633_v62, %v11627_v58 }
 0x815   :  { %v11635_v22 = vadd.f32 %v11634_v54, %v11628_v60 }
 0x817   :  { %v11636_v5 = vadd.f32 %v11635_v22, %v11629_v6 }
 0x819   :  { %v11637_v43 = vadd.f32 %v11636_v5, %v11630_v26 }
 0x81b   :  { %v11638_v47 = vadd.f32 %v11637_v43, %v11631_v14 }
 0x81d   :  { %11639 = vadd.xlane.f32.xlu1 %v11638_v47 }
 0x890   :  { %v11640_v61 = vpop.xlane.xlu1 %11639 }
 0x891   :  { %v11641_v35 = vmul.f32 %v11640_v61, %v18588_v2  ;;  %v12285_v2 = vld [vmem:[%s17312_s0 + $0x20] sm:$0xff] }
 0x893   :  { %v11643_v45 = vadd.f32 1e-05, %v11641_v35 }
 0x895   :  { %12271 = vrsqrt.f32 %v11643_v45  ;;  %vm11650_vm12 = vweird.f32 %v11643_v45 }
 0x89b   :  { %v12272_v49 = vpop.eup %12271 }
 0x89c   :  { %v11645_v13 = vmul.f32 %v12272_v49, %v11643_v45  ;;  %vm11651_vm1 = vweird.f32 %v12272_v49 }
 0x89d   :  { %vm11652_vm10 = vmor %vm11650_vm12, %vm11651_vm1 }
 0x89e   :  { %v11646_v55 = vmul.f32 %v12272_v49, %v11645_v13 }
 0x8a0   :  { %v11647_v7 = vmul.f32 0.5, %v11646_v55 }
 0x8a2   :  { %v11648_v44 = vsub.f32 1.5, %v11647_v7 }
 0x8a4   :  { %v11649_v4 = vmul.f32 %v12272_v49, %v11648_v44 }
 0x8a6   :  { %v11653_v41 = vsel %vm11652_vm10, %v12272_v49, %v11649_v4 }
 0x8a7   :  { %v11654_v39 = vmul.f32 %v11653_v41, %v11642_v18 }
 0x8a9   :  { %11657 = vperm.xlu0 %12266, %v11654_v39  }
 0x8b1   :  { %11671 = vperm.xlu0 %12266, %v11668_v33  }
 0x91b   :  { %v11658_v50 = vpop.permute.xlu0 %11657 }
 0x91c   :  { %v11660_v40 = vmul.f32 %v11658_v50, %v11616_v15  ;;  %v11661_v46 = vmul.f32 %v11658_v50, %v11617_v19  ;;  %v11662_v24 = vmul.f32 %v11658_v50, %v11618_v31  ;;  %v11663_v52 = vmul.f32 %v11658_v50, %v11619_v12  ;;  %v12286_v15 = vld [vmem:[%s17312_s0 + $0x28] sm:$0xff]  ;;  %v12287_v31 = vld [vmem:[%s17312_s0 + $0x30] sm:$0xff] }
 0x91d   :  { %v11664_v32 = vmul.f32 %v11658_v50, %v11620_v21  ;;  %v11665_v53 = vmul.f32 %v11658_v50, %v11621_v34  ;;  %v11666_v30 = vmul.f32 %v11658_v50, %v11622_v27  ;;  %v11667_v57 = vmul.f32 %v11658_v50, %v11623_v11 }
 0x923   :  { %v11672_v16 = vpop.permute.xlu0 %11671 }
 0x924   :  { %v11674_v23 = vadd.f32 %v11672_v16, %v11660_v40  ;;  %v11675_v1 = vadd.f32 %v11672_v16, %v11661_v46  ;;  %v11676_v51 = vadd.f32 %v11672_v16, %v11662_v24  ;;  %v11677_v25 = vadd.f32 %v11672_v16, %v11663_v52 }
 0x925   :  { %v11678_v28 = vadd.f32 %v11672_v16, %v11664_v32  ;;  %v11679_v48 = vadd.f32 %v11672_v16, %v11665_v53  ;;  %v11680_v8 = vadd.f32 %v11672_v16, %v11666_v30  ;;  %v11681_v10 = vadd.f32 %v11672_v16, %v11667_v57 }
 0x926   :  { %v11682_v38 = vadd.f32 %v12281_v20, %v11674_v23  ;;  %v11683_v36 = vadd.f32 %v12282_v63, %v11675_v1  ;;  %v11684_v56 = vadd.f32 %v12283_v42, %v11676_v51  ;;  %v11685_v9 = vadd.f32 %v12284_v3, %v11677_v25 }
 0x927   :  { %v11686_v0 = vadd.f32 %v12285_v2, %v11678_v28  ;;  %v11687_v19 = vadd.f32 %v12286_v15, %v11679_v48  ;;  %v11688_v12 = vadd.f32 %v12287_v31, %v11680_v8  ;;  %v11689_v59 = vadd.f32 %v12288_v29, %v11681_v10 }
 0x928   :  { %11690 = vst [vmem:[%s17320_s8] sm:$0xff] %v11682_v38 }
 0x929   :  { %11691 = vst [vmem:[%s17320_s8 + $0x8] sm:$0xff] %v11683_v36 }
 0x92a   :  { %11692 = vst [vmem:[%s17320_s8 + $0x10] sm:$0xff] %v11684_v56 }
 0x92b   :  { %11693 = vst [vmem:[%s17320_s8 + $0x18] sm:$0xff] %v11685_v9 }
 0x92c   :  { %12243 = vst [vmem:[%s17320_s8 + $0x20] sm:$0xff] %v11686_v0 }
 0x92d   :  { %12244 = vst [vmem:[%s17320_s8 + $0x28] sm:$0xff] %v11687_v19 }
 0x92e   :  { %12245 = vst [vmem:[%s17320_s8 + $0x30] sm:$0xff] %v11688_v12 }
 0x92f   :  { %12246 = vst [vmem:[%s17320_s8 + $0x38] sm:$0xff] %v11689_v59 }

</bundles_post_ra>
